<compile_context>
chip_gen: v6e
topology: v6e:2x2x1
jax: 0.10.0
libtpu: 0.0.40
codegen_flags: <defaults>
</compile_context>

<pallas_src>
import jax
import jax.numpy as jnp
from jax.experimental import pallas as pl
from jax.experimental.pallas import tpu as pltpu

IMG_SHAPE = (1, 28, 28)
BN_EPS = 0.8            # nn.BatchNorm1d(num_features, 0.8) -> eps = 0.8
LRELU_SLOPE = 0.2
LAYER_DIMS = (256, 512, 1024, 784)
VEC_LEN = 2 * (LAYER_DIMS[0] + LAYER_DIMS[1] + LAYER_DIMS[2]) + LAYER_DIMS[3]  # 4368


def _generator_kernel(z_ref, w1_ref, w2_ref, w3_ref, w4_ref, vec_ref, out_ref):
    """Fused MLP: 4 bf16 matmuls + 3 (single-pass BN + leaky relu) + tanh in VMEM."""
    inv_b = 1.0 / z_ref.shape[0]

    # Statically lane-aligned slices of the packed f32 vector bundle.
    D1, D2, D3, D4 = LAYER_DIMS
    o = 0
    g1 = vec_ref[:, o:o + D1]; o += D1
    be1 = vec_ref[:, o:o + D1]; o += D1
    g2 = vec_ref[:, o:o + D2]; o += D2
    be2 = vec_ref[:, o:o + D2]; o += D2
    g3 = vec_ref[:, o:o + D3]; o += D3
    be3 = vec_ref[:, o:o + D3]; o += D3
    b4 = vec_ref[:, o:o + D4]

    def bn_lrelu(h, gamma, beta):
        # Training-mode BatchNorm1d with biased batch variance, single pass:
        # var = E[h^2] - mu^2, gamma folded into the normalization scale.
        mu = jnp.sum(h, axis=0, keepdims=True) * inv_b
        ex2 = jnp.sum(h * h, axis=0, keepdims=True) * inv_b
        var = ex2 - mu * mu
        scale = gamma * jax.lax.rsqrt(var + BN_EPS)   # rsqrt -> EUP slot
        y = h * scale + (beta - mu * scale)
        # LeakyReLU(0.2)
        return jnp.where(y > 0, y, LRELU_SLOPE * y)

    def dot_bf16(x, w_ref):
        # Weights stay bf16 (no in-VMEM f32 copy); cast only the small
        # activation operand.  f32 accumulation on the MXU.
        return jnp.dot(x.astype(jnp.bfloat16), w_ref[...],
                       preferred_element_type=jnp.float32)

    # b1/b2/b3 omitted: bias before training-mode BN is cancelled by the mean.
    h = bn_lrelu(dot_bf16(z_ref[...], w1_ref), g1, be1)
    h = bn_lrelu(dot_bf16(h, w2_ref), g2, be2)
    h = bn_lrelu(dot_bf16(h, w3_ref), g3, be3)
    h = dot_bf16(h, w4_ref) + b4
    out_ref[...] = jnp.tanh(h)


@jax.jit
def generator_forward(z, params):
    """z: (B, input_len) f32.  params["kernel_inputs"]: 4 bf16 weights + packed f32 vec."""
    B, in_len = z.shape
    flat = params["kernel_inputs"]
    vmem = pl.BlockSpec(memory_space=pltpu.MemorySpace.VMEM)

    dims = (in_len,) + LAYER_DIMS
    mac = sum(dims[i] * dims[i + 1] for i in range(4))
    cost = pl.CostEstimate(
        flops=2 * B * mac,
        transcendentals=B * 784 + (256 + 512 + 1024),   # tanh + rsqrt
        bytes_accessed=2 * mac                           # bf16 weights
        + 4 * VEC_LEN                                    # packed gamma/beta/b4
        + 4 * B * (in_len + 784),                        # z + output
    )

    out = pl.pallas_call(
        _generator_kernel,
        out_shape=jax.ShapeDtypeStruct((B, 784), jnp.float32),
        in_specs=[vmem] * (1 + len(flat)),
        out_specs=vmem,
        cost_estimate=cost,
    )(z, *flat)

    return out.reshape(B, *IMG_SHAPE)


def init_params(key, input_len):
    """Deterministic synthetic parameters matching the PyTorch module's shapes.

    Weights are stored transposed as (in, out) and cast to bf16 for HBM
    residency; gamma/beta/b4 are packed into one lane-dense (1, 4368) f32
    array.  Also returns the full per-layer set (including the pre-BN biases
    b1/b2/b3) for the reference, which proves the bias-cancellation.
    """
    dims = [(input_len, LAYER_DIMS[0])] + [
        (LAYER_DIMS[i], LAYER_DIMS[i + 1]) for i in range(3)]
    weights, vec_parts, ref_params = [], [], []
    last_bias = None
    for li, (fan_in, fan_out) in enumerate(dims):
        key, kw, kb, kg, kbeta = jax.random.split(key, 5)
        bound = 1.0 / jnp.sqrt(fan_in)
        # PyTorch Linear weight is (out, in); store transposed as (in, out).
        w = jax.random.uniform(kw, (fan_in, fan_out), jnp.float32, -bound, bound)
        w = w.astype(jnp.bfloat16)                       # HBM-resident dtype
        b = jax.random.uniform(kb, (1, fan_out), jnp.float32, -bound, bound)
        weights.append(w)
        if li < 3:
            gamma = 1.0 + 0.1 * jax.random.normal(kg, (1, fan_out), jnp.float32)
            beta = 0.1 * jax.random.normal(kbeta, (1, fan_out), jnp.float32)
            vec_parts += [gamma, beta]                   # bias dropped (BN cancels it)
            ref_params.append((w, b, gamma, beta))
        else:
            last_bias = b
            ref_params.append((w, b, None, None))
    vec = jnp.concatenate(vec_parts + [last_bias], axis=1)   # (1, 4368) f32
    assert vec.shape == (1, VEC_LEN)
    kernel_inputs = tuple(weights) + (vec,)
    return {"kernel_inputs": kernel_inputs, "ref": tuple(ref_params)}


def reference_forward(z, params):
    """Pure-JAX reference: same bf16 weights AND same bf16 activation operands
    into the matmuls (f32 accumulation), full PyTorch semantics including the
    pre-BN biases and two-pass batch variance."""
    h = z
    for li, (w, b, gamma, beta) in enumerate(params["ref"]):
        h = jnp.dot(h.astype(jnp.bfloat16), w,
                    preferred_element_type=jnp.float32) + b
        if li < 3:
            mu = jnp.mean(h, axis=0, keepdims=True)
            var = jnp.mean(jnp.square(h - mu), axis=0, keepdims=True)
            h = (h - mu) * jax.lax.rsqrt(var + BN_EPS) * gamma + beta
            h = jnp.where(h > 0, h, LRELU_SLOPE * h)
    h = jnp.tanh(h)
    return h.reshape(z.shape[0], *IMG_SHAPE)


if __name__ == "__main__":
    key = jax.random.PRNGKey(0)
    key, kz = jax.random.split(key)

    batch = 128        # amortizes the ~2.9 MB bf16 weight DMA (dominant HBM
    input_len = 32     # traffic); activations still trivially fit VMEM.
    z = jax.random.normal(kz, (batch, input_len), jnp.float32)

    params = init_params(key, input_len)

    img = generator_forward(z, params)
    jax.block_until_ready(img)

    ref = reference_forward(z, params)
    assert img.shape == (batch, 1, 28, 28), img.shape
    # bf16 matmul operands on both sides; residual diff comes from single- vs
    # two-pass BN stats and bias-cancellation rounding (eps=0.8 keeps it tiny).
    assert jnp.allclose(img, ref, atol=5e-3, rtol=5e-3), float(
        jnp.max(jnp.abs(img - ref)))

    print("KERNEL_OK")
</pallas_src>

<mosaic_0001>
module attributes {stable_mosaic.version = 11 : i64} {
  func.func @_generator_kernel(%arg0: memref<128x32xf32, #tpu.memory_space<vmem>>, %arg1: memref<32x256xbf16, #tpu.memory_space<vmem>>, %arg2: memref<256x512xbf16, #tpu.memory_space<vmem>>, %arg3: memref<512x1024xbf16, #tpu.memory_space<vmem>>, %arg4: memref<1024x784xbf16, #tpu.memory_space<vmem>>, %arg5: memref<1x4368xf32, #tpu.memory_space<vmem>>, %arg6: memref<128x784xf32, #tpu.memory_space<vmem>>) attributes {dimension_semantics = [], scalar_prefetch = 0 : i64, scratch_operands = 0 : i64, tpu.core_type = #tpu.core_type<tc>} {
    %c0 = arith.constant 0 : index
    %c0_0 = arith.constant 0 : index
    %0 = vector.load %arg5[%c0, %c0_0] : memref<1x4368xf32, #tpu.memory_space<vmem>>, vector<1x256xf32>
    %c0_1 = arith.constant 0 : index
    %c256 = arith.constant 256 : index
    %1 = vector.load %arg5[%c0_1, %c256] : memref<1x4368xf32, #tpu.memory_space<vmem>>, vector<1x256xf32>
    %c0_2 = arith.constant 0 : index
    %c512 = arith.constant 512 : index
    %2 = vector.load %arg5[%c0_2, %c512] : memref<1x4368xf32, #tpu.memory_space<vmem>>, vector<1x512xf32>
    %c0_3 = arith.constant 0 : index
    %c1024 = arith.constant 1024 : index
    %3 = vector.load %arg5[%c0_3, %c1024] : memref<1x4368xf32, #tpu.memory_space<vmem>>, vector<1x512xf32>
    %c0_4 = arith.constant 0 : index
    %c1536 = arith.constant 1536 : index
    %4 = vector.load %arg5[%c0_4, %c1536] : memref<1x4368xf32, #tpu.memory_space<vmem>>, vector<1x1024xf32>
    %c0_5 = arith.constant 0 : index
    %c2560 = arith.constant 2560 : index
    %5 = vector.load %arg5[%c0_5, %c2560] : memref<1x4368xf32, #tpu.memory_space<vmem>>, vector<1x1024xf32>
    %c0_6 = arith.constant 0 : index
    %c3584 = arith.constant 3584 : index
    %6 = vector.load %arg5[%c0_6, %c3584] : memref<1x4368xf32, #tpu.memory_space<vmem>>, vector<1x784xf32>
    %c0_7 = arith.constant 0 : index
    %c0_8 = arith.constant 0 : index
    %7 = vector.load %arg0[%c0_7, %c0_8] : memref<128x32xf32, #tpu.memory_space<vmem>>, vector<128x32xf32>
    %8 = arith.truncf %7 : vector<128x32xf32> to vector<128x32xbf16>
    %c0_9 = arith.constant 0 : index
    %c0_10 = arith.constant 0 : index
    %9 = vector.load %arg1[%c0_9, %c0_10] : memref<32x256xbf16, #tpu.memory_space<vmem>>, vector<32x256xbf16>
    %cst = arith.constant dense<0.000000e+00> : vector<128x256xf32>
    %10 = tpu.matmul %8, %9, %cst {dimension_numbers = #tpu.dot_dimension_numbers<[1], [0], [0], [1], [0, 0, 1, 1], [], []>} : vector<128x32xbf16>, vector<32x256xbf16>, vector<128x256xf32> -> vector<128x256xf32>
    %cst_11 = arith.constant dense<0.000000e+00> : vector<256xf32>
    %11 = vector.multi_reduction <add>, %10, %cst_11 [0] : vector<128x256xf32> to vector<256xf32>
    %12 = vector.shape_cast %11 : vector<256xf32> to vector<1x256xf32>
    %cst_12 = arith.constant 7.812500e-03 : f32
    %13 = vector.broadcast %cst_12 : f32 to vector<1x256xf32>
    %14 = arith.mulf %12, %13 : vector<1x256xf32>
    %15 = arith.mulf %10, %10 : vector<128x256xf32>
    %cst_13 = arith.constant dense<0.000000e+00> : vector<256xf32>
    %16 = vector.multi_reduction <add>, %15, %cst_13 [0] : vector<128x256xf32> to vector<256xf32>
    %17 = vector.shape_cast %16 : vector<256xf32> to vector<1x256xf32>
    %cst_14 = arith.constant 7.812500e-03 : f32
    %18 = vector.broadcast %cst_14 : f32 to vector<1x256xf32>
    %19 = arith.mulf %17, %18 : vector<1x256xf32>
    %20 = arith.mulf %14, %14 : vector<1x256xf32>
    %21 = arith.subf %19, %20 : vector<1x256xf32>
    %cst_15 = arith.constant 8.000000e-01 : f32
    %22 = vector.broadcast %cst_15 : f32 to vector<1x256xf32>
    %23 = arith.addf %21, %22 : vector<1x256xf32>
    %24 = math.rsqrt %23 : vector<1x256xf32>
    %25 = arith.mulf %0, %24 : vector<1x256xf32>
    %26 = vector.broadcast %25 : vector<1x256xf32> to vector<128x256xf32>
    %27 = arith.mulf %10, %26 : vector<128x256xf32>
    %28 = arith.mulf %14, %25 : vector<1x256xf32>
    %29 = arith.subf %1, %28 : vector<1x256xf32>
    %30 = vector.broadcast %29 : vector<1x256xf32> to vector<128x256xf32>
    %31 = arith.addf %27, %30 : vector<128x256xf32>
    %cst_16 = arith.constant 0.000000e+00 : f32
    %32 = vector.broadcast %cst_16 : f32 to vector<128x256xf32>
    %33 = arith.cmpf ogt, %31, %32 : vector<128x256xf32>
    %cst_17 = arith.constant 2.000000e-01 : f32
    %34 = vector.broadcast %cst_17 : f32 to vector<128x256xf32>
    %35 = arith.mulf %34, %31 : vector<128x256xf32>
    %36 = arith.select %33, %31, %35 : vector<128x256xi1>, vector<128x256xf32>
    %37 = arith.truncf %36 : vector<128x256xf32> to vector<128x256xbf16>
    %c0_18 = arith.constant 0 : index
    %c0_19 = arith.constant 0 : index
    %38 = vector.load %arg2[%c0_18, %c0_19] : memref<256x512xbf16, #tpu.memory_space<vmem>>, vector<256x512xbf16>
    %cst_20 = arith.constant dense<0.000000e+00> : vector<128x512xf32>
    %39 = tpu.matmul %37, %38, %cst_20 {dimension_numbers = #tpu.dot_dimension_numbers<[1], [0], [0], [1], [0, 0, 1, 1], [], []>} : vector<128x256xbf16>, vector<256x512xbf16>, vector<128x512xf32> -> vector<128x512xf32>
    %cst_21 = arith.constant dense<0.000000e+00> : vector<512xf32>
    %40 = vector.multi_reduction <add>, %39, %cst_21 [0] : vector<128x512xf32> to vector<512xf32>
    %41 = vector.shape_cast %40 : vector<512xf32> to vector<1x512xf32>
    %cst_22 = arith.constant 7.812500e-03 : f32
    %42 = vector.broadcast %cst_22 : f32 to vector<1x512xf32>
    %43 = arith.mulf %41, %42 : vector<1x512xf32>
    %44 = arith.mulf %39, %39 : vector<128x512xf32>
    %cst_23 = arith.constant dense<0.000000e+00> : vector<512xf32>
    %45 = vector.multi_reduction <add>, %44, %cst_23 [0] : vector<128x512xf32> to vector<512xf32>
    %46 = vector.shape_cast %45 : vector<512xf32> to vector<1x512xf32>
    %cst_24 = arith.constant 7.812500e-03 : f32
    %47 = vector.broadcast %cst_24 : f32 to vector<1x512xf32>
    %48 = arith.mulf %46, %47 : vector<1x512xf32>
    %49 = arith.mulf %43, %43 : vector<1x512xf32>
    %50 = arith.subf %48, %49 : vector<1x512xf32>
    %cst_25 = arith.constant 8.000000e-01 : f32
    %51 = vector.broadcast %cst_25 : f32 to vector<1x512xf32>
    %52 = arith.addf %50, %51 : vector<1x512xf32>
    %53 = math.rsqrt %52 : vector<1x512xf32>
    %54 = arith.mulf %2, %53 : vector<1x512xf32>
    %55 = vector.broadcast %54 : vector<1x512xf32> to vector<128x512xf32>
    %56 = arith.mulf %39, %55 : vector<128x512xf32>
    %57 = arith.mulf %43, %54 : vector<1x512xf32>
    %58 = arith.subf %3, %57 : vector<1x512xf32>
    %59 = vector.broadcast %58 : vector<1x512xf32> to vector<128x512xf32>
    %60 = arith.addf %56, %59 : vector<128x512xf32>
    %cst_26 = arith.constant 0.000000e+00 : f32
    %61 = vector.broadcast %cst_26 : f32 to vector<128x512xf32>
    %62 = arith.cmpf ogt, %60, %61 : vector<128x512xf32>
    %cst_27 = arith.constant 2.000000e-01 : f32
    %63 = vector.broadcast %cst_27 : f32 to vector<128x512xf32>
    %64 = arith.mulf %63, %60 : vector<128x512xf32>
    %65 = arith.select %62, %60, %64 : vector<128x512xi1>, vector<128x512xf32>
    %66 = arith.truncf %65 : vector<128x512xf32> to vector<128x512xbf16>
    %c0_28 = arith.constant 0 : index
    %c0_29 = arith.constant 0 : index
    %67 = vector.load %arg3[%c0_28, %c0_29] : memref<512x1024xbf16, #tpu.memory_space<vmem>>, vector<512x1024xbf16>
    %cst_30 = arith.constant dense<0.000000e+00> : vector<128x1024xf32>
    %68 = tpu.matmul %66, %67, %cst_30 {dimension_numbers = #tpu.dot_dimension_numbers<[1], [0], [0], [1], [0, 0, 1, 1], [], []>} : vector<128x512xbf16>, vector<512x1024xbf16>, vector<128x1024xf32> -> vector<128x1024xf32>
    %cst_31 = arith.constant dense<0.000000e+00> : vector<1024xf32>
    %69 = vector.multi_reduction <add>, %68, %cst_31 [0] : vector<128x1024xf32> to vector<1024xf32>
    %70 = vector.shape_cast %69 : vector<1024xf32> to vector<1x1024xf32>
    %cst_32 = arith.constant 7.812500e-03 : f32
    %71 = vector.broadcast %cst_32 : f32 to vector<1x1024xf32>
    %72 = arith.mulf %70, %71 : vector<1x1024xf32>
    %73 = arith.mulf %68, %68 : vector<128x1024xf32>
    %cst_33 = arith.constant dense<0.000000e+00> : vector<1024xf32>
    %74 = vector.multi_reduction <add>, %73, %cst_33 [0] : vector<128x1024xf32> to vector<1024xf32>
    %75 = vector.shape_cast %74 : vector<1024xf32> to vector<1x1024xf32>
    %cst_34 = arith.constant 7.812500e-03 : f32
    %76 = vector.broadcast %cst_34 : f32 to vector<1x1024xf32>
    %77 = arith.mulf %75, %76 : vector<1x1024xf32>
    %78 = arith.mulf %72, %72 : vector<1x1024xf32>
    %79 = arith.subf %77, %78 : vector<1x1024xf32>
    %cst_35 = arith.constant 8.000000e-01 : f32
    %80 = vector.broadcast %cst_35 : f32 to vector<1x1024xf32>
    %81 = arith.addf %79, %80 : vector<1x1024xf32>
    %82 = math.rsqrt %81 : vector<1x1024xf32>
    %83 = arith.mulf %4, %82 : vector<1x1024xf32>
    %84 = vector.broadcast %83 : vector<1x1024xf32> to vector<128x1024xf32>
    %85 = arith.mulf %68, %84 : vector<128x1024xf32>
    %86 = arith.mulf %72, %83 : vector<1x1024xf32>
    %87 = arith.subf %5, %86 : vector<1x1024xf32>
    %88 = vector.broadcast %87 : vector<1x1024xf32> to vector<128x1024xf32>
    %89 = arith.addf %85, %88 : vector<128x1024xf32>
    %cst_36 = arith.constant 0.000000e+00 : f32
    %90 = vector.broadcast %cst_36 : f32 to vector<128x1024xf32>
    %91 = arith.cmpf ogt, %89, %90 : vector<128x1024xf32>
    %cst_37 = arith.constant 2.000000e-01 : f32
    %92 = vector.broadcast %cst_37 : f32 to vector<128x1024xf32>
    %93 = arith.mulf %92, %89 : vector<128x1024xf32>
    %94 = arith.select %91, %89, %93 : vector<128x1024xi1>, vector<128x1024xf32>
    %95 = arith.truncf %94 : vector<128x1024xf32> to vector<128x1024xbf16>
    %c0_38 = arith.constant 0 : index
    %c0_39 = arith.constant 0 : index
    %96 = vector.load %arg4[%c0_38, %c0_39] : memref<1024x784xbf16, #tpu.memory_space<vmem>>, vector<1024x784xbf16>
    %cst_40 = arith.constant dense<0.000000e+00> : vector<128x784xf32>
    %97 = tpu.matmul %95, %96, %cst_40 {dimension_numbers = #tpu.dot_dimension_numbers<[1], [0], [0], [1], [0, 0, 1, 1], [], []>} : vector<128x1024xbf16>, vector<1024x784xbf16>, vector<128x784xf32> -> vector<128x784xf32>
    %98 = vector.broadcast %6 : vector<1x784xf32> to vector<128x784xf32>
    %99 = arith.addf %97, %98 : vector<128x784xf32>
    %100 = math.tanh %99 : vector<128x784xf32>
    %c0_41 = arith.constant 0 : index
    %c0_42 = arith.constant 0 : index
    %101 = vector.load %arg6[%c0_41, %c0_42] : memref<128x784xf32, #tpu.memory_space<vmem>>, vector<128x784xf32>
    tpu.vector_store %arg6[%c0_41, %c0_42], %100 {strides = array<i32>} : memref<128x784xf32, #tpu.memory_space<vmem>>, vector<128x784xf32>,
    return
  }
}

</mosaic_0001>

<bundles_post_ra>
// kernel: generator_forward.1
= control target key start
LH: loop header
LB: loop body
LE: loop exit
PB: predicated region body
PF: predicated region fallthrough
CT: control target
= control target key end

     0   :  { %v12630_v1 = vmov 0   ;;  %vm79_vm0 = vcmask 261120   ;;  %s19936_s1 = inlined_call_operand.vmem [shape: bf16[32,256], index: 1, kind: input, shape index: {}]   ;;  %s19937_s0 = inlined_call_operand.vmem [shape: f32[128,32], index: 0, kind: input, shape index: {}]   ;;  %s19938_s2 = inlined_call_operand.vmem [shape: bf16[256,512], index: 2, kind: input, shape index: {}]   ;;  %s19939_s5 = inlined_call_operand.vmem [shape: f32[1,4368], index: 5, kind: input, shape index: {}]   ;;  %s19940_s3 = inlined_call_operand.vmem [shape: bf16[512,1024], index: 3, kind: input, shape index: {}]   ;;  %s19941_s4 = inlined_call_operand.vmem [shape: bf16[1024,784], index: 4, kind: input, shape index: {}]   ;;  %s19942_s6 = inlined_call_operand.vmem [shape: f32[128,784], index: 6, kind: output, shape index: {}]  }
   0x1   :  { %v11634_v0 = vld [vmem:[%s19936_s1 + $0x14] ss:$8 sps:$4 sm:$0xff]   ;;  %136 = vmatprep.mubr.bf16.mxu0 %v12630_v1  ;;  %v11636_v2 = vld [vmem:[%s19936_s1 + $0x10] ss:$8 sps:$4 sm:$0xff]   ;;  %v11637_v3 = vld [vmem:[%s19936_s1 + $0x4] ss:$8 sps:$4 sm:$0xff]  }
   0x2   :  { %116 = vmatprep.subr.bf16.mxu0 %v11634_v0  ;;  %v11639_v4 = vld [vmem:[%s19936_s1] ss:$8 sps:$4 sm:$0xff]   ;;  %v33_v8 = vld [vmem:[%s19937_s0 + $0x10] sm:$0xff]  ;;  %v34_v9 = vld [vmem:[%s19937_s0 + $0x18] sm:$0xff] }
   0x3   :  { %117 = vmatpush1.bf16.msra.mxu0 %v11636_v2  ;;  %v31_v5 = vld [vmem:[%s19937_s0] sm:$0xff]  ;;  %v32_v6 = vld [vmem:[%s19937_s0 + $0x8] sm:$0xff]  ;;  %v48_v10 = vpack.c.bf16 %v34_v9, %v33_v8  ;;  %v37_v14 = vld [vmem:[%s19937_s0 + $0x30] sm:$0xff] }
   0x4   :  { %118 = vmatprep.subr.bf16.mxu0 %v11637_v3  ;;  %v47_v7 = vpack.c.bf16 %v32_v6, %v31_v5  ;;  %v35_v11 = vld [vmem:[%s19937_s0 + $0x20] sm:$0xff]  ;;  %v36_v12 = vld [vmem:[%s19937_s0 + $0x28] sm:$0xff]  ;;  %v38_v15 = vld [vmem:[%s19937_s0 + $0x38] sm:$0xff] }
   0x5   :  { %v49_v13 = vpack.c.bf16 %v36_v12, %v35_v11  ;;  %v50_v16 = vpack.c.bf16 %v38_v15, %v37_v14  ;;  %v39_v17 = vld [vmem:[%s19937_s0 + $0x40] sm:$0xff]  ;;  %v40_v18 = vld [vmem:[%s19937_s0 + $0x48] sm:$0xff]  ;;  %v41_v20 = vld [vmem:[%s19937_s0 + $0x50] sm:$0xff] }
   0x6   :  { %v51_v19 = vpack.c.bf16 %v40_v18, %v39_v17  ;;  %v42_v21 = vld [vmem:[%s19937_s0 + $0x58] sm:$0xff]  ;;  %v43_v23 = vld [vmem:[%s19937_s0 + $0x60] sm:$0xff]  ;;  %v44_v24 = vld [vmem:[%s19937_s0 + $0x68] sm:$0xff] }
   0x7   :  { %119 = vmatpush1.bf16.msra.mxu0 %v11639_v4  ;;  %v52_v22 = vpack.c.bf16 %v42_v21, %v41_v20  ;;  %v53_v25 = vpack.c.bf16 %v44_v24, %v43_v23  ;;  %v45_v26 = vld [vmem:[%s19937_s0 + $0x70] sm:$0xff]  ;;  %v46_v27 = vld [vmem:[%s19937_s0 + $0x78] sm:$0xff] }
   0x8   :  { %v54_v28 = vpack.c.bf16 %v46_v27, %v45_v26  ;;  %v11642_v29 = vld [vmem:[%s19938_s2 + $0xec] ss:$16 sps:$4 sm:$0xff]   ;;  %v11640_v30 = vld [vmem:[%s19938_s2 + $0xe8] ss:$16 sps:$4 sm:$0xff]   ;;  %v11643_v31 = vld [vmem:[%s19938_s2 + $0xe4] ss:$16 sps:$4 sm:$0xff]  }
   0x9   :  { %1080 = vmatprep.subr.bf16.mxu0 %v11642_v29  ;;  %v11645_v32 = vld [vmem:[%s19938_s2 + $0xe0] ss:$16 sps:$4 sm:$0xff]   ;;  %967 = vmatprep.subr.bf16.mxu1 %v11643_v31  ;;  %v11648_v33 = vld [vmem:[%s19938_s2 + $0xcc] ss:$16 sps:$4 sm:$0xff]   ;;  %v11649_v34 = vld [vmem:[%s19938_s2 + $0xc4] ss:$16 sps:$4 sm:$0xff]  }
   0xa   :  { %10600 = vmatmul.mubr.msk.bf16.vlgmr.msra.gmra.mxu0 %vm79_vm0, %v47_v7  ;;  %968 = vmatpush1.bf16.msra.mxu1 %v11645_v32  ;;  %v11646_v35 = vld [vmem:[%s19938_s2 + $0xc8] ss:$16 sps:$4 sm:$0xff]   ;;  %v11651_v36 = vld [vmem:[%s19938_s2 + $0xc0] ss:$16 sps:$4 sm:$0xff]   ;;  %v11654_v37 = vld [vmem:[%s19938_s2 + $0xac] ss:$16 sps:$4 sm:$0xff]  }
   0xb   :  { %146 = vmatprep.mubr.bf16.mxu0 %v12630_v1  ;;  %1081 = vmatpush1.bf16.msra.mxu0 %v11640_v30  ;;  %v11655_v38 = vld [vmem:[%s19938_s2 + $0xa4] ss:$16 sps:$4 sm:$0xff]   ;;  %v11652_v39 = vld [vmem:[%s19938_s2 + $0xa8] ss:$16 sps:$4 sm:$0xff]   ;;  %v11657_v40 = vld [vmem:[%s19938_s2 + $0xa0] ss:$16 sps:$4 sm:$0xff]  }
   0xc   :  { %1082 = vmatprep.subr.bf16.mxu0 %v11648_v33  ;;  %969 = vmatprep.subr.bf16.mxu1 %v11649_v34  ;;  %v11660_v41 = vld [vmem:[%s19938_s2 + $0x8c] ss:$16 sps:$4 sm:$0xff]   ;;  %v11661_v42 = vld [vmem:[%s19938_s2 + $0x84] ss:$16 sps:$4 sm:$0xff]   ;;  %v11658_v43 = vld [vmem:[%s19938_s2 + $0x88] ss:$16 sps:$4 sm:$0xff]  }
   0xd   :  { %v11663_v44 = vld [vmem:[%s19938_s2 + $0x80] ss:$16 sps:$4 sm:$0xff]   ;;  %v11666_v45 = vld [vmem:[%s19938_s2 + $0x6c] ss:$16 sps:$4 sm:$0xff]   ;;  %v11667_v46 = vld [vmem:[%s19938_s2 + $0x64] ss:$16 sps:$4 sm:$0xff]  }
   0xe   :  { %970 = vmatpush1.bf16.msra.mxu1 %v11651_v36  ;;  %v11664_v47 = vld [vmem:[%s19938_s2 + $0x68] ss:$16 sps:$4 sm:$0xff]   ;;  %v11669_v48 = vld [vmem:[%s19938_s2 + $0x60] ss:$16 sps:$4 sm:$0xff]   ;;  %v11672_v49 = vld [vmem:[%s19938_s2 + $0x4c] ss:$16 sps:$4 sm:$0xff]  }
   0xf   :  { %1083 = vmatpush1.bf16.msra.mxu0 %v11646_v35  ;;  %971 = vmatprep.subr.bf16.mxu1 %v11655_v38  ;;  %v11673_v50 = vld [vmem:[%s19938_s2 + $0x44] ss:$16 sps:$4 sm:$0xff]   ;;  %v11670_v51 = vld [vmem:[%s19938_s2 + $0x48] ss:$16 sps:$4 sm:$0xff]   ;;  %v11675_v52 = vld [vmem:[%s19938_s2 + $0x40] ss:$16 sps:$4 sm:$0xff]  }
  0x10   :  { %1084 = vmatprep.subr.bf16.mxu0 %v11654_v37  ;;  %v11678_v53 = vld [vmem:[%s19938_s2 + $0x2c] ss:$16 sps:$4 sm:$0xff]   ;;  %v11679_v54 = vld [vmem:[%s19938_s2 + $0x24] ss:$16 sps:$4 sm:$0xff]   ;;  %v11676_v55 = vld [vmem:[%s19938_s2 + $0x28] ss:$16 sps:$4 sm:$0xff]  }
  0x11   :  { %v11681_v56 = vld [vmem:[%s19938_s2 + $0x20] ss:$16 sps:$4 sm:$0xff]   ;;  %v11684_v57 = vld [vmem:[%s19938_s2 + $0xc] ss:$16 sps:$4 sm:$0xff]   ;;  %v11685_v58 = vld [vmem:[%s19938_s2 + $0x4] ss:$16 sps:$4 sm:$0xff]  }
  0x12   :  { %10601 = vmatmul.mubr.msk.bf16.gmra.mxu0 %vm79_vm0, %v48_v10  ;;  %972 = vmatpush1.bf16.msra.mxu1 %v11657_v40  ;;  %v11682_v59 = vld [vmem:[%s19938_s2 + $0x8] ss:$16 sps:$4 sm:$0xff]   ;;  %v11687_v60 = vld [vmem:[%s19938_s2] ss:$16 sps:$4 sm:$0xff]   ;;  %v11690_v61 = vld [vmem:[%s19938_s2 + $0x1ec] ss:$16 sps:$4 sm:$0xff]  }
  0x13   :  { %156 = vmatprep.mubr.bf16.mxu0 %v12630_v1  ;;  %1085 = vmatpush1.bf16.msra.mxu0 %v11652_v39  ;;  %v11691_v62 = vld [vmem:[%s19938_s2 + $0x1e4] ss:$16 sps:$4 sm:$0xff]   ;;  %v11688_v63 = vld [vmem:[%s19938_s2 + $0x1e8] ss:$16 sps:$4 sm:$0xff]   ;;  %v11693_v0 = vld [vmem:[%s19938_s2 + $0x1e0] ss:$16 sps:$4 sm:$0xff]  }
  0x14   :  { %1086 = vmatprep.subr.bf16.mxu0 %v11660_v41  ;;  %973 = vmatprep.subr.bf16.mxu1 %v11661_v42  ;;  %v11697_v2 = vld [vmem:[%s19938_s2 + $0x1c4] ss:$16 sps:$4 sm:$0xff]   ;;  %v11694_v3 = vld [vmem:[%s19938_s2 + $0x1c8] ss:$16 sps:$4 sm:$0xff]   ;;  %v11699_v4 = vld [vmem:[%s19938_s2 + $0x1c0] ss:$16 sps:$4 sm:$0xff]  }
  0x15   :  { %v11702_v5 = vld [vmem:[%s19938_s2 + $0x1ac] ss:$16 sps:$4 sm:$0xff]   ;;  %v11703_v6 = vld [vmem:[%s19938_s2 + $0x1a4] ss:$16 sps:$4 sm:$0xff]   ;;  %v11700_v7 = vld [vmem:[%s19938_s2 + $0x1a8] ss:$16 sps:$4 sm:$0xff]  }
  0x16   :  { %974 = vmatpush1.bf16.msra.mxu1 %v11663_v44  ;;  %v11705_v8 = vld [vmem:[%s19938_s2 + $0x1a0] ss:$16 sps:$4 sm:$0xff]   ;;  %v11708_v9 = vld [vmem:[%s19938_s2 + $0x18c] ss:$16 sps:$4 sm:$0xff]   ;;  %v11709_v10 = vld [vmem:[%s19938_s2 + $0x184] ss:$16 sps:$4 sm:$0xff]  }
  0x17   :  { %1087 = vmatpush1.bf16.msra.mxu0 %v11658_v43  ;;  %975 = vmatprep.subr.bf16.mxu1 %v11667_v46  ;;  %v11706_v11 = vld [vmem:[%s19938_s2 + $0x188] ss:$16 sps:$4 sm:$0xff]   ;;  %v11711_v12 = vld [vmem:[%s19938_s2 + $0x180] ss:$16 sps:$4 sm:$0xff]   ;;  %v11715_v14 = vld [vmem:[%s19938_s2 + $0x164] ss:$16 sps:$4 sm:$0xff]  }
  0x18   :  { %1088 = vmatprep.subr.bf16.mxu0 %v11666_v45  ;;  %v11712_v15 = vld [vmem:[%s19938_s2 + $0x168] ss:$16 sps:$4 sm:$0xff]   ;;  %v11720_v17 = vld [vmem:[%s19938_s2 + $0x14c] ss:$16 sps:$4 sm:$0xff]   ;;  %v11721_v18 = vld [vmem:[%s19938_s2 + $0x144] ss:$16 sps:$4 sm:$0xff]  }
  0x19   :  { %v11723_v20 = vld [vmem:[%s19938_s2 + $0x140] ss:$16 sps:$4 sm:$0xff]   ;;  %v11726_v21 = vld [vmem:[%s19938_s2 + $0x12c] ss:$16 sps:$4 sm:$0xff]   ;;  %v11724_v23 = vld [vmem:[%s19938_s2 + $0x128] ss:$16 sps:$4 sm:$0xff]  }
  0x1a   :  { %10602 = vmatmul.mubr.msk.bf16.gmra.mxu0 %vm79_vm0, %v49_v13  ;;  %976 = vmatpush1.bf16.msra.mxu1 %v11669_v48  ;;  %v11714_v13 = vld [vmem:[%s19938_s2 + $0x16c] ss:$16 sps:$4 sm:$0xff]   ;;  %v11729_v24 = vld [vmem:[%s19938_s2 + $0x120] ss:$16 sps:$4 sm:$0xff]   ;;  %v11733_v26 = vld [vmem:[%s19938_s2 + $0x104] ss:$16 sps:$4 sm:$0xff]  }
  0x1b   :  { %166 = vmatprep.mubr.bf16.mxu0 %v12630_v1  ;;  %1089 = vmatpush1.bf16.msra.mxu0 %v11664_v47  ;;  %v11730_v27 = vld [vmem:[%s19938_s2 + $0x108] ss:$16 sps:$4 sm:$0xff]  }
  0x1c   :  { %1090 = vmatprep.subr.bf16.mxu0 %v11672_v49  ;;  %977 = vmatprep.subr.bf16.mxu1 %v11673_v50 }
  0x1e   :  { %978 = vmatpush1.bf16.msra.mxu1 %v11675_v52 }
  0x1f   :  { %1091 = vmatpush1.bf16.msra.mxu0 %v11670_v51  ;;  %979 = vmatprep.subr.bf16.mxu1 %v11679_v54 }
  0x20   :  { %1092 = vmatprep.subr.bf16.mxu0 %v11678_v53 }
  0x22   :  { %10603 = vmatmul.mubr.msk.bf16.gmra.mxu0 %vm79_vm0, %v50_v16  ;;  %980 = vmatpush1.bf16.msra.mxu1 %v11681_v56  ;;  %v11717_v16 = vld [vmem:[%s19938_s2 + $0x160] ss:$16 sps:$4 sm:$0xff]  }
  0x23   :  { %176 = vmatprep.mubr.bf16.mxu0 %v12630_v1  ;;  %1093 = vmatpush1.bf16.msra.mxu0 %v11676_v55 }
  0x24   :  { %1094 = vmatprep.subr.bf16.mxu0 %v11684_v57  ;;  %981 = vmatprep.subr.bf16.mxu1 %v11685_v58 }
  0x26   :  { %982 = vmatpush1.bf16.msra.mxu1 %v11687_v60 }
  0x27   :  { %1095 = vmatpush1.bf16.msra.mxu0 %v11682_v59  ;;  %983 = vmatprep.subr.bf16.mxu1 %v11691_v62 }
  0x28   :  { %1096 = vmatprep.subr.bf16.mxu0 %v11690_v61 }
  0x2a   :  { %10604 = vmatmul.mubr.msk.bf16.gmra.mxu0 %vm79_vm0, %v51_v19  ;;  %984 = vmatpush2.bf16.msra.mxu1 %v11693_v0  ;;  %v11718_v19 = vld [vmem:[%s19938_s2 + $0x148] ss:$16 sps:$4 sm:$0xff]  }
  0x2b   :  { %186 = vmatprep.mubr.bf16.mxu0 %v12630_v1  ;;  %1097 = vmatpush2.bf16.msra.mxu0 %v11688_v63 }
  0x2c   :  { %985 = vmatprep.subr.bf16.mxu1 %v11697_v2 }
  0x2e   :  { %986 = vmatpush2.bf16.msra.mxu1 %v11699_v4 }
  0x2f   :  { %987 = vmatprep.subr.bf16.mxu1 %v11703_v6 }
  0x32   :  { %10605 = vmatmul.mubr.msk.bf16.gmra.mxu0 %vm79_vm0, %v52_v22  ;;  %988 = vmatpush2.bf16.msra.mxu1 %v11705_v8  ;;  %v11727_v22 = vld [vmem:[%s19938_s2 + $0x124] ss:$16 sps:$4 sm:$0xff]  }
  0x33   :  { %196 = vmatprep.mubr.bf16.mxu0 %v12630_v1  ;;  %989 = vmatprep.subr.bf16.mxu1 %v11709_v10 }
  0x36   :  { %990 = vmatpush2.bf16.msra.mxu1 %v11711_v12 }
  0x37   :  { %991 = vmatprep.subr.bf16.mxu1 %v11715_v14 }
  0x3a   :  { %10606 = vmatmul.mubr.msk.bf16.gmra.mxu0 %vm79_vm0, %v53_v25  ;;  %992 = vmatpush2.bf16.msra.mxu1 %v11717_v16  ;;  %v11732_v25 = vld [vmem:[%s19938_s2 + $0x10c] ss:$16 sps:$4 sm:$0xff]  }
  0x3b   :  { %206 = vmatprep.mubr.bf16.mxu0 %v12630_v1  ;;  %v11696_v1 = vld [vmem:[%s19938_s2 + $0x1cc] ss:$16 sps:$4 sm:$0xff]   ;;  %993 = vmatprep.subr.bf16.mxu1 %v11721_v18 }
  0x3c   :  { %1098 = vmatprep.subr.bf16.mxu0 %v11696_v1 }
  0x3d   :  { %1099 = vmatpush2.bf16.msra.mxu0 %v11694_v3 }
  0x3e   :  { %1100 = vmatprep.subr.bf16.mxu0 %v11702_v5  ;;  %994 = vmatpush2.bf16.msra.mxu1 %v11723_v20 }
  0x3f   :  { %995 = vmatprep.subr.bf16.mxu1 %v11727_v22 }
  0x41   :  { %1101 = vmatpush2.bf16.msra.mxu0 %v11700_v7 }
  0x42   :  { %10607 = vmatmul.mubr.msk.bf16.gmra.mxu0 %vm79_vm0, %v54_v28  ;;  %1102 = vmatprep.subr.bf16.mxu0 %v11708_v9  ;;  %v11735_v28 = vld [vmem:[%s19938_s2 + $0x100] ss:$16 sps:$4 sm:$0xff]  }
  0x43   :  { %996 = vmatpush2.bf16.msra.mxu1 %v11729_v24 }
  0x44   :  { %997 = vmatprep.subr.bf16.mxu1 %v11733_v26 }
  0x45   :  { %1103 = vmatpush2.bf16.msra.mxu0 %v11706_v11 }
  0x46   :  { %1104 = vmatprep.subr.bf16.mxu0 %v11714_v13 }
  0x47   :  { %998 = vmatpush2.bf16.msra.mxu1 %v11735_v28 }
  0x49   :  { %1105 = vmatpush2.bf16.msra.mxu0 %v11712_v15 }
  0x4a   :  { %1106 = vmatprep.subr.bf16.mxu0 %v11720_v17 }
  0x4d   :  { %1107 = vmatpush2.bf16.msra.mxu0 %v11718_v19 }
  0x4e   :  { %1108 = vmatprep.subr.bf16.mxu0 %v11726_v21 }
  0x51   :  { %1109 = vmatpush2.bf16.msra.mxu0 %v11724_v23 }
  0x52   :  { %1110 = vmatprep.subr.bf16.mxu0 %v11732_v25 }
  0x55   :  { %1111 = vmatpush2.bf16.msra.mxu0 %v11730_v27 }
  0xca   :  { %v12927_v29 = vpop.f32.mrf.mxu0 }
  0xcb   :  { %v261_v48 = vmul.f32 %v12927_v29, %v12927_v29 }
  0xcc   :  { %v12929_v30 = vpop.f32.mrf.mxu0 }
  0xcd   :  { %v262_v51 = vmul.f32 %v12929_v30, %v12929_v30 }
  0xce   :  { %v12931_v31 = vpop.f32.mrf.mxu0 }
  0xcf   :  { %v263_v45 = vmul.f32 %v12931_v31, %v12931_v31  ;;  %v217_v49 = vadd.f32 %v12931_v31, %v12927_v29 }
  0xd0   :  { %v12933_v32 = vpop.f32.mrf.mxu0 }
  0xd1   :  { %v264_v46 = vmul.f32 %v12933_v32, %v12933_v32  ;;  %v293_v54 = vadd.f32 %v263_v45, %v261_v48  ;;  %v238_v56 = vadd.f32 %v12933_v32, %v12929_v30 }
  0xd2   :  { %v12935_v33 = vpop.f32.mrf.mxu0 }
  0xd3   :  { %v265_v50 = vmul.f32 %v12935_v33, %v12935_v33  ;;  %v218_v55 = vadd.f32 %v217_v49, %v12935_v33  ;;  %v314_v58 = vadd.f32 %v264_v46, %v262_v51 }
  0xd4   :  { %v12937_v34 = vpop.f32.mrf.mxu0 }
  0xd5   :  { %v266_v52 = vmul.f32 %v12937_v34, %v12937_v34  ;;  %v294_v61 = vadd.f32 %v293_v54, %v265_v50  ;;  %v239_v62 = vadd.f32 %v238_v56, %v12937_v34 }
  0xd6   :  { %v12939_v35 = vpop.f32.mrf.mxu0 }
  0xd7   :  { %v267_v57 = vmul.f32 %v12939_v35, %v12939_v35  ;;  %v219_v63 = vadd.f32 %v218_v55, %v12939_v35  ;;  %v315_v1 = vadd.f32 %v314_v58, %v266_v52 }
  0xd8   :  { %v12941_v36 = vpop.f32.mrf.mxu0 }
  0xd9   :  { %v268_v59 = vmul.f32 %v12941_v36, %v12941_v36  ;;  %v295_v4 = vadd.f32 %v294_v61, %v267_v57  ;;  %v240_v6 = vadd.f32 %v239_v62, %v12941_v36 }
  0xda   :  { %v12943_v37 = vpop.f32.mrf.mxu0 }
  0xdb   :  { %v269_v0 = vmul.f32 %v12943_v37, %v12943_v37  ;;  %v220_v5 = vadd.f32 %v219_v63, %v12943_v37  ;;  %v316_v8 = vadd.f32 %v315_v1, %v268_v59 }
  0xdc   :  { %v12945_v38 = vpop.f32.mrf.mxu0 }
  0xdd   :  { %v270_v2 = vmul.f32 %v12945_v38, %v12945_v38  ;;  %v296_v11 = vadd.f32 %v295_v4, %v269_v0  ;;  %v241_v12 = vadd.f32 %v240_v6, %v12945_v38 }
  0xde   :  { %v12947_v39 = vpop.f32.mrf.mxu0 }
  0xdf   :  { %v271_v7 = vmul.f32 %v12947_v39, %v12947_v39  ;;  %v221_v13 = vadd.f32 %v220_v5, %v12947_v39  ;;  %v317_v15 = vadd.f32 %v316_v8, %v270_v2 }
  0xe0   :  { %v12949_v40 = vpop.f32.mrf.mxu0 }
  0xe1   :  { %v272_v9 = vmul.f32 %v12949_v40, %v12949_v40  ;;  %v297_v18 = vadd.f32 %v296_v11, %v271_v7  ;;  %v242_v20 = vadd.f32 %v241_v12, %v12949_v40 }
  0xe2   :  { %v12951_v41 = vpop.f32.mrf.mxu0 }
  0xe3   :  { %v273_v14 = vmul.f32 %v12951_v41, %v12951_v41  ;;  %v222_v19 = vadd.f32 %v221_v13, %v12951_v41  ;;  %v318_v22 = vadd.f32 %v317_v15, %v272_v9 }
  0xe4   :  { %v12953_v42 = vpop.f32.mrf.mxu0 }
  0xe5   :  { %v274_v16 = vmul.f32 %v12953_v42, %v12953_v42  ;;  %v298_v25 = vadd.f32 %v297_v18, %v273_v14  ;;  %v243_v26 = vadd.f32 %v242_v20, %v12953_v42 }
  0xe6   :  { %v12955_v43 = vpop.f32.mrf.mxu0 }
  0xe7   :  { %v275_v21 = vmul.f32 %v12955_v43, %v12955_v43  ;;  %v223_v27 = vadd.f32 %v222_v19, %v12955_v43  ;;  %v319_v45 = vadd.f32 %v318_v22, %v274_v16 }
  0xe8   :  { %v12957_v44 = vpop.f32.mrf.mxu0 }
  0xe9   :  { %v276_v23 = vmul.f32 %v12957_v44, %v12957_v44  ;;  %v299_v49 = vadd.f32 %v298_v25, %v275_v21  ;;  %v244_v51 = vadd.f32 %v243_v26, %v12957_v44 }
  0xea   :  { %v12963_v47 = vpop.f32.mrf.mxu0 }
  0xeb   :  { %v277_v28 = vmul.f32 %v12963_v47, %v12963_v47  ;;  %v224_v50 = vadd.f32 %v223_v27, %v12963_v47  ;;  %v320_v54 = vadd.f32 %v319_v45, %v276_v23 }
  0xec   :  { %v12975_v53 = vpop.f32.mrf.mxu0 }
  0xed   :  { %v278_v46 = vmul.f32 %v12975_v53, %v12975_v53  ;;  %v300_v57 = vadd.f32 %v299_v49, %v277_v28  ;;  %v245_v58 = vadd.f32 %v244_v51, %v12975_v53 }
  0xee   :  { %v12984_v60 = vpop.f32.mrf.mxu0 }
  0xef   :  { %v279_v52 = vmul.f32 %v12984_v60, %v12984_v60  ;;  %v225_v59 = vadd.f32 %v224_v50, %v12984_v60  ;;  %v321_v62 = vadd.f32 %v320_v54, %v278_v46 }
  0xf0   :  { %v12992_v3 = vpop.f32.mrf.mxu0 }
  0xf1   :  { %v280_v55 = vmul.f32 %v12992_v3, %v12992_v3  ;;  %v301_v1 = vadd.f32 %v300_v57, %v279_v52  ;;  %v246_v4 = vadd.f32 %v245_v58, %v12992_v3 }
  0xf2   :  { %v13000_v10 = vpop.f32.mrf.mxu0 }
  0xf3   :  { %v281_v61 = vmul.f32 %v13000_v10, %v13000_v10  ;;  %v226_v2 = vadd.f32 %v225_v59, %v13000_v10  ;;  %v322_v6 = vadd.f32 %v321_v62, %v280_v55 }
  0xf4   :  { %v13008_v17 = vpop.f32.mrf.mxu0 }
  0xf5   :  { %v282_v63 = vmul.f32 %v13008_v17, %v13008_v17  ;;  %v302_v9 = vadd.f32 %v301_v1, %v281_v61  ;;  %v247_v11 = vadd.f32 %v246_v4, %v13008_v17 }
  0xf6   :  { %v13016_v24 = vpop.f32.mrf.mxu0 }
  0xf7   :  { %v283_v5 = vmul.f32 %v13016_v24, %v13016_v24  ;;  %v227_v12 = vadd.f32 %v226_v2, %v13016_v24  ;;  %v323_v14 = vadd.f32 %v322_v6, %v282_v63 }
  0xf8   :  { %v13024_v48 = vpop.f32.mrf.mxu0 }
  0xf9   :  { %v284_v7 = vmul.f32 %v13024_v48, %v13024_v48  ;;  %v303_v18 = vadd.f32 %v302_v9, %v283_v5  ;;  %v248_v20 = vadd.f32 %v247_v11, %v13024_v48 }
  0xfa   :  { %v13032_v56 = vpop.f32.mrf.mxu0 }
  0xfb   :  { %v285_v13 = vmul.f32 %v13032_v56, %v13032_v56  ;;  %v228_v19 = vadd.f32 %v227_v12, %v13032_v56  ;;  %v324_v22 = vadd.f32 %v323_v14, %v284_v7 }
  0xfc   :  { %v13040_v0 = vpop.f32.mrf.mxu0 }
  0xfd   :  { %v286_v15 = vmul.f32 %v13040_v0, %v13040_v0  ;;  %v304_v26 = vadd.f32 %v303_v18, %v285_v13  ;;  %v249_v27 = vadd.f32 %v248_v20, %v13040_v0 }
  0xfe   :  { %v13048_v8 = vpop.f32.mrf.mxu0 }
  0xff   :  { %v287_v21 = vmul.f32 %v13048_v8, %v13048_v8  ;;  %v229_v28 = vadd.f32 %v228_v19, %v13048_v8  ;;  %v325_v46 = vadd.f32 %v324_v22, %v286_v15 }
 0x100   :  { %v13056_v16 = vpop.f32.mrf.mxu0 }
 0x101   :  { %v288_v23 = vmul.f32 %v13056_v16, %v13056_v16  ;;  %v305_v50 = vadd.f32 %v304_v26, %v287_v21  ;;  %v250_v52 = vadd.f32 %v249_v27, %v13056_v16 }
 0x102   :  { %v13064_v25 = vpop.f32.mrf.mxu0 }
 0x103   :  { %v289_v45 = vmul.f32 %v13064_v25, %v13064_v25  ;;  %v230_v51 = vadd.f32 %v229_v28, %v13064_v25  ;;  %v326_v55 = vadd.f32 %v325_v46, %v288_v23 }
 0x104   :  { %v13070_v49 = vpop.f32.mrf.mxu0 }
 0x105   :  { %v290_v54 = vmul.f32 %v13070_v49, %v13070_v49  ;;  %v306_v58 = vadd.f32 %v305_v50, %v289_v45  ;;  %v251_v59 = vadd.f32 %v250_v52, %v13070_v49 }
 0x106   :  { %v13076_v57 = vpop.f32.mrf.mxu0 }
 0x107   :  { %v231_v61 = vadd.f32 %v230_v51, %v13076_v57  ;;  %v291_v62 = vmul.f32 %v13076_v57, %v13076_v57  ;;  %v327_v63 = vadd.f32 %v326_v55, %v290_v54 }
 0x108   :  { %v13082_v1 = vpop.f32.mrf.mxu0 }
 0x109   :  { %v232_v2 = vrot.slane %v231_v61, 4  ;;  %v307_v4 = vadd.f32 %v306_v58, %v291_v62  ;;  %v252_v5 = vadd.f32 %v251_v59, %v13082_v1  ;;  %v292_v6 = vmul.f32 %v13082_v1, %v13082_v1 }
 0x10b   :  { %v233_v7 = vadd.f32 %v232_v2, %v231_v61  ;;  %v308_v9 = vrot.slane %v307_v4, 4  ;;  %v253_v11 = vrot.slane %v252_v5, 4  ;;  %v328_v12 = vadd.f32 %v327_v63, %v292_v6 }
 0x10d   :  { %v234_v13 = vrot.slane %v233_v7, 2  ;;  %v309_v14 = vadd.f32 %v308_v9, %v307_v4  ;;  %v254_v15 = vadd.f32 %v253_v11, %v252_v5  ;;  %v329_v18 = vrot.slane %v328_v12, 4 }
 0x10e   :  { %v12631_v11 = vmov 1966171168  }
 0x10f   :  { %v235_v19 = vadd.f32 %v234_v13, %v233_v7  ;;  %v310_v20 = vrot.slane %v309_v14, 2  ;;  %v255_v21 = vrot.slane %v254_v15, 2  ;;  %v330_v22 = vadd.f32 %v329_v18, %v328_v12 }
 0x110   :  { %v349_v12 = vunpack.c.l.s4 %v12631_v11  ;;  %v351_v13 = vlaneseq }
 0x111   :  { %v236_v23 = vrot.slane %v235_v19, 1  ;;  %v311_v26 = vadd.f32 %v310_v20, %v309_v14  ;;  %v256_v27 = vadd.f32 %v255_v21, %v254_v15  ;;  %v331_v28 = vrot.slane %v330_v22, 2 }
 0x112   :  { %v350_v14 = vunpack.c.0.s8 %v349_v12  ;;  %v13087_v15 = vshrl.u32 %v351_v13, 7 }
 0x113   :  { %v237_v45 = vadd.f32 %v236_v23, %v235_v19  ;;  %v312_v46 = vrot.slane %v311_v26, 1  ;;  %v257_v50 = vrot.slane %v256_v27, 1  ;;  %v332_v51 = vadd.f32 %v331_v28, %v330_v22  ;;  %v24_v23 = vld [vmem:[%s19939_s5] sm:$0x3] }
 0x114   :  { %20386 = vst [vmem:[#allocation2_spill] sm:$0xff] %v13087_v15  ;;  %v13090_v19 = vsub.s32 %v350_v14, %v13087_v15  ;;  %v13101_v28 = vsub.s32 1, %v13087_v15 }
 0x115   :  { %v259_v52 = vmul.f32 0.0078125, %v237_v45  ;;  %v313_v54 = vadd.f32 %v312_v46, %v311_v26  ;;  %v258_v55 = vadd.f32 %v257_v50, %v256_v27  ;;  %v333_v58 = vrot.slane %v332_v51, 1 }
 0x116   :  { %20387 = vst [vmem:[#allocation3_spill] sm:$0xff] %v13090_v19  ;;  %v13098_v27 = vsub.s32 0, %v13087_v15  ;;  %20389 = vst [vmem:[#allocation5_spill] sm:$0xff] %v13101_v28 }
 0x117   :  { %v335_v59 = vmul.f32 0.0078125, %v313_v54  ;;  %v337_v61 = vmul.f32 %v259_v52, %v259_v52  ;;  %v260_v62 = vmul.f32 0.0078125, %v258_v55  ;;  %v334_v63 = vadd.f32 %v333_v58, %v332_v51 }
 0x118   :  { %20388 = vst [vmem:[#allocation4_spill] sm:$0xff] %v13098_v27 }
 0x119   :  { %v339_v2 = vsub.f32 %v335_v59, %v337_v61  ;;  %v336_v4 = vmul.f32 0.0078125, %v334_v63  ;;  %v338_v5 = vmul.f32 %v260_v62, %v260_v62  ;;  %v25_v59 = vld [vmem:[%s19939_s5 + $0x2] sm:$0x3] }
 0x11b   :  { %v341_v6 = vadd.f32 0.8, %v339_v2  ;;  %v340_v7 = vsub.f32 %v336_v4, %v338_v5 }
 0x11d   :  { %v342_v9 = vadd.f32 0.8, %v340_v7  ;;  %12376 = vrsqrt.f32 %v341_v6 }
 0x11f   :  { %12378 = vrsqrt.f32 %v342_v9 }
 0x12a   :  { %v12377_v18 = vpop.eup %12376 }
 0x12c   :  { %v12379_v20 = vpop.eup %12378 }
 0x12d   :  { %v347_v21 = vcombine.low %v12377_v18, %v12379_v20 }
 0x12f   :  { %v354_v22 = vrot.slane %v347_v21, %v13090_v19 }
 0x131   :  { %v361_v26 = vrot.slane %v354_v22, %v13090_v19 }
 0x133   :  { %v363_v45 = vmul.f32 %v361_v26, %v24_v23 }
 0x135   :  { %v13104_v46 = vrot.slane %v363_v45, %v13098_v27  ;;  %v13107_v50 = vrot.slane %v363_v45, %v13101_v28 }
 0x137   :  { %v407_v51 = vmul.f32 %v13104_v46, %v259_v52  ;;  %v408_v54 = vmul.f32 %v13107_v50, %v260_v62  ;;  %v376_v2 = vmul.f32 %v13107_v50, %v12929_v30  ;;  %v378_v4 = vmul.f32 %v13107_v50, %v12933_v32 }
 0x138   :  { %v375_v52 = vmul.f32 %v13104_v46, %v12927_v29  ;;  %v377_v62 = vmul.f32 %v13104_v46, %v12931_v31  ;;  %v13126_v5 = vmul.f32 %v13104_v46, %v13064_v25  ;;  %v13130_v6 = vmul.f32 %v13104_v46, %v13076_v57 }
 0x139   :  { %v411_v55 = vcombine.low %v407_v51, %v408_v54  ;;  %v380_v29 = vmul.f32 %v13107_v50, %v12937_v34  ;;  %v382_v31 = vmul.f32 %v13107_v50, %v12941_v36  ;;  %v379_v32 = vmul.f32 %v13104_v46, %v12935_v33 }
 0x13a   :  { %v381_v25 = vmul.f32 %v13104_v46, %v12939_v35  ;;  %v384_v57 = vmul.f32 %v13107_v50, %v12945_v38  ;;  %v386_v9 = vmul.f32 %v13107_v50, %v12949_v40  ;;  %v383_v36 = vmul.f32 %v13104_v46, %v12943_v37 }
 0x13b   :  { %v418_v58 = vrot.slane %v411_v55, %v13090_v19 }
 0x13d   :  { %v425_v61 = vrot.slane %v418_v58, %v13090_v19  ;;  %v385_v58 = vmul.f32 %v13104_v46, %v12947_v39  ;;  %v388_v39 = vmul.f32 %v13107_v50, %v12953_v42 }
 0x13f   :  { %v427_v63 = vsub.f32 %v25_v59, %v425_v61 }
 0x141   :  { %v13133_v7 = vrot.slane %v427_v63, %v13098_v27  ;;  %v13136_v30 = vrot.slane %v427_v63, %v13101_v28 }
 0x143   :  { %v440_v11 = vadd.f32 %v13136_v30, %v376_v2  ;;  %v442_v12 = vadd.f32 %v13136_v30, %v378_v4  ;;  %v439_v34 = vadd.f32 %v13133_v7, %v375_v52  ;;  %v441_v33 = vadd.f32 %v13133_v7, %v377_v62 }
 0x144   :  { %v444_v13 = vadd.f32 %v13136_v30, %v380_v29  ;;  %v446_v35 = vadd.f32 %v13136_v30, %v382_v31  ;;  %v443_v38 = vadd.f32 %v13133_v7, %v379_v32  ;;  %v445_v55 = vadd.f32 %v13133_v7, %v381_v25 }
 0x145   :  { %vm472_vm1 = vcmp.gt.f32.partialorder %v440_v11, 0.0  ;;  %vm474_vm2 = vcmp.gt.f32.partialorder %v442_v12, 0.0  ;;  %v504_v40 = vmul.f32 0.2, %v440_v11  ;;  %v506_v14 = vmul.f32 0.2, %v442_v12 }
 0x146   :  { %vm471_vm3 = vcmp.gt.f32.partialorder %v439_v34, 0.0  ;;  %vm473_vm4 = vcmp.gt.f32.partialorder %v441_v33, 0.0  ;;  %v503_v18 = vmul.f32 0.2, %v439_v34  ;;  %v505_v20 = vmul.f32 0.2, %v441_v33 }
 0x147   :  { %v536_v21 = vsel %vm472_vm1, %v440_v11, %v504_v40  ;;  %v538_v22 = vsel %vm474_vm2, %v442_v12, %v506_v14  ;;  %vm476_vm5 = vcmp.gt.f32.partialorder %v444_v13, 0.0  ;;  %vm478_vm6 = vcmp.gt.f32.partialorder %v446_v35, 0.0 }
 0x148   :  { %v568_v37 = vpack.c.bf16 %v538_v22, %v536_v21  ;;  %v535_v23 = vsel %vm471_vm3, %v439_v34, %v503_v18  ;;  %v537_v26 = vsel %vm473_vm4, %v441_v33, %v505_v20  ;;  %v508_v45 = vmul.f32 0.2, %v444_v13 }
 0x149   :  { %v567_v51 = vpack.c.bf16 %v537_v26, %v535_v23  ;;  %v510_v54 = vmul.f32 0.2, %v446_v35  ;;  %v507_v61 = vmul.f32 0.2, %v443_v38  ;;  %v448_v63 = vadd.f32 %v13136_v30, %v384_v57 }
 0x14a   :  { %999 = vmatprep.mubr.bf16.mxu1 %v568_v37  ;;  %1112 = vmatprep.mubr.bf16.mxu0 %v568_v37  ;;  %v540_v59 = vsel %vm476_vm5, %v444_v13, %v508_v45  ;;  %v450_v2 = vadd.f32 %v13136_v30, %v386_v9  ;;  %vm475_vm7 = vcmp.gt.f32.partialorder %v443_v38, 0.0  ;;  %vm477_vm8 = vcmp.gt.f32.partialorder %v445_v55, 0.0 }
 0x14b   :  { %1000 = vmatmul.mubr.bf16.vlgmr.msra.gmra.mxu1 %v567_v51  ;;  %1113 = vmatmul.mubr.bf16.vlgmr.msra.gmra.mxu0 %v567_v51  ;;  %v542_v4 = vsel %vm478_vm6, %v446_v35, %v510_v54  ;;  %v509_v52 = vmul.f32 0.2, %v445_v55  ;;  %vm480_vm9 = vcmp.gt.f32.partialorder %v448_v63, 0.0  ;;  %v512_v29 = vmul.f32 0.2, %v448_v63 }
 0x14c   :  { %v570_v62 = vpack.c.bf16 %v542_v4, %v540_v59  ;;  %vm482_vm10 = vcmp.gt.f32.partialorder %v450_v2, 0.0  ;;  %v514_v31 = vmul.f32 0.2, %v450_v2  ;;  %v447_v32 = vadd.f32 %v13133_v7, %v383_v36 }
 0x14d   :  { %v390_v25 = vmul.f32 %v13107_v50, %v12957_v44  ;;  %v539_v57 = vsel %vm475_vm7, %v443_v38, %v507_v61  ;;  %v541_v9 = vsel %vm477_vm8, %v445_v55, %v509_v52  ;;  %v449_v11 = vadd.f32 %v13133_v7, %v385_v58 }
 0x14e   :  { %1009 = vmatprep.mubr.bf16.mxu1 %v570_v62  ;;  %1122 = vmatprep.mubr.bf16.mxu0 %v570_v62  ;;  %v544_v12 = vsel %vm480_vm9, %v448_v63, %v512_v29  ;;  %v546_v34 = vsel %vm482_vm10, %v450_v2, %v514_v31  ;;  %v452_v33 = vadd.f32 %v13136_v30, %v388_v39  ;;  %v511_v40 = vmul.f32 0.2, %v447_v32 }
 0x14f   :  { %v454_v13 = vadd.f32 %v13136_v30, %v390_v25  ;;  %v569_v42 = vpack.c.bf16 %v541_v9, %v539_v57  ;;  %v572_v35 = vpack.c.bf16 %v546_v34, %v544_v12  ;;  %v513_v14 = vmul.f32 0.2, %v449_v11 }
 0x150   :  { %vm479_vm11 = vcmp.gt.f32.partialorder %v447_v32, 0.0  ;;  %vm481_vm12 = vcmp.gt.f32.partialorder %v449_v11, 0.0  ;;  %v516_v44 = vmul.f32 0.2, %v452_v33  ;;  %vm484_vm13 = vcmp.gt.f32.partialorder %v452_v33, 0.0 }
 0x151   :  { %v518_v36 = vmul.f32 0.2, %v454_v13  ;;  %vm486_vm14 = vcmp.gt.f32.partialorder %v454_v13, 0.0  ;;  %v387_v38 = vmul.f32 %v13104_v46, %v12951_v41  ;;  %v389_v18 = vmul.f32 %v13104_v46, %v12955_v43 }
 0x152   :  { %v392_v20 = vmul.f32 %v13107_v50, %v12975_v53  ;;  %v394_v21 = vmul.f32 %v13107_v50, %v12992_v3  ;;  %v543_v22 = vsel %vm479_vm11, %v447_v32, %v511_v40  ;;  %v545_v37 = vsel %vm481_vm12, %v449_v11, %v513_v14 }
 0x153   :  { %1010 = vmatmul.mubr.bf16.gmra.mxu1 %v569_v42  ;;  %1123 = vmatmul.mubr.bf16.gmra.mxu0 %v569_v42  ;;  %v451_v23 = vadd.f32 %v13133_v7, %v387_v38  ;;  %v453_v26 = vadd.f32 %v13133_v7, %v389_v18  ;;  %v548_v45 = vsel %vm484_vm13, %v452_v33, %v516_v44 }
 0x154   :  { %1019 = vmatprep.mubr.bf16.mxu1 %v572_v35  ;;  %1132 = vmatprep.mubr.bf16.mxu0 %v572_v35  ;;  %v550_v51 = vsel %vm486_vm14, %v454_v13, %v518_v36  ;;  %v456_v54 = vadd.f32 %v13136_v30, %v392_v20  ;;  %v458_v41 = vadd.f32 %v13136_v30, %v394_v21 }
 0x155   :  { %v571_v55 = vpack.c.bf16 %v545_v37, %v543_v22  ;;  %v391_v43 = vmul.f32 %v13104_v46, %v12963_v47  ;;  %v574_v53 = vpack.c.bf16 %v550_v51, %v548_v45  ;;  %v515_v58 = vmul.f32 0.2, %v451_v23 }
 0x156   :  { %v517_v59 = vmul.f32 0.2, %v453_v26  ;;  %v393_v3 = vmul.f32 %v13104_v46, %v12984_v60  ;;  %vm483_vm15 = vcmp.gt.f32.partialorder %v451_v23, 0.0  ;;  %vm485_vm0 = vcmp.gt.f32.partialorder %v453_v26, 0.0 }
 0x157   :  { %v520_v61 = vmul.f32 0.2, %v456_v54  ;;  %v522_v63 = vmul.f32 0.2, %v458_v41  ;;  %vm488_vm1 = vcmp.gt.f32.partialorder %v456_v54, 0.0  ;;  %vm490_vm2 = vcmp.gt.f32.partialorder %v458_v41, 0.0 }
 0x158   :  { %v396_v2 = vmul.f32 %v13107_v50, %v13008_v17  ;;  %v455_v47 = vadd.f32 %v13133_v7, %v391_v43  ;;  %v457_v4 = vadd.f32 %v13133_v7, %v393_v3  ;;  %v398_v60 = vmul.f32 %v13107_v50, %v13024_v48 }
 0x159   :  { %v547_v52 = vsel %vm483_vm15, %v451_v23, %v515_v58  ;;  %v549_v62 = vsel %vm485_vm0, %v453_v26, %v517_v59  ;;  %v552_v29 = vsel %vm488_vm1, %v456_v54, %v520_v61  ;;  %v554_v31 = vsel %vm490_vm2, %v458_v41, %v522_v63 }
 0x15a   :  { %v460_v39 = vadd.f32 %v13136_v30, %v396_v2  ;;  %v462_v32 = vadd.f32 %v13136_v30, %v398_v60  ;;  %v395_v25 = vmul.f32 %v13104_v46, %v13000_v10  ;;  %v573_v57 = vpack.c.bf16 %v549_v62, %v547_v52  ;;  %v1963_v62 = vld [vmem:[%s19940_s3 + $0x1c0] sm:$0xff] }
 0x15b   :  { %1020 = vmatmul.mubr.bf16.gmra.mxu1 %v571_v55  ;;  %1133 = vmatmul.mubr.bf16.gmra.mxu0 %v571_v55  ;;  %vm487_vm3 = vcmp.gt.f32.partialorder %v455_v47, 0.0  ;;  %v519_v17 = vmul.f32 0.2, %v455_v47  ;;  %v521_v9 = vmul.f32 0.2, %v457_v4  ;;  %v576_v11 = vpack.c.bf16 %v554_v31, %v552_v29  ;;  %v2091_v29 = vld [vmem:[%s19940_s3 + $0x5c0] sm:$0xff] }
 0x15c   :  { %1029 = vmatprep.mubr.bf16.mxu1 %v574_v53  ;;  %1142 = vmatprep.mubr.bf16.mxu0 %v574_v53  ;;  %vm489_vm4 = vcmp.gt.f32.partialorder %v457_v4, 0.0  ;;  %v524_v12 = vmul.f32 0.2, %v460_v39  ;;  %v467_v48 = vadd.f32 %v13133_v7, %v13126_v5  ;;  %vm492_vm5 = vcmp.gt.f32.partialorder %v460_v39, 0.0 }
 0x15d   :  { %v526_v34 = vmul.f32 0.2, %v462_v32  ;;  %v397_v33 = vmul.f32 %v13104_v46, %v13016_v24  ;;  %v400_v10 = vmul.f32 %v13107_v50, %v13040_v0  ;;  %vm494_vm6 = vcmp.gt.f32.partialorder %v462_v32, 0.0 }
 0x15e   :  { %v402_v13 = vmul.f32 %v13107_v50, %v13056_v16  ;;  %v469_v42 = vadd.f32 %v13133_v7, %v13130_v6  ;;  %vm499_vm7 = vcmp.gt.f32.partialorder %v467_v48, 0.0  ;;  %v551_v5 = vsel %vm487_vm3, %v455_v47, %v519_v17 }
 0x15f   :  { %v553_v35 = vsel %vm489_vm4, %v457_v4, %v521_v9  ;;  %v459_v40 = vadd.f32 %v13133_v7, %v395_v25  ;;  %v531_v24 = vmul.f32 0.2, %v467_v48  ;;  %v556_v14 = vsel %vm492_vm5, %v460_v39, %v524_v12  ;;  %v1967_v39 = vld [vmem:[%s19940_s3 + $0x1e0] sm:$0xff] }
 0x160   :  { %v461_v0 = vadd.f32 %v13133_v7, %v397_v33  ;;  %vm501_vm8 = vcmp.gt.f32.partialorder %v469_v42, 0.0  ;;  %v533_v44 = vmul.f32 0.2, %v469_v42  ;;  %v558_v36 = vsel %vm494_vm6, %v462_v32, %v526_v34  ;;  %v2095_v32 = vld [vmem:[%s19940_s3 + $0x5e0] sm:$0xff] }
 0x161   :  { %v464_v38 = vadd.f32 %v13136_v30, %v400_v10  ;;  %v466_v16 = vadd.f32 %v13136_v30, %v402_v13  ;;  %v563_v18 = vsel %vm499_vm7, %v467_v48, %v531_v24  ;;  %v575_v20 = vpack.c.bf16 %v553_v35, %v551_v5  ;;  %v1955_v9 = vld [vmem:[%s19940_s3 + $0x180] sm:$0xff] }
 0x162   :  { %v565_v6 = vsel %vm501_vm8, %v469_v42, %v533_v44  ;;  %v578_v22 = vpack.c.bf16 %v558_v36, %v556_v14  ;;  %v523_v37 = vmul.f32 0.2, %v459_v40  ;;  %v525_v23 = vmul.f32 0.2, %v461_v0  ;;  %v2083_v12 = vld [vmem:[%s19940_s3 + $0x580] sm:$0xff] }
 0x163   :  { %1030 = vmatmul.mubr.bf16.gmra.mxu1 %v573_v57  ;;  %1143 = vmatmul.mubr.bf16.gmra.mxu0 %v573_v57  ;;  %v581_v21 = vpack.c.bf16 %v565_v6, %v563_v18  ;;  %vm491_vm9 = vcmp.gt.f32.partialorder %v459_v40, 0.0  ;;  %vm493_vm10 = vcmp.gt.f32.partialorder %v461_v0, 0.0  ;;  %v528_v26 = vmul.f32 0.2, %v464_v38  ;;  %v2087_v34 = vld [vmem:[%s19940_s3 + $0x5a0] sm:$0xff] }
 0x164   :  { %1039 = vmatprep.mubr.bf16.mxu1 %v576_v11  ;;  %1152 = vmatprep.mubr.bf16.mxu0 %v576_v11  ;;  %v530_v45 = vmul.f32 0.2, %v466_v16  ;;  %vm496_vm11 = vcmp.gt.f32.partialorder %v464_v38, 0.0  ;;  %vm498_vm12 = vcmp.gt.f32.partialorder %v466_v16, 0.0  ;;  %v399_v51 = vmul.f32 %v13104_v46, %v13032_v56  ;;  %v1959_v11 = vld [vmem:[%s19940_s3 + $0x1a0] sm:$0xff] }
 0x165   :  { %v401_v54 = vmul.f32 %v13104_v46, %v13048_v8  ;;  %v406_v41 = vmul.f32 %v13107_v50, %v13082_v1  ;;  %v404_v55 = vmul.f32 %v13107_v50, %v13070_v49  ;;  %v555_v43 = vsel %vm491_vm9, %v459_v40, %v523_v37  ;;  %v1947_v42 = vld [vmem:[%s19940_s3 + $0x140] sm:$0xff] }
 0x166   :  { %v557_v53 = vsel %vm493_vm10, %v461_v0, %v525_v23  ;;  %v463_v58 = vadd.f32 %v13133_v7, %v399_v51  ;;  %v560_v61 = vsel %vm496_vm11, %v464_v38, %v528_v26  ;;  %v562_v63 = vsel %vm498_vm12, %v466_v16, %v530_v45  ;;  %v1951_v5 = vld [vmem:[%s19940_s3 + $0x160] sm:$0xff] }
 0x167   :  { %v465_v59 = vadd.f32 %v13133_v7, %v401_v54  ;;  %v470_v3 = vadd.f32 %v13136_v30, %v406_v41  ;;  %v468_v56 = vadd.f32 %v13136_v30, %v404_v55  ;;  %v577_v2 = vpack.c.bf16 %v557_v53, %v555_v43  ;;  %v2075_v35 = vld [vmem:[%s19940_s3 + $0x540] sm:$0xff] }
 0x168   :  { %v580_v8 = vpack.c.bf16 %v562_v63, %v560_v61  ;;  %v527_v46 = vmul.f32 0.2, %v463_v58  ;;  %vm495_vm13 = vcmp.gt.f32.partialorder %v463_v58, 0.0  ;;  %v10729_v31 = vcombine.high %v1963_v62, %v1967_v39  ;;  %v2079_v24 = vld [vmem:[%s19940_s3 + $0x560] sm:$0xff] }
 0x169   :  { %v529_v47 = vmul.f32 0.2, %v465_v59  ;;  %vm497_vm14 = vcmp.gt.f32.partialorder %v465_v59, 0.0  ;;  %v532_v49 = vmul.f32 0.2, %v468_v56  ;;  %vm500_vm15 = vcmp.gt.f32.partialorder %v468_v56, 0.0 }
 0x16a   :  { %v534_v1 = vmul.f32 0.2, %v470_v3  ;;  %vm502_vm0 = vcmp.gt.f32.partialorder %v470_v3, 0.0  ;;  %v559_v50 = vsel %vm495_vm13, %v463_v58, %v527_v46  ;;  %v10728_v25 = vcombine.low %v1963_v62, %v1967_v39  ;;  %3443 = vmatprep.subr.bf16.mxu1 %v10729_v31  ;;  %v1939_v36 = vld [vmem:[%s19940_s3 + $0x100] sm:$0xff] }
 0x16b   :  { %1040 = vmatmul.mubr.bf16.gmra.mxu1 %v575_v20  ;;  %1153 = vmatmul.mubr.bf16.gmra.mxu0 %v575_v20  ;;  %v561_v7 = vsel %vm497_vm14, %v465_v59, %v529_v47  ;;  %v564_v4 = vsel %vm500_vm15, %v468_v56, %v532_v49  ;;  %v10856_v57 = vcombine.low %v2091_v29, %v2095_v32  ;;  %v1943_v38 = vld [vmem:[%s19940_s3 + $0x120] sm:$0xff] }
 0x16c   :  { %1049 = vmatprep.mubr.bf16.mxu1 %v578_v22  ;;  %1162 = vmatprep.mubr.bf16.mxu0 %v578_v22  ;;  %v566_v60 = vsel %vm502_vm0, %v470_v3, %v534_v1  ;;  %v579_v52 = vpack.c.bf16 %v561_v7, %v559_v50  ;;  %v10857_v17 = vcombine.high %v2091_v29, %v2095_v32  ;;  %v2067_v16 = vld [vmem:[%s19940_s3 + $0x500] sm:$0xff] }
 0x16d   :  { %v582_v30 = vpack.c.bf16 %v566_v60, %v564_v4  ;;  %3444 = vmatpush1.bf16.msra.mxu1 %v10728_v25  ;;  %v10721_v48 = vcombine.high %v1955_v9, %v1959_v11  ;;  %v10720_v33 = vcombine.low %v1955_v9, %v1959_v11  ;;  %v10848_v10 = vcombine.low %v2083_v12, %v2087_v34  ;;  %v2071_v6 = vld [vmem:[%s19940_s3 + $0x520] sm:$0xff] }
 0x16e   :  { %3556 = vmatprep.subr.bf16.mxu0 %v10857_v17  ;;  %v10849_v13 = vcombine.high %v2083_v12, %v2087_v34  ;;  %v10713_v40 = vcombine.high %v1947_v42, %v1951_v5  ;;  %v10712_v14 = vcombine.low %v1947_v42, %v1951_v5  ;;  %v10840_v0 = vcombine.low %v2075_v35, %v2079_v24  ;;  %v1931_v37 = vld [vmem:[%s19940_s3 + $0xc0] sm:$0xff] }
 0x16f   :  { %3557 = vmatpush1.bf16.msra.mxu0 %v10856_v57  ;;  %3445 = vmatprep.subr.bf16.mxu1 %v10721_v48  ;;  %v10841_v44 = vcombine.high %v2075_v35, %v2079_v24  ;;  %v10705_v18 = vcombine.high %v1939_v36, %v1943_v38  ;;  %v10704_v20 = vcombine.low %v1939_v36, %v1943_v38  ;;  %v1935_v23 = vld [vmem:[%s19940_s3 + $0xe0] sm:$0xff] }
 0x170   :  { %3558 = vmatprep.subr.bf16.mxu0 %v10849_v13  ;;  %v10833_v22 = vcombine.high %v2067_v16, %v2071_v6  ;;  %v2059_v26 = vld [vmem:[%s19940_s3 + $0x4c0] sm:$0xff]  ;;  %v10697_v45 = vcombine.high %v1931_v37, %v1935_v23  ;;  %v10696_v54 = vcombine.low %v1931_v37, %v1935_v23 }
 0x171   :  { %3446 = vmatpush1.bf16.msra.mxu1 %v10720_v33  ;;  %v2063_v51 = vld [vmem:[%s19940_s3 + $0x4e0] sm:$0xff] }
 0x172   :  { %3447 = vmatprep.subr.bf16.mxu1 %v10713_v40  ;;  %v10824_v41 = vcombine.low %v2059_v26, %v2063_v51  ;;  %v10825_v55 = vcombine.high %v2059_v26, %v2063_v51  ;;  %v1923_v43 = vld [vmem:[%s19940_s3 + $0x80] sm:$0xff] }
 0x173   :  { %1050 = vmatmul.mubr.bf16.gmra.mxu1 %v577_v2  ;;  %1163 = vmatmul.mubr.bf16.gmra.mxu0 %v577_v2  ;;  %v1927_v53 = vld [vmem:[%s19940_s3 + $0xa0] sm:$0xff] }
 0x174   :  { %1059 = vmatprep.mubr.bf16.mxu1 %v580_v8  ;;  %1172 = vmatprep.mubr.bf16.mxu0 %v580_v8  ;;  %v2051_v58 = vld [vmem:[%s19940_s3 + $0x480] sm:$0xff]  ;;  %v10689_v59 = vcombine.high %v1923_v43, %v1927_v53  ;;  %v10688_v61 = vcombine.low %v1923_v43, %v1927_v53 }
 0x175   :  { %3559 = vmatpush1.bf16.msra.mxu0 %v10848_v10  ;;  %3448 = vmatpush1.bf16.msra.mxu1 %v10712_v14  ;;  %v2055_v3 = vld [vmem:[%s19940_s3 + $0x4a0] sm:$0xff] }
 0x176   :  { %3560 = vmatprep.subr.bf16.mxu0 %v10841_v44  ;;  %3449 = vmatprep.subr.bf16.mxu1 %v10705_v18  ;;  %v10816_v63 = vcombine.low %v2051_v58, %v2055_v3  ;;  %v10817_v56 = vcombine.high %v2051_v58, %v2055_v3  ;;  %v1915_v2 = vld [vmem:[%s19940_s3 + $0x40] sm:$0xff] }
 0x177   :  { %v1919_v8 = vld [vmem:[%s19940_s3 + $0x60] sm:$0xff] }
 0x178   :  { %v2043_v46 = vld [vmem:[%s19940_s3 + $0x440] sm:$0xff]  ;;  %v10681_v47 = vcombine.high %v1915_v2, %v1919_v8  ;;  %v10680_v1 = vcombine.low %v1915_v2, %v1919_v8 }
 0x179   :  { %3561 = vmatpush1.bf16.msra.mxu0 %v10840_v0  ;;  %3450 = vmatpush1.bf16.msra.mxu1 %v10704_v20  ;;  %v2047_v49 = vld [vmem:[%s19940_s3 + $0x460] sm:$0xff] }
 0x17a   :  { %3562 = vmatprep.subr.bf16.mxu0 %v10833_v22  ;;  %3451 = vmatprep.subr.bf16.mxu1 %v10697_v45  ;;  %v10808_v50 = vcombine.low %v2043_v46, %v2047_v49  ;;  %v10809_v7 = vcombine.high %v2043_v46, %v2047_v49  ;;  %v1907_v4 = vld [vmem:[%s19940_s3] sm:$0xff] }
 0x17b   :  { %1060 = vmatmul.mubr.bf16.gmra.mxu1 %v579_v52  ;;  %1173 = vmatmul.mubr.bf16.gmra.mxu0 %v579_v52  ;;  %v1911_v60 = vld [vmem:[%s19940_s3 + $0x20] sm:$0xff] }
 0x17c   :  { %1069 = vmatprep.mubr.bf16.mxu1 %v582_v30  ;;  %1182 = vmatprep.mubr.bf16.mxu0 %v582_v30  ;;  %v2035_v52 = vld [vmem:[%s19940_s3 + $0x400] sm:$0xff]  ;;  %v10673_v39 = vcombine.high %v1907_v4, %v1911_v60  ;;  %v10672_v31 = vcombine.low %v1907_v4, %v1911_v60 }
 0x17d   :  { %3452 = vmatpush1.bf16.msra.mxu1 %v10696_v54  ;;  %v2039_v29 = vld [vmem:[%s19940_s3 + $0x420] sm:$0xff] }
 0x17e   :  { %3453 = vmatprep.subr.bf16.mxu1 %v10689_v59  ;;  %v10800_v32 = vcombine.low %v2035_v52, %v2039_v29  ;;  %v10801_v17 = vcombine.high %v2035_v52, %v2039_v29  ;;  %v2027_v9 = vld [vmem:[%s19940_s3 + $0x3c0] sm:$0xff] }
 0x17f   :  { %v2031_v11 = vld [vmem:[%s19940_s3 + $0x3e0] sm:$0xff] }
 0x180   :  { %v2155_v12 = vld [vmem:[%s19940_s3 + $0x7c0] sm:$0xff]  ;;  %v10792_v48 = vcombine.low %v2027_v9, %v2031_v11  ;;  %v10793_v34 = vcombine.high %v2027_v9, %v2031_v11 }
 0x181   :  { %3454 = vmatpush1.bf16.msra.mxu1 %v10688_v61  ;;  %v2159_v33 = vld [vmem:[%s19940_s3 + $0x7e0] sm:$0xff] }
 0x182   :  { %3455 = vmatprep.subr.bf16.mxu1 %v10681_v47  ;;  %v2019_v10 = vld [vmem:[%s19940_s3 + $0x380] sm:$0xff]  ;;  %v10921_v35 = vcombine.high %v2155_v12, %v2159_v33  ;;  %v10920_v0 = vcombine.low %v2155_v12, %v2159_v33 }
 0x183   :  { %1070 = vmatmul.mubr.bf16.gmra.mxu1 %v581_v21  ;;  %1183 = vmatmul.mubr.bf16.gmra.mxu0 %v581_v21  ;;  %v10832_v21 = vcombine.low %v2067_v16, %v2071_v6  ;;  %v2023_v13 = vld [vmem:[%s19940_s3 + $0x3a0] sm:$0xff] }
 0x184   :  { %v10785_v40 = vcombine.high %v2019_v10, %v2023_v13  ;;  %v2147_v24 = vld [vmem:[%s19940_s3 + $0x780] sm:$0xff]  ;;  %v10784_v6 = vcombine.low %v2019_v10, %v2023_v13 }
 0x185   :  { %3563 = vmatpush1.bf16.msra.mxu0 %v10832_v21  ;;  %3456 = vmatpush1.bf16.msra.mxu1 %v10680_v1  ;;  %v2151_v14 = vld [vmem:[%s19940_s3 + $0x7a0] sm:$0xff] }
 0x186   :  { %3564 = vmatprep.subr.bf16.mxu0 %v10825_v55  ;;  %3457 = vmatprep.subr.bf16.mxu1 %v10673_v39  ;;  %v2011_v44 = vld [vmem:[%s19940_s3 + $0x340] sm:$0xff]  ;;  %v10913_v18 = vcombine.high %v2147_v24, %v2151_v14  ;;  %v10912_v26 = vcombine.low %v2147_v24, %v2151_v14 }
 0x187   :  { %v2015_v36 = vld [vmem:[%s19940_s3 + $0x360] sm:$0xff] }
 0x188   :  { %v2139_v20 = vld [vmem:[%s19940_s3 + $0x740] sm:$0xff]  ;;  %v10777_v23 = vcombine.high %v2011_v44, %v2015_v36  ;;  %v10776_v43 = vcombine.low %v2011_v44, %v2015_v36 }
 0x189   :  { %3565 = vmatpush1.bf16.msra.mxu0 %v10824_v41  ;;  %3458 = vmatpush1.bf16.msra.mxu1 %v10672_v31  ;;  %v2143_v21 = vld [vmem:[%s19940_s3 + $0x760] sm:$0xff] }
 0x18a   :  { %3566 = vmatprep.subr.bf16.mxu0 %v10817_v56  ;;  %3459 = vmatprep.subr.bf16.mxu1 %v10793_v34  ;;  %v2003_v45 = vld [vmem:[%s19940_s3 + $0x300] sm:$0xff]  ;;  %v10905_v55 = vcombine.high %v2139_v20, %v2143_v21  ;;  %v10904_v8 = vcombine.low %v2139_v20, %v2143_v21 }
 0x18b   :  { %v2007_v51 = vld [vmem:[%s19940_s3 + $0x320] sm:$0xff] }
 0x18c   :  { %v13392_v53 = vld [vmem:[%s19940_s3 + $0x700] sm:$0xff]  ;;  %v10769_v61 = vcombine.high %v2003_v45, %v2007_v51  ;;  %v10768_v31 = vcombine.low %v2003_v45, %v2007_v51 }
 0x18d   :  { %3567 = vmatpush1.bf16.msra.mxu0 %v10816_v63  ;;  %3460 = vmatpush2.bf16.msra.mxu1 %v10792_v48  ;;  %v13397_v58 = vld [vmem:[%s19940_s3 + $0x720] sm:$0xff] }
 0x18e   :  { %3568 = vmatprep.subr.bf16.mxu0 %v10809_v7  ;;  %3461 = vmatprep.subr.bf16.mxu1 %v10785_v40  ;;  %v13412_v46 = vld [vmem:[%s19940_s3 + $0x2c0] sm:$0xff]  ;;  %v10897_v60 = vcombine.high %v13392_v53, %v13397_v58  ;;  %v10896_v40 = vcombine.low %v13392_v53, %v13397_v58 }
 0x18f   :  { %v13417_v47 = vld [vmem:[%s19940_s3 + $0x2e0] sm:$0xff] }
 0x190   :  { %v10761_v33 = vcombine.high %v13412_v46, %v13417_v47  ;;  %v13466_v24 = vld [vmem:[%s19940_s3 + $0x280] sm:$0xff]  ;;  %v10760_v45 = vcombine.low %v13412_v46, %v13417_v47 }
 0x191   :  { %3569 = vmatpush1.bf16.msra.mxu0 %v10808_v50  ;;  %3462 = vmatpush2.bf16.msra.mxu1 %v10784_v6  ;;  %v13471_v14 = vld [vmem:[%s19940_s3 + $0x2a0] sm:$0xff] }
 0x192   :  { %3570 = vmatprep.subr.bf16.mxu0 %v10801_v17  ;;  %3463 = vmatprep.subr.bf16.mxu1 %v10777_v23  ;;  %v13445_v17 = vld [vmem:[%s19940_s3 + $0x6e0] sm:$0xff] }
 0x193   :  { %v13492_v51 = vld [vmem:[%s19940_s3 + $0x680] sm:$0xff] }
 0x195   :  { %3571 = vmatpush1.bf16.msra.mxu0 %v10800_v32  ;;  %3464 = vmatpush2.bf16.msra.mxu1 %v10776_v43  ;;  %v13440_v32 = vld [vmem:[%s19940_s3 + $0x6c0] sm:$0xff] }
 0x196   :  { %3572 = vmatprep.subr.bf16.mxu0 %v10921_v35  ;;  %3465 = vmatprep.subr.bf16.mxu1 %v10769_v61  ;;  %v10889_v20 = vcombine.high %v13440_v32, %v13445_v17  ;;  %v10888_v47 = vcombine.low %v13440_v32, %v13445_v17 }
 0x199   :  { %3573 = vmatpush2.bf16.msra.mxu0 %v10920_v0  ;;  %3466 = vmatpush2.bf16.msra.mxu1 %v10768_v31 }
 0x19a   :  { %3574 = vmatprep.subr.bf16.mxu0 %v10913_v18  ;;  %3467 = vmatprep.subr.bf16.mxu1 %v10761_v33  ;;  %v13543_v33 = vld [vmem:[%s19940_s3 + $0x660] sm:$0xff] }
 0x19d   :  { %3575 = vmatpush2.bf16.msra.mxu0 %v10912_v26  ;;  %3468 = vmatpush2.bf16.msra.mxu1 %v10760_v45 }
 0x19e   :  { %3576 = vmatprep.subr.bf16.mxu0 %v10905_v55  ;;  %v13497_v55 = vld [vmem:[%s19940_s3 + $0x6a0] sm:$0xff] }
 0x19f   :  { %v10881_v31 = vcombine.high %v13492_v51, %v13497_v55 }
 0x1a1   :  { %3577 = vmatpush2.bf16.msra.mxu0 %v10904_v8 }
 0x1a2   :  { %3578 = vmatprep.subr.bf16.mxu0 %v10897_v60 }
 0x1a5   :  { %3579 = vmatpush2.bf16.msra.mxu0 %v10896_v40 }
 0x1a6   :  { %3580 = vmatprep.subr.bf16.mxu0 %v10889_v20  ;;  %v10880_v20 = vcombine.low %v13492_v51, %v13497_v55 }
 0x1a9   :  { %3581 = vmatpush2.bf16.msra.mxu0 %v10888_v47  ;;  %v13593_v47 = vld [vmem:[%s19940_s3 + $0x620] sm:$0xff] }
 0x1aa   :  { %3582 = vmatprep.subr.bf16.mxu0 %v10881_v31 }
 0x1ad   :  { %3583 = vmatpush2.bf16.msra.mxu0 %v10880_v20 }
 0x20b   :  { %v13320_v30 = vpop.f32.mrf.mxu1  ;;  %v13322_v62 = vpop.f32.mrf.mxu0 }
 0x20c   :  { %v1281_v63 = vmul.f32 %v13320_v30, %v13320_v30  ;;  %v1283_v49 = vmul.f32 %v13322_v62, %v13322_v62 }
 0x20d   :  { %v13327_v25 = vpop.f32.mrf.mxu1  ;;  %v13329_v57 = vpop.f32.mrf.mxu0 }
 0x20e   :  { %v1282_v1 = vmul.f32 %v13327_v25, %v13327_v25  ;;  %v1284_v50 = vmul.f32 %v13329_v57, %v13329_v57 }
 0x20f   :  { %v13349_v42 = vpop.f32.mrf.mxu1  ;;  %v13351_v5 = vpop.f32.mrf.mxu0 }
 0x210   :  { %v1285_v56 = vmul.f32 %v13349_v42, %v13349_v42  ;;  %v1287_v2 = vmul.f32 %v13351_v5, %v13351_v5  ;;  %v1193_v52 = vadd.f32 %v13349_v42, %v13320_v30  ;;  %v1235_v39 = vadd.f32 %v13351_v5, %v13322_v62 }
 0x211   :  { %v13365_v38 = vpop.f32.mrf.mxu1  ;;  %v13367_v16 = vpop.f32.mrf.mxu0 }
 0x212   :  { %v1286_v29 = vmul.f32 %v13365_v38, %v13365_v38  ;;  %v1288_v9 = vmul.f32 %v13367_v16, %v13367_v16  ;;  %v1345_v10 = vadd.f32 %v1285_v56, %v1281_v63  ;;  %v1387_v13 = vadd.f32 %v1287_v2, %v1283_v49  ;;  %v13515_v49 = vld [vmem:[%s19940_s3 + $0x240] sm:$0xff] }
 0x213   :  { %v13375_v22 = vpop.f32.mrf.mxu1  ;;  %v13377_v37 = vpop.f32.mrf.mxu0  ;;  %v1214_v35 = vadd.f32 %v13365_v38, %v13327_v25  ;;  %v1256_v36 = vadd.f32 %v13367_v16, %v13329_v57  ;;  %v10753_v56 = vcombine.high %v13466_v24, %v13471_v14 }
 0x214   :  { %v1289_v11 = vmul.f32 %v13375_v22, %v13375_v22  ;;  %v1291_v12 = vmul.f32 %v13377_v37, %v13377_v37  ;;  %v1194_v0 = vadd.f32 %v1193_v52, %v13375_v22  ;;  %v1236_v21 = vadd.f32 %v1235_v39, %v13377_v37 }
 0x215   :  { %v13385_v54 = vpop.f32.mrf.mxu1  ;;  %v13387_v41 = vpop.f32.mrf.mxu0  ;;  %v1366_v23 = vadd.f32 %v1286_v29, %v1282_v1  ;;  %v1408_v58 = vadd.f32 %v1288_v9, %v1284_v50  ;;  %v13520_v1 = vld [vmem:[%s19940_s3 + $0x260] sm:$0xff]  ;;  %3469 = vmatprep.subr.bf16.mxu1 %v10753_v56 }
 0x216   :  { %v1290_v44 = vmul.f32 %v13385_v54, %v13385_v54  ;;  %v1292_v26 = vmul.f32 %v13387_v41, %v13387_v41  ;;  %v1346_v43 = vadd.f32 %v1345_v10, %v1289_v11  ;;  %v1388_v53 = vadd.f32 %v1387_v13, %v1291_v12  ;;  %v13538_v12 = vld [vmem:[%s19940_s3 + $0x640] sm:$0xff] }
 0x217   :  { %v13399_v59 = vpop.f32.mrf.mxu1  ;;  %v13401_v3 = vpop.f32.mrf.mxu0  ;;  %v1215_v2 = vadd.f32 %v1214_v35, %v13385_v54  ;;  %v1257_v60 = vadd.f32 %v1256_v36, %v13387_v41  ;;  %v10752_v11 = vcombine.low %v13466_v24, %v13471_v14  ;;  %v10745_v14 = vcombine.high %v13515_v49, %v13520_v1 }
 0x218   :  { %v1293_v8 = vmul.f32 %v13399_v59, %v13399_v59  ;;  %v1295_v46 = vmul.f32 %v13401_v3, %v13401_v3  ;;  %v1367_v50 = vadd.f32 %v1366_v23, %v1290_v44  ;;  %v1195_v52 = vadd.f32 %v1194_v0, %v13399_v59  ;;  %v13568_v23 = vld [vmem:[%s19940_s3 + $0x220] sm:$0xff] }
 0x219   :  { %v13425_v7 = vpop.f32.mrf.mxu1  ;;  %v13427_v4 = vpop.f32.mrf.mxu0  ;;  %v1409_v32 = vadd.f32 %v1408_v58, %v1292_v26  ;;  %v1237_v17 = vadd.f32 %v1236_v21, %v13401_v3  ;;  %v13563_v21 = vld [vmem:[%s19940_s3 + $0x200] sm:$0xff]  ;;  %v10873_v55 = vcombine.high %v13538_v12, %v13543_v33  ;;  %3470 = vmatpush2.bf16.msra.mxu1 %v10752_v11 }
 0x21a   :  { %v1294_v9 = vmul.f32 %v13425_v7, %v13425_v7  ;;  %v1296_v10 = vmul.f32 %v13427_v4, %v13427_v4  ;;  %v1347_v0 = vadd.f32 %v1346_v43, %v1293_v8  ;;  %v1389_v44 = vadd.f32 %v1388_v53, %v1295_v46  ;;  %v13583_v58 = vld [vmem:[%s19940_s3 + $0x600] sm:$0xff]  ;;  %3471 = vmatprep.subr.bf16.mxu1 %v10745_v14 }
 0x21b   :  { %v13453_v48 = vpop.f32.mrf.mxu1  ;;  %v13455_v34 = vpop.f32.mrf.mxu0  ;;  %v1216_v36 = vadd.f32 %v1215_v2, %v13425_v7  ;;  %v1258_v43 = vadd.f32 %v1257_v60, %v13427_v4  ;;  %v10744_v46 = vcombine.low %v13515_v49, %v13520_v1  ;;  %v13598_v60 = vld [vmem:[%s19940_s3 + $0x1c8] sm:$0xff]  ;;  %v10737_v1 = vcombine.high %v13563_v21, %v13568_v23  ;;  %3584 = vmatprep.subr.bf16.mxu0 %v10873_v55 }
 0x21c   :  { %20390 = vst [vmem:[#allocation6_spill] sm:$0xff] %v13453_v48  ;;  %20391 = vst [vmem:[#allocation7_spill] sm:$0xff] %v13455_v34  ;;  %v1297_v13 = vmul.f32 %v13453_v48, %v13453_v48  ;;  %v1299_v35 = vmul.f32 %v13455_v34, %v13455_v34  ;;  %v1196_v26 = vadd.f32 %v1195_v52, %v13453_v48 }
 0x21d   :  { %v13478_v18 = vpop.f32.mrf.mxu1  ;;  %v13480_v6 = vpop.f32.mrf.mxu0  ;;  %v1238_v56 = vadd.f32 %v1237_v17, %v13455_v34  ;;  %v1368_v2 = vadd.f32 %v1367_v50, %v1294_v9  ;;  %20395 = vst [vmem:[#allocation11_spill] sm:$0xff] %v13598_v60  ;;  %v13603_v50 = vld [vmem:[%s19940_s3 + $0x1e8] sm:$0xff]  ;;  %v1410_v17 = vadd.f32 %v1409_v32, %v1296_v10  ;;  %3472 = vmatpush2.bf16.msra.mxu1 %v10744_v46 }
 0x21e   :  { %20392 = vst [vmem:[#allocation8_spill] sm:$0xff] %v13478_v18  ;;  %20393 = vst [vmem:[#allocation9_spill] sm:$0xff] %v13480_v6  ;;  %v1298_v45 = vmul.f32 %v13478_v18, %v13478_v18  ;;  %v1300_v8 = vmul.f32 %v13480_v6, %v13480_v6  ;;  %v1348_v52 = vadd.f32 %v1347_v0, %v1297_v13  ;;  %v13620_v32 = vld [vmem:[%s19940_s3 + $0x5c8] sm:$0xff]  ;;  %3473 = vmatprep.subr.bf16.mxu1 %v10737_v1 }
 0x21f   :  { %v13499_v61 = vpop.f32.mrf.mxu1  ;;  %v13501_v63 = vpop.f32.mrf.mxu0  ;;  %20396 = vst [vmem:[#allocation12_spill] sm:$0xff] %v13603_v50  ;;  %v1390_v31 = vadd.f32 %v1389_v44, %v1299_v35  ;;  %v1217_v11 = vadd.f32 %v1216_v36, %v13478_v18  ;;  %v1259_v34 = vadd.f32 %v1258_v43, %v13480_v6  ;;  %v10872_v13 = vcombine.low %v13538_v12, %v13543_v33  ;;  %v13625_v10 = vld [vmem:[%s19940_s3 + $0x5e8] sm:$0xff] }
 0x220   :  { %v1301_v48 = vmul.f32 %v13499_v61, %v13499_v61  ;;  %20399 = vst [vmem:[#allocation15_spill] sm:$0xff] %v13620_v32  ;;  %20400 = vst [vmem:[#allocation16_spill] sm:$0xff] %v13625_v10  ;;  %v1369_v35 = vadd.f32 %v1368_v2, %v1298_v45  ;;  %v1303_v14 = vmul.f32 %v13501_v63, %v13501_v63 }
 0x221   :  { %v13524_v39 = vpop.f32.mrf.mxu1  ;;  %v13526_v29 = vpop.f32.mrf.mxu0  ;;  %v10865_v12 = vcombine.high %v13583_v58, %v13593_v47  ;;  %v1411_v36 = vadd.f32 %v1410_v17, %v1300_v8  ;;  %v1197_v20 = vadd.f32 %v1196_v26, %v13499_v61  ;;  %v1239_v43 = vadd.f32 %v1238_v56, %v13501_v63  ;;  %3585 = vmatpush2.bf16.msra.mxu0 %v10872_v13 }
 0x222   :  { %v10736_v45 = vcombine.low %v13563_v21, %v13568_v23  ;;  %v1302_v2 = vmul.f32 %v13524_v39, %v13524_v39  ;;  %v1304_v55 = vmul.f32 %v13526_v29, %v13526_v29  ;;  %v10731_v26 = vcombine.high %v13598_v60, %v13603_v50 }
 0x223   :  { %v13551_v40 = vpop.f32.mrf.mxu1  ;;  %v13553_v24 = vpop.f32.mrf.mxu0  ;;  %v1349_v8 = vadd.f32 %v1348_v52, %v1301_v48  ;;  %v10864_v46 = vcombine.low %v13583_v58, %v13593_v47  ;;  %v1391_v17 = vadd.f32 %v1390_v31, %v1303_v14  ;;  %v1218_v1 = vadd.f32 %v1217_v11, %v13524_v39  ;;  %3586 = vmatprep.subr.bf16.mxu0 %v10865_v12 }
 0x224   :  { %20394 = vst [vmem:[#allocation10_spill] sm:$0xff] %v13553_v24  ;;  %v1305_v21 = vmul.f32 %v13551_v40, %v13551_v40  ;;  %v1307_v23 = vmul.f32 %v13553_v24, %v13553_v24  ;;  %v10859_v48 = vcombine.high %v13620_v32, %v13625_v10  ;;  %v1198_v52 = vadd.f32 %v1197_v20, %v13551_v40 }
 0x225   :  { %v13574_v53 = vpop.f32.mrf.mxu1  ;;  %v13576_v51 = vpop.f32.mrf.mxu0  ;;  %v1240_v13 = vadd.f32 %v1239_v43, %v13553_v24  ;;  %v1260_v58 = vadd.f32 %v1259_v34, %v13526_v29  ;;  %3474 = vmatpush2.bf16.msra.mxu1 %v10736_v45  ;;  %v1370_v31 = vadd.f32 %v1369_v35, %v1302_v2  ;;  %v1412_v11 = vadd.f32 %v1411_v36, %v1304_v55 }
 0x226   :  { %v1306_v33 = vmul.f32 %v13574_v53, %v13574_v53  ;;  %v1308_v47 = vmul.f32 %v13576_v51, %v13576_v51  ;;  %3669 = vmatprep.subr.bf16.mxu1 %v10731_v26  ;;  %v1350_v20 = vadd.f32 %v1349_v8, %v1305_v21  ;;  %v1392_v43 = vadd.f32 %v1391_v17, %v1307_v23 }
 0x227   :  { %v13605_v9 = vpop.f32.mrf.mxu1  ;;  %v13607_v49 = vpop.f32.mrf.mxu0  ;;  %v1219_v34 = vadd.f32 %v1218_v1, %v13574_v53  ;;  %v1261_v32 = vadd.f32 %v1260_v58, %v13576_v51  ;;  %3587 = vmatpush2.bf16.msra.mxu0 %v10864_v46 }
 0x228   :  { %20397 = vst [vmem:[#allocation13_spill] sm:$0xff] %v13605_v9  ;;  %20398 = vst [vmem:[#allocation14_spill] sm:$0xff] %v13607_v49  ;;  %v1309_v14 = vmul.f32 %v13605_v9, %v13605_v9  ;;  %v1311_v12 = vmul.f32 %v13607_v49, %v13607_v49  ;;  %v1371_v35 = vadd.f32 %v1370_v31, %v1306_v33  ;;  %3782 = vmatprep.subr.bf16.mxu0 %v10859_v48 }
 0x229   :  { %v13629_v0 = vpop.f32.mrf.mxu1  ;;  %v13631_v44 = vpop.f32.mrf.mxu0  ;;  %v1199_v36 = vadd.f32 %v1198_v52, %v13605_v9  ;;  %v1413_v26 = vadd.f32 %v1412_v11, %v1308_v47  ;;  %v1241_v8 = vadd.f32 %v1240_v13, %v13607_v49 }
 0x22a   :  { %v1310_v45 = vmul.f32 %v13629_v0, %v13629_v0  ;;  %v1312_v2 = vmul.f32 %v13631_v44, %v13631_v44  ;;  %v1351_v23 = vadd.f32 %v1350_v20, %v1309_v14  ;;  %v1393_v46 = vadd.f32 %v1392_v43, %v1311_v12 }
 0x22b   :  { %v13645_v6 = vpop.f32.mrf.mxu1  ;;  %v13647_v18 = vpop.f32.mrf.mxu0  ;;  %v1220_v17 = vadd.f32 %v1219_v34, %v13629_v0  ;;  %v1262_v47 = vadd.f32 %v1261_v32, %v13631_v44 }
 0x22c   :  { %20401 = vst [vmem:[#allocation17_spill] sm:$0xff] %v13645_v6  ;;  %20402 = vst [vmem:[#allocation18_spill] sm:$0xff] %v13647_v18  ;;  %v1313_v21 = vmul.f32 %v13645_v6, %v13645_v6  ;;  %v1315_v33 = vmul.f32 %v13647_v18, %v13647_v18  ;;  %v1200_v48 = vadd.f32 %v1199_v36, %v13645_v6 }
 0x22d   :  { %v13662_v50 = vpop.f32.mrf.mxu1  ;;  %v13664_v56 = vpop.f32.mrf.mxu0  ;;  %v1242_v13 = vadd.f32 %v1241_v8, %v13647_v18  ;;  %v1372_v11 = vadd.f32 %v1371_v35, %v1310_v45  ;;  %v1414_v14 = vadd.f32 %v1413_v26, %v1312_v2 }
 0x22e   :  { %20403 = vst [vmem:[#allocation19_spill] sm:$0xff] %v13664_v56  ;;  %v1314_v1 = vmul.f32 %v13662_v50, %v13662_v50  ;;  %v1316_v31 = vmul.f32 %v13664_v56, %v13664_v56  ;;  %v1352_v36 = vadd.f32 %v1351_v23, %v1313_v21  ;;  %v1394_v6 = vadd.f32 %v1393_v46, %v1315_v33 }
 0x22f   :  { %v13677_v60 = vpop.f32.mrf.mxu1  ;;  %v13679_v10 = vpop.f32.mrf.mxu0  ;;  %v1221_v8 = vadd.f32 %v1220_v17, %v13662_v50  ;;  %v1263_v32 = vadd.f32 %v1262_v47, %v13664_v56 }
 0x230   :  { %20404 = vst [vmem:[#allocation20_spill] sm:$0xff] %v13677_v60  ;;  %20405 = vst [vmem:[#allocation21_spill] sm:$0xff] %v13679_v10  ;;  %v1317_v12 = vmul.f32 %v13677_v60, %v13677_v60  ;;  %v1319_v20 = vmul.f32 %v13679_v10, %v13679_v10  ;;  %v1373_v18 = vadd.f32 %v1372_v11, %v1314_v1 }
 0x231   :  { %v13688_v55 = vpop.f32.mrf.mxu1  ;;  %v13690_v24 = vpop.f32.mrf.mxu0  ;;  %v1201_v35 = vadd.f32 %v1200_v48, %v13677_v60  ;;  %v1415_v9 = vadd.f32 %v1414_v14, %v1316_v31  ;;  %v1243_v21 = vadd.f32 %v1242_v13, %v13679_v10 }
 0x232   :  { %20406 = vst [vmem:[#allocation22_spill] sm:$0xff] %v13688_v55  ;;  %20407 = vst [vmem:[#allocation23_spill] sm:$0xff] %v13690_v24  ;;  %v1318_v45 = vmul.f32 %v13688_v55, %v13688_v55  ;;  %v1320_v2 = vmul.f32 %v13690_v24, %v13690_v24  ;;  %v1353_v46 = vadd.f32 %v1352_v36, %v1317_v12 }
 0x233   :  { %v13700_v52 = vpop.f32.mrf.mxu1  ;;  %v13702_v58 = vpop.f32.mrf.mxu0  ;;  %v1395_v17 = vadd.f32 %v1394_v6, %v1319_v20  ;;  %v1222_v1 = vadd.f32 %v1221_v8, %v13688_v55  ;;  %v1264_v14 = vadd.f32 %v1263_v32, %v13690_v24 }
 0x234   :  { %20408 = vst [vmem:[#allocation24_spill] sm:$0xff] %v13700_v52  ;;  %20409 = vst [vmem:[#allocation25_spill] sm:$0xff] %v13702_v58  ;;  %v1321_v33 = vmul.f32 %v13700_v52, %v13700_v52  ;;  %v1323_v23 = vmul.f32 %v13702_v58, %v13702_v58  ;;  %v1202_v31 = vadd.f32 %v1201_v35, %v13700_v52 }
 0x235   :  { %v13713_v43 = vpop.f32.mrf.mxu1  ;;  %v13715_v34 = vpop.f32.mrf.mxu0  ;;  %v1244_v13 = vadd.f32 %v1243_v21, %v13702_v58  ;;  %v1374_v12 = vadd.f32 %v1373_v18, %v1318_v45  ;;  %v1416_v6 = vadd.f32 %v1415_v9, %v1320_v2 }
 0x236   :  { %20410 = vst [vmem:[#allocation26_spill] sm:$0xff] %v13713_v43  ;;  %20411 = vst [vmem:[#allocation27_spill] sm:$0xff] %v13715_v34  ;;  %v1322_v48 = vmul.f32 %v13713_v43, %v13713_v43  ;;  %v1324_v10 = vmul.f32 %v13715_v34, %v13715_v34  ;;  %v1354_v35 = vadd.f32 %v1353_v46, %v1321_v33 }
 0x237   :  { %v13724_v26 = vpop.f32.mrf.mxu1  ;;  %v13726_v49 = vpop.f32.mrf.mxu0  ;;  %v1396_v52 = vadd.f32 %v1395_v17, %v1323_v23  ;;  %v1223_v21 = vadd.f32 %v1222_v1, %v13713_v43  ;;  %v1265_v32 = vadd.f32 %v1264_v14, %v13715_v34 }
 0x238   :  { %20412 = vst [vmem:[#allocation28_spill] sm:$0xff] %v13724_v26  ;;  %20413 = vst [vmem:[#allocation29_spill] sm:$0xff] %v13726_v49  ;;  %v1325_v20 = vmul.f32 %v13724_v26, %v13724_v26  ;;  %v1327_v36 = vmul.f32 %v13726_v49, %v13726_v49  ;;  %v1375_v58 = vadd.f32 %v1374_v12, %v1322_v48 }
 0x239   :  { %v13736_v47 = vpop.f32.mrf.mxu1  ;;  %v13738_v11 = vpop.f32.mrf.mxu0  ;;  %v1203_v18 = vadd.f32 %v1202_v31, %v13724_v26  ;;  %v1417_v56 = vadd.f32 %v1416_v6, %v1324_v10  ;;  %v1245_v33 = vadd.f32 %v1244_v13, %v13726_v49 }
 0x23a   :  { %20414 = vst [vmem:[#allocation30_spill] sm:$0xff] %v13736_v47  ;;  %20415 = vst [vmem:[#allocation31_spill] sm:$0xff] %v13738_v11  ;;  %v1326_v9 = vmul.f32 %v13736_v47, %v13736_v47  ;;  %v1328_v45 = vmul.f32 %v13738_v11, %v13738_v11  ;;  %v1355_v17 = vadd.f32 %v1354_v35, %v1325_v20 }
 0x23b   :  { %v13749_v8 = vpop.f32.mrf.mxu1  ;;  %v13751_v60 = vpop.f32.mrf.mxu0  ;;  %v1397_v1 = vadd.f32 %v1396_v52, %v1327_v36  ;;  %v1224_v48 = vadd.f32 %v1223_v21, %v13736_v47  ;;  %v1266_v6 = vadd.f32 %v1265_v32, %v13738_v11 }
 0x23c   :  { %20416 = vst [vmem:[#allocation32_spill] sm:$0xff] %v13749_v8  ;;  %20417 = vst [vmem:[#allocation33_spill] sm:$0xff] %v13751_v60  ;;  %v1329_v23 = vmul.f32 %v13749_v8, %v13749_v8  ;;  %v1331_v46 = vmul.f32 %v13751_v60, %v13751_v60  ;;  %v1204_v10 = vadd.f32 %v1203_v18, %v13749_v8 }
 0x23d   :  { %v13760_v2 = vpop.f32.mrf.mxu1  ;;  %v13762_v24 = vpop.f32.mrf.mxu0  ;;  %v1246_v13 = vadd.f32 %v1245_v33, %v13751_v60  ;;  %v1376_v20 = vadd.f32 %v1375_v58, %v1326_v9  ;;  %v1418_v52 = vadd.f32 %v1417_v56, %v1328_v45 }
 0x23e   :  { %20418 = vst [vmem:[#allocation34_spill] sm:$0xff] %v13760_v2  ;;  %20419 = vst [vmem:[#allocation35_spill] sm:$0xff] %v13762_v24  ;;  %v1330_v31 = vmul.f32 %v13760_v2, %v13760_v2  ;;  %v1332_v49 = vmul.f32 %v13762_v24, %v13762_v24  ;;  %v1356_v18 = vadd.f32 %v1355_v17, %v1329_v23 }
 0x23f   :  { %v13772_v14 = vpop.f32.mrf.mxu1  ;;  %v13774_v12 = vpop.f32.mrf.mxu0  ;;  %v1398_v8 = vadd.f32 %v1397_v1, %v1331_v46  ;;  %v1225_v33 = vadd.f32 %v1224_v48, %v13760_v2  ;;  %v1267_v56 = vadd.f32 %v1266_v6, %v13762_v24 }
 0x240   :  { %20420 = vst [vmem:[#allocation36_spill] sm:$0xff] %v13772_v14  ;;  %20421 = vst [vmem:[#allocation37_spill] sm:$0xff] %v13774_v12  ;;  %v1333_v36 = vmul.f32 %v13772_v14, %v13772_v14  ;;  %v1335_v35 = vmul.f32 %v13774_v12, %v13774_v12  ;;  %v1377_v60 = vadd.f32 %v1376_v20, %v1330_v31 }
 0x241   :  { %v13785_v21 = vpop.f32.mrf.mxu1  ;;  %v13787_v26 = vpop.f32.mrf.mxu0  ;;  %v1205_v58 = vadd.f32 %v1204_v10, %v13772_v14  ;;  %v1419_v34 = vadd.f32 %v1418_v52, %v1332_v49  ;;  %v1247_v23 = vadd.f32 %v1246_v13, %v13774_v12 }
 0x242   :  { %20422 = vst [vmem:[#allocation38_spill] sm:$0xff] %v13785_v21  ;;  %20423 = vst [vmem:[#allocation39_spill] sm:$0xff] %v13787_v26  ;;  %v1334_v32 = vmul.f32 %v13785_v21, %v13785_v21  ;;  %v1336_v9 = vmul.f32 %v13787_v26, %v13787_v26  ;;  %v1357_v1 = vadd.f32 %v1356_v18, %v1333_v36 }
 0x243   :  { %v13796_v45 = vpop.f32.mrf.mxu1  ;;  %v13798_v11 = vpop.f32.mrf.mxu0  ;;  %v1399_v48 = vadd.f32 %v1398_v8, %v1335_v35  ;;  %v1226_v10 = vadd.f32 %v1225_v33, %v13785_v21  ;;  %v1268_v20 = vadd.f32 %v1267_v56, %v13787_v26 }
 0x244   :  { %20424 = vst [vmem:[#allocation40_spill] sm:$0xff] %v13796_v45  ;;  %20425 = vst [vmem:[#allocation41_spill] sm:$0xff] %v13798_v11  ;;  %v1337_v46 = vmul.f32 %v13796_v45, %v13796_v45  ;;  %v1339_v17 = vmul.f32 %v13798_v11, %v13798_v11  ;;  %v1206_v49 = vadd.f32 %v1205_v58, %v13796_v45 }
 0x245   :  { %v13805_v31 = vpop.f32.mrf.mxu1  ;;  %v13808_v6 = vpop.f32.mrf.mxu0  ;;  %v1248_v13 = vadd.f32 %v1247_v23, %v13798_v11  ;;  %v1378_v12 = vadd.f32 %v1377_v60, %v1334_v32  ;;  %v1420_v36 = vadd.f32 %v1419_v34, %v1336_v9 }
 0x246   :  { %20426 = vst [vmem:[#allocation42_spill] sm:$0xff] %v13805_v31  ;;  %20427 = vst [vmem:[#allocation43_spill] sm:$0xff] %v13808_v6  ;;  %v1338_v52 = vmul.f32 %v13805_v31, %v13805_v31  ;;  %v1358_v14 = vadd.f32 %v1357_v1, %v1337_v46  ;;  %v1400_v24 = vadd.f32 %v1399_v48, %v1339_v17 }
 0x247   :  { %v1340_v8 = vmul.f32 %v13808_v6, %v13808_v6  ;;  %v13817_v35 = vpop.f32.mrf.mxu1  ;;  %v13819_v18 = vpop.f32.mrf.mxu0  ;;  %v1227_v33 = vadd.f32 %v1226_v10, %v13805_v31  ;;  %v1269_v32 = vadd.f32 %v1268_v20, %v13808_v6 }
 0x248   :  { %20428 = vst [vmem:[#allocation44_spill] sm:$0xff] %v13817_v35  ;;  %20429 = vst [vmem:[#allocation45_spill] sm:$0xff] %v13819_v18  ;;  %v1207_v56 = vadd.f32 %v1206_v49, %v13817_v35  ;;  %v1341_v58 = vmul.f32 %v13817_v35, %v13817_v35  ;;  %v1249_v23 = vadd.f32 %v1248_v13, %v13819_v18 }
 0x249   :  { %v1379_v60 = vadd.f32 %v1378_v12, %v1338_v52  ;;  %v1421_v46 = vadd.f32 %v1420_v36, %v1340_v8  ;;  %v1343_v34 = vmul.f32 %v13819_v18, %v13819_v18  ;;  %v13829_v9 = vpop.f32.mrf.mxu1  ;;  %v13831_v17 = vpop.f32.mrf.mxu0 }
 0x24a   :  { %20430 = vst [vmem:[#allocation46_spill] sm:$0xff] %v13829_v9  ;;  %v1208_v1 = vrot.slane %v1207_v56, 4  ;;  %v1359_v48 = vadd.f32 %v1358_v14, %v1341_v58  ;;  %v1250_v10 = vrot.slane %v1249_v23, 4  ;;  %v1228_v49 = vadd.f32 %v1227_v33, %v13829_v9 }
 0x24b   :  { %v1401_v11 = vadd.f32 %v1400_v24, %v1343_v34  ;;  %v1342_v13 = vmul.f32 %v13829_v9, %v13829_v9  ;;  %v1270_v12 = vadd.f32 %v1269_v32, %v13831_v17  ;;  %v1344_v20 = vmul.f32 %v13831_v17, %v13831_v17 }
 0x24c   :  { %v1209_v52 = vadd.f32 %v1208_v1, %v1207_v56  ;;  %v1360_v8 = vrot.slane %v1359_v48, 4  ;;  %v1251_v36 = vadd.f32 %v1250_v10, %v1249_v23  ;;  %v1229_v18 = vrot.slane %v1228_v49, 4 }
 0x24d   :  { %v1402_v35 = vrot.slane %v1401_v11, 4  ;;  %v1380_v45 = vadd.f32 %v1379_v60, %v1342_v13  ;;  %v1271_v6 = vrot.slane %v1270_v12, 4  ;;  %v1422_v14 = vadd.f32 %v1421_v46, %v1344_v20 }
 0x24e   :  { %v1210_v58 = vrot.slane %v1209_v52, 2  ;;  %v1361_v31 = vadd.f32 %v1360_v8, %v1359_v48  ;;  %v1252_v33 = vrot.slane %v1251_v36, 2  ;;  %v1230_v24 = vadd.f32 %v1229_v18, %v1228_v49 }
 0x24f   :  { %v1403_v34 = vadd.f32 %v1402_v35, %v1401_v11  ;;  %v1381_v26 = vrot.slane %v1380_v45, 4  ;;  %v1272_v9 = vadd.f32 %v1271_v6, %v1270_v12  ;;  %v1423_v21 = vrot.slane %v1422_v14, 4 }
 0x250   :  { %v1211_v32 = vadd.f32 %v1210_v58, %v1209_v52  ;;  %v1362_v2 = vrot.slane %v1361_v31, 2  ;;  %v1253_v47 = vadd.f32 %v1252_v33, %v1251_v36  ;;  %v1231_v43 = vrot.slane %v1230_v24, 2 }
 0x251   :  { %v1404_v56 = vrot.slane %v1403_v34, 2  ;;  %v1382_v1 = vadd.f32 %v1381_v26, %v1380_v45  ;;  %v1273_v23 = vrot.slane %v1272_v9, 2  ;;  %v1424_v10 = vadd.f32 %v1423_v21, %v1422_v14 }
 0x252   :  { %v1212_v55 = vrot.slane %v1211_v32, 1  ;;  %v1363_v60 = vadd.f32 %v1362_v2, %v1361_v31  ;;  %v1254_v13 = vrot.slane %v1253_v47, 1  ;;  %v1232_v46 = vadd.f32 %v1231_v43, %v1230_v24 }
 0x253   :  { %v1405_v20 = vadd.f32 %v1404_v56, %v1403_v34  ;;  %v1383_v48 = vrot.slane %v1382_v1, 2  ;;  %v1274_v8 = vadd.f32 %v1273_v23, %v1272_v9  ;;  %v1425_v18 = vrot.slane %v1424_v10, 2 }
 0x254   :  { %v1213_v11 = vadd.f32 %v1212_v55, %v1211_v32  ;;  %v1364_v35 = vrot.slane %v1363_v60, 1  ;;  %v1255_v6 = vadd.f32 %v1254_v13, %v1253_v47  ;;  %v1233_v49 = vrot.slane %v1232_v46, 1 }
 0x255   :  { %v1406_v12 = vrot.slane %v1405_v20, 1  ;;  %v1384_v52 = vadd.f32 %v1383_v48, %v1382_v1  ;;  %v1275_v36 = vrot.slane %v1274_v8, 1  ;;  %v1426_v58 = vadd.f32 %v1425_v18, %v1424_v10 }
 0x256   :  { %v13839_v33 = vmul.f32 0.0078125, %v1213_v11  ;;  %v1365_v26 = vadd.f32 %v1364_v35, %v1363_v60  ;;  %v13841_v21 = vmul.f32 0.0078125, %v1255_v6  ;;  %v1234_v2 = vadd.f32 %v1233_v49, %v1232_v46  ;;  %v13858_v49 = vld [vmem:[%s19940_s3 + $0x188] sm:$0xff] }
 0x257   :  { %v1407_v45 = vadd.f32 %v1406_v12, %v1405_v20  ;;  %v1385_v43 = vrot.slane %v1384_v52, 1  ;;  %v1276_v31 = vadd.f32 %v1275_v36, %v1274_v8  ;;  %v1427_v14 = vrot.slane %v1426_v58, 1  ;;  %v13863_v12 = vld [vmem:[%s19940_s3 + $0x1a8] sm:$0xff] }
 0x258   :  { %v1429_v9 = vmul.f32 0.0078125, %v1365_v26  ;;  %v1433_v55 = vmul.f32 %v13839_v33, %v13839_v33  ;;  %v1435_v47 = vmul.f32 %v13841_v21, %v13841_v21  ;;  %v13847_v24 = vmul.f32 0.0078125, %v1234_v2  ;;  %v13873_v36 = vld [vmem:[%s19940_s3 + $0x5a8] sm:$0xff] }
 0x259   :  { %v1431_v34 = vmul.f32 0.0078125, %v1407_v45  ;;  %v1386_v32 = vadd.f32 %v1385_v43, %v1384_v52  ;;  %v13849_v56 = vmul.f32 0.0078125, %v1276_v31  ;;  %v1428_v1 = vadd.f32 %v1427_v14, %v1426_v58  ;;  %v13868_v52 = vld [vmem:[%s19940_s3 + $0x588] sm:$0xff] }
 0x25a   :  { %v1437_v23 = vsub.f32 %v1429_v9, %v1433_v55  ;;  %v1434_v10 = vmul.f32 %v13847_v24, %v13847_v24  ;;  %v13878_v58 = vld [vmem:[%s19940_s3 + $0x148] sm:$0xff] }
 0x25b   :  { %v1439_v60 = vsub.f32 %v1431_v34, %v1435_v47  ;;  %v1430_v13 = vmul.f32 0.0078125, %v1386_v32  ;;  %v1432_v46 = vmul.f32 0.0078125, %v1428_v1  ;;  %v1436_v20 = vmul.f32 %v13849_v56, %v13849_v56  ;;  %20431 = vst [vmem:[#allocation47_spill] sm:$0xff] %v13878_v58  ;;  %v13883_v26 = vld [vmem:[%s19940_s3 + $0x168] sm:$0xff] }
 0x25c   :  { %v1441_v48 = vadd.f32 0.8, %v1437_v23  ;;  %20432 = vst [vmem:[#allocation48_spill] sm:$0xff] %v13883_v26  ;;  %v13888_v2 = vld [vmem:[%s19940_s3 + $0x548] sm:$0xff]  ;;  %v13936_v1 = vsub.s32 2, %v13087_v15  ;;  %v13939_v23 = vsub.s32 3, %v13087_v15 }
 0x25d   :  { %v1443_v8 = vadd.f32 0.8, %v1439_v60  ;;  %v1438_v18 = vsub.f32 %v1430_v13, %v1434_v10  ;;  %v1440_v11 = vsub.f32 %v1432_v46, %v1436_v20  ;;  %20433 = vst [vmem:[#allocation49_spill] sm:$0xff] %v13888_v2  ;;  %v13893_v45 = vld [vmem:[%s19940_s3 + $0x568] sm:$0xff] }
 0x25e   :  { %12380 = vrsqrt.f32 %v1441_v48  ;;  %20434 = vst [vmem:[#allocation50_spill] sm:$0xff] %v13893_v45  ;;  %v13898_v43 = vld [vmem:[%s19940_s3 + $0x108] sm:$0xff]  ;;  %20443 = vst [vmem:[#allocation59_spill] sm:$0xff] %v13936_v1 }
 0x25f   :  { %v1442_v35 = vadd.f32 0.8, %v1438_v18  ;;  %v1444_v6 = vadd.f32 0.8, %v1440_v11  ;;  %12382 = vrsqrt.f32 %v1443_v8  ;;  %20435 = vst [vmem:[#allocation51_spill] sm:$0xff] %v13898_v43  ;;  %v13903_v31 = vld [vmem:[%s19940_s3 + $0x128] sm:$0xff] }
 0x260   :  { %20436 = vst [vmem:[#allocation52_spill] sm:$0xff] %v13903_v31  ;;  %v13908_v14 = vld [vmem:[%s19940_s3 + $0x508] sm:$0xff]  ;;  %20444 = vst [vmem:[#allocation60_spill] sm:$0xff] %v13939_v23 }
 0x261   :  { %12384 = vrsqrt.f32 %v1442_v35  ;;  %20437 = vst [vmem:[#allocation53_spill] sm:$0xff] %v13908_v14  ;;  %v13913_v9 = vld [vmem:[%s19940_s3 + $0x528] sm:$0xff] }
 0x262   :  { %12386 = vrsqrt.f32 %v1444_v6  ;;  %20438 = vst [vmem:[#allocation54_spill] sm:$0xff] %v13913_v9  ;;  %v13918_v55 = vld [vmem:[%s19940_s3 + $0xc8] sm:$0xff] }
 0x263   :  { %20439 = vst [vmem:[#allocation55_spill] sm:$0xff] %v13918_v55  ;;  %v13923_v47 = vld [vmem:[%s19940_s3 + $0xe8] sm:$0xff] }
 0x264   :  { %20440 = vst [vmem:[#allocation56_spill] sm:$0xff] %v13923_v47  ;;  %v13928_v34 = vld [vmem:[%s19940_s3 + $0x4c8] sm:$0xff] }
 0x265   :  { %20441 = vst [vmem:[#allocation57_spill] sm:$0xff] %v13928_v34  ;;  %v13933_v32 = vld [vmem:[%s19940_s3 + $0x4e8] sm:$0xff] }
 0x266   :  { %20442 = vst [vmem:[#allocation58_spill] sm:$0xff] %v13933_v32  ;;  %v13944_v10 = vld [vmem:[%s19940_s3 + $0x88] sm:$0xff] }
 0x267   :  { %20445 = vst [vmem:[#allocation61_spill] sm:$0xff] %v13944_v10  ;;  %v13949_v60 = vld [vmem:[%s19940_s3 + $0xa8] sm:$0xff] }
 0x268   :  { %20446 = vst [vmem:[#allocation62_spill] sm:$0xff] %v13949_v60  ;;  %v13954_v13 = vld [vmem:[%s19940_s3 + $0x488] sm:$0xff] }
 0x269   :  { %20447 = vst [vmem:[#allocation63_spill] sm:$0xff] %v13954_v13  ;;  %v13967_v18 = vld [vmem:[%s19940_s3 + $0x4a8] sm:$0xff] }
 0x26a   :  { %20448 = vst [vmem:[#allocation64_spill] sm:$0xff] %v13967_v18  ;;  %v13972_v11 = vld [vmem:[%s19940_s3 + $0x48] sm:$0xff]  ;;  %v26_v18 = vld [vmem:[%s19939_s5 + $0x4] sm:$0xf] }
 0x26b   :  { %20449 = vst [vmem:[#allocation65_spill] sm:$0xff] %v13972_v11  ;;  %v13977_v35 = vld [vmem:[%s19940_s3 + $0x68] sm:$0xff]  ;;  %v12381_v48 = vpop.eup %12380 }
 0x26c   :  { %20450 = vst [vmem:[#allocation66_spill] sm:$0xff] %v13977_v35  ;;  %v13990_v20 = vld [vmem:[%s19940_s3 + $0x448] sm:$0xff]  ;;  %v12383_v8 = vpop.eup %12382 }
 0x26d   :  { %v13995_v15 = vld [vmem:[%s19940_s3 + $0x468] sm:$0xff] }
 0x26e   :  { %20451 = vst [vmem:[#allocation67_spill] sm:$0xff] %v13995_v15  ;;  %v14000_v6 = vld [vmem:[%s19940_s3 + $0x8] sm:$0xff]  ;;  %v12385_v2 = vpop.eup %12384 }
 0x26f   :  { %20452 = vst [vmem:[#allocation68_spill] sm:$0xff] %v14000_v6  ;;  %v14013_v26 = vld [vmem:[%s19940_s3 + $0x28] sm:$0xff]  ;;  %v12387_v14 = vpop.eup %12386  ;;  %v1453_v32 = vcombine.low %v12381_v48, %v12385_v2 }
 0x270   :  { %20453 = vst [vmem:[#allocation69_spill] sm:$0xff] %v14013_v26  ;;  %v14018_v58 = vld [vmem:[%s19940_s3 + $0x408] sm:$0xff]  ;;  %v1454_v48 = vcombine.low %v12383_v8, %v12387_v14 }
 0x271   :  { %20454 = vst [vmem:[#allocation70_spill] sm:$0xff] %v14018_v58  ;;  %v14023_v46 = vld [vmem:[%s19940_s3 + $0x428] sm:$0xff]  ;;  %v1461_v8 = vrot.slane %v1453_v32, %v13090_v19 }
 0x272   :  { %20455 = vst [vmem:[#allocation71_spill] sm:$0xff] %v14023_v46  ;;  %v14036_v31 = vld [vmem:[%s19940_s3 + $0x3c8] sm:$0xff]  ;;  %v1468_v13 = vrot.slane %v1454_v48, %v13090_v19 }
 0x273   :  { %20456 = vst [vmem:[#allocation72_spill] sm:$0xff] %v14036_v31  ;;  %v14041_v43 = vld [vmem:[%s19940_s3 + $0x3e8] sm:$0xff] }
 0x274   :  { %20457 = vst [vmem:[#allocation73_spill] sm:$0xff] %v14041_v43  ;;  %v14046_v45 = vld [vmem:[%s19940_s3 + $0x7c8] sm:$0xff]  ;;  %v1469_v34 = vcombine.low %v1461_v8, %v1468_v13 }
 0x275   :  { %20458 = vst [vmem:[#allocation74_spill] sm:$0xff] %v14046_v45  ;;  %v14059_v47 = vld [vmem:[%s19940_s3 + $0x7e8] sm:$0xff] }
 0x276   :  { %20459 = vst [vmem:[#allocation75_spill] sm:$0xff] %v14059_v47  ;;  %v14064_v55 = vld [vmem:[%s19940_s3 + $0x388] sm:$0xff]  ;;  %v1476_v47 = vrot.slane %v1469_v34, %v13090_v19 }
 0x277   :  { %20460 = vst [vmem:[#allocation76_spill] sm:$0xff] %v14064_v55  ;;  %v14069_v9 = vld [vmem:[%s19940_s3 + $0x3a8] sm:$0xff] }
 0x278   :  { %20461 = vst [vmem:[#allocation77_spill] sm:$0xff] %v14069_v9  ;;  %v14080_v60 = vld [vmem:[%s19940_s3 + $0x788] sm:$0xff] }
 0x279   :  { %20462 = vst [vmem:[#allocation78_spill] sm:$0xff] %v14080_v60  ;;  %v14085_v10 = vld [vmem:[%s19940_s3 + $0x7a8] sm:$0xff] }
 0x27a   :  { %20463 = vst [vmem:[#allocation79_spill] sm:$0xff] %v14085_v10  ;;  %v14090_v2 = vld [vmem:[%s19940_s3 + $0x348] sm:$0xff] }
 0x27b   :  { %20464 = vst [vmem:[#allocation80_spill] sm:$0xff] %v14090_v2  ;;  %v14101_v35 = vld [vmem:[%s19940_s3 + $0x368] sm:$0xff] }
 0x27c   :  { %20465 = vst [vmem:[#allocation81_spill] sm:$0xff] %v14101_v35  ;;  %v14106_v11 = vld [vmem:[%s19940_s3 + $0x748] sm:$0xff] }
 0x27d   :  { %20466 = vst [vmem:[#allocation82_spill] sm:$0xff] %v14106_v11  ;;  %v14111_v14 = vld [vmem:[%s19940_s3 + $0x768] sm:$0xff]  ;;  %v20513_v11 = vld [vmem:[#allocation30_spill] sm:$0xff] }
 0x27e   :  { %20467 = vst [vmem:[#allocation83_spill] sm:$0xff] %v14111_v14  ;;  %v14123_v26 = vld [vmem:[%s19940_s3 + $0x308] sm:$0xff] }
 0x27f   :  { %20468 = vst [vmem:[#allocation84_spill] sm:$0xff] %v14123_v26  ;;  %v14128_v6 = vld [vmem:[%s19940_s3 + $0x328] sm:$0xff] }
 0x280   :  { %20469 = vst [vmem:[#allocation85_spill] sm:$0xff] %v14128_v6  ;;  %v14133_v32 = vld [vmem:[%s19940_s3 + $0x708] sm:$0xff] }
 0x281   :  { %20470 = vst [vmem:[#allocation86_spill] sm:$0xff] %v14133_v32  ;;  %v14145_v58 = vld [vmem:[%s19940_s3 + $0x728] sm:$0xff] }
 0x282   :  { %20471 = vst [vmem:[#allocation87_spill] sm:$0xff] %v14145_v58  ;;  %v14150_v15 = vld [vmem:[%s19940_s3 + $0x2c8] sm:$0xff]  ;;  %v1478_v58 = vmul.f32 %v1476_v47, %v26_v18  ;;  %v14281_v47 = vld [vmem:[%s19940_s3 + $0x1f0] sm:$0xff] }
 0x283   :  { %20472 = vst [vmem:[#allocation88_spill] sm:$0xff] %v14150_v15  ;;  %v14155_v48 = vld [vmem:[%s19940_s3 + $0x2e8] sm:$0xff]  ;;  %20489 = vst [vmem:[#allocation105_spill] sm:$0xff] %v14281_v47 }
 0x284   :  { %20473 = vst [vmem:[#allocation89_spill] sm:$0xff] %v14155_v48  ;;  %v14171_v43 = vld [vmem:[%s19940_s3 + $0x6c8] sm:$0xff]  ;;  %v14276_v48 = vld [vmem:[%s19940_s3 + $0x1d0] sm:$0xff]  ;;  %v14302_v18 = vrot.slane %v1478_v58, %v13098_v27  ;;  %v14305_v6 = vrot.slane %v1478_v58, %v13101_v28  ;;  %v14308_v32 = vrot.slane %v1478_v58, %v13936_v1  ;;  %v14311_v8 = vrot.slane %v1478_v58, %v13939_v23 }
 0x285   :  { %20474 = vst [vmem:[#allocation90_spill] sm:$0xff] %v14171_v43  ;;  %v14176_v31 = vld [vmem:[%s19940_s3 + $0x6e8] sm:$0xff]  ;;  %20488 = vst [vmem:[#allocation104_spill] sm:$0xff] %v14276_v48  ;;  %v20503_v48 = vld [vmem:[#allocation22_spill] sm:$0xff] }
 0x286   :  { %20475 = vst [vmem:[#allocation91_spill] sm:$0xff] %v14176_v31  ;;  %v14181_v46 = vld [vmem:[%s19940_s3 + $0x288] sm:$0xff]  ;;  %20492 = vst [vmem:[#allocation108_spill] sm:$0xff] %v14302_v18  ;;  %v1566_v58 = vmul.f32 %v14308_v32, %v13841_v21  ;;  %v1507_v21 = vmul.f32 %v14311_v8, %v13367_v16  ;;  %v14371_v16 = vmul.f32 %v14302_v18, %v13375_v22  ;;  %v20509_v31 = vld [vmem:[#allocation21_spill] sm:$0xff] }
 0x287   :  { %20476 = vst [vmem:[#allocation92_spill] sm:$0xff] %v14181_v46  ;;  %v14192_v60 = vld [vmem:[%s19940_s3 + $0x2a8] sm:$0xff]  ;;  %20493 = vst [vmem:[#allocation109_spill] sm:$0xff] %v14305_v6  ;;  %v1565_v46 = vmul.f32 %v14305_v6, %v13847_v24  ;;  %v1503_v24 = vmul.f32 %v14311_v8, %v13329_v57  ;;  %v14354_v57 = vmul.f32 %v14305_v6, %v13385_v54  ;;  %v20511_v43 = vld [vmem:[#allocation26_spill] sm:$0xff] }
 0x288   :  { %20477 = vst [vmem:[#allocation93_spill] sm:$0xff] %v14192_v60  ;;  %v14197_v9 = vld [vmem:[%s19940_s3 + $0x688] sm:$0xff]  ;;  %20494 = vst [vmem:[#allocation110_spill] sm:$0xff] %v14308_v32  ;;  %v1564_v60 = vmul.f32 %v14302_v18, %v13839_v33  ;;  %v1505_v33 = vmul.f32 %v14305_v6, %v13365_v38  ;;  %v14349_v38 = vmul.f32 %v14308_v32, %v13351_v5 }
 0x289   :  { %20478 = vst [vmem:[#allocation94_spill] sm:$0xff] %v14197_v9  ;;  %v14202_v13 = vld [vmem:[%s19940_s3 + $0x6a8] sm:$0xff]  ;;  %v14299_v9 = vld [vmem:[%s19940_s3 + $0x5f0] sm:$0xff]  ;;  %20495 = vst [vmem:[#allocation111_spill] sm:$0xff] %v14311_v8  ;;  %v14367_v5 = vmul.f32 %v14311_v8, %v13427_v4  ;;  %v14375_v54 = vmul.f32 %v14302_v18, %v13399_v59  ;;  %v14391_v22 = vmul.f32 %v14305_v6, %v13524_v39 }
 0x28a   :  { %20479 = vst [vmem:[#allocation95_spill] sm:$0xff] %v14202_v13  ;;  %v14215_v35 = vld [vmem:[%s19940_s3 + $0x248] sm:$0xff]  ;;  %v14294_v13 = vld [vmem:[%s19940_s3 + $0x5d0] sm:$0xff]  ;;  %20491 = vst [vmem:[#allocation107_spill] sm:$0xff] %v14299_v9  ;;  %v1572_v47 = vcombine.low %v1564_v60, %v1565_v46  ;;  %v14410_v39 = vmul.f32 %v14302_v18, %v13499_v61  ;;  %v14431_v61 = vmul.f32 %v14311_v8, %v13576_v51 }
 0x28b   :  { %20480 = vst [vmem:[#allocation96_spill] sm:$0xff] %v14215_v35  ;;  %v14220_v2 = vld [vmem:[%s19940_s3 + $0x268] sm:$0xff]  ;;  %20490 = vst [vmem:[#allocation106_spill] sm:$0xff] %v14294_v13  ;;  %v1501_v35 = vmul.f32 %v14305_v6, %v13327_v25  ;;  %v1502_v25 = vmul.f32 %v14308_v32, %v13322_v62  ;;  %v20496_v46 = vld [vmem:[#allocation8_spill] sm:$0xff] }
 0x28c   :  { %20481 = vst [vmem:[#allocation97_spill] sm:$0xff] %v14220_v2  ;;  %v14225_v10 = vld [vmem:[%s19940_s3 + $0x648] sm:$0xff]  ;;  %v1567_v2 = vmul.f32 %v14311_v8, %v13849_v56  ;;  %v1504_v56 = vmul.f32 %v14302_v18, %v13349_v42  ;;  %v1580_v60 = vrot.slane %v1572_v47, %v13090_v19  ;;  %v14362_v42 = vmul.f32 %v14311_v8, %v13387_v41  ;;  %v20497_v47 = vld [vmem:[#allocation9_spill] sm:$0xff] }
 0x28d   :  { %20482 = vst [vmem:[#allocation98_spill] sm:$0xff] %v14225_v10  ;;  %v14237_v26 = vld [vmem:[%s19940_s3 + $0x668] sm:$0xff]  ;;  %v1563_v10 = vmul.f32 %v14311_v8, %v13831_v17  ;;  %v14383_v41 = vmul.f32 %v14308_v32, %v13401_v3  ;;  %v14387_v4 = vmul.f32 %v14305_v6, %v20496_v46  ;;  %v14395_v59 = vmul.f32 %v14311_v8, %v20497_v47 }
 0x28e   :  { %20483 = vst [vmem:[#allocation99_spill] sm:$0xff] %v14237_v26  ;;  %v14242_v14 = vld [vmem:[%s19940_s3 + $0x208] sm:$0xff]  ;;  %v1500_v26 = vmul.f32 %v14302_v18, %v13320_v30  ;;  %v1573_v17 = vcombine.low %v1566_v58, %v1567_v2  ;;  %v14358_v30 = vmul.f32 %v14305_v6, %v13425_v7  ;;  %v14379_v7 = vmul.f32 %v14308_v32, %v13377_v37  ;;  %v20498_v58 = vld [vmem:[#allocation6_spill] sm:$0xff] }
 0x28f   :  { %20484 = vst [vmem:[#allocation100_spill] sm:$0xff] %v14242_v14  ;;  %v14247_v34 = vld [vmem:[%s19940_s3 + $0x228] sm:$0xff]  ;;  %v14399_v37 = vmul.f32 %v14311_v8, %v13526_v29  ;;  %v14403_v3 = vmul.f32 %v14302_v18, %v20498_v58  ;;  %v14418_v29 = vmul.f32 %v14308_v32, %v13501_v63  ;;  %v14422_v46 = vmul.f32 %v14305_v6, %v13574_v53  ;;  %v20500_v53 = vld [vmem:[#allocation13_spill] sm:$0xff] }
 0x290   :  { %20485 = vst [vmem:[#allocation101_spill] sm:$0xff] %v14247_v34  ;;  %v14260_v15 = vld [vmem:[%s19940_s3 + $0x608] sm:$0xff]  ;;  %v1587_v62 = vrot.slane %v1573_v17, %v13090_v19  ;;  %v14427_v58 = vmul.f32 %v14305_v6, %v13629_v0  ;;  %v14439_v63 = vmul.f32 %v14302_v18, %v13551_v40  ;;  %v14443_v9 = vmul.f32 %v14302_v18, %v20500_v53  ;;  %v20506_v34 = vld [vmem:[#allocation17_spill] sm:$0xff] }
 0x291   :  { %20486 = vst [vmem:[#allocation102_spill] sm:$0xff] %v14260_v15  ;;  %v14271_v45 = vld [vmem:[%s19940_s3 + $0x628] sm:$0xff]  ;;  %v14459_v40 = vmul.f32 %v14305_v6, %v20503_v48 }
 0x292   :  { %20487 = vst [vmem:[#allocation103_spill] sm:$0xff] %v14271_v45  ;;  %v1588_v2 = vcombine.low %v1580_v60, %v1587_v62  ;;  %v27_v17 = vld [vmem:[%s19939_s5 + $0x8] sm:$0xf] }
 0x293   :  { %v20499_v60 = vld [vmem:[#allocation7_spill] sm:$0xff] }
 0x294   :  { %v14414_v62 = vmul.f32 %v14308_v32, %v20499_v60  ;;  %v1595_v47 = vrot.slane %v1588_v2, %v13090_v19  ;;  %v14435_v60 = vmul.f32 %v14311_v8, %v13631_v44  ;;  %v20501_v2 = vld [vmem:[#allocation10_spill] sm:$0xff]  ;;  %v14455_v44 = vmul.f32 %v14305_v6, %v13662_v50  ;;  %v20504_v45 = vld [vmem:[#allocation19_spill] sm:$0xff] }
 0x295   :  { %v14447_v0 = vmul.f32 %v14308_v32, %v20501_v2  ;;  %v20502_v19 = vld [vmem:[#allocation14_spill] sm:$0xff]  ;;  %v14463_v53 = vmul.f32 %v14311_v8, %v20504_v45  ;;  %v20505_v15 = vld [vmem:[#allocation23_spill] sm:$0xff] }
 0x296   :  { %v14451_v51 = vmul.f32 %v14308_v32, %v20502_v19  ;;  %v1597_v13 = vsub.f32 %v27_v17, %v1595_v47  ;;  %v14467_v2 = vmul.f32 %v14311_v8, %v20505_v15  ;;  %v14471_v19 = vmul.f32 %v14302_v18, %v20506_v34  ;;  %v20507_v17 = vld [vmem:[#allocation20_spill] sm:$0xff]  ;;  %v20508_v47 = vld [vmem:[#allocation18_spill] sm:$0xff] }
 0x297   :  { %v14475_v50 = vmul.f32 %v14302_v18, %v20507_v17  ;;  %v14479_v48 = vmul.f32 %v14308_v32, %v20508_v47  ;;  %v14495_v17 = vmul.f32 %v14308_v32, %v20509_v31  ;;  %v14499_v47 = vmul.f32 %v14305_v6, %v20511_v43  ;;  %v20517_v31 = vld [vmem:[#allocation31_spill] sm:$0xff] }
 0x298   :  { %v14482_v14 = vrot.slane %v1597_v13, %v13098_v27  ;;  %v14485_v45 = vrot.slane %v1597_v13, %v13101_v28  ;;  %v14488_v15 = vrot.slane %v1597_v13, %v13936_v1  ;;  %v14491_v34 = vrot.slane %v1597_v13, %v13939_v23  ;;  %v20515_v28 = vld [vmem:[#allocation27_spill] sm:$0xff] }
 0x299   :  { %20510 = vst [vmem:[#allocation8_spill] sm:$0xff] %v14495_v17  ;;  %20512 = vst [vmem:[#allocation9_spill] sm:$0xff] %v14499_v47  ;;  %v14503_v27 = vmul.f32 %v14305_v6, %v20513_v11  ;;  %v14507_v18 = vmul.f32 %v14311_v8, %v20515_v28  ;;  %v14514_v32 = vmul.f32 %v14311_v8, %v20517_v31 }
 0x29a   :  { %v1620_v1 = vadd.f32 %v14485_v45, %v1501_v35  ;;  %v1624_v13 = vadd.f32 %v14485_v45, %v1505_v33  ;;  %v1622_v23 = vadd.f32 %v14491_v34, %v1503_v24  ;;  %v14517_v43 = vadd.f32 %v14491_v34, %v1563_v10 }
 0x29b   :  { %20514 = vst [vmem:[#allocation6_spill] sm:$0xff] %v14503_v27  ;;  %20516 = vst [vmem:[#allocation7_spill] sm:$0xff] %v14507_v18  ;;  %v1626_v11 = vadd.f32 %v14491_v34, %v1507_v21  ;;  %v1619_v6 = vadd.f32 %v14482_v14, %v1500_v26  ;;  %v1623_v28 = vadd.f32 %v14482_v14, %v1504_v56 }
 0x29c   :  { %20518 = vst [vmem:[#allocation13_spill] sm:$0xff] %v14514_v32  ;;  %20519 = vst [vmem:[#allocation10_spill] sm:$0xff] %v14517_v43  ;;  %vm1684_vm1 = vcmp.gt.f32.partialorder %v1620_v1, 0.0  ;;  %vm1688_vm2 = vcmp.gt.f32.partialorder %v1624_v13, 0.0  ;;  %v1748_v35 = vmul.f32 0.2, %v1620_v1  ;;  %v1621_v33 = vadd.f32 %v14488_v15, %v1502_v25 }
 0x29d   :  { %v1752_v18 = vmul.f32 0.2, %v1624_v13  ;;  %vm1686_vm3 = vcmp.gt.f32.partialorder %v1622_v23, 0.0  ;;  %vm1690_vm4 = vcmp.gt.f32.partialorder %v1626_v11, 0.0  ;;  %v1750_v24 = vmul.f32 0.2, %v1622_v23 }
 0x29e   :  { %v1812_v31 = vsel %vm1684_vm1, %v1620_v1, %v1748_v35  ;;  %v1754_v8 = vmul.f32 0.2, %v1626_v11  ;;  %vm1683_vm5 = vcmp.gt.f32.partialorder %v1619_v6, 0.0  ;;  %vm1687_vm6 = vcmp.gt.f32.partialorder %v1623_v28, 0.0 }
 0x29f   :  { %v1816_v10 = vsel %vm1688_vm2, %v1624_v13, %v1752_v18  ;;  %v1814_v43 = vsel %vm1686_vm3, %v1622_v23, %v1750_v24  ;;  %v1747_v21 = vmul.f32 0.2, %v1619_v6  ;;  %v1751_v32 = vmul.f32 0.2, %v1623_v28  ;;  %v20524_v24 = vld [vmem:[#allocation15_spill] sm:$0xff] }
 0x2a0   :  { %v14523_v26 = vpack.c.bf16 %v1816_v10, %v1812_v31  ;;  %v1818_v56 = vsel %vm1690_vm4, %v1626_v11, %v1754_v8  ;;  %v1625_v27 = vadd.f32 %v14488_v15, %v14349_v38  ;;  %vm1685_vm7 = vcmp.gt.f32.partialorder %v1621_v33, 0.0  ;;  %v20525_v31 = vld [vmem:[#allocation16_spill] sm:$0xff] }
 0x2a1   :  { %v14527_v25 = vpack.c.bf16 %v1818_v56, %v1814_v43  ;;  %v1811_v47 = vsel %vm1683_vm5, %v1619_v6, %v1747_v21  ;;  %v1815_v55 = vsel %vm1687_vm6, %v1623_v28, %v1751_v32  ;;  %v1749_v17 = vmul.f32 0.2, %v1621_v33  ;;  %v20521_v43 = vld [vmem:[#allocation12_spill] sm:$0xff] }
 0x2a2   :  { %3475 = vmatprep.mubr.bf16.mxu1 %v14523_v26  ;;  %v14530_v1 = vpack.c.bf16 %v1815_v55, %v1811_v47  ;;  %vm1689_vm8 = vcmp.gt.f32.partialorder %v1625_v27, 0.0  ;;  %v1753_v23 = vmul.f32 0.2, %v1625_v27  ;;  %v1628_v18 = vadd.f32 %v14485_v45, %v14354_v57 }
 0x2a3   :  { %3588 = vmatprep.mubr.bf16.mxu0 %v14527_v25  ;;  %v1813_v8 = vsel %vm1685_vm7, %v1621_v33, %v1749_v17  ;;  %v1632_v38 = vadd.f32 %v14485_v45, %v14358_v30  ;;  %v1630_v6 = vadd.f32 %v14491_v34, %v14362_v42  ;;  %v1634_v32 = vadd.f32 %v14491_v34, %v14367_v5  ;;  %v20520_v17 = vld [vmem:[#allocation11_spill] sm:$0xff] }
 0x2a4   :  { %3476 = vmatmul.mubr.bf16.vlgmr.msra.gmra.mxu1 %v14530_v1  ;;  %v1817_v55 = vsel %vm1689_vm8, %v1625_v27, %v1753_v23  ;;  %vm1692_vm9 = vcmp.gt.f32.partialorder %v1628_v18, 0.0  ;;  %v1756_v47 = vmul.f32 0.2, %v1628_v18  ;;  %v1627_v57 = vadd.f32 %v14482_v14, %v14371_v16 }
 0x2a5   :  { %v14544_v13 = vpack.c.bf16 %v1817_v55, %v1813_v8  ;;  %v20522_v11 = vcombine.low %v20520_v17, %v20521_v43  ;;  %vm1696_vm10 = vcmp.gt.f32.partialorder %v1632_v38, 0.0  ;;  %v1760_v30 = vmul.f32 0.2, %v1632_v38 }
 0x2a6   :  { %vm1694_vm11 = vcmp.gt.f32.partialorder %v1630_v6, 0.0  ;;  %v1820_v42 = vsel %vm1692_vm9, %v1628_v18, %v1756_v47  ;;  %vm1698_vm12 = vcmp.gt.f32.partialorder %v1634_v32, 0.0  ;;  %v1758_v5 = vmul.f32 0.2, %v1630_v6 }
 0x2a7   :  { %3670 = vmatpush1.bf16.msra.mxu1 %v20522_v11  ;;  %v1762_v28 = vmul.f32 0.2, %v1634_v32  ;;  %v20523_v27 = vcombine.high %v13858_v49, %v13863_v12  ;;  %3589 = vmatmul.mubr.bf16.vlgmr.msra.gmra.mxu0 %v14544_v13  ;;  %v1824_v16 = vsel %vm1696_vm10, %v1632_v38, %v1760_v30  ;;  %v1631_v35 = vadd.f32 %v14482_v14, %v14375_v54 }
 0x2a8   :  { %vm1691_vm13 = vcmp.gt.f32.partialorder %v1627_v57, 0.0  ;;  %v1755_v33 = vmul.f32 0.2, %v1627_v57  ;;  %v20526_v10 = vcombine.low %v20524_v24, %v20525_v31  ;;  %v14558_v21 = vpack.c.bf16 %v1824_v16, %v1820_v42 }
 0x2a9   :  { %3671 = vmatprep.subr.bf16.mxu1 %v20523_v27  ;;  %v1822_v56 = vsel %vm1694_vm11, %v1630_v6, %v1758_v5  ;;  %v1826_v23 = vsel %vm1698_vm12, %v1634_v32, %v1762_v28  ;;  %v1629_v18 = vadd.f32 %v14488_v15, %v14379_v7  ;;  %v20527_v38 = vcombine.high %v13868_v52, %v13873_v36  ;;  %v20529_v6 = vld [vmem:[#allocation47_spill] sm:$0xff]  ;;  %v20530_v32 = vld [vmem:[#allocation48_spill] sm:$0xff]  ;;  %v20533_v28 = vld [vmem:[#allocation49_spill] sm:$0xff] }
 0x2aa   :  { %3783 = vmatpush1.bf16.msra.mxu0 %v20526_v10  ;;  %v14562_v8 = vpack.c.bf16 %v1826_v23, %v1822_v56  ;;  %v20528_v54 = vcombine.low %v13858_v49, %v13863_v12  ;;  %vm1695_vm14 = vcmp.gt.f32.partialorder %v1631_v35, 0.0  ;;  %v1759_v55 = vmul.f32 0.2, %v1631_v35  ;;  %3485 = vmatprep.mubr.bf16.mxu1 %v14558_v21  ;;  %v20534_v27 = vld [vmem:[#allocation50_spill] sm:$0xff] }
 0x2ab   :  { %3784 = vmatprep.subr.bf16.mxu0 %v20527_v38  ;;  %v1819_v47 = vsel %vm1691_vm13, %v1627_v57, %v1755_v33  ;;  %v20531_v17 = vcombine.high %v20529_v6, %v20530_v32  ;;  %v1633_v7 = vadd.f32 %v14488_v15, %v14383_v41  ;;  %vm1693_vm15 = vcmp.gt.f32.partialorder %v1629_v18, 0.0  ;;  %v20538_v33 = vld [vmem:[#allocation52_spill] sm:$0xff] }
 0x2ac   :  { %3672 = vmatpush1.bf16.msra.mxu1 %v20528_v54  ;;  %v1757_v43 = vmul.f32 0.2, %v1629_v18  ;;  %v1636_v11 = vadd.f32 %v14485_v45, %v14387_v4  ;;  %3598 = vmatprep.mubr.bf16.mxu0 %v14562_v8  ;;  %v1823_v49 = vsel %vm1695_vm14, %v1631_v35, %v1759_v55  ;;  %v1640_v12 = vadd.f32 %v14485_v45, %v14391_v22  ;;  %v20537_v35 = vld [vmem:[#allocation51_spill] sm:$0xff] }
 0x2ad   :  { %3673 = vmatprep.subr.bf16.mxu1 %v20531_v17  ;;  %v1638_v57 = vadd.f32 %v14491_v34, %v14395_v59  ;;  %v1642_v30 = vadd.f32 %v14491_v34, %v14399_v37  ;;  %v20532_v41 = vcombine.low %v13868_v52, %v13873_v36  ;;  %v14588_v42 = vpack.c.bf16 %v1823_v49, %v1819_v47  ;;  %v20542_v17 = vld [vmem:[#allocation54_spill] sm:$0xff] }
 0x2ae   :  { %vm1697_vm0 = vcmp.gt.f32.partialorder %v1633_v7, 0.0  ;;  %v1761_v4 = vmul.f32 0.2, %v1633_v7  ;;  %v1821_v5 = vsel %vm1693_vm15, %v1629_v18, %v1757_v43  ;;  %v20535_v16 = vcombine.high %v20533_v28, %v20534_v27 }
 0x2af   :  { %3785 = vmatpush1.bf16.msra.mxu0 %v20532_v41  ;;  %v20536_v22 = vcombine.low %v20529_v6, %v20530_v32  ;;  %vm1700_vm1 = vcmp.gt.f32.partialorder %v1636_v11, 0.0  ;;  %vm1704_vm2 = vcmp.gt.f32.partialorder %v1640_v12, 0.0  ;;  %v1764_v59 = vmul.f32 0.2, %v1636_v11  ;;  %3486 = vmatmul.mubr.bf16.gmra.mxu1 %v14588_v42  ;;  %v20541_v32 = vld [vmem:[#allocation53_spill] sm:$0xff] }
 0x2b0   :  { %3786 = vmatprep.subr.bf16.mxu0 %v20535_v16  ;;  %v1768_v37 = vmul.f32 0.2, %v1640_v12  ;;  %v1825_v52 = vsel %vm1697_vm0, %v1633_v7, %v1761_v4  ;;  %vm1702_vm3 = vcmp.gt.f32.partialorder %v1638_v57, 0.0  ;;  %vm1706_vm4 = vcmp.gt.f32.partialorder %v1642_v30, 0.0  ;;  %v20549_v16 = vld [vmem:[#allocation57_spill] sm:$0xff] }
 0x2b1   :  { %3674 = vmatpush1.bf16.msra.mxu1 %v20536_v22  ;;  %v1766_v36 = vmul.f32 0.2, %v1638_v57  ;;  %v20539_v24 = vcombine.high %v20537_v35, %v20538_v33  ;;  %v14600_v31 = vpack.c.bf16 %v1825_v52, %v1821_v5  ;;  %v1828_v10 = vsel %vm1700_vm1, %v1636_v11, %v1764_v59  ;;  %v20550_v22 = vld [vmem:[#allocation58_spill] sm:$0xff] }
 0x2b2   :  { %v1832_v56 = vsel %vm1704_vm2, %v1640_v12, %v1768_v37  ;;  %v1770_v23 = vmul.f32 0.2, %v1642_v30  ;;  %v20540_v18 = vcombine.low %v20533_v28, %v20534_v27  ;;  %v1635_v55 = vadd.f32 %v14482_v14, %v14403_v3  ;;  %v20545_v12 = vld [vmem:[#allocation55_spill] sm:$0xff] }
 0x2b3   :  { %3675 = vmatprep.subr.bf16.mxu1 %v20539_v24  ;;  %v14605_v38 = vpack.c.bf16 %v1832_v56, %v1828_v10  ;;  %v1830_v54 = vsel %vm1702_vm3, %v1638_v57, %v1766_v36  ;;  %v1639_v47 = vadd.f32 %v14482_v14, %v14410_v39  ;;  %3599 = vmatmul.mubr.bf16.gmra.mxu0 %v14600_v31  ;;  %v20546_v57 = vld [vmem:[#allocation56_spill] sm:$0xff] }
 0x2b4   :  { %3787 = vmatpush1.bf16.msra.mxu0 %v20540_v18  ;;  %v1834_v6 = vsel %vm1706_vm4, %v1642_v30, %v1770_v23  ;;  %v20543_v7 = vcombine.high %v20541_v32, %v20542_v17  ;;  %v1637_v43 = vadd.f32 %v14488_v15, %v14414_v62  ;;  %v1641_v11 = vadd.f32 %v14488_v15, %v14418_v29  ;;  %v20553_v23 = vld [vmem:[#allocation61_spill] sm:$0xff]  ;;  %v20554_v18 = vld [vmem:[#allocation62_spill] sm:$0xff] }
 0x2b5   :  { %3495 = vmatprep.mubr.bf16.mxu1 %v14605_v38  ;;  %v14620_v49 = vpack.c.bf16 %v1834_v6, %v1830_v54  ;;  %v20544_v3 = vcombine.low %v20537_v35, %v20538_v33  ;;  %vm1699_vm5 = vcmp.gt.f32.partialorder %v1635_v55, 0.0  ;;  %vm1703_vm6 = vcmp.gt.f32.partialorder %v1639_v47, 0.0 }
 0x2b6   :  { %3788 = vmatprep.subr.bf16.mxu0 %v20543_v7  ;;  %v1763_v39 = vmul.f32 0.2, %v1635_v55  ;;  %v20547_v30 = vcombine.high %v20545_v12, %v20546_v57  ;;  %v1767_v41 = vmul.f32 0.2, %v1639_v47  ;;  %vm1701_vm7 = vcmp.gt.f32.partialorder %v1637_v43, 0.0  ;;  %v20558_v7 = vld [vmem:[#allocation64_spill] sm:$0xff] }
 0x2b7   :  { %3676 = vmatpush1.bf16.msra.mxu1 %v20544_v3  ;;  %vm1705_vm8 = vcmp.gt.f32.partialorder %v1641_v11, 0.0  ;;  %v1765_v62 = vmul.f32 0.2, %v1637_v43  ;;  %3608 = vmatprep.mubr.bf16.mxu0 %v14620_v49  ;;  %v20548_v29 = vcombine.low %v20541_v32, %v20542_v17  ;;  %v1769_v5 = vmul.f32 0.2, %v1641_v11  ;;  %v20557_v17 = vld [vmem:[#allocation63_spill] sm:$0xff] }
 0x2b8   :  { %3677 = vmatprep.subr.bf16.mxu1 %v20547_v30  ;;  %v1827_v4 = vsel %vm1699_vm5, %v1635_v55, %v1763_v39  ;;  %v1644_v28 = vadd.f32 %v14485_v45, %v14422_v46  ;;  %v1648_v27 = vadd.f32 %v14485_v45, %v14427_v58  ;;  %v20551_v59 = vcombine.high %v20549_v16, %v20550_v22  ;;  %v20561_v30 = vld [vmem:[#allocation65_spill] sm:$0xff] }
 0x2b9   :  { %3789 = vmatpush1.bf16.msra.mxu0 %v20548_v29  ;;  %v1831_v37 = vsel %vm1703_vm6, %v1639_v47, %v1767_v41  ;;  %v1829_v52 = vsel %vm1701_vm7, %v1637_v43, %v1765_v62  ;;  %v1646_v36 = vadd.f32 %v14491_v34, %v14431_v61  ;;  %v1650_v35 = vadd.f32 %v14491_v34, %v14435_v60  ;;  %v20562_v41 = vld [vmem:[#allocation66_spill] sm:$0xff] }
 0x2ba   :  { %3790 = vmatprep.subr.bf16.mxu0 %v20551_v59  ;;  %v14643_v33 = vpack.c.bf16 %v1831_v37, %v1827_v4  ;;  %v1833_v24 = vsel %vm1705_vm8, %v1641_v11, %v1769_v5  ;;  %v20552_v46 = vcombine.low %v20545_v12, %v20546_v57  ;;  %vm1708_vm9 = vcmp.gt.f32.partialorder %v1644_v28, 0.0 }
 0x2bb   :  { %vm1712_vm10 = vcmp.gt.f32.partialorder %v1648_v27, 0.0  ;;  %v14648_v58 = vpack.c.bf16 %v1833_v24, %v1829_v52  ;;  %v1772_v10 = vmul.f32 0.2, %v1644_v28  ;;  %v1776_v56 = vmul.f32 0.2, %v1648_v27  ;;  %v20568_v24 = vld [vmem:[#allocation68_spill] sm:$0xff] }
 0x2bc   :  { %3678 = vmatpush1.bf16.msra.mxu1 %v20552_v46  ;;  %vm1710_vm11 = vcmp.gt.f32.partialorder %v1646_v36, 0.0  ;;  %v20555_v61 = vcombine.high %v20553_v23, %v20554_v18  ;;  %v20556_v60 = vcombine.low %v20549_v16, %v20550_v22  ;;  %vm1714_vm12 = vcmp.gt.f32.partialorder %v1650_v35, 0.0  ;;  %v20565_v16 = vld [vmem:[#allocation67_spill] sm:$0xff]  ;;  %v20569_v46 = vld [vmem:[#allocation69_spill] sm:$0xff] }
 0x2bd   :  { %3496 = vmatmul.mubr.bf16.gmra.mxu1 %v14643_v33  ;;  %v1774_v54 = vmul.f32 0.2, %v1646_v36  ;;  %v1778_v55 = vmul.f32 0.2, %v1650_v35  ;;  %v1643_v47 = vadd.f32 %v14482_v14, %v14439_v63  ;;  %3609 = vmatmul.mubr.bf16.gmra.mxu0 %v14648_v58  ;;  %v1836_v6 = vsel %vm1708_vm9, %v1644_v28, %v1772_v10 }
 0x2be   :  { %3679 = vmatprep.subr.bf16.mxu1 %v20555_v61  ;;  %3791 = vmatpush1.bf16.msra.mxu0 %v20556_v60  ;;  %v1840_v32 = vsel %vm1712_vm10, %v1648_v27, %v1776_v56  ;;  %v20559_v43 = vcombine.high %v20557_v17, %v20558_v7  ;;  %v1647_v11 = vadd.f32 %v14482_v14, %v14443_v9 }
 0x2bf   :  { %v14665_v3 = vpack.c.bf16 %v1840_v32, %v1836_v6  ;;  %v1838_v39 = vsel %vm1710_vm11, %v1646_v36, %v1774_v54  ;;  %v1842_v12 = vsel %vm1714_vm12, %v1650_v35, %v1778_v55  ;;  %v20560_v57 = vcombine.low %v20553_v23, %v20554_v18  ;;  %v20572_v55 = vld [vmem:[#allocation70_spill] sm:$0xff] }
 0x2c0   :  { %3792 = vmatprep.subr.bf16.mxu0 %v20559_v43  ;;  %vm1707_vm13 = vcmp.gt.f32.partialorder %v1643_v47, 0.0  ;;  %v14670_v63 = vpack.c.bf16 %v1842_v12, %v1838_v39  ;;  %v20563_v62 = vcombine.high %v20561_v30, %v20562_v41  ;;  %vm1711_vm14 = vcmp.gt.f32.partialorder %v1647_v11, 0.0  ;;  %v20576_v39 = vld [vmem:[#allocation72_spill] sm:$0xff]  ;;  %v20577_v12 = vld [vmem:[#allocation73_spill] sm:$0xff] }
 0x2c1   :  { %3680 = vmatpush1.bf16.msra.mxu1 %v20560_v57  ;;  %v1771_v29 = vmul.f32 0.2, %v1643_v47  ;;  %v1775_v4 = vmul.f32 0.2, %v1647_v11  ;;  %3505 = vmatprep.mubr.bf16.mxu1 %v14665_v3  ;;  %v20564_v9 = vcombine.low %v20557_v17, %v20558_v7  ;;  %v1645_v5 = vadd.f32 %v14488_v15, %v14447_v0 }
 0x2c2   :  { %3681 = vmatprep.subr.bf16.mxu1 %v20563_v62  ;;  %v1649_v28 = vadd.f32 %v14488_v15, %v14451_v51  ;;  %v1652_v27 = vadd.f32 %v14485_v45, %v14455_v44  ;;  %3618 = vmatprep.mubr.bf16.mxu0 %v14670_v63  ;;  %v20566_v22 = vcombine.high %v13990_v20, %v20565_v16 }
 0x2c3   :  { %3793 = vmatpush1.bf16.msra.mxu0 %v20564_v9  ;;  %v1835_v59 = vsel %vm1707_vm13, %v1643_v47, %v1771_v29  ;;  %v1839_v37 = vsel %vm1711_vm14, %v1647_v11, %v1775_v4  ;;  %v1656_v52 = vadd.f32 %v14485_v45, %v14459_v40  ;;  %vm1709_vm15 = vcmp.gt.f32.partialorder %v1645_v5, 0.0  ;;  %v20573_v47 = vld [vmem:[#allocation71_spill] sm:$0xff]  ;;  %v20580_v4 = vld [vmem:[#allocation8_spill] sm:$0xff] }
 0x2c4   :  { %3794 = vmatprep.subr.bf16.mxu0 %v20566_v22  ;;  %v14691_v36 = vpack.c.bf16 %v1839_v37, %v1835_v59  ;;  %vm1713_vm0 = vcmp.gt.f32.partialorder %v1649_v28, 0.0  ;;  %v1773_v0 = vmul.f32 0.2, %v1645_v5  ;;  %v20567_v51 = vcombine.low %v20561_v30, %v20562_v41 }
 0x2c5   :  { %v1777_v44 = vmul.f32 0.2, %v1649_v28  ;;  %vm1716_vm1 = vcmp.gt.f32.partialorder %v1652_v27, 0.0  ;;  %vm1720_vm2 = vcmp.gt.f32.partialorder %v1656_v52, 0.0  ;;  %v1780_v35 = vmul.f32 0.2, %v1652_v27 }
 0x2c6   :  { %3682 = vmatpush1.bf16.msra.mxu1 %v20567_v51  ;;  %v20570_v10 = vcombine.high %v20568_v24, %v20569_v46  ;;  %v1837_v40 = vsel %vm1709_vm15, %v1645_v5, %v1773_v0  ;;  %v20571_v56 = vcombine.low %v13990_v20, %v20565_v16  ;;  %v1784_v23 = vmul.f32 0.2, %v1656_v52  ;;  %v20585_v51 = vld [vmem:[#allocation76_spill] sm:$0xff] }
 0x2c7   :  { %3506 = vmatmul.mubr.bf16.gmra.mxu1 %v14691_v36  ;;  %v1654_v18 = vadd.f32 %v14491_v34, %v14463_v53  ;;  %v1658_v61 = vadd.f32 %v14491_v34, %v14467_v2  ;;  %v1841_v60 = vsel %vm1713_vm0, %v1649_v28, %v1777_v44  ;;  %v1844_v54 = vsel %vm1716_vm1, %v1652_v27, %v1780_v35  ;;  %v20581_v28 = vld [vmem:[#allocation74_spill] sm:$0xff]  ;;  %v20582_v27 = vld [vmem:[#allocation75_spill] sm:$0xff]  ;;  %v20586_v44 = vld [vmem:[#allocation77_spill] sm:$0xff] }
 0x2c8   :  { %3683 = vmatprep.subr.bf16.mxu1 %v20570_v10  ;;  %3795 = vmatpush1.bf16.msra.mxu0 %v20571_v56  ;;  %v20574_v6 = vcombine.high %v20572_v55, %v20573_v47  ;;  %v1651_v32 = vadd.f32 %v14482_v14, %v14471_v19  ;;  %v1655_v20 = vadd.f32 %v14482_v14, %v14475_v50  ;;  %v20589_v10 = vld [vmem:[#allocation6_spill] sm:$0xff]  ;;  %v20590_v56 = vld [vmem:[#allocation7_spill] sm:$0xff] }
 0x2c9   :  { %v14714_v17 = vpack.c.bf16 %v1841_v60, %v1837_v40  ;;  %v1848_v7 = vsel %vm1720_vm2, %v1656_v52, %v1784_v23  ;;  %vm1718_vm3 = vcmp.gt.f32.partialorder %v1654_v18, 0.0  ;;  %vm1722_vm4 = vcmp.gt.f32.partialorder %v1658_v61, 0.0  ;;  %v20592_v60 = vld [vmem:[#allocation10_spill] sm:$0xff] }
 0x2ca   :  { %3796 = vmatprep.subr.bf16.mxu0 %v20574_v6  ;;  %v20575_v53 = vcombine.low %v20568_v24, %v20569_v46  ;;  %v14719_v2 = vpack.c.bf16 %v1848_v7, %v1844_v54  ;;  %v1782_v43 = vmul.f32 0.2, %v1654_v18  ;;  %v1786_v11 = vmul.f32 0.2, %v1658_v61  ;;  %v20588_v24 = vld [vmem:[#allocation9_spill] sm:$0xff] }
 0x2cb   :  { %v20578_v57 = vcombine.high %v20576_v39, %v20577_v12  ;;  %vm1715_vm5 = vcmp.gt.f32.partialorder %v1651_v32, 0.0  ;;  %3619 = vmatmul.mubr.bf16.gmra.mxu0 %v14714_v17  ;;  %vm1719_vm6 = vcmp.gt.f32.partialorder %v1655_v20, 0.0  ;;  %v1779_v19 = vmul.f32 0.2, %v1651_v32 }
 0x2cc   :  { %3684 = vmatpush1.bf16.msra.mxu1 %v20575_v53  ;;  %v1783_v50 = vmul.f32 0.2, %v1655_v20  ;;  %v1653_v30 = vadd.f32 %v14488_v15, %v14479_v48  ;;  %3515 = vmatprep.mubr.bf16.mxu1 %v14719_v2  ;;  %v1846_v41 = vsel %vm1718_vm3, %v1654_v18, %v1782_v43  ;;  %v1850_v62 = vsel %vm1722_vm4, %v1658_v61, %v1786_v11  ;;  %v20591_v18 = vld [vmem:[#allocation13_spill] sm:$0xff]  ;;  %v20596_v11 = vld [vmem:[#allocation78_spill] sm:$0xff] }
 0x2cd   :  { %3685 = vmatprep.subr.bf16.mxu1 %v20578_v57  ;;  %v20579_v29 = vcombine.low %v20572_v55, %v20573_v47  ;;  %v1657_v9 = vadd.f32 %v14488_v15, %v20580_v4  ;;  %v14733_v5 = vpack.c.bf16 %v1850_v62, %v1846_v41  ;;  %v20583_v16 = vcombine.high %v20581_v28, %v20582_v27  ;;  %v20601_v41 = vld [vmem:[#allocation81_spill] sm:$0xff] }
 0x2ce   :  { %v1843_v22 = vsel %vm1715_vm5, %v1651_v32, %v1779_v19  ;;  %v1847_v59 = vsel %vm1719_vm6, %v1655_v20, %v1783_v50  ;;  %vm1717_vm7 = vcmp.gt.f32.partialorder %v1653_v30, 0.0  ;;  %v20584_v48 = vcombine.low %v20576_v39, %v20577_v12  ;;  %v20594_v32 = vld [vmem:[#allocation24_spill] sm:$0xff]  ;;  %v20597_v39 = vld [vmem:[#allocation79_spill] sm:$0xff] }
 0x2cf   :  { %3797 = vmatpush1.bf16.msra.mxu0 %v20579_v29  ;;  %v14741_v37 = vpack.c.bf16 %v1847_v59, %v1843_v22  ;;  %vm1721_vm8 = vcmp.gt.f32.partialorder %v1657_v9, 0.0  ;;  %v1781_v52 = vmul.f32 0.2, %v1653_v30  ;;  %v1785_v0 = vmul.f32 0.2, %v1657_v9  ;;  %3628 = vmatprep.mubr.bf16.mxu0 %v14733_v5  ;;  %v20595_v20 = vld [vmem:[#allocation108_spill] sm:$0xff] }
 0x2d0   :  { %3798 = vmatprep.subr.bf16.mxu0 %v20583_v16  ;;  %3686 = vmatpush2.bf16.msra.mxu1 %v20584_v48  ;;  %v20587_v35 = vcombine.high %v20585_v51, %v20586_v44  ;;  %v1660_v46 = vadd.f32 %v14485_v45, %v20588_v24  ;;  %v1664_v40 = vadd.f32 %v14485_v45, %v20589_v10  ;;  %v14756_v54 = vmul.f32 0.2, %v20592_v60  ;;  %v20605_v48 = vld [vmem:[#allocation25_spill] sm:$0xff]  ;;  %v20609_v10 = vld [vmem:[#allocation83_spill] sm:$0xff] }
 0x2d1   :  { %v1662_v23 = vadd.f32 %v14491_v34, %v20590_v56  ;;  %v1666_v61 = vadd.f32 %v14491_v34, %v20591_v18  ;;  %3516 = vmatmul.mubr.bf16.gmra.mxu1 %v14741_v37  ;;  %v1845_v55 = vsel %vm1717_vm7, %v1653_v30, %v1781_v52  ;;  %v1849_v47 = vsel %vm1721_vm8, %v1657_v9, %v1785_v0  ;;  %v20600_v30 = vld [vmem:[#allocation80_spill] sm:$0xff]  ;;  %v20606_v52 = vld [vmem:[#allocation110_spill] sm:$0xff] }
 0x2d2   :  { %3687 = vmatprep.subr.bf16.mxu1 %v20587_v35  ;;  %v20593_v6 = vcombine.low %v20581_v28, %v20582_v27  ;;  %v1540_v7 = vmul.f32 %v20595_v20, %v20594_v32  ;;  %v14764_v53 = vpack.c.bf16 %v1849_v47, %v1845_v55  ;;  %vm1724_vm9 = vcmp.gt.f32.partialorder %v1660_v46, 0.0  ;;  %v20603_v9 = vld [vmem:[#allocation28_spill] sm:$0xff] }
 0x2d3   :  { %vm1728_vm10 = vcmp.gt.f32.partialorder %v1664_v40, 0.0  ;;  %v1788_v43 = vmul.f32 0.2, %v1660_v46  ;;  %v20598_v12 = vcombine.high %v20596_v11, %v20597_v39  ;;  %v20599_v57 = vcombine.low %v20585_v51, %v20586_v44  ;;  %v20607_v51 = vld [vmem:[#allocation29_spill] sm:$0xff]  ;;  %v20612_v32 = vld [vmem:[#allocation84_spill] sm:$0xff] }
 0x2d4   :  { %3799 = vmatpush2.bf16.msra.mxu0 %v20593_v6  ;;  %v1792_v19 = vmul.f32 0.2, %v1664_v40  ;;  %vm1726_vm11 = vcmp.gt.f32.partialorder %v1662_v23, 0.0  ;;  %vm1730_vm12 = vcmp.gt.f32.partialorder %v1666_v61, 0.0  ;;  %v1790_v50 = vmul.f32 0.2, %v1662_v23 }
 0x2d5   :  { %3800 = vmatprep.subr.bf16.mxu0 %v20598_v12  ;;  %3688 = vmatpush2.bf16.msra.mxu1 %v20599_v57  ;;  %v20602_v62 = vcombine.high %v20600_v30, %v20601_v41  ;;  %v1852_v29 = vsel %vm1724_vm9, %v1660_v46, %v1788_v43  ;;  %v1794_v4 = vmul.f32 0.2, %v1666_v61  ;;  %v1544_v28 = vmul.f32 %v20595_v20, %v20603_v9  ;;  %v20608_v46 = vld [vmem:[#allocation82_spill] sm:$0xff] }
 0x2d6   :  { %3629 = vmatmul.mubr.bf16.gmra.mxu0 %v14764_v53  ;;  %v1659_v27 = vadd.f32 %v14482_v14, %v1540_v7  ;;  %v1856_v16 = vsel %vm1728_vm10, %v1664_v40, %v1792_v19  ;;  %v1854_v22 = vsel %vm1726_vm11, %v1662_v23, %v1790_v50  ;;  %v20604_v59 = vcombine.low %v20596_v11, %v20597_v39  ;;  %v20615_v11 = vld [vmem:[#allocation34_spill] sm:$0xff]  ;;  %v20616_v39 = vld [vmem:[#allocation109_spill] sm:$0xff] }
 0x2d7   :  { %3689 = vmatprep.subr.bf16.mxu1 %v20602_v62  ;;  %v1542_v0 = vmul.f32 %v20606_v52, %v20605_v48  ;;  %v1546_v44 = vmul.f32 %v20606_v52, %v20607_v51  ;;  %v14786_v35 = vpack.c.bf16 %v1856_v16, %v1852_v29  ;;  %v1858_v24 = vsel %vm1730_vm12, %v1666_v61, %v1794_v4  ;;  %v20613_v61 = vld [vmem:[#allocation85_spill] sm:$0xff]  ;;  %v20617_v57 = vld [vmem:[#allocation38_spill] sm:$0xff]  ;;  %v20620_v16 = vld [vmem:[#allocation87_spill] sm:$0xff] }
 0x2d8   :  { %3801 = vmatpush2.bf16.msra.mxu0 %v20604_v59  ;;  %v20610_v56 = vcombine.high %v20608_v46, %v20609_v10  ;;  %v1663_v40 = vadd.f32 %v14482_v14, %v1544_v28  ;;  %vm1723_vm13 = vcmp.gt.f32.partialorder %v1659_v27, 0.0  ;;  %v20611_v23 = vcombine.low %v20600_v30, %v20601_v41  ;;  %v20619_v28 = vld [vmem:[#allocation86_spill] sm:$0xff]  ;;  %v20624_v51 = vld [vmem:[#allocation111_spill] sm:$0xff] }
 0x2d9   :  { %v14795_v18 = vpack.c.bf16 %v1858_v24, %v1854_v22  ;;  %v1787_v55 = vmul.f32 0.2, %v1659_v27  ;;  %v1661_v47 = vadd.f32 %v14488_v15, %v1542_v0  ;;  %v1665_v6 = vadd.f32 %v14488_v15, %v1546_v44  ;;  %3525 = vmatprep.mubr.bf16.mxu1 %v14786_v35  ;;  %v20623_v0 = vld [vmem:[#allocation35_spill] sm:$0xff] }
 0x2da   :  { %3802 = vmatprep.subr.bf16.mxu0 %v20610_v56  ;;  %3690 = vmatpush2.bf16.msra.mxu1 %v20611_v23  ;;  %v20614_v7 = vcombine.high %v20612_v32, %v20613_v61  ;;  %vm1727_vm14 = vcmp.gt.f32.partialorder %v1663_v40, 0.0  ;;  %v1791_v43 = vmul.f32 0.2, %v1663_v40  ;;  %v1549_v12 = vmul.f32 %v20616_v39, %v20615_v11  ;;  %v20625_v24 = vld [vmem:[#allocation39_spill] sm:$0xff]  ;;  %v20627_v56 = vld [vmem:[#allocation89_spill] sm:$0xff] }
 0x2db   :  { %v1553_v19 = vmul.f32 %v20616_v39, %v20617_v57  ;;  %3638 = vmatprep.mubr.bf16.mxu0 %v14795_v18  ;;  %v1851_v50 = vsel %vm1723_vm13, %v1659_v27, %v1787_v55  ;;  %vm1725_vm15 = vcmp.gt.f32.partialorder %v1661_v47, 0.0  ;;  %vm1729_vm0 = vcmp.gt.f32.partialorder %v1665_v6, 0.0 }
 0x2dc   :  { %3691 = vmatprep.subr.bf16.mxu1 %v20614_v7  ;;  %v1789_v30 = vmul.f32 0.2, %v1661_v47  ;;  %v20618_v41 = vcombine.low %v20608_v46, %v20609_v10  ;;  %v1855_v62 = vsel %vm1727_vm14, %v1663_v40, %v1791_v43  ;;  %v1793_v29 = vmul.f32 0.2, %v1665_v6  ;;  %v20626_v10 = vld [vmem:[#allocation88_spill] sm:$0xff] }
 0x2dd   :  { %v1668_v4 = vadd.f32 %v14485_v45, %v1549_v12  ;;  %v1672_v9 = vadd.f32 %v14485_v45, %v1553_v19  ;;  %v20621_v22 = vcombine.high %v20619_v28, %v20620_v16  ;;  %v20622_v27 = vcombine.low %v20612_v32, %v20613_v61  ;;  %v20631_v12 = vld [vmem:[#allocation91_spill] sm:$0xff]  ;;  %v20633_v19 = vld [vmem:[#allocation32_spill] sm:$0xff] }
 0x2de   :  { %3803 = vmatpush2.bf16.msra.mxu0 %v20618_v41  ;;  %v14819_v59 = vpack.c.bf16 %v1855_v62, %v1851_v50  ;;  %v1853_v48 = vsel %vm1725_vm15, %v1661_v47, %v1789_v30  ;;  %v1551_v44 = vmul.f32 %v20624_v51, %v20623_v0  ;;  %v1555_v46 = vmul.f32 %v20624_v51, %v20625_v24  ;;  %v20634_v30 = vld [vmem:[#allocation36_spill] sm:$0xff]  ;;  %v20635_v62 = vld [vmem:[#allocation33_spill] sm:$0xff] }
 0x2df   :  { %3804 = vmatprep.subr.bf16.mxu0 %v20621_v22  ;;  %3692 = vmatpush2.bf16.msra.mxu1 %v20622_v27  ;;  %v20628_v40 = vcombine.high %v20626_v10, %v20627_v56  ;;  %v1857_v23 = vsel %vm1729_vm0, %v1665_v6, %v1793_v29  ;;  %vm1732_vm1 = vcmp.gt.f32.partialorder %v1668_v4, 0.0  ;;  %vm1736_vm2 = vcmp.gt.f32.partialorder %v1672_v9, 0.0  ;;  %v20630_v6 = vld [vmem:[#allocation90_spill] sm:$0xff]  ;;  %v20638_v24 = vld [vmem:[#allocation93_spill] sm:$0xff] }
 0x2e0   :  { %v1796_v55 = vmul.f32 0.2, %v1668_v4  ;;  %vm1746_vm3 = vcmp.gt.f32.partialorder %v20592_v60, 0.0  ;;  %3526 = vmatmul.mubr.bf16.gmra.mxu1 %v14819_v59  ;;  %v14830_v32 = vpack.c.bf16 %v1857_v23, %v1853_v48  ;;  %v1800_v47 = vmul.f32 0.2, %v1672_v9 }
 0x2e1   :  { %3693 = vmatprep.subr.bf16.mxu1 %v20628_v40  ;;  %v1670_v61 = vadd.f32 %v14491_v34, %v1551_v44  ;;  %v1674_v7 = vadd.f32 %v14491_v34, %v1555_v46  ;;  %v20629_v43 = vcombine.low %v20619_v28, %v20620_v16  ;;  %v20632_v57 = vcombine.high %v20630_v6, %v20631_v12  ;;  %v20637_v44 = vld [vmem:[#allocation92_spill] sm:$0xff] }
 0x2e2   :  { %v1860_v11 = vsel %vm1732_vm1, %v1668_v4, %v1796_v55  ;;  %v1548_v50 = vmul.f32 %v20595_v20, %v20633_v19  ;;  %v1552_v41 = vmul.f32 %v20595_v20, %v20634_v30  ;;  %v1550_v29 = vmul.f32 %v20606_v52, %v20635_v62  ;;  %3639 = vmatmul.mubr.bf16.gmra.mxu0 %v14830_v32 }
 0x2e3   :  { %3805 = vmatpush2.bf16.msra.mxu0 %v20629_v43  ;;  %v1864_v22 = vsel %vm1736_vm2, %v1672_v9, %v1800_v47  ;;  %vm1734_vm4 = vcmp.gt.f32.partialorder %v1670_v61, 0.0  ;;  %vm1738_vm5 = vcmp.gt.f32.partialorder %v1674_v7, 0.0  ;;  %v1798_v28 = vmul.f32 0.2, %v1670_v61  ;;  %v20640_v9 = vld [vmem:[#allocation37_spill] sm:$0xff] }
 0x2e4   :  { %3806 = vmatprep.subr.bf16.mxu0 %v20632_v57  ;;  %v20636_v4 = vcombine.low %v20626_v10, %v20627_v56  ;;  %v14850_v16 = vpack.c.bf16 %v1864_v22, %v1860_v11  ;;  %v1802_v27 = vmul.f32 0.2, %v1674_v7  ;;  %v1667_v48 = vadd.f32 %v14482_v14, %v1548_v50  ;;  %v20642_v56 = vld [vmem:[#allocation42_spill] sm:$0xff] }
 0x2e5   :  { %v1671_v0 = vadd.f32 %v14482_v14, %v1552_v41  ;;  %v20639_v46 = vcombine.high %v20637_v44, %v20638_v24  ;;  %v1862_v40 = vsel %vm1734_vm4, %v1670_v61, %v1798_v28  ;;  %v1554_v23 = vmul.f32 %v20606_v52, %v20640_v9  ;;  %v20643_v57 = vld [vmem:[#allocation94_spill] sm:$0xff]  ;;  %v20644_v61 = vld [vmem:[#allocation95_spill] sm:$0xff]  ;;  %v20648_v28 = vld [vmem:[#allocation96_spill] sm:$0xff] }
 0x2e6   :  { %3694 = vmatpush2.bf16.msra.mxu1 %v20636_v4  ;;  %v1669_v55 = vadd.f32 %v14488_v15, %v1550_v29  ;;  %v20641_v10 = vcombine.low %v20630_v6, %v20631_v12  ;;  %v1557_v47 = vmul.f32 %v20616_v39, %v20642_v56  ;;  %3535 = vmatprep.mubr.bf16.mxu1 %v14850_v16  ;;  %vm1731_vm6 = vcmp.gt.f32.partialorder %v1667_v48, 0.0  ;;  %v20649_v4 = vld [vmem:[#allocation97_spill] sm:$0xff]  ;;  %v20651_v9 = vld [vmem:[#allocation43_spill] sm:$0xff] }
 0x2e7   :  { %3695 = vmatprep.subr.bf16.mxu1 %v20639_v46  ;;  %v1866_v43 = vsel %vm1738_vm5, %v1674_v7, %v1802_v27  ;;  %vm1735_vm7 = vcmp.gt.f32.partialorder %v1671_v0, 0.0  ;;  %v1795_v11 = vmul.f32 0.2, %v1667_v48  ;;  %v20645_v19 = vcombine.high %v20643_v57, %v20644_v61  ;;  %v20647_v7 = vld [vmem:[#allocation46_spill] sm:$0xff]  ;;  %v20654_v56 = vld [vmem:[#allocation99_spill] sm:$0xff] }
 0x2e8   :  { %3807 = vmatpush2.bf16.msra.mxu0 %v20641_v10  ;;  %v14869_v50 = vpack.c.bf16 %v1866_v43, %v1862_v40  ;;  %v1799_v30 = vmul.f32 0.2, %v1671_v0  ;;  %v1673_v41 = vadd.f32 %v14488_v15, %v1554_v23  ;;  %vm1733_vm8 = vcmp.gt.f32.partialorder %v1669_v55, 0.0  ;;  %v20653_v10 = vld [vmem:[#allocation98_spill] sm:$0xff] }
 0x2e9   :  { %3808 = vmatprep.subr.bf16.mxu0 %v20645_v19  ;;  %v20646_v6 = vcombine.low %v20637_v44, %v20638_v24  ;;  %v1859_v12 = vsel %vm1731_vm6, %v1667_v48, %v1795_v11  ;;  %v1797_v62 = vmul.f32 0.2, %v1669_v55  ;;  %v1561_v29 = vmul.f32 %v20616_v39, %v20647_v7 }
 0x2ea   :  { %v1676_v22 = vadd.f32 %v14485_v45, %v1557_v47  ;;  %v20650_v27 = vcombine.high %v20648_v28, %v20649_v4  ;;  %3648 = vmatprep.mubr.bf16.mxu0 %v14869_v50  ;;  %v1863_v46 = vsel %vm1735_vm7, %v1671_v0, %v1799_v30  ;;  %vm1737_vm9 = vcmp.gt.f32.partialorder %v1673_v41, 0.0  ;;  %v20658_v30 = vld [vmem:[#allocation100_spill] sm:$0xff] }
 0x2eb   :  { %3696 = vmatpush2.bf16.msra.mxu1 %v20646_v6  ;;  %v1801_v40 = vmul.f32 0.2, %v1673_v41  ;;  %v1559_v44 = vmul.f32 %v20624_v51, %v20651_v9  ;;  %v20652_v48 = vcombine.low %v20643_v57, %v20644_v61  ;;  %v14887_v24 = vpack.c.bf16 %v1863_v46, %v1859_v12  ;;  %v20657_v61 = vld [vmem:[#allocation40_spill] sm:$0xff]  ;;  %v20665_v9 = vld [vmem:[#allocation102_spill] sm:$0xff] }
 0x2ec   :  { %3697 = vmatprep.subr.bf16.mxu1 %v20650_v27  ;;  %v1861_v39 = vsel %vm1733_vm8, %v1669_v55, %v1797_v62  ;;  %v1680_v23 = vadd.f32 %v14485_v45, %v1561_v29  ;;  %vm1740_vm10 = vcmp.gt.f32.partialorder %v1676_v22, 0.0  ;;  %v20655_v47 = vcombine.high %v20653_v10, %v20654_v56  ;;  %v20664_v27 = vld [vmem:[#allocation45_spill] sm:$0xff] }
 0x2ed   :  { %3809 = vmatpush2.bf16.msra.mxu0 %v20652_v48  ;;  %v1865_v0 = vsel %vm1737_vm9, %v1673_v41, %v1801_v40  ;;  %v1804_v43 = vmul.f32 0.2, %v1676_v22  ;;  %v1678_v11 = vadd.f32 %v14491_v34, %v1559_v44  ;;  %v1874_v51 = vsel %vm1746_vm3, %v20592_v60, %v14756_v54  ;;  %3536 = vmatmul.mubr.bf16.gmra.mxu1 %v14887_v24  ;;  %v20659_v34 = vld [vmem:[#allocation101_spill] sm:$0xff]  ;;  %v20661_v54 = vld [vmem:[#allocation44_spill] sm:$0xff]  ;;  %v20666_v44 = vld [vmem:[#allocation103_spill] sm:$0xff] }
 0x2ee   :  { %3810 = vmatprep.subr.bf16.mxu0 %v20655_v47  ;;  %v20656_v57 = vcombine.low %v20648_v28, %v20649_v4  ;;  %v14902_v45 = vpack.c.bf16 %v1865_v0, %v1861_v39  ;;  %vm1744_vm11 = vcmp.gt.f32.partialorder %v1680_v23, 0.0  ;;  %v1808_v55 = vmul.f32 0.2, %v1680_v23  ;;  %v20663_v28 = vld [vmem:[#allocation41_spill] sm:$0xff] }
 0x2ef   :  { %v1556_v19 = vmul.f32 %v20595_v20, %v20657_v61  ;;  %v20660_v41 = vcombine.high %v20658_v30, %v20659_v34  ;;  %v1868_v6 = vsel %vm1740_vm10, %v1676_v22, %v1804_v43  ;;  %vm1742_vm12 = vcmp.gt.f32.partialorder %v1678_v11, 0.0  ;;  %v20670_v47 = vld [vmem:[#allocation105_spill] sm:$0xff]  ;;  %v20674_v61 = vld [vmem:[#allocation107_spill] sm:$0xff] }
 0x2f0   :  { %3698 = vmatpush2.bf16.msra.mxu1 %v20656_v57  ;;  %v1806_v60 = vmul.f32 0.2, %v1678_v11  ;;  %v1560_v12 = vmul.f32 %v20595_v20, %v20661_v54  ;;  %v20662_v62 = vcombine.low %v20653_v10, %v20654_v56  ;;  %3649 = vmatmul.mubr.bf16.gmra.mxu0 %v14902_v45  ;;  %v1872_v7 = vsel %vm1744_vm11, %v1680_v23, %v1808_v55  ;;  %v20673_v55 = vld [vmem:[#allocation106_spill] sm:$0xff]  ;;  %v1957_v54 = vld [vmem:[%s19940_s3 + $0x190] sm:$0xff] }
 0x2f1   :  { %3699 = vmatprep.subr.bf16.mxu1 %v20660_v41  ;;  %v1675_v29 = vadd.f32 %v14482_v14, %v1556_v19  ;;  %v1558_v4 = vmul.f32 %v20606_v52, %v20663_v28  ;;  %v1562_v22 = vmul.f32 %v20606_v52, %v20664_v27  ;;  %v14920_v46 = vpack.c.bf16 %v1872_v7, %v1868_v6  ;;  %v20669_v52 = vld [vmem:[#allocation104_spill] sm:$0xff] }
 0x2f2   :  { %3811 = vmatpush2.bf16.msra.mxu0 %v20662_v62  ;;  %v1870_v40 = vsel %vm1742_vm12, %v1678_v11, %v1806_v60  ;;  %v1679_v20 = vadd.f32 %v14482_v14, %v1560_v12  ;;  %v20667_v48 = vcombine.high %v20665_v9, %v20666_v44  ;;  %v20668_v39 = vcombine.low %v20658_v30, %v20659_v34  ;;  %v1961_v12 = vld [vmem:[%s19940_s3 + $0x1b0] sm:$0xff] }
 0x2f3   :  { %v14929_v23 = vpack.c.bf16 %v1874_v51, %v1870_v40  ;;  %vm1739_vm13 = vcmp.gt.f32.partialorder %v1675_v29, 0.0  ;;  %v1803_v10 = vmul.f32 0.2, %v1675_v29  ;;  %v1677_v56 = vadd.f32 %v14488_v15, %v1558_v4  ;;  %3545 = vmatprep.mubr.bf16.mxu1 %v14920_v46  ;;  %v2085_v7 = vld [vmem:[%s19940_s3 + $0x590] sm:$0xff] }
 0x2f4   :  { %3812 = vmatprep.subr.bf16.mxu0 %v20667_v48  ;;  %3700 = vmatpush2.bf16.msra.mxu1 %v20668_v39  ;;  %v20671_v0 = vcombine.high %v20669_v52, %v20670_v47  ;;  %vm1743_vm14 = vcmp.gt.f32.partialorder %v1679_v20, 0.0  ;;  %v1807_v14 = vmul.f32 0.2, %v1679_v20  ;;  %v1681_v43 = vadd.f32 %v14488_v15, %v1562_v22  ;;  %v1949_v27 = vld [vmem:[%s19940_s3 + $0x150] sm:$0xff] }
 0x2f5   :  { %v20672_v11 = vcombine.low %v20665_v9, %v20666_v44  ;;  %3658 = vmatprep.mubr.bf16.mxu0 %v14929_v23  ;;  %v1867_v51 = vsel %vm1739_vm13, %v1675_v29, %v1803_v10  ;;  %vm1741_vm15 = vcmp.gt.f32.partialorder %v1677_v56, 0.0  ;;  %v1805_v57 = vmul.f32 0.2, %v1677_v56  ;;  %v2089_v29 = vld [vmem:[%s19940_s3 + $0x5b0] sm:$0xff] }
 0x2f6   :  { %3895 = vmatprep.subr.bf16.mxu1 %v20671_v0  ;;  %v20675_v19 = vcombine.high %v20673_v55, %v20674_v61  ;;  %v1871_v30 = vsel %vm1743_vm14, %v1679_v20, %v1807_v14  ;;  %vm1745_vm0 = vcmp.gt.f32.partialorder %v1681_v43, 0.0  ;;  %v1809_v34 = vmul.f32 0.2, %v1681_v43  ;;  %v1953_v22 = vld [vmem:[%s19940_s3 + $0x170] sm:$0xff] }
 0x2f7   :  { %3813 = vmatpush2.bf16.msra.mxu0 %v20672_v11  ;;  %v14944_v41 = vpack.c.bf16 %v1871_v30, %v1867_v51  ;;  %v1869_v6 = vsel %vm1741_vm15, %v1677_v56, %v1805_v57  ;;  %v10732_v62 = vcombine.low %v20669_v52, %v20670_v47  ;;  %v10725_v28 = vcombine.high %v1957_v54, %v1961_v12  ;;  %v2077_v9 = vld [vmem:[%s19940_s3 + $0x550] sm:$0xff] }
 0x2f8   :  { %4008 = vmatprep.subr.bf16.mxu0 %v20675_v19  ;;  %v1873_v15 = vsel %vm1745_vm0, %v1681_v43, %v1809_v34  ;;  %v10860_v4 = vcombine.low %v20673_v55, %v20674_v61  ;;  %v10853_v40 = vcombine.high %v2085_v7, %v2089_v29  ;;  %v10724_v20 = vcombine.low %v1957_v54, %v1961_v12  ;;  %v2081_v44 = vld [vmem:[%s19940_s3 + $0x570] sm:$0xff] }
 0x2f9   :  { %3546 = vmatmul.mubr.bf16.gmra.mxu1 %v14944_v41  ;;  %v14947_v60 = vpack.c.bf16 %v1873_v15, %v1869_v6  ;;  %v10717_v48 = vcombine.high %v1949_v27, %v1953_v22  ;;  %v10852_v39 = vcombine.low %v2085_v7, %v2089_v29  ;;  %v1941_v10 = vld [vmem:[%s19940_s3 + $0x110] sm:$0xff]  ;;  %v10845_v52 = vcombine.high %v2077_v9, %v2081_v44 }
 0x2fa   :  { %3701 = vmatprep.mubr.bf16.mxu1 %v14523_v26  ;;  %v1945_v56 = vld [vmem:[%s19940_s3 + $0x130] sm:$0xff]  ;;  %v10716_v47 = vcombine.low %v1949_v27, %v1953_v22  ;;  %v10844_v11 = vcombine.low %v2077_v9, %v2081_v44 }
 0x2fb   :  { %3659 = vmatmul.mubr.bf16.gmra.mxu0 %v14947_v60  ;;  %v2069_v0 = vld [vmem:[%s19940_s3 + $0x510] sm:$0xff]  ;;  %v10709_v43 = vcombine.high %v1941_v10, %v1945_v56  ;;  %v10708_v61 = vcombine.low %v1941_v10, %v1945_v56 }
 0x2fc   :  { %3814 = vmatprep.mubr.bf16.mxu0 %v14527_v25  ;;  %v2073_v14 = vld [vmem:[%s19940_s3 + $0x530] sm:$0xff] }
 0x2fd   :  { %v1933_v51 = vld [vmem:[%s19940_s3 + $0xd0] sm:$0xff]  ;;  %v10837_v55 = vcombine.high %v2069_v0, %v2073_v14  ;;  %v10836_v6 = vcombine.low %v2069_v0, %v2073_v14 }
 0x2fe   :  { %v1937_v57 = vld [vmem:[%s19940_s3 + $0xf0] sm:$0xff] }
 0x2ff   :  { %v2061_v19 = vld [vmem:[%s19940_s3 + $0x4d0] sm:$0xff]  ;;  %v10701_v34 = vcombine.high %v1933_v51, %v1937_v57 }
 0x300   :  { %v2065_v30 = vld [vmem:[%s19940_s3 + $0x4f0] sm:$0xff] }
 0x301   :  { %3702 = vmatmul.mubr.bf16.vlgmr.msra.gmra.mxu1 %v14530_v1  ;;  %v1925_v15 = vld [vmem:[%s19940_s3 + $0x90] sm:$0xff]  ;;  %v10829_v12 = vcombine.high %v2061_v19, %v2065_v30 }
 0x302   :  { %3896 = vmatpush1.bf16.msra.mxu1 %v10732_v62  ;;  %3711 = vmatprep.mubr.bf16.mxu1 %v14558_v21  ;;  %v1929_v54 = vld [vmem:[%s19940_s3 + $0xb0] sm:$0xff]  ;;  %v10700_v62 = vcombine.low %v1933_v51, %v1937_v57 }
 0x303   :  { %3815 = vmatmul.mubr.bf16.vlgmr.msra.gmra.mxu0 %v14544_v13  ;;  %3897 = vmatprep.subr.bf16.mxu1 %v10725_v28  ;;  %v2053_v7 = vld [vmem:[%s19940_s3 + $0x490] sm:$0xff]  ;;  %v10693_v28 = vcombine.high %v1925_v15, %v1929_v54 }
 0x304   :  { %4009 = vmatpush1.bf16.msra.mxu0 %v10860_v4  ;;  %3824 = vmatprep.mubr.bf16.mxu0 %v14562_v8  ;;  %v2057_v29 = vld [vmem:[%s19940_s3 + $0x4b0] sm:$0xff]  ;;  %v10828_v4 = vcombine.low %v2061_v19, %v2065_v30 }
 0x305   :  { %4010 = vmatprep.subr.bf16.mxu0 %v10853_v40  ;;  %v1917_v27 = vld [vmem:[%s19940_s3 + $0x50] sm:$0xff]  ;;  %v10821_v40 = vcombine.high %v2053_v7, %v2057_v29 }
 0x306   :  { %3898 = vmatpush1.bf16.msra.mxu1 %v10724_v20  ;;  %v1921_v22 = vld [vmem:[%s19940_s3 + $0x70] sm:$0xff]  ;;  %v10692_v20 = vcombine.low %v1925_v15, %v1929_v54 }
 0x307   :  { %3899 = vmatprep.subr.bf16.mxu1 %v10717_v48  ;;  %v2045_v9 = vld [vmem:[%s19940_s3 + $0x450] sm:$0xff]  ;;  %v10685_v48 = vcombine.high %v1917_v27, %v1921_v22 }
 0x308   :  { %4011 = vmatpush1.bf16.msra.mxu0 %v10852_v39  ;;  %v2049_v44 = vld [vmem:[%s19940_s3 + $0x470] sm:$0xff]  ;;  %v10820_v39 = vcombine.low %v2053_v7, %v2057_v29 }
 0x309   :  { %4012 = vmatprep.subr.bf16.mxu0 %v10845_v52  ;;  %3712 = vmatmul.mubr.bf16.gmra.mxu1 %v14588_v42  ;;  %v1909_v10 = vld [vmem:[%s19940_s3 + $0x10] sm:$0xff]  ;;  %v10813_v52 = vcombine.high %v2045_v9, %v2049_v44 }
 0x30a   :  { %3900 = vmatpush1.bf16.msra.mxu1 %v10716_v47  ;;  %3721 = vmatprep.mubr.bf16.mxu1 %v14605_v38  ;;  %v1913_v56 = vld [vmem:[%s19940_s3 + $0x30] sm:$0xff]  ;;  %v10684_v47 = vcombine.low %v1917_v27, %v1921_v22 }
 0x30b   :  { %3825 = vmatmul.mubr.bf16.gmra.mxu0 %v14600_v31  ;;  %3901 = vmatprep.subr.bf16.mxu1 %v10709_v43  ;;  %v2037_v0 = vld [vmem:[%s19940_s3 + $0x410] sm:$0xff]  ;;  %v10677_v43 = vcombine.high %v1909_v10, %v1913_v56 }
 0x30c   :  { %4013 = vmatpush1.bf16.msra.mxu0 %v10844_v11  ;;  %3834 = vmatprep.mubr.bf16.mxu0 %v14620_v49  ;;  %v2041_v14 = vld [vmem:[%s19940_s3 + $0x430] sm:$0xff]  ;;  %v10812_v11 = vcombine.low %v2045_v9, %v2049_v44 }
 0x30d   :  { %4014 = vmatprep.subr.bf16.mxu0 %v10837_v55  ;;  %v2029_v51 = vld [vmem:[%s19940_s3 + $0x3d0] sm:$0xff]  ;;  %v10805_v55 = vcombine.high %v2037_v0, %v2041_v14 }
 0x30e   :  { %3902 = vmatpush1.bf16.msra.mxu1 %v10708_v61  ;;  %v2033_v57 = vld [vmem:[%s19940_s3 + $0x3f0] sm:$0xff]  ;;  %v10676_v61 = vcombine.low %v1909_v10, %v1913_v56 }
 0x30f   :  { %3903 = vmatprep.subr.bf16.mxu1 %v10701_v34  ;;  %v2157_v19 = vld [vmem:[%s19940_s3 + $0x7d0] sm:$0xff]  ;;  %v10797_v34 = vcombine.high %v2029_v51, %v2033_v57 }
 0x310   :  { %4015 = vmatpush1.bf16.msra.mxu0 %v10836_v6  ;;  %v2161_v30 = vld [vmem:[%s19940_s3 + $0x7f0] sm:$0xff]  ;;  %v10804_v6 = vcombine.low %v2037_v0, %v2041_v14 }
 0x311   :  { %4016 = vmatprep.subr.bf16.mxu0 %v10829_v12  ;;  %3722 = vmatmul.mubr.bf16.gmra.mxu1 %v14643_v33  ;;  %v2021_v15 = vld [vmem:[%s19940_s3 + $0x390] sm:$0xff]  ;;  %v10925_v12 = vcombine.high %v2157_v19, %v2161_v30 }
 0x312   :  { %3904 = vmatpush1.bf16.msra.mxu1 %v10700_v62  ;;  %3731 = vmatprep.mubr.bf16.mxu1 %v14665_v3  ;;  %v2025_v54 = vld [vmem:[%s19940_s3 + $0x3b0] sm:$0xff]  ;;  %v10796_v62 = vcombine.low %v2029_v51, %v2033_v57 }
 0x313   :  { %3835 = vmatmul.mubr.bf16.gmra.mxu0 %v14648_v58  ;;  %3905 = vmatprep.subr.bf16.mxu1 %v10693_v28  ;;  %v2149_v7 = vld [vmem:[%s19940_s3 + $0x790] sm:$0xff]  ;;  %v10789_v28 = vcombine.high %v2021_v15, %v2025_v54 }
 0x314   :  { %4017 = vmatpush1.bf16.msra.mxu0 %v10828_v4  ;;  %3844 = vmatprep.mubr.bf16.mxu0 %v14670_v63  ;;  %v2153_v29 = vld [vmem:[%s19940_s3 + $0x7b0] sm:$0xff]  ;;  %v10924_v4 = vcombine.low %v2157_v19, %v2161_v30 }
 0x315   :  { %4018 = vmatprep.subr.bf16.mxu0 %v10821_v40  ;;  %v2013_v27 = vld [vmem:[%s19940_s3 + $0x350] sm:$0xff]  ;;  %v10917_v40 = vcombine.high %v2149_v7, %v2153_v29 }
 0x316   :  { %3906 = vmatpush1.bf16.msra.mxu1 %v10692_v20  ;;  %v2017_v22 = vld [vmem:[%s19940_s3 + $0x370] sm:$0xff]  ;;  %v10788_v20 = vcombine.low %v2021_v15, %v2025_v54 }
 0x317   :  { %3907 = vmatprep.subr.bf16.mxu1 %v10685_v48  ;;  %v2141_v9 = vld [vmem:[%s19940_s3 + $0x750] sm:$0xff]  ;;  %v10781_v48 = vcombine.high %v2013_v27, %v2017_v22 }
 0x318   :  { %4019 = vmatpush1.bf16.msra.mxu0 %v10820_v39  ;;  %v2145_v44 = vld [vmem:[%s19940_s3 + $0x770] sm:$0xff]  ;;  %v10916_v39 = vcombine.low %v2149_v7, %v2153_v29 }
 0x319   :  { %4020 = vmatprep.subr.bf16.mxu0 %v10813_v52  ;;  %3732 = vmatmul.mubr.bf16.gmra.mxu1 %v14691_v36  ;;  %v2005_v10 = vld [vmem:[%s19940_s3 + $0x310] sm:$0xff]  ;;  %v10909_v52 = vcombine.high %v2141_v9, %v2145_v44 }
 0x31a   :  { %3908 = vmatpush1.bf16.msra.mxu1 %v10684_v47  ;;  %3741 = vmatprep.mubr.bf16.mxu1 %v14719_v2  ;;  %v2009_v56 = vld [vmem:[%s19940_s3 + $0x330] sm:$0xff]  ;;  %v10780_v47 = vcombine.low %v2013_v27, %v2017_v22 }
 0x31b   :  { %3845 = vmatmul.mubr.bf16.gmra.mxu0 %v14714_v17  ;;  %3909 = vmatprep.subr.bf16.mxu1 %v10677_v43  ;;  %v2133_v0 = vld [vmem:[%s19940_s3 + $0x710] sm:$0xff]  ;;  %v10773_v43 = vcombine.high %v2005_v10, %v2009_v56 }
 0x31c   :  { %4021 = vmatpush1.bf16.msra.mxu0 %v10812_v11  ;;  %3854 = vmatprep.mubr.bf16.mxu0 %v14733_v5  ;;  %v2137_v14 = vld [vmem:[%s19940_s3 + $0x730] sm:$0xff]  ;;  %v10908_v11 = vcombine.low %v2141_v9, %v2145_v44 }
 0x31d   :  { %4022 = vmatprep.subr.bf16.mxu0 %v10805_v55  ;;  %v1997_v51 = vld [vmem:[%s19940_s3 + $0x2d0] sm:$0xff]  ;;  %v10901_v55 = vcombine.high %v2133_v0, %v2137_v14 }
 0x31e   :  { %3910 = vmatpush1.bf16.msra.mxu1 %v10676_v61  ;;  %v2001_v57 = vld [vmem:[%s19940_s3 + $0x2f0] sm:$0xff]  ;;  %v10772_v61 = vcombine.low %v2005_v10, %v2009_v56 }
 0x31f   :  { %3911 = vmatprep.subr.bf16.mxu1 %v10797_v34  ;;  %v2125_v19 = vld [vmem:[%s19940_s3 + $0x6d0] sm:$0xff]  ;;  %v10765_v34 = vcombine.high %v1997_v51, %v2001_v57 }
 0x320   :  { %4023 = vmatpush1.bf16.msra.mxu0 %v10804_v6  ;;  %v2129_v30 = vld [vmem:[%s19940_s3 + $0x6f0] sm:$0xff]  ;;  %v10900_v6 = vcombine.low %v2133_v0, %v2137_v14 }
 0x321   :  { %4024 = vmatprep.subr.bf16.mxu0 %v10925_v12  ;;  %3742 = vmatmul.mubr.bf16.gmra.mxu1 %v14741_v37  ;;  %v1989_v15 = vld [vmem:[%s19940_s3 + $0x290] sm:$0xff]  ;;  %v10893_v12 = vcombine.high %v2125_v19, %v2129_v30 }
 0x322   :  { %3912 = vmatpush2.bf16.msra.mxu1 %v10796_v62  ;;  %3751 = vmatprep.mubr.bf16.mxu1 %v14786_v35  ;;  %v1993_v54 = vld [vmem:[%s19940_s3 + $0x2b0] sm:$0xff]  ;;  %v10764_v62 = vcombine.low %v1997_v51, %v2001_v57  ;;  %v1966_v51 = vld [vmem:[%s19940_s3 + $0x1d8] sm:$0xff] }
 0x323   :  { %3855 = vmatmul.mubr.bf16.gmra.mxu0 %v14764_v53  ;;  %3913 = vmatprep.subr.bf16.mxu1 %v10789_v28  ;;  %v2117_v7 = vld [vmem:[%s19940_s3 + $0x690] sm:$0xff]  ;;  %v10757_v28 = vcombine.high %v1989_v15, %v1993_v54  ;;  %v1970_v57 = vld [vmem:[%s19940_s3 + $0x1f8] sm:$0xff] }
 0x324   :  { %4025 = vmatpush2.bf16.msra.mxu0 %v10924_v4  ;;  %3864 = vmatprep.mubr.bf16.mxu0 %v14795_v18  ;;  %v2121_v29 = vld [vmem:[%s19940_s3 + $0x6b0] sm:$0xff]  ;;  %v10892_v4 = vcombine.low %v2125_v19, %v2129_v30  ;;  %v2094_v19 = vld [vmem:[%s19940_s3 + $0x5d8] sm:$0xff] }
 0x325   :  { %4026 = vmatprep.subr.bf16.mxu0 %v10917_v40  ;;  %v1981_v27 = vld [vmem:[%s19940_s3 + $0x250] sm:$0xff]  ;;  %v10885_v40 = vcombine.high %v2117_v7, %v2121_v29  ;;  %v2098_v30 = vld [vmem:[%s19940_s3 + $0x5f8] sm:$0xff] }
 0x326   :  { %3914 = vmatpush2.bf16.msra.mxu1 %v10788_v20  ;;  %v1985_v22 = vld [vmem:[%s19940_s3 + $0x270] sm:$0xff]  ;;  %v10756_v20 = vcombine.low %v1989_v15, %v1993_v54  ;;  %v1958_v15 = vld [vmem:[%s19940_s3 + $0x198] sm:$0xff] }
 0x327   :  { %3915 = vmatprep.subr.bf16.mxu1 %v10781_v48  ;;  %v2109_v9 = vld [vmem:[%s19940_s3 + $0x650] sm:$0xff]  ;;  %v10749_v48 = vcombine.high %v1981_v27, %v1985_v22  ;;  %v1962_v54 = vld [vmem:[%s19940_s3 + $0x1b8] sm:$0xff] }
 0x328   :  { %4027 = vmatpush2.bf16.msra.mxu0 %v10916_v39  ;;  %v2113_v44 = vld [vmem:[%s19940_s3 + $0x670] sm:$0xff]  ;;  %v10884_v39 = vcombine.low %v2117_v7, %v2121_v29  ;;  %v2086_v7 = vld [vmem:[%s19940_s3 + $0x598] sm:$0xff] }
 0x329   :  { %4028 = vmatprep.subr.bf16.mxu0 %v10909_v52  ;;  %3752 = vmatmul.mubr.bf16.gmra.mxu1 %v14819_v59  ;;  %v1973_v10 = vld [vmem:[%s19940_s3 + $0x210] sm:$0xff]  ;;  %v10877_v52 = vcombine.high %v2109_v9, %v2113_v44  ;;  %v2090_v29 = vld [vmem:[%s19940_s3 + $0x5b8] sm:$0xff] }
 0x32a   :  { %3916 = vmatpush2.bf16.msra.mxu1 %v10780_v47  ;;  %3761 = vmatprep.mubr.bf16.mxu1 %v14850_v16  ;;  %v1977_v56 = vld [vmem:[%s19940_s3 + $0x230] sm:$0xff]  ;;  %v10748_v47 = vcombine.low %v1981_v27, %v1985_v22  ;;  %v1950_v27 = vld [vmem:[%s19940_s3 + $0x158] sm:$0xff] }
 0x32b   :  { %3865 = vmatmul.mubr.bf16.gmra.mxu0 %v14830_v32  ;;  %3917 = vmatprep.subr.bf16.mxu1 %v10773_v43  ;;  %v2101_v0 = vld [vmem:[%s19940_s3 + $0x610] sm:$0xff]  ;;  %v10741_v43 = vcombine.high %v1973_v10, %v1977_v56  ;;  %v1954_v22 = vld [vmem:[%s19940_s3 + $0x178] sm:$0xff] }
 0x32c   :  { %4029 = vmatpush2.bf16.msra.mxu0 %v10908_v11  ;;  %3874 = vmatprep.mubr.bf16.mxu0 %v14869_v50  ;;  %v2105_v14 = vld [vmem:[%s19940_s3 + $0x630] sm:$0xff]  ;;  %v10876_v11 = vcombine.low %v2109_v9, %v2113_v44  ;;  %v2078_v9 = vld [vmem:[%s19940_s3 + $0x558] sm:$0xff] }
 0x32d   :  { %4030 = vmatprep.subr.bf16.mxu0 %v10901_v55  ;;  %v10869_v55 = vcombine.high %v2101_v0, %v2105_v14  ;;  %v2082_v44 = vld [vmem:[%s19940_s3 + $0x578] sm:$0xff] }
 0x32e   :  { %3918 = vmatpush2.bf16.msra.mxu1 %v10772_v61  ;;  %v10740_v61 = vcombine.low %v1973_v10, %v1977_v56  ;;  %v1942_v10 = vld [vmem:[%s19940_s3 + $0x118] sm:$0xff] }
 0x32f   :  { %3919 = vmatprep.subr.bf16.mxu1 %v10765_v34  ;;  %v10735_v34 = vcombine.high %v1966_v51, %v1970_v57  ;;  %v1946_v56 = vld [vmem:[%s19940_s3 + $0x138] sm:$0xff] }
 0x330   :  { %4031 = vmatpush2.bf16.msra.mxu0 %v10900_v6  ;;  %v10868_v6 = vcombine.low %v2101_v0, %v2105_v14  ;;  %v2070_v0 = vld [vmem:[%s19940_s3 + $0x518] sm:$0xff] }
 0x331   :  { %4032 = vmatprep.subr.bf16.mxu0 %v10893_v12  ;;  %3762 = vmatmul.mubr.bf16.gmra.mxu1 %v14887_v24  ;;  %v10863_v12 = vcombine.high %v2094_v19, %v2098_v30  ;;  %v2074_v14 = vld [vmem:[%s19940_s3 + $0x538] sm:$0xff] }
 0x332   :  { %3920 = vmatpush2.bf16.msra.mxu1 %v10764_v62  ;;  %3771 = vmatprep.mubr.bf16.mxu1 %v14920_v46  ;;  %v10734_v62 = vcombine.low %v1966_v51, %v1970_v57  ;;  %v1934_v51 = vld [vmem:[%s19940_s3 + $0xd8] sm:$0xff] }
 0x333   :  { %3875 = vmatmul.mubr.bf16.gmra.mxu0 %v14902_v45  ;;  %3921 = vmatprep.subr.bf16.mxu1 %v10757_v28  ;;  %v10727_v28 = vcombine.high %v1958_v15, %v1962_v54  ;;  %v1938_v57 = vld [vmem:[%s19940_s3 + $0xf8] sm:$0xff] }
 0x334   :  { %4033 = vmatpush2.bf16.msra.mxu0 %v10892_v4  ;;  %3884 = vmatprep.mubr.bf16.mxu0 %v14929_v23  ;;  %v10862_v4 = vcombine.low %v2094_v19, %v2098_v30  ;;  %v2062_v19 = vld [vmem:[%s19940_s3 + $0x4d8] sm:$0xff] }
 0x335   :  { %4034 = vmatprep.subr.bf16.mxu0 %v10885_v40  ;;  %v10855_v40 = vcombine.high %v2086_v7, %v2090_v29  ;;  %v2066_v30 = vld [vmem:[%s19940_s3 + $0x4f8] sm:$0xff] }
 0x336   :  { %3922 = vmatpush2.bf16.msra.mxu1 %v10756_v20  ;;  %v10726_v20 = vcombine.low %v1958_v15, %v1962_v54  ;;  %v1926_v15 = vld [vmem:[%s19940_s3 + $0x98] sm:$0xff] }
 0x337   :  { %3923 = vmatprep.subr.bf16.mxu1 %v10749_v48  ;;  %v10719_v48 = vcombine.high %v1950_v27, %v1954_v22  ;;  %v1930_v54 = vld [vmem:[%s19940_s3 + $0xb8] sm:$0xff] }
 0x338   :  { %4035 = vmatpush2.bf16.msra.mxu0 %v10884_v39  ;;  %v10854_v39 = vcombine.low %v2086_v7, %v2090_v29  ;;  %v2054_v7 = vld [vmem:[%s19940_s3 + $0x498] sm:$0xff] }
 0x339   :  { %4036 = vmatprep.subr.bf16.mxu0 %v10877_v52  ;;  %3772 = vmatmul.mubr.bf16.gmra.mxu1 %v14944_v41  ;;  %v10847_v52 = vcombine.high %v2078_v9, %v2082_v44  ;;  %v2058_v29 = vld [vmem:[%s19940_s3 + $0x4b8] sm:$0xff] }
 0x33a   :  { %3924 = vmatpush2.bf16.msra.mxu1 %v10748_v47  ;;  %3927 = vmatprep.mubr.bf16.mxu1 %v14523_v26  ;;  %v10718_v47 = vcombine.low %v1950_v27, %v1954_v22  ;;  %v1918_v27 = vld [vmem:[%s19940_s3 + $0x58] sm:$0xff] }
 0x33b   :  { %3885 = vmatmul.mubr.bf16.gmra.mxu0 %v14947_v60  ;;  %3925 = vmatprep.subr.bf16.mxu1 %v10741_v43  ;;  %v10711_v43 = vcombine.high %v1942_v10, %v1946_v56  ;;  %v1922_v22 = vld [vmem:[%s19940_s3 + $0x78] sm:$0xff] }
 0x33c   :  { %4037 = vmatpush2.bf16.msra.mxu0 %v10876_v11  ;;  %4040 = vmatprep.mubr.bf16.mxu0 %v14527_v25  ;;  %v10846_v11 = vcombine.low %v2078_v9, %v2082_v44  ;;  %v2046_v9 = vld [vmem:[%s19940_s3 + $0x458] sm:$0xff] }
 0x33d   :  { %4038 = vmatprep.subr.bf16.mxu0 %v10869_v55  ;;  %v10839_v55 = vcombine.high %v2070_v0, %v2074_v14  ;;  %v2050_v44 = vld [vmem:[%s19940_s3 + $0x478] sm:$0xff] }
 0x33e   :  { %3926 = vmatpush2.bf16.msra.mxu1 %v10740_v61  ;;  %v10710_v61 = vcombine.low %v1942_v10, %v1946_v56  ;;  %v1910_v10 = vld [vmem:[%s19940_s3 + $0x18] sm:$0xff] }
 0x33f   :  { %4121 = vmatprep.subr.bf16.mxu1 %v10735_v34  ;;  %v10703_v34 = vcombine.high %v1934_v51, %v1938_v57  ;;  %v1914_v56 = vld [vmem:[%s19940_s3 + $0x38] sm:$0xff] }
 0x340   :  { %4039 = vmatpush2.bf16.msra.mxu0 %v10868_v6  ;;  %v10838_v6 = vcombine.low %v2070_v0, %v2074_v14  ;;  %v2038_v0 = vld [vmem:[%s19940_s3 + $0x418] sm:$0xff] }
 0x341   :  { %4234 = vmatprep.subr.bf16.mxu0 %v10863_v12  ;;  %3928 = vmatmul.mubr.bf16.vlgmr.msra.gmra.mxu1 %v14530_v1  ;;  %v10831_v12 = vcombine.high %v2062_v19, %v2066_v30  ;;  %v2042_v14 = vld [vmem:[%s19940_s3 + $0x438] sm:$0xff] }
 0x342   :  { %4122 = vmatpush1.bf16.msra.mxu1 %v10734_v62  ;;  %3937 = vmatprep.mubr.bf16.mxu1 %v14558_v21  ;;  %v10702_v62 = vcombine.low %v1934_v51, %v1938_v57  ;;  %v2030_v51 = vld [vmem:[%s19940_s3 + $0x3d8] sm:$0xff] }
 0x343   :  { %4041 = vmatmul.mubr.bf16.vlgmr.msra.gmra.mxu0 %v14544_v13  ;;  %4123 = vmatprep.subr.bf16.mxu1 %v10727_v28  ;;  %v10695_v28 = vcombine.high %v1926_v15, %v1930_v54  ;;  %v2034_v57 = vld [vmem:[%s19940_s3 + $0x3f8] sm:$0xff] }
 0x344   :  { %4235 = vmatpush1.bf16.msra.mxu0 %v10862_v4  ;;  %4050 = vmatprep.mubr.bf16.mxu0 %v14562_v8  ;;  %v10830_v4 = vcombine.low %v2062_v19, %v2066_v30  ;;  %v2158_v19 = vld [vmem:[%s19940_s3 + $0x7d8] sm:$0xff] }
 0x345   :  { %4236 = vmatprep.subr.bf16.mxu0 %v10855_v40  ;;  %v10823_v40 = vcombine.high %v2054_v7, %v2058_v29  ;;  %v2162_v30 = vld [vmem:[%s19940_s3 + $0x7f8] sm:$0xff] }
 0x346   :  { %4124 = vmatpush1.bf16.msra.mxu1 %v10726_v20  ;;  %v10694_v20 = vcombine.low %v1926_v15, %v1930_v54  ;;  %v2022_v15 = vld [vmem:[%s19940_s3 + $0x398] sm:$0xff] }
 0x347   :  { %4125 = vmatprep.subr.bf16.mxu1 %v10719_v48  ;;  %v10687_v48 = vcombine.high %v1918_v27, %v1922_v22  ;;  %v2026_v54 = vld [vmem:[%s19940_s3 + $0x3b8] sm:$0xff] }
 0x348   :  { %4237 = vmatpush1.bf16.msra.mxu0 %v10854_v39  ;;  %v10822_v39 = vcombine.low %v2054_v7, %v2058_v29  ;;  %v2150_v7 = vld [vmem:[%s19940_s3 + $0x798] sm:$0xff] }
 0x349   :  { %4238 = vmatprep.subr.bf16.mxu0 %v10847_v52  ;;  %3938 = vmatmul.mubr.bf16.gmra.mxu1 %v14588_v42  ;;  %v10815_v52 = vcombine.high %v2046_v9, %v2050_v44  ;;  %v2154_v29 = vld [vmem:[%s19940_s3 + $0x7b8] sm:$0xff] }
 0x34a   :  { %4126 = vmatpush1.bf16.msra.mxu1 %v10718_v47  ;;  %3947 = vmatprep.mubr.bf16.mxu1 %v14605_v38  ;;  %v10686_v47 = vcombine.low %v1918_v27, %v1922_v22  ;;  %v2014_v27 = vld [vmem:[%s19940_s3 + $0x358] sm:$0xff] }
 0x34b   :  { %4051 = vmatmul.mubr.bf16.gmra.mxu0 %v14600_v31  ;;  %4127 = vmatprep.subr.bf16.mxu1 %v10711_v43  ;;  %v10679_v43 = vcombine.high %v1910_v10, %v1914_v56  ;;  %v2018_v22 = vld [vmem:[%s19940_s3 + $0x378] sm:$0xff] }
 0x34c   :  { %4239 = vmatpush1.bf16.msra.mxu0 %v10846_v11  ;;  %4060 = vmatprep.mubr.bf16.mxu0 %v14620_v49  ;;  %v10814_v11 = vcombine.low %v2046_v9, %v2050_v44  ;;  %v2142_v9 = vld [vmem:[%s19940_s3 + $0x758] sm:$0xff] }
 0x34d   :  { %4240 = vmatprep.subr.bf16.mxu0 %v10839_v55  ;;  %v10807_v55 = vcombine.high %v2038_v0, %v2042_v14  ;;  %v2146_v44 = vld [vmem:[%s19940_s3 + $0x778] sm:$0xff] }
 0x34e   :  { %4128 = vmatpush1.bf16.msra.mxu1 %v10710_v61  ;;  %v10678_v61 = vcombine.low %v1910_v10, %v1914_v56  ;;  %v2006_v10 = vld [vmem:[%s19940_s3 + $0x318] sm:$0xff] }
 0x34f   :  { %4129 = vmatprep.subr.bf16.mxu1 %v10703_v34  ;;  %v10799_v34 = vcombine.high %v2030_v51, %v2034_v57  ;;  %v2010_v56 = vld [vmem:[%s19940_s3 + $0x338] sm:$0xff] }
 0x350   :  { %4241 = vmatpush1.bf16.msra.mxu0 %v10838_v6  ;;  %v10806_v6 = vcombine.low %v2038_v0, %v2042_v14  ;;  %v2134_v0 = vld [vmem:[%s19940_s3 + $0x718] sm:$0xff] }
 0x351   :  { %4242 = vmatprep.subr.bf16.mxu0 %v10831_v12  ;;  %3948 = vmatmul.mubr.bf16.gmra.mxu1 %v14643_v33  ;;  %v10927_v12 = vcombine.high %v2158_v19, %v2162_v30  ;;  %v2138_v14 = vld [vmem:[%s19940_s3 + $0x738] sm:$0xff] }
 0x352   :  { %4130 = vmatpush1.bf16.msra.mxu1 %v10702_v62  ;;  %3957 = vmatprep.mubr.bf16.mxu1 %v14665_v3  ;;  %v10798_v62 = vcombine.low %v2030_v51, %v2034_v57  ;;  %v1998_v51 = vld [vmem:[%s19940_s3 + $0x2d8] sm:$0xff] }
 0x353   :  { %4061 = vmatmul.mubr.bf16.gmra.mxu0 %v14648_v58  ;;  %4131 = vmatprep.subr.bf16.mxu1 %v10695_v28  ;;  %v10791_v28 = vcombine.high %v2022_v15, %v2026_v54  ;;  %v2002_v57 = vld [vmem:[%s19940_s3 + $0x2f8] sm:$0xff] }
 0x354   :  { %4243 = vmatpush1.bf16.msra.mxu0 %v10830_v4  ;;  %4070 = vmatprep.mubr.bf16.mxu0 %v14670_v63  ;;  %v10926_v4 = vcombine.low %v2158_v19, %v2162_v30  ;;  %v2126_v19 = vld [vmem:[%s19940_s3 + $0x6d8] sm:$0xff] }
 0x355   :  { %4244 = vmatprep.subr.bf16.mxu0 %v10823_v40  ;;  %v10919_v40 = vcombine.high %v2150_v7, %v2154_v29  ;;  %v2130_v30 = vld [vmem:[%s19940_s3 + $0x6f8] sm:$0xff] }
 0x356   :  { %4132 = vmatpush1.bf16.msra.mxu1 %v10694_v20  ;;  %v10790_v20 = vcombine.low %v2022_v15, %v2026_v54  ;;  %v1990_v15 = vld [vmem:[%s19940_s3 + $0x298] sm:$0xff] }
 0x357   :  { %4133 = vmatprep.subr.bf16.mxu1 %v10687_v48  ;;  %v10783_v48 = vcombine.high %v2014_v27, %v2018_v22  ;;  %v1994_v54 = vld [vmem:[%s19940_s3 + $0x2b8] sm:$0xff] }
 0x358   :  { %4245 = vmatpush1.bf16.msra.mxu0 %v10822_v39  ;;  %v10918_v39 = vcombine.low %v2150_v7, %v2154_v29  ;;  %v2118_v7 = vld [vmem:[%s19940_s3 + $0x698] sm:$0xff] }
 0x359   :  { %4246 = vmatprep.subr.bf16.mxu0 %v10815_v52  ;;  %3958 = vmatmul.mubr.bf16.gmra.mxu1 %v14691_v36  ;;  %v10911_v52 = vcombine.high %v2142_v9, %v2146_v44  ;;  %v2122_v29 = vld [vmem:[%s19940_s3 + $0x6b8] sm:$0xff] }
 0x35a   :  { %4134 = vmatpush1.bf16.msra.mxu1 %v10686_v47  ;;  %3967 = vmatprep.mubr.bf16.mxu1 %v14719_v2  ;;  %v10782_v47 = vcombine.low %v2014_v27, %v2018_v22  ;;  %v1982_v27 = vld [vmem:[%s19940_s3 + $0x258] sm:$0xff] }
 0x35b   :  { %4071 = vmatmul.mubr.bf16.gmra.mxu0 %v14714_v17  ;;  %4135 = vmatprep.subr.bf16.mxu1 %v10679_v43  ;;  %v10775_v43 = vcombine.high %v2006_v10, %v2010_v56  ;;  %v1986_v22 = vld [vmem:[%s19940_s3 + $0x278] sm:$0xff] }
 0x35c   :  { %4247 = vmatpush1.bf16.msra.mxu0 %v10814_v11  ;;  %4080 = vmatprep.mubr.bf16.mxu0 %v14733_v5  ;;  %v10910_v11 = vcombine.low %v2142_v9, %v2146_v44  ;;  %v2110_v9 = vld [vmem:[%s19940_s3 + $0x658] sm:$0xff] }
 0x35d   :  { %4248 = vmatprep.subr.bf16.mxu0 %v10807_v55  ;;  %v10903_v55 = vcombine.high %v2134_v0, %v2138_v14  ;;  %v2114_v44 = vld [vmem:[%s19940_s3 + $0x678] sm:$0xff] }
 0x35e   :  { %4136 = vmatpush1.bf16.msra.mxu1 %v10678_v61  ;;  %v10774_v61 = vcombine.low %v2006_v10, %v2010_v56  ;;  %v10886_v10 = vcombine.low %v2118_v7, %v2122_v29  ;;  %v1974_v56 = vld [vmem:[%s19940_s3 + $0x218] sm:$0xff] }
 0x35f   :  { %4137 = vmatprep.subr.bf16.mxu1 %v10799_v34  ;;  %v10767_v34 = vcombine.high %v1998_v51, %v2002_v57 }
 0x360   :  { %4249 = vmatpush1.bf16.msra.mxu0 %v10806_v6  ;;  %v10902_v6 = vcombine.low %v2134_v0, %v2138_v14  ;;  %v10750_v14 = vcombine.low %v1982_v27, %v1986_v22 }
 0x361   :  { %4250 = vmatprep.subr.bf16.mxu0 %v10927_v12  ;;  %3968 = vmatmul.mubr.bf16.gmra.mxu1 %v14741_v37  ;;  %v10895_v12 = vcombine.high %v2126_v19, %v2130_v30 }
 0x362   :  { %4138 = vmatpush2.bf16.msra.mxu1 %v10798_v62  ;;  %3977 = vmatprep.mubr.bf16.mxu1 %v14786_v35  ;;  %v10766_v62 = vcombine.low %v1998_v51, %v2002_v57 }
 0x363   :  { %4081 = vmatmul.mubr.bf16.gmra.mxu0 %v14764_v53  ;;  %4139 = vmatprep.subr.bf16.mxu1 %v10791_v28  ;;  %v10759_v28 = vcombine.high %v1990_v15, %v1994_v54 }
 0x364   :  { %4251 = vmatpush2.bf16.msra.mxu0 %v10926_v4  ;;  %4090 = vmatprep.mubr.bf16.mxu0 %v14795_v18  ;;  %v10894_v4 = vcombine.low %v2126_v19, %v2130_v30  ;;  %v10878_v19 = vcombine.low %v2110_v9, %v2114_v44 }
 0x365   :  { %4252 = vmatprep.subr.bf16.mxu0 %v10919_v40  ;;  %v10887_v40 = vcombine.high %v2118_v7, %v2122_v29 }
 0x366   :  { %4140 = vmatpush2.bf16.msra.mxu1 %v10790_v20  ;;  %v10758_v20 = vcombine.low %v1990_v15, %v1994_v54 }
 0x367   :  { %4141 = vmatprep.subr.bf16.mxu1 %v10783_v48  ;;  %v10751_v48 = vcombine.high %v1982_v27, %v1986_v22  ;;  %v3590_v51 = vpop.f32.mrf.mxu0 }
 0x368   :  { %4253 = vmatpush2.bf16.msra.mxu0 %v10918_v39  ;;  %v3477_v39 = vpop.f32.mrf.mxu1 }
 0x369   :  { %4254 = vmatprep.subr.bf16.mxu0 %v10911_v52  ;;  %3978 = vmatmul.mubr.bf16.gmra.mxu1 %v14819_v59  ;;  %v1978_v52 = vld [vmem:[%s19940_s3 + $0x238] sm:$0xff]  ;;  %v3592_v30 = vpop.f32.mrf.mxu0 }
 0x36a   :  { %4142 = vmatpush2.bf16.msra.mxu1 %v10782_v47  ;;  %3987 = vmatprep.mubr.bf16.mxu1 %v14850_v16  ;;  %v10879_v47 = vcombine.high %v2110_v9, %v2114_v44  ;;  %v3479_v0 = vpop.f32.mrf.mxu1  ;;  %v10743_v57 = vcombine.high %v1974_v56, %v1978_v52  ;;  %v10742_v54 = vcombine.low %v1974_v56, %v1978_v52 }
 0x36b   :  { %4091 = vmatmul.mubr.bf16.gmra.mxu0 %v14830_v32  ;;  %4143 = vmatprep.subr.bf16.mxu1 %v10775_v43  ;;  %v2102_v43 = vld [vmem:[%s19940_s3 + $0x618] sm:$0xff] }
 0x36c   :  { %4255 = vmatpush2.bf16.msra.mxu0 %v10910_v11  ;;  %4100 = vmatprep.mubr.bf16.mxu0 %v14869_v50  ;;  %v2106_v11 = vld [vmem:[%s19940_s3 + $0x638] sm:$0xff] }
 0x36d   :  { %4256 = vmatprep.subr.bf16.mxu0 %v10903_v55  ;;  %v15388_v55 = vadd.f32 %v3590_v51, %v3477_v39  ;;  %v10870_v7 = vcombine.low %v2102_v43, %v2106_v11 }
 0x36e   :  { %4144 = vmatpush2.bf16.msra.mxu1 %v10774_v61  ;;  %v3481_v61 = vpop.f32.mrf.mxu1 }
 0x36f   :  { %4145 = vmatprep.subr.bf16.mxu1 %v10767_v34  ;;  %20676 = vst [vmem:[#allocation14_spill] sm:$0xff] %v15388_v55  ;;  %v10871_v34 = vcombine.high %v2102_v43, %v2106_v11 }
 0x370   :  { %4257 = vmatpush2.bf16.msra.mxu0 %v10902_v6  ;;  %v15391_v6 = vadd.f32 %v3592_v30, %v3479_v0  ;;  %v3483_v15 = vpop.f32.mrf.mxu1 }
 0x371   :  { %4258 = vmatprep.subr.bf16.mxu0 %v10895_v12  ;;  %3988 = vmatmul.mubr.bf16.gmra.mxu1 %v14887_v24  ;;  %v3594_v12 = vpop.f32.mrf.mxu0 }
 0x372   :  { %4146 = vmatpush2.bf16.msra.mxu1 %v10766_v62  ;;  %3997 = vmatprep.mubr.bf16.mxu1 %v14920_v46  ;;  %20677 = vst [vmem:[#allocation22_spill] sm:$0xff] %v15391_v6  ;;  %v15395_v62 = vadd.f32 %v3594_v12, %v3481_v61 }
 0x373   :  { %4101 = vmatmul.mubr.bf16.gmra.mxu0 %v14902_v45  ;;  %4147 = vmatprep.subr.bf16.mxu1 %v10759_v28  ;;  %v3596_v29 = vpop.f32.mrf.mxu0 }
 0x374   :  { %4259 = vmatpush2.bf16.msra.mxu0 %v10894_v4  ;;  %4110 = vmatprep.mubr.bf16.mxu0 %v14929_v23  ;;  %20678 = vst [vmem:[#allocation19_spill] sm:$0xff] %v15395_v62  ;;  %v15398_v28 = vadd.f32 %v3596_v29, %v3483_v15  ;;  %v3487_v4 = vpop.f32.mrf.mxu1 }
 0x375   :  { %4260 = vmatprep.subr.bf16.mxu0 %v10887_v40 }
 0x376   :  { %4148 = vmatpush2.bf16.msra.mxu1 %v10758_v20  ;;  %20679 = vst [vmem:[#allocation23_spill] sm:$0xff] %v15398_v28  ;;  %v3489_v27 = vpop.f32.mrf.mxu1 }
 0x377   :  { %4149 = vmatprep.subr.bf16.mxu1 %v10751_v48 }
 0x378   :  { %4261 = vmatpush2.bf16.msra.mxu0 %v10886_v10  ;;  %v3491_v40 = vpop.f32.mrf.mxu1 }
 0x379   :  { %4262 = vmatprep.subr.bf16.mxu0 %v10879_v47  ;;  %3998 = vmatmul.mubr.bf16.gmra.mxu1 %v14944_v41 }
 0x37a   :  { %4150 = vmatpush2.bf16.msra.mxu1 %v10750_v14  ;;  %4153 = vmatprep.mubr.bf16.mxu1 %v14523_v26  ;;  %v3600_v26 = vpop.f32.mrf.mxu0  ;;  %v3493_v9 = vpop.f32.mrf.mxu1 }
 0x37b   :  { %4111 = vmatmul.mubr.bf16.gmra.mxu0 %v14947_v60  ;;  %4151 = vmatprep.subr.bf16.mxu1 %v10743_v57  ;;  %v15401_v22 = vadd.f32 %v3600_v26, %v3487_v4 }
 0x37c   :  { %4263 = vmatpush2.bf16.msra.mxu0 %v10878_v19  ;;  %4266 = vmatprep.mubr.bf16.mxu0 %v14527_v25  ;;  %v3602_v20 = vpop.f32.mrf.mxu0 }
 0x37d   :  { %4264 = vmatprep.subr.bf16.mxu0 %v10871_v34  ;;  %20680 = vst [vmem:[#allocation17_spill] sm:$0xff] %v15401_v22  ;;  %v15405_v25 = vadd.f32 %v3602_v20, %v3489_v27 }
 0x37e   :  { %4152 = vmatpush2.bf16.msra.mxu1 %v10742_v54  ;;  %v3604_v44 = vpop.f32.mrf.mxu0 }
 0x37f   :  { %20681 = vst [vmem:[#allocation20_spill] sm:$0xff] %v15405_v25  ;;  %v15408_v48 = vadd.f32 %v3604_v44, %v3491_v40 }
 0x380   :  { %4265 = vmatpush2.bf16.msra.mxu0 %v10870_v7  ;;  %v3606_v39 = vpop.f32.mrf.mxu0 }
 0x381   :  { %4154 = vmatmul.mubr.bf16.vlgmr.msra.gmra.mxu1 %v14530_v1  ;;  %20682 = vst [vmem:[#allocation18_spill] sm:$0xff] %v15408_v48  ;;  %v15410_v10 = vadd.f32 %v3606_v39, %v3493_v9  ;;  %v3497_v1 = vpop.f32.mrf.mxu1 }
 0x382   :  { %4163 = vmatprep.mubr.bf16.mxu1 %v14558_v21  ;;  %v3610_v56 = vpop.f32.mrf.mxu0 }
 0x383   :  { %4267 = vmatmul.mubr.bf16.vlgmr.msra.gmra.mxu0 %v14544_v13  ;;  %20683 = vst [vmem:[#allocation21_spill] sm:$0xff] %v15410_v10  ;;  %v15413_v52 = vadd.f32 %v3610_v56, %v3497_v1  ;;  %v3499_v21 = vpop.f32.mrf.mxu1 }
 0x384   :  { %4276 = vmatprep.mubr.bf16.mxu0 %v14562_v8  ;;  %v3612_v13 = vpop.f32.mrf.mxu0 }
 0x385   :  { %20684 = vst [vmem:[#allocation26_spill] sm:$0xff] %v15413_v52  ;;  %v15417_v47 = vadd.f32 %v3612_v13, %v3499_v21  ;;  %v3501_v8 = vpop.f32.mrf.mxu1 }
 0x386   :  { %v3614_v0 = vpop.f32.mrf.mxu0 }
 0x387   :  { %20685 = vst [vmem:[#allocation30_spill] sm:$0xff] %v15417_v47  ;;  %v15420_v14 = vadd.f32 %v3614_v0, %v3501_v8  ;;  %v3503_v43 = vpop.f32.mrf.mxu1 }
 0x388   :  { %v3616_v11 = vpop.f32.mrf.mxu0 }
 0x389   :  { %4164 = vmatmul.mubr.bf16.gmra.mxu1 %v14588_v42  ;;  %20686 = vst [vmem:[#allocation27_spill] sm:$0xff] %v15420_v14  ;;  %v15422_v51 = vadd.f32 %v3616_v11, %v3503_v43  ;;  %v3507_v42 = vpop.f32.mrf.mxu1 }
 0x38a   :  { %4173 = vmatprep.mubr.bf16.mxu1 %v14605_v38 }
 0x38b   :  { %4277 = vmatmul.mubr.bf16.gmra.mxu0 %v14600_v31  ;;  %20687 = vst [vmem:[#allocation31_spill] sm:$0xff] %v15422_v51  ;;  %v3509_v57 = vpop.f32.mrf.mxu1  ;;  %v3620_v31 = vpop.f32.mrf.mxu0 }
 0x38c   :  { %4286 = vmatprep.mubr.bf16.mxu0 %v14620_v49  ;;  %v15428_v49 = vadd.f32 %v3620_v31, %v3507_v42 }
 0x38d   :  { %v3511_v38 = vpop.f32.mrf.mxu1  ;;  %v3622_v61 = vpop.f32.mrf.mxu0 }
 0x38e   :  { %20688 = vst [vmem:[#allocation11_spill] sm:$0xff] %v15428_v49  ;;  %v15430_v30 = vadd.f32 %v3622_v61, %v3509_v57 }
 0x38f   :  { %v3513_v19 = vpop.f32.mrf.mxu1  ;;  %v3624_v34 = vpop.f32.mrf.mxu0 }
 0x390   :  { %20689 = vst [vmem:[#allocation12_spill] sm:$0xff] %v15430_v30  ;;  %v15432_v15 = vadd.f32 %v3624_v34, %v3511_v38 }
 0x391   :  { %4174 = vmatmul.mubr.bf16.gmra.mxu1 %v14643_v33  ;;  %v3517_v54 = vpop.f32.mrf.mxu1  ;;  %v3626_v33 = vpop.f32.mrf.mxu0 }
 0x392   :  { %4183 = vmatprep.mubr.bf16.mxu1 %v14665_v3  ;;  %20690 = vst [vmem:[#allocation15_spill] sm:$0xff] %v15432_v15 }
 0x393   :  { %4287 = vmatmul.mubr.bf16.gmra.mxu0 %v14648_v58  ;;  %v15436_v58 = vadd.f32 %v3626_v33, %v3513_v19  ;;  %v3519_v3 = vpop.f32.mrf.mxu1 }
 0x394   :  { %4296 = vmatprep.mubr.bf16.mxu0 %v14670_v63 }
 0x395   :  { %20691 = vst [vmem:[#allocation16_spill] sm:$0xff] %v15436_v58  ;;  %v3521_v7 = vpop.f32.mrf.mxu1 }
 0x396   :  { %v3630_v63 = vpop.f32.mrf.mxu0 }
 0x397   :  { %v15440_v12 = vadd.f32 %v3630_v63, %v3517_v54 }
 0x398   :  { %v3632_v29 = vpop.f32.mrf.mxu0 }
 0x399   :  { %4184 = vmatmul.mubr.bf16.gmra.mxu1 %v14691_v36  ;;  %20692 = vst [vmem:[#allocation47_spill] sm:$0xff] %v15440_v12  ;;  %v15442_v4 = vadd.f32 %v3632_v29, %v3519_v3  ;;  %v15446_v36 = vpop.f32.mrf.mxu1 }
 0x39a   :  { %4193 = vmatprep.mubr.bf16.mxu1 %v14719_v2  ;;  %v3634_v27 = vpop.f32.mrf.mxu0 }
 0x39b   :  { %4297 = vmatmul.mubr.bf16.gmra.mxu0 %v14714_v17  ;;  %20693 = vst [vmem:[#allocation48_spill] sm:$0xff] %v15442_v4  ;;  %v15444_v26 = vadd.f32 %v3634_v27, %v3521_v7 }
 0x39c   :  { %4306 = vmatprep.mubr.bf16.mxu0 %v14733_v5  ;;  %v15450_v2 = vpop.f32.mrf.mxu0 }
 0x39d   :  { %20694 = vst [vmem:[#allocation49_spill] sm:$0xff] %v15444_v26 }
 0x3a0   :  { %v3527_v17 = vpop.f32.mrf.mxu1 }
 0x3a1   :  { %4194 = vmatmul.mubr.bf16.gmra.mxu1 %v14741_v37 }
 0x3a2   :  { %4203 = vmatprep.mubr.bf16.mxu1 %v14786_v35  ;;  %v3640_v5 = vpop.f32.mrf.mxu0  ;;  %v3529_v40 = vpop.f32.mrf.mxu1 }
 0x3a3   :  { %4307 = vmatmul.mubr.bf16.gmra.mxu0 %v14764_v53  ;;  %v15454_v20 = vadd.f32 %v3640_v5, %v3527_v17 }
 0x3a4   :  { %4316 = vmatprep.mubr.bf16.mxu0 %v14795_v18  ;;  %v3642_v9 = vpop.f32.mrf.mxu0  ;;  %v3531_v44 = vpop.f32.mrf.mxu1 }
 0x3a5   :  { %20695 = vst [vmem:[#allocation50_spill] sm:$0xff] %v15454_v20  ;;  %v15457_v39 = vadd.f32 %v3642_v9, %v3529_v40 }
 0x3a6   :  { %v3644_v37 = vpop.f32.mrf.mxu0  ;;  %v15463_v53 = vpop.f32.mrf.mxu1 }
 0x3a7   :  { %20696 = vst [vmem:[#allocation51_spill] sm:$0xff] %v15457_v39  ;;  %v15461_v35 = vadd.f32 %v3644_v37, %v3531_v44 }
 0x3a8   :  { %v15466_v18 = vpop.f32.mrf.mxu0 }
 0x3a9   :  { %4204 = vmatmul.mubr.bf16.gmra.mxu1 %v14819_v59  ;;  %20697 = vst [vmem:[#allocation52_spill] sm:$0xff] %v15461_v35 }
 0x3aa   :  { %4213 = vmatprep.mubr.bf16.mxu1 %v14850_v16 }
 0x3ab   :  { %4317 = vmatmul.mubr.bf16.gmra.mxu0 %v14830_v32 }
 0x3ac   :  { %4326 = vmatprep.mubr.bf16.mxu0 %v14869_v50 }
 0x3ad   :  { %v3537_v1 = vpop.f32.mrf.mxu1 }
 0x3af   :  { %v3539_v59 = vpop.f32.mrf.mxu1 }
 0x3b0   :  { %v3650_v56 = vpop.f32.mrf.mxu0 }
 0x3b1   :  { %4214 = vmatmul.mubr.bf16.gmra.mxu1 %v14887_v24  ;;  %v15469_v21 = vadd.f32 %v3650_v56, %v3537_v1  ;;  %v3541_v16 = vpop.f32.mrf.mxu1 }
 0x3b2   :  { %4223 = vmatprep.mubr.bf16.mxu1 %v14920_v46  ;;  %v3652_v32 = vpop.f32.mrf.mxu0 }
 0x3b3   :  { %20698 = vst [vmem:[#allocation53_spill] sm:$0xff] %v15469_v21  ;;  %4327 = vmatmul.mubr.bf16.gmra.mxu0 %v14902_v45  ;;  %v15474_v13 = vadd.f32 %v3652_v32, %v3539_v59  ;;  %v15476_v8 = vpop.f32.mrf.mxu1 }
 0x3b4   :  { %4336 = vmatprep.mubr.bf16.mxu0 %v14929_v23  ;;  %v3654_v50 = vpop.f32.mrf.mxu0 }
 0x3b5   :  { %20699 = vst [vmem:[#allocation54_spill] sm:$0xff] %v15474_v13  ;;  %v15478_v0 = vadd.f32 %v3654_v50, %v3541_v16 }
 0x3b6   :  { %v15480_v43 = vpop.f32.mrf.mxu0 }
 0x3b7   :  { %20700 = vst [vmem:[#allocation55_spill] sm:$0xff] %v15478_v0 }
 0x3b9   :  { %v3547_v24 = vpop.f32.mrf.mxu1  ;;  %4224 = vmatmul.mubr.bf16.gmra.mxu1 %v14944_v41 }
 0x3bb   :  { %v3660_v11 = vpop.f32.mrf.mxu0  ;;  %4337 = vmatmul.mubr.bf16.gmra.mxu0 %v14947_v60  ;;  %v3549_v45 = vpop.f32.mrf.mxu1 }
 0x3bc   :  { %v15484_v46 = vadd.f32 %v3660_v11, %v3547_v24 }
 0x3bd   :  { %v3662_v42 = vpop.f32.mrf.mxu0  ;;  %v3551_v23 = vpop.f32.mrf.mxu1 }
 0x3be   :  { %20701 = vst [vmem:[#allocation56_spill] sm:$0xff] %v15484_v46  ;;  %v15486_v57 = vadd.f32 %v3662_v42, %v3549_v45 }
 0x3bf   :  { %v3664_v31 = vpop.f32.mrf.mxu0  ;;  %v15488_v38 = vpop.f32.mrf.mxu1 }
 0x3c0   :  { %20702 = vst [vmem:[#allocation57_spill] sm:$0xff] %v15486_v57  ;;  %v15490_v61 = vadd.f32 %v3664_v31, %v3551_v23 }
 0x3c1   :  { %v15492_v19 = vpop.f32.mrf.mxu0  ;;  %v3703_v34 = vpop.f32.mrf.mxu1 }
 0x3c2   :  { %20703 = vst [vmem:[#allocation58_spill] sm:$0xff] %v15490_v61 }
 0x3c3   :  { %v3816_v54 = vpop.f32.mrf.mxu0  ;;  %v3705_v41 = vpop.f32.mrf.mxu1 }
 0x3c4   :  { %v15494_v33 = vadd.f32 %v3816_v54, %v3703_v34 }
 0x3c5   :  { %v3818_v60 = vpop.f32.mrf.mxu0  ;;  %v3707_v3 = vpop.f32.mrf.mxu1 }
 0x3c6   :  { %20704 = vst [vmem:[#allocation61_spill] sm:$0xff] %v15494_v33  ;;  %v15496_v63 = vadd.f32 %v3818_v60, %v3705_v41 }
 0x3c7   :  { %v3820_v7 = vpop.f32.mrf.mxu0  ;;  %v15498_v29 = vpop.f32.mrf.mxu1 }
 0x3c8   :  { %20705 = vst [vmem:[#allocation62_spill] sm:$0xff] %v15496_v63  ;;  %v15500_v27 = vadd.f32 %v3820_v7, %v3707_v3 }
 0x3c9   :  { %v15502_v17 = vpop.f32.mrf.mxu0  ;;  %v3713_v5 = vpop.f32.mrf.mxu1 }
 0x3ca   :  { %20706 = vst [vmem:[#allocation63_spill] sm:$0xff] %v15500_v27 }
 0x3cb   :  { %v3826_v40 = vpop.f32.mrf.mxu0  ;;  %v3715_v9 = vpop.f32.mrf.mxu1 }
 0x3cc   :  { %v15504_v44 = vadd.f32 %v3826_v40, %v3713_v5 }
 0x3cd   :  { %v3828_v37 = vpop.f32.mrf.mxu0  ;;  %v3717_v1 = vpop.f32.mrf.mxu1 }
 0x3ce   :  { %20707 = vst [vmem:[#allocation64_spill] sm:$0xff] %v15504_v44  ;;  %v15506_v56 = vadd.f32 %v3828_v37, %v3715_v9 }
 0x3cf   :  { %v3830_v59 = vpop.f32.mrf.mxu0  ;;  %v15508_v32 = vpop.f32.mrf.mxu1 }
 0x3d0   :  { %20708 = vst [vmem:[#allocation65_spill] sm:$0xff] %v15506_v56  ;;  %v15510_v16 = vadd.f32 %v3830_v59, %v3717_v1 }
 0x3d1   :  { %v15512_v50 = vpop.f32.mrf.mxu0  ;;  %v3723_v24 = vpop.f32.mrf.mxu1 }
 0x3d2   :  { %20709 = vst [vmem:[#allocation66_spill] sm:$0xff] %v15510_v16 }
 0x3d3   :  { %v3836_v11 = vpop.f32.mrf.mxu0  ;;  %v3725_v45 = vpop.f32.mrf.mxu1 }
 0x3d4   :  { %v15514_v42 = vadd.f32 %v3836_v11, %v3723_v24 }
 0x3d5   :  { %v3838_v23 = vpop.f32.mrf.mxu0  ;;  %v3727_v31 = vpop.f32.mrf.mxu1 }
 0x3d6   :  { %20710 = vst [vmem:[#allocation67_spill] sm:$0xff] %v15514_v42  ;;  %v15516_v34 = vadd.f32 %v3838_v23, %v3725_v45 }
 0x3d7   :  { %v3840_v54 = vpop.f32.mrf.mxu0  ;;  %v15518_v41 = vpop.f32.mrf.mxu1 }
 0x3d8   :  { %20711 = vst [vmem:[#allocation68_spill] sm:$0xff] %v15516_v34  ;;  %20712 = vst [vmem:[#allocation69_spill] sm:$0xff] %v15518_v41  ;;  %v15520_v60 = vadd.f32 %v3840_v54, %v3727_v31 }
 0x3d9   :  { %v15522_v3 = vpop.f32.mrf.mxu0  ;;  %v3733_v7 = vpop.f32.mrf.mxu1 }
 0x3da   :  { %20713 = vst [vmem:[#allocation70_spill] sm:$0xff] %v15520_v60  ;;  %20714 = vst [vmem:[#allocation71_spill] sm:$0xff] %v15522_v3 }
 0x3db   :  { %v3846_v5 = vpop.f32.mrf.mxu0  ;;  %v3735_v40 = vpop.f32.mrf.mxu1 }
 0x3dc   :  { %v15524_v9 = vadd.f32 %v3846_v5, %v3733_v7 }
 0x3dd   :  { %v3848_v37 = vpop.f32.mrf.mxu0  ;;  %v3737_v1 = vpop.f32.mrf.mxu1 }
 0x3de   :  { %20715 = vst [vmem:[#allocation72_spill] sm:$0xff] %v15524_v9  ;;  %v15526_v59 = vadd.f32 %v3848_v37, %v3735_v40 }
 0x3df   :  { %v3850_v24 = vpop.f32.mrf.mxu0  ;;  %v15528_v11 = vpop.f32.mrf.mxu1 }
 0x3e0   :  { %20716 = vst [vmem:[#allocation73_spill] sm:$0xff] %v15526_v59  ;;  %20717 = vst [vmem:[#allocation8_spill] sm:$0xff] %v15528_v11  ;;  %v15530_v45 = vadd.f32 %v3850_v24, %v3737_v1 }
 0x3e1   :  { %v15532_v23 = vpop.f32.mrf.mxu0  ;;  %v3743_v31 = vpop.f32.mrf.mxu1 }
 0x3e2   :  { %20718 = vst [vmem:[#allocation74_spill] sm:$0xff] %v15530_v45  ;;  %20719 = vst [vmem:[#allocation75_spill] sm:$0xff] %v15532_v23 }
 0x3e3   :  { %v3856_v54 = vpop.f32.mrf.mxu0  ;;  %v3745_v60 = vpop.f32.mrf.mxu1 }
 0x3e4   :  { %v15534_v34 = vadd.f32 %v3856_v54, %v3743_v31 }
 0x3e5   :  { %v3858_v42 = vpop.f32.mrf.mxu0  ;;  %v3747_v3 = vpop.f32.mrf.mxu1 }
 0x3e6   :  { %20720 = vst [vmem:[#allocation76_spill] sm:$0xff] %v15534_v34  ;;  %v15536_v7 = vadd.f32 %v3858_v42, %v3745_v60 }
 0x3e7   :  { %v3860_v5 = vpop.f32.mrf.mxu0  ;;  %v15538_v9 = vpop.f32.mrf.mxu1 }
 0x3e8   :  { %20721 = vst [vmem:[#allocation77_spill] sm:$0xff] %v15536_v7  ;;  %20722 = vst [vmem:[#allocation9_spill] sm:$0xff] %v15538_v9  ;;  %v15540_v40 = vadd.f32 %v3860_v5, %v3747_v3 }
 0x3e9   :  { %v15542_v37 = vpop.f32.mrf.mxu0  ;;  %v3753_v1 = vpop.f32.mrf.mxu1 }
 0x3ea   :  { %20723 = vst [vmem:[#allocation6_spill] sm:$0xff] %v15540_v40  ;;  %20724 = vst [vmem:[#allocation7_spill] sm:$0xff] %v15542_v37 }
 0x3eb   :  { %v3866_v24 = vpop.f32.mrf.mxu0  ;;  %v3755_v45 = vpop.f32.mrf.mxu1 }
 0x3ec   :  { %v15544_v59 = vadd.f32 %v3866_v24, %v3753_v1 }
 0x3ed   :  { %v3868_v23 = vpop.f32.mrf.mxu0  ;;  %v3757_v11 = vpop.f32.mrf.mxu1 }
 0x3ee   :  { %20725 = vst [vmem:[#allocation13_spill] sm:$0xff] %v15544_v59  ;;  %v15546_v31 = vadd.f32 %v3868_v23, %v3755_v45  ;;  %v4531_v45 = vmul.f32 %v15395_v62, %v15395_v62 }
 0x3ef   :  { %v3870_v54 = vpop.f32.mrf.mxu0  ;;  %v15548_v34 = vpop.f32.mrf.mxu1 }
 0x3f0   :  { %20726 = vst [vmem:[#allocation10_spill] sm:$0xff] %v15546_v31  ;;  %20727 = vst [vmem:[#allocation24_spill] sm:$0xff] %v15548_v34  ;;  %v15550_v42 = vadd.f32 %v3870_v54, %v3757_v11  ;;  %v4347_v11 = vadd.f32 %v15395_v62, %v15388_v55  ;;  %v4555_v34 = vmul.f32 %v15413_v52, %v15413_v52 }
 0x3f1   :  { %v15552_v60 = vpop.f32.mrf.mxu0  ;;  %v3763_v3 = vpop.f32.mrf.mxu1 }
 0x3f2   :  { %20728 = vst [vmem:[#allocation108_spill] sm:$0xff] %v15550_v42  ;;  %20729 = vst [vmem:[#allocation78_spill] sm:$0xff] %v15552_v60  ;;  %v4523_v42 = vmul.f32 %v15388_v55, %v15388_v55 }
 0x3f3   :  { %v3876_v5 = vpop.f32.mrf.mxu0  ;;  %v3765_v40 = vpop.f32.mrf.mxu1 }
 0x3f4   :  { %v15554_v7 = vadd.f32 %v3876_v5, %v3763_v3  ;;  %v4532_v3 = vmul.f32 %v15398_v28, %v15398_v28  ;;  %v4651_v62 = vadd.f32 %v4531_v45, %v4523_v42  ;;  %v4548_v42 = vmul.f32 %v15410_v10, %v15410_v10 }
 0x3f5   :  { %v3878_v37 = vpop.f32.mrf.mxu0  ;;  %v3767_v9 = vpop.f32.mrf.mxu1 }
 0x3f6   :  { %20730 = vst [vmem:[#allocation79_spill] sm:$0xff] %v15554_v7  ;;  %v15556_v1 = vadd.f32 %v3878_v37, %v3765_v40  ;;  %v4539_v40 = vmul.f32 %v15401_v22, %v15401_v22  ;;  %v4524_v7 = vmul.f32 %v15391_v6, %v15391_v6 }
 0x3f7   :  { %v3880_v23 = vpop.f32.mrf.mxu0  ;;  %v15560_v24 = vpop.f32.mrf.mxu1 }
 0x3f8   :  { %20731 = vst [vmem:[#allocation80_spill] sm:$0xff] %v15556_v1  ;;  %20732 = vst [vmem:[#allocation81_spill] sm:$0xff] %v15560_v24  ;;  %v15564_v54 = vadd.f32 %v3880_v23, %v3767_v9  ;;  %v4348_v1 = vadd.f32 %v4347_v11, %v15401_v22  ;;  %v4540_v9 = vmul.f32 %v15405_v25, %v15405_v25 }
 0x3f9   :  { %v15572_v37 = vpop.f32.mrf.mxu0  ;;  %v3773_v5 = vpop.f32.mrf.mxu1  ;;  %v4547_v23 = vmul.f32 %v15408_v48, %v15408_v48  ;;  %v4672_v11 = vadd.f32 %v4532_v3, %v4524_v7  ;;  %v4652_v22 = vadd.f32 %v4651_v62, %v4539_v40  ;;  %v4556_v62 = vmul.f32 %v15417_v47, %v15417_v47 }
 0x3fa   :  { %20733 = vst [vmem:[#allocation28_spill] sm:$0xff] %v15564_v54  ;;  %20734 = vst [vmem:[#allocation25_spill] sm:$0xff] %v15572_v37  ;;  %v4349_v24 = vadd.f32 %v4348_v1, %v15408_v48  ;;  %v4368_v37 = vadd.f32 %v15398_v28, %v15391_v6  ;;  %v20777_v6 = vld [vmem:[#allocation6_spill] sm:$0xff] }
 0x3fb   :  { %v3886_v55 = vpop.f32.mrf.mxu0  ;;  %v3775_v54 = vpop.f32.mrf.mxu1  ;;  %v4673_v1 = vadd.f32 %v4672_v11, %v4540_v9  ;;  %v4564_v9 = vmul.f32 %v15422_v51, %v15422_v51 }
 0x3fc   :  { %v15582_v31 = vadd.f32 %v3886_v55, %v3773_v5  ;;  %v4350_v60 = vadd.f32 %v4349_v24, %v15413_v52  ;;  %v4369_v55 = vadd.f32 %v4368_v37, %v15405_v25  ;;  %v4653_v5 = vadd.f32 %v4652_v22, %v4547_v23 }
 0x3fd   :  { %v3888_v45 = vpop.f32.mrf.mxu0  ;;  %v3777_v59 = vpop.f32.mrf.mxu1  ;;  %v4563_v24 = vmul.f32 %v15420_v14, %v15420_v14  ;;  %v4674_v40 = vadd.f32 %v4673_v1, %v4548_v42  ;;  %v4572_v1 = vmul.f32 %v15430_v30, %v15430_v30 }
 0x3fe   :  { %20735 = vst [vmem:[#allocation110_spill] sm:$0xff] %v15582_v31  ;;  %v15591_v41 = vadd.f32 %v3888_v45, %v3775_v54  ;;  %v4351_v7 = vadd.f32 %v4350_v60, %v15420_v14  ;;  %v4370_v54 = vadd.f32 %v4369_v55, %v15410_v10  ;;  %v4654_v22 = vadd.f32 %v4653_v5, %v4555_v34 }
 0x3ff   :  { %v3890_v48 = vpop.f32.mrf.mxu0  ;;  %v15594_v28 = vpop.f32.mrf.mxu1  ;;  %v4571_v60 = vmul.f32 %v15428_v49, %v15428_v49  ;;  %v4579_v55 = vmul.f32 %v15432_v15, %v15432_v15 }
 0x400   :  { %20736 = vst [vmem:[#allocation29_spill] sm:$0xff] %v15591_v41  ;;  %v15601_v3 = vadd.f32 %v3890_v48, %v3777_v59  ;;  %v4352_v23 = vadd.f32 %v4351_v7, %v15428_v49  ;;  %v4371_v11 = vadd.f32 %v4370_v54, %v15417_v47  ;;  %v4675_v59 = vadd.f32 %v4674_v40, %v4556_v62 }
 0x401   :  { %v15604_v45 = vpop.f32.mrf.mxu0  ;;  %v3929_v37 = vpop.f32.mrf.mxu1  ;;  %v4655_v52 = vadd.f32 %v4654_v22, %v4563_v24  ;;  %v4587_v62 = vmul.f32 %v15440_v12, %v15440_v12  ;;  %v4580_v40 = vmul.f32 %v15436_v58, %v15436_v58  ;;  %v15628_v22 = vadd.f32 %v15450_v2, %v15446_v36 }
 0x402   :  { %20737 = vst [vmem:[#allocation82_spill] sm:$0xff] %v15601_v3  ;;  %v4353_v42 = vadd.f32 %v4352_v23, %v15432_v15  ;;  %v4372_v34 = vadd.f32 %v4371_v11, %v15422_v51  ;;  %v4676_v10 = vadd.f32 %v4675_v59, %v4564_v9  ;;  %v20760_v51 = vld [vmem:[#allocation68_spill] sm:$0xff] }
 0x403   :  { %v4042_v14 = vpop.f32.mrf.mxu0  ;;  %v3931_v48 = vpop.f32.mrf.mxu1  ;;  %v4656_v54 = vadd.f32 %v4655_v52, %v4571_v60  ;;  %20739 = vst [vmem:[#allocation84_spill] sm:$0xff] %v15628_v22  ;;  %v4595_v60 = vmul.f32 %v15444_v26, %v15444_v26 }
 0x404   :  { %v15618_v5 = vadd.f32 %v4042_v14, %v3929_v37  ;;  %v4354_v47 = vadd.f32 %v4353_v42, %v15440_v12  ;;  %v4373_v24 = vadd.f32 %v4372_v34, %v15430_v30  ;;  %v4677_v11 = vadd.f32 %v4676_v10, %v4572_v1 }
 0x405   :  { %v4044_v7 = vpop.f32.mrf.mxu0  ;;  %v3933_v49 = vpop.f32.mrf.mxu1  ;;  %v4657_v52 = vadd.f32 %v4656_v54, %v4579_v55  ;;  %v4588_v42 = vmul.f32 %v15442_v4, %v15442_v4  ;;  %v4596_v10 = vmul.f32 %v15628_v22, %v15628_v22 }
 0x406   :  { %20738 = vst [vmem:[#allocation83_spill] sm:$0xff] %v15618_v5  ;;  %v15630_v14 = vadd.f32 %v4044_v7, %v3931_v48  ;;  %v4355_v9 = vadd.f32 %v4354_v47, %v15444_v26  ;;  %v4374_v59 = vadd.f32 %v4373_v24, %v15436_v58  ;;  %v4603_v47 = vmul.f32 %v15454_v20, %v15454_v20 }
 0x407   :  { %v4046_v37 = vpop.f32.mrf.mxu0  ;;  %v15632_v23 = vpop.f32.mrf.mxu1  ;;  %v4658_v48 = vadd.f32 %v4657_v52, %v4587_v62  ;;  %v4678_v55 = vadd.f32 %v4677_v11, %v4580_v40  ;;  %v15655_v62 = vadd.f32 %v15466_v18, %v15463_v53 }
 0x408   :  { %20740 = vst [vmem:[#allocation85_spill] sm:$0xff] %v15630_v14  ;;  %v15640_v34 = vadd.f32 %v4046_v37, %v3933_v49  ;;  %v4356_v7 = vadd.f32 %v4355_v9, %v15454_v20  ;;  %v4375_v54 = vadd.f32 %v4374_v59, %v15442_v4  ;;  %v4611_v37 = vmul.f32 %v15461_v35, %v15461_v35 }
 0x409   :  { %v15642_v36 = vpop.f32.mrf.mxu0  ;;  %v3939_v2 = vpop.f32.mrf.mxu1  ;;  %v4659_v26 = vadd.f32 %v4658_v48, %v4595_v60  ;;  %20742 = vst [vmem:[#allocation109_spill] sm:$0xff] %v15655_v62  ;;  %v4679_v52 = vadd.f32 %v4678_v55, %v4588_v42  ;;  %v4604_v60 = vmul.f32 %v15457_v39, %v15457_v39 }
 0x40a   :  { %20741 = vst [vmem:[#allocation34_spill] sm:$0xff] %v15640_v34  ;;  %v4357_v49 = vadd.f32 %v4356_v7, %v15461_v35  ;;  %v4376_v40 = vadd.f32 %v4375_v54, %v15628_v22  ;;  %v4619_v7 = vmul.f32 %v15469_v21, %v15469_v21  ;;  %v4627_v54 = vmul.f32 %v15478_v0, %v15478_v0  ;;  %v20759_v22 = vld [vmem:[#allocation67_spill] sm:$0xff] }
 0x40b   :  { %v4052_v1 = vpop.f32.mrf.mxu0  ;;  %v3941_v24 = vpop.f32.mrf.mxu1  ;;  %v4660_v20 = vadd.f32 %v4659_v26, %v4603_v47  ;;  %v4680_v35 = vadd.f32 %v4679_v52, %v4596_v10  ;;  %v4612_v26 = vmul.f32 %v15655_v62, %v15655_v62  ;;  %v15678_v10 = vadd.f32 %v15480_v43, %v15476_v8 }
 0x40c   :  { %v15658_v9 = vadd.f32 %v4052_v1, %v3939_v2  ;;  %v4358_v48 = vadd.f32 %v4357_v49, %v15469_v21  ;;  %v4377_v53 = vadd.f32 %v4376_v40, %v15457_v39  ;;  %v4620_v40 = vmul.f32 %v15474_v13, %v15474_v13 }
 0x40d   :  { %v4054_v11 = vpop.f32.mrf.mxu0  ;;  %v3943_v59 = vpop.f32.mrf.mxu1  ;;  %v4661_v2 = vadd.f32 %v4660_v20, %v4611_v37  ;;  %20745 = vst [vmem:[#allocation87_spill] sm:$0xff] %v15678_v10  ;;  %v4681_v20 = vadd.f32 %v4680_v35, %v4604_v60  ;;  %v4628_v60 = vmul.f32 %v15678_v10, %v15678_v10  ;;  %v4557_v4 = vmul.f32 %v20759_v22, %v20759_v22 }
 0x40e   :  { %20743 = vst [vmem:[#allocation38_spill] sm:$0xff] %v15658_v9  ;;  %v15666_v18 = vadd.f32 %v4054_v11, %v3941_v24  ;;  %v4359_v47 = vadd.f32 %v4358_v48, %v15478_v0  ;;  %v4378_v1 = vadd.f32 %v4377_v53, %v15655_v62  ;;  %v4635_v53 = vmul.f32 %v15484_v46, %v15484_v46  ;;  %v20755_v62 = vld [vmem:[#allocation69_spill] sm:$0xff] }
 0x40f   :  { %v4056_v42 = vpop.f32.mrf.mxu0  ;;  %v15668_v55 = vpop.f32.mrf.mxu1  ;;  %v4662_v37 = vadd.f32 %v4661_v2, %v4619_v7  ;;  %v4682_v43 = vadd.f32 %v4681_v20, %v4612_v26  ;;  %v4643_v7 = vmul.f32 %v15490_v61, %v15490_v61  ;;  %v15700_v2 = vadd.f32 %v15492_v19, %v15488_v38 }
 0x410   :  { %20744 = vst [vmem:[#allocation86_spill] sm:$0xff] %v15666_v18  ;;  %v15680_v24 = vadd.f32 %v4056_v42, %v3943_v59  ;;  %v4360_v11 = vadd.f32 %v4359_v47, %v15484_v46  ;;  %v4379_v48 = vadd.f32 %v4378_v1, %v15474_v13 }
 0x411   :  { %v15682_v49 = vpop.f32.mrf.mxu0  ;;  %v3949_v52 = vpop.f32.mrf.mxu1  ;;  %v4663_v59 = vadd.f32 %v4662_v37, %v4627_v54  ;;  %20748 = vst [vmem:[#allocation39_spill] sm:$0xff] %v15700_v2  ;;  %v4683_v26 = vadd.f32 %v4682_v43, %v4620_v40 }
 0x412   :  { %20746 = vst [vmem:[#allocation35_spill] sm:$0xff] %v15680_v24  ;;  %v4361_v42 = vadd.f32 %v4360_v11, %v15490_v61  ;;  %v4380_v35 = vadd.f32 %v4379_v48, %v15678_v10  ;;  %v15711_v61 = vadd.f32 %v15502_v17, %v15498_v29 }
 0x413   :  { %v4062_v0 = vpop.f32.mrf.mxu0  ;;  %v3951_v8 = vpop.f32.mrf.mxu1  ;;  %v4664_v54 = vadd.f32 %v4663_v59, %v4635_v53  ;;  %v4684_v19 = vadd.f32 %v4683_v26, %v4628_v60  ;;  %v15726_v60 = vadd.f32 %v15512_v50, %v15508_v32  ;;  %v4542_v32 = vmul.f32 %v15506_v56, %v15506_v56 }
 0x414   :  { %v15691_v21 = vadd.f32 %v4062_v0, %v3949_v52  ;;  %v4381_v20 = vadd.f32 %v4380_v35, %v15486_v57  ;;  %v4636_v0 = vmul.f32 %v15486_v57, %v15486_v57  ;;  %v4362_v48 = vrot.slane %v4361_v42, 4  ;;  %20750 = vst [vmem:[#allocation89_spill] sm:$0xff] %v15711_v61 }
 0x415   :  { %v4064_v47 = vpop.f32.mrf.mxu0  ;;  %v3953_v1 = vpop.f32.mrf.mxu1  ;;  %v4665_v40 = vadd.f32 %v4664_v54, %v4643_v7  ;;  %v4534_v17 = vmul.f32 %v15711_v61, %v15711_v61  ;;  %20752 = vst [vmem:[#allocation91_spill] sm:$0xff] %v15726_v60  ;;  %v4525_v54 = vmul.f32 %v15494_v33, %v15494_v33  ;;  %v4389_v50 = vadd.f32 %v15500_v27, %v15494_v33 }
 0x416   :  { %20747 = vst [vmem:[#allocation111_spill] sm:$0xff] %v15691_v21  ;;  %v15705_v52 = vadd.f32 %v4064_v47, %v3951_v8  ;;  %v4382_v53 = vadd.f32 %v4381_v20, %v15700_v2  ;;  %v4644_v8 = vmul.f32 %v15700_v2, %v15700_v2  ;;  %v4685_v35 = vadd.f32 %v4684_v19, %v4636_v0 }
 0x417   :  { %v4066_v37 = vpop.f32.mrf.mxu0  ;;  %v15707_v11 = vpop.f32.mrf.mxu1  ;;  %v4533_v47 = vmul.f32 %v15500_v27, %v15500_v27  ;;  %v4363_v29 = vadd.f32 %v4362_v48, %v4361_v42  ;;  %v4541_v20 = vmul.f32 %v15504_v44, %v15504_v44  ;;  %v4526_v48 = vmul.f32 %v15496_v63, %v15496_v63 }
 0x418   :  { %20749 = vst [vmem:[#allocation88_spill] sm:$0xff] %v15705_v52  ;;  %v15713_v38 = vadd.f32 %v4066_v37, %v3953_v1  ;;  %v4666_v1 = vrot.slane %v4665_v40, 4  ;;  %v4383_v26 = vrot.slane %v4382_v53, 4  ;;  %v15734_v42 = vadd.f32 %v4685_v35, %v4644_v8 }
 0x419   :  { %v15716_v43 = vpop.f32.mrf.mxu0  ;;  %v3959_v59 = vpop.f32.mrf.mxu1  ;;  %v4693_v19 = vadd.f32 %v4533_v47, %v4525_v54  ;;  %v4549_v2 = vmul.f32 %v15510_v16, %v15510_v16  ;;  %v4714_v10 = vadd.f32 %v4534_v17, %v4526_v48  ;;  %v4550_v13 = vmul.f32 %v15726_v60, %v15726_v60 }
 0x41a   :  { %20751 = vst [vmem:[#allocation90_spill] sm:$0xff] %v15713_v38  ;;  %v4390_v47 = vadd.f32 %v4389_v50, %v15504_v44  ;;  %v4364_v48 = vrot.slane %v4363_v29, 2  ;;  %v15764_v58 = vadd.f32 %v4666_v1, %v4665_v40  ;;  %v20761_v44 = vld [vmem:[#allocation70_spill] sm:$0xff]  ;;  %v4687_v1 = vrot.slane %v15734_v42, 4 }
 0x41b   :  { %v4072_v46 = vpop.f32.mrf.mxu0  ;;  %v3961_v57 = vpop.f32.mrf.mxu1  ;;  %v4694_v54 = vadd.f32 %v4693_v19, %v4541_v20  ;;  %v4715_v30 = vadd.f32 %v4714_v10, %v4542_v32  ;;  %v20763_v32 = vld [vmem:[#allocation8_spill] sm:$0xff] }
 0x41c   :  { %v15728_v7 = vadd.f32 %v4072_v46, %v3959_v59  ;;  %v4410_v59 = vadd.f32 %v15711_v61, %v15496_v63  ;;  %v4391_v50 = vadd.f32 %v4390_v47, %v15510_v16  ;;  %v20766_v16 = vld [vmem:[#allocation72_spill] sm:$0xff] }
 0x41d   :  { %v4074_v0 = vpop.f32.mrf.mxu0  ;;  %v3963_v37 = vpop.f32.mrf.mxu1  ;;  %v4695_v20 = vadd.f32 %v4694_v54, %v4549_v2  ;;  %v20764_v2 = vld [vmem:[#allocation75_spill] sm:$0xff] }
 0x41e   :  { %20753 = vst [vmem:[#allocation32_spill] sm:$0xff] %v15728_v7  ;;  %v15740_v46 = vadd.f32 %v4074_v0, %v3961_v57  ;;  %v20756_v57 = vld [vmem:[#allocation71_spill] sm:$0xff]  ;;  %v4411_v12 = vadd.f32 %v4410_v59, %v15506_v56  ;;  %v4565_v56 = vmul.f32 %v20761_v44, %v20761_v44  ;;  %v15782_v47 = vadd.f32 %v20764_v2, %v20763_v32 }
 0x41f   :  { %v4076_v8 = vpop.f32.mrf.mxu0  ;;  %v15748_v35 = vpop.f32.mrf.mxu1  ;;  %v15754_v0 = vadd.f32 %v20756_v57, %v20755_v62  ;;  %v4558_v62 = vmul.f32 %v20760_v51, %v20760_v51  ;;  %v4716_v57 = vadd.f32 %v4715_v30, %v4550_v13 }
 0x420   :  { %20754 = vst [vmem:[#allocation36_spill] sm:$0xff] %v15740_v46  ;;  %v15756_v39 = vadd.f32 %v4076_v8, %v3963_v37  ;;  %v15768_v37 = vadd.f32 %v4383_v26, %v4382_v53  ;;  %v4412_v19 = vadd.f32 %v4411_v12, %v15726_v60  ;;  %v4392_v53 = vadd.f32 %v4391_v50, %v20759_v22  ;;  %v20769_v50 = vld [vmem:[#allocation73_spill] sm:$0xff] }
 0x421   :  { %20757 = vst [vmem:[#allocation33_spill] sm:$0xff] %v15754_v0  ;;  %v15762_v15 = vpop.f32.mrf.mxu0  ;;  %v3969_v17 = vpop.f32.mrf.mxu1  ;;  %v4566_v40 = vmul.f32 %v15754_v0, %v15754_v0  ;;  %v4696_v26 = vadd.f32 %v4695_v20, %v4557_v4  ;;  %20765 = vst [vmem:[#allocation37_spill] sm:$0xff] %v15782_v47  ;;  %v4717_v13 = vadd.f32 %v4716_v57, %v4558_v62  ;;  %v20770_v57 = vld [vmem:[#allocation74_spill] sm:$0xff] }
 0x422   :  { %20758 = vst [vmem:[#allocation92_spill] sm:$0xff] %v15756_v39  ;;  %v4413_v30 = vadd.f32 %v4412_v19, %v20760_v51  ;;  %v4573_v60 = vmul.f32 %v20766_v16, %v20766_v16  ;;  %v4393_v4 = vadd.f32 %v4392_v53, %v20761_v44  ;;  %v4574_v20 = vmul.f32 %v20769_v50, %v20769_v50  ;;  %v20772_v53 = vld [vmem:[#allocation7_spill] sm:$0xff] }
 0x423   :  { %v4082_v59 = vpop.f32.mrf.mxu0  ;;  %v3971_v8 = vpop.f32.mrf.mxu1  ;;  %v4697_v22 = vadd.f32 %v4696_v26, %v4565_v56  ;;  %v4718_v19 = vadd.f32 %v4717_v13, %v4566_v40  ;;  %v4385_v26 = vrot.slane %v15768_v37, 2  ;;  %v20775_v13 = vld [vmem:[#allocation76_spill] sm:$0xff] }
 0x424   :  { %v15776_v10 = vadd.f32 %v4082_v59, %v3969_v17  ;;  %v15789_v17 = vadd.f32 %v4364_v48, %v4363_v29  ;;  %v4668_v59 = vrot.slane %v15764_v58, 2  ;;  %v4414_v62 = vadd.f32 %v4413_v30, %v15754_v0 }
 0x425   :  { %v4084_v12 = vpop.f32.mrf.mxu0  ;;  %v3973_v54 = vpop.f32.mrf.mxu1  ;;  %v4394_v29 = vadd.f32 %v4393_v4, %v20766_v16  ;;  %v4582_v48 = vmul.f32 %v15782_v47, %v15782_v47  ;;  %v4698_v40 = vadd.f32 %v4697_v22, %v4573_v60  ;;  %v4589_v4 = vmul.f32 %v20775_v13, %v20775_v13 }
 0x426   :  { %20762 = vst [vmem:[#allocation93_spill] sm:$0xff] %v15776_v10  ;;  %v15787_v25 = vadd.f32 %v4084_v12, %v3971_v8  ;;  %20768 = vst [vmem:[#allocation94_spill] sm:$0xff] %v15789_v17  ;;  %v4581_v8 = vmul.f32 %v20770_v57, %v20770_v57  ;;  %v20771_v12 = vld [vmem:[#allocation9_spill] sm:$0xff]  ;;  %v4415_v30 = vadd.f32 %v4414_v62, %v20769_v50 }
 0x427   :  { %v4086_v32 = vpop.f32.mrf.mxu0  ;;  %v15795_v2 = vpop.f32.mrf.mxu1  ;;  %v15805_v44 = vadd.f32 %v20772_v53, %v20771_v12  ;;  %v4688_v16 = vadd.f32 %v4687_v1, %v15734_v42  ;;  %v4719_v0 = vadd.f32 %v4718_v19, %v4574_v20  ;;  %v4395_v33 = vadd.f32 %v4394_v29, %v20770_v57  ;;  %v20776_v12 = vld [vmem:[#allocation77_spill] sm:$0xff]  ;;  %v20779_v1 = vld [vmem:[#allocation24_spill] sm:$0xff]  ;;  %v20780_v20 = vld [vmem:[#allocation78_spill] sm:$0xff] }
 0x428   :  { %20767 = vst [vmem:[#allocation42_spill] sm:$0xff] %v15787_v25  ;;  %v15807_v51 = vadd.f32 %v4086_v32, %v3973_v54  ;;  %v4590_v54 = vmul.f32 %v20776_v12, %v20776_v12  ;;  %v4699_v61 = vadd.f32 %v4698_v40, %v4581_v8  ;;  %v4416_v63 = vadd.f32 %v4415_v30, %v15782_v47  ;;  %v20781_v47 = vld [vmem:[#allocation13_spill] sm:$0xff] }
 0x429   :  { %20773 = vst [vmem:[#allocation95_spill] sm:$0xff] %v15805_v44  ;;  %v15809_v27 = vpop.f32.mrf.mxu0  ;;  %v3979_v56 = vpop.f32.mrf.mxu1  ;;  %v4597_v22 = vmul.f32 %v20777_v6, %v20777_v6  ;;  %v4720_v62 = vadd.f32 %v4719_v0, %v4582_v48  ;;  %v4396_v50 = vadd.f32 %v4395_v33, %v20775_v13  ;;  %v4598_v42 = vmul.f32 %v15805_v44, %v15805_v44  ;;  %v20782_v48 = vld [vmem:[#allocation10_spill] sm:$0xff] }
 0x42a   :  { %20774 = vst [vmem:[#allocation46_spill] sm:$0xff] %v15807_v51  ;;  %v15829_v19 = vadd.f32 %v20780_v20, %v20779_v1  ;;  %v4700_v40 = vadd.f32 %v4699_v61, %v4589_v4  ;;  %v4417_v30 = vadd.f32 %v4416_v63, %v20776_v12  ;;  %v20784_v61 = vld [vmem:[#allocation108_spill] sm:$0xff] }
 0x42b   :  { %v4092_v32 = vpop.f32.mrf.mxu0  ;;  %v3981_v53 = vpop.f32.mrf.mxu1  ;;  %v4721_v0 = vadd.f32 %v4720_v62, %v4590_v54  ;;  %v4397_v33 = vadd.f32 %v4396_v50, %v20777_v6  ;;  %v4613_v63 = vmul.f32 %v20784_v61, %v20784_v61  ;;  %v20786_v62 = vld [vmem:[#allocation81_spill] sm:$0xff] }
 0x42c   :  { %v15822_v60 = vadd.f32 %v4092_v32, %v3979_v56  ;;  %v4605_v56 = vmul.f32 %v20781_v47, %v20781_v47  ;;  %v4606_v32 = vmul.f32 %v20782_v48, %v20782_v48  ;;  %v4418_v8 = vadd.f32 %v4417_v30, %v15805_v44  ;;  %v20790_v44 = vld [vmem:[#allocation80_spill] sm:$0xff] }
 0x42d   :  { %v4094_v29 = vpop.f32.mrf.mxu0  ;;  %v3983_v57 = vpop.f32.mrf.mxu1  ;;  %v4722_v12 = vadd.f32 %v4721_v0, %v4598_v42  ;;  %v4398_v54 = vadd.f32 %v4397_v33, %v20781_v47  ;;  %v4614_v50 = vmul.f32 %v15829_v19, %v15829_v19  ;;  %v4689_v0 = vrot.slane %v4688_v16, 2 }
 0x42e   :  { %20778 = vst [vmem:[#allocation96_spill] sm:$0xff] %v15822_v60  ;;  %v15838_v13 = vadd.f32 %v4094_v29, %v3981_v53  ;;  %v4701_v60 = vadd.f32 %v4700_v40, %v4597_v22  ;;  %v20787_v53 = vld [vmem:[#allocation25_spill] sm:$0xff]  ;;  %v15857_v40 = vadd.f32 %v4668_v59, %v15764_v58  ;;  %v20791_v58 = vld [vmem:[#allocation28_spill] sm:$0xff] }
 0x42f   :  { %v4096_v1 = vpop.f32.mrf.mxu0  ;;  %v15840_v20 = vpop.f32.mrf.mxu1  ;;  %v15852_v29 = vadd.f32 %v20787_v53, %v20786_v62  ;;  %v4723_v33 = vadd.f32 %v4722_v12, %v4606_v32  ;;  %v4399_v47 = vadd.f32 %v4398_v54, %v20784_v61  ;;  %v4622_v62 = vmul.f32 %v20790_v44, %v20790_v44 }
 0x430   :  { %20783 = vst [vmem:[#allocation97_spill] sm:$0xff] %v15838_v13  ;;  %v15845_v4 = vadd.f32 %v4096_v1, %v3983_v57  ;;  %v4702_v30 = vadd.f32 %v4701_v60, %v4605_v56  ;;  %v4419_v57 = vadd.f32 %v4418_v8, %v20782_v48  ;;  %v20789_v1 = vld [vmem:[#allocation79_spill] sm:$0xff]  ;;  %v4629_v59 = vmul.f32 %v20791_v58, %v20791_v58 }
 0x431   :  { %20788 = vst [vmem:[#allocation98_spill] sm:$0xff] %v15852_v29  ;;  %v15854_v6 = vpop.f32.mrf.mxu0  ;;  %v3989_v22 = vpop.f32.mrf.mxu1  ;;  %v4621_v42 = vmul.f32 %v20789_v1, %v20789_v1  ;;  %v4724_v8 = vadd.f32 %v4723_v33, %v4614_v50  ;;  %v4400_v56 = vadd.f32 %v4399_v47, %v20789_v1  ;;  %v4630_v12 = vmul.f32 %v15852_v29, %v15852_v29 }
 0x432   :  { %20785 = vst [vmem:[#allocation43_spill] sm:$0xff] %v15845_v4  ;;  %v4703_v13 = vadd.f32 %v4702_v30, %v4613_v63  ;;  %v4420_v4 = vadd.f32 %v4419_v57, %v15829_v19  ;;  %v15875_v32 = vadd.f32 %v15642_v36, %v15632_v23  ;;  %v15878_v63 = vadd.f32 %v4385_v26, %v15768_v37 }
 0x433   :  { %v4102_v53 = vpop.f32.mrf.mxu0  ;;  %v3991_v17 = vpop.f32.mrf.mxu1  ;;  %v15884_v50 = vadd.f32 %v4689_v0, %v4688_v16  ;;  %v4725_v33 = vadd.f32 %v4724_v8, %v4622_v62  ;;  %v4638_v37 = vmul.f32 %v15591_v41, %v15591_v41  ;;  %v4431_v26 = vadd.f32 %v15640_v34, %v15618_v5 }
 0x434   :  { %v15868_v60 = vadd.f32 %v4102_v53, %v3989_v22  ;;  %20793 = vst [vmem:[#allocation40_spill] sm:$0xff] %v15875_v32  ;;  %v4704_v30 = vadd.f32 %v4703_v13, %v4621_v42  ;;  %v4637_v22 = vmul.f32 %v15582_v31, %v15582_v31  ;;  %v4421_v47 = vadd.f32 %v4420_v4, %v20790_v44 }
 0x435   :  { %v4104_v54 = vpop.f32.mrf.mxu0  ;;  %v3993_v61 = vpop.f32.mrf.mxu1  ;;  %v4401_v53 = vadd.f32 %v4400_v56, %v20791_v58  ;;  %v4535_v4 = vmul.f32 %v15640_v34, %v15640_v34  ;;  %v4536_v42 = vmul.f32 %v15875_v32, %v15875_v32  ;;  %v4432_v56 = vadd.f32 %v4431_v26, %v15658_v9 }
 0x436   :  { %20792 = vst [vmem:[#allocation99_spill] sm:$0xff] %v15868_v60  ;;  %v15882_v57 = vadd.f32 %v4104_v54, %v3991_v17  ;;  %v4705_v1 = vadd.f32 %v4704_v30, %v4629_v59  ;;  %v4422_v16 = vadd.f32 %v4421_v47, %v15852_v29  ;;  %v4726_v17 = vadd.f32 %v4725_v33, %v4630_v12 }
 0x437   :  { %v4106_v23 = vpop.f32.mrf.mxu0  ;;  %v15888_v36 = vpop.f32.mrf.mxu1  ;;  %v4402_v59 = vadd.f32 %v4401_v53, %v15582_v31  ;;  %v4527_v54 = vmul.f32 %v15618_v5, %v15618_v5  ;;  %v4528_v30 = vmul.f32 %v15630_v14, %v15630_v14  ;;  %v4543_v47 = vmul.f32 %v15658_v9, %v15658_v9 }
 0x438   :  { %20794 = vst [vmem:[#allocation100_spill] sm:$0xff] %v15882_v57  ;;  %v15894_v13 = vadd.f32 %v4106_v23, %v3993_v61  ;;  %v4706_v8 = vadd.f32 %v4705_v1, %v4637_v22  ;;  %v15907_v61 = vadd.f32 %v15682_v49, %v15668_v55  ;;  %v4423_v12 = vadd.f32 %v4422_v16, %v15591_v41 }
 0x439   :  { %v15901_v0 = vpop.f32.mrf.mxu0  ;;  %v3999_v62 = vpop.f32.mrf.mxu1  ;;  %v4727_v1 = vadd.f32 %v4726_v17, %v4638_v37  ;;  %v4544_v22 = vmul.f32 %v15666_v18, %v15666_v18  ;;  %v4433_v55 = vadd.f32 %v4432_v56, %v15680_v24  ;;  %v4735_v23 = vadd.f32 %v4535_v4, %v4527_v54 }
 0x43a   :  { %20795 = vst [vmem:[#allocation101_spill] sm:$0xff] %v15894_v13  ;;  %20796 = vst [vmem:[#allocation44_spill] sm:$0xff] %v15907_v61  ;;  %v4452_v26 = vadd.f32 %v15875_v32, %v15630_v14  ;;  %v4756_v16 = vadd.f32 %v4536_v42, %v4528_v30  ;;  %v4551_v34 = vmul.f32 %v15680_v24, %v15680_v24 }
 0x43b   :  { %v4112_v33 = vpop.f32.mrf.mxu0  ;;  %v4001_v53 = vpop.f32.mrf.mxu1  ;;  %v4552_v37 = vmul.f32 %v15907_v61, %v15907_v61  ;;  %v4434_v17 = vadd.f32 %v4433_v55, %v15691_v21  ;;  %v15930_v56 = vadd.f32 %v15716_v43, %v15707_v11  ;;  %v15936_v4 = vadd.f32 %v15604_v45, %v15594_v28 }
 0x43c   :  { %v15919_v49 = vadd.f32 %v4112_v33, %v3999_v62  ;;  %v4736_v42 = vadd.f32 %v4735_v23, %v4543_v47  ;;  %v4453_v54 = vadd.f32 %v4452_v26, %v15666_v18  ;;  %v4559_v30 = vmul.f32 %v15691_v21, %v15691_v21 }
 0x43d   :  { %v4114_v5 = vpop.f32.mrf.mxu0  ;;  %v4003_v9 = vpop.f32.mrf.mxu1  ;;  %20798 = vst [vmem:[#allocation45_spill] sm:$0xff] %v15930_v56  ;;  %20800 = vst [vmem:[#allocation103_spill] sm:$0xff] %v15936_v4  ;;  %v4757_v55 = vadd.f32 %v4756_v16, %v4544_v22  ;;  %v4560_v11 = vmul.f32 %v15705_v52, %v15705_v52  ;;  %v4645_v28 = vmul.f32 %v15601_v3, %v15601_v3 }
 0x43e   :  { %20797 = vst [vmem:[#allocation41_spill] sm:$0xff] %v15919_v49  ;;  %v15932_v62 = vadd.f32 %v4114_v5, %v4001_v53  ;;  %v4435_v5 = vadd.f32 %v4434_v17, %v15713_v38  ;;  %v4737_v45 = vadd.f32 %v4736_v42, %v4551_v34  ;;  %v4454_v47 = vadd.f32 %v4453_v54, %v15907_v61 }
 0x43f   :  { %v4116_v33 = vpop.f32.mrf.mxu0  ;;  %v15941_v24 = vpop.f32.mrf.mxu1  ;;  %v4567_v53 = vmul.f32 %v15713_v38, %v15713_v38  ;;  %v4758_v22 = vadd.f32 %v4757_v55, %v4552_v37  ;;  %v4568_v16 = vmul.f32 %v15930_v56, %v15930_v56  ;;  %v15962_v17 = vadd.f32 %v15762_v15, %v15748_v35 }
 0x440   :  { %20799 = vst [vmem:[#allocation102_spill] sm:$0xff] %v15932_v62  ;;  %v15946_v43 = vadd.f32 %v4116_v33, %v4003_v9  ;;  %v4436_v9 = vadd.f32 %v4435_v5, %v15728_v7  ;;  %v4403_v34 = vadd.f32 %v4402_v59, %v15601_v3  ;;  %v4646_v42 = vmul.f32 %v15936_v4, %v15936_v4  ;;  %v11748_v3 = vld [vmem:[%s19941_s4 + $0x118] ss:$28 sps:$4 sm:$0xff]  }
 0x441   :  { %v15953_v23 = vpop.f32.mrf.mxu0  ;;  %v15955_v26 = vpop.f32.mrf.mxu1  ;;  %20802 = vst [vmem:[#allocation105_spill] sm:$0xff] %v15962_v17  ;;  %v4738_v54 = vadd.f32 %v4737_v45, %v4559_v30  ;;  %v4575_v33 = vmul.f32 %v15728_v7, %v15728_v7  ;;  %v4455_v55 = vadd.f32 %v4454_v47, %v15705_v52  ;;  %v4759_v5 = vadd.f32 %v4758_v22, %v4560_v11 }
 0x442   :  { %20801 = vst [vmem:[#allocation104_spill] sm:$0xff] %v15946_v43  ;;  %v4576_v15 = vmul.f32 %v15740_v46, %v15740_v46  ;;  %v4437_v35 = vadd.f32 %v4436_v9, %v15756_v39  ;;  %v4707_v59 = vadd.f32 %v4706_v8, %v4645_v28  ;;  %v4424_v21 = vadd.f32 %v4423_v12, %v15936_v4 }
 0x443   :  { %v15969_v38 = vpop.f32.mrf.mxu0  ;;  %v15971_v37 = vpop.f32.mrf.mxu1  ;;  %v4739_v61 = vadd.f32 %v4738_v54, %v4567_v53  ;;  %v4583_v30 = vmul.f32 %v15756_v39, %v15756_v39  ;;  %v4456_v18 = vadd.f32 %v4455_v55, %v15930_v56  ;;  %v4760_v47 = vadd.f32 %v4759_v5, %v4568_v16 }
 0x444   :  { %v4584_v11 = vmul.f32 %v15962_v17, %v15962_v17  ;;  %v4438_v22 = vadd.f32 %v4437_v35, %v15776_v10  ;;  %v4404_v9 = vrot.slane %v4403_v34, 4  ;;  %v4591_v12 = vmul.f32 %v15776_v10, %v15776_v10 }
 0x445   :  { %v15980_v45 = vpop.f32.mrf.mxu0  ;;  %v15982_v7 = vpop.f32.mrf.mxu1  ;;  %v4740_v8 = vadd.f32 %v4739_v61, %v4575_v33  ;;  %v15992_v28 = vadd.f32 %v15809_v27, %v15795_v2  ;;  %v4728_v55 = vadd.f32 %v4727_v1, %v4646_v42  ;;  %v4457_v16 = vadd.f32 %v4456_v18, %v15740_v46  ;;  %v20804_v18 = vld [vmem:[#allocation96_spill] sm:$0xff] }
 0x446   :  { %v4761_v5 = vadd.f32 %v4760_v47, %v4576_v15  ;;  %v4439_v39 = vadd.f32 %v4438_v22, %v15807_v51  ;;  %v4708_v35 = vrot.slane %v4707_v59, 4  ;;  %v4592_v61 = vmul.f32 %v15787_v25, %v15787_v25 }
 0x447   :  { %20803 = vst [vmem:[#allocation106_spill] sm:$0xff] %v15992_v28  ;;  %v15994_v53 = vpop.f32.mrf.mxu0  ;;  %v15996_v54 = vpop.f32.mrf.mxu1  ;;  %v4741_v56 = vadd.f32 %v4740_v8, %v4583_v30  ;;  %v4599_v33 = vmul.f32 %v15807_v51, %v15807_v51  ;;  %v4425_v10 = vrot.slane %v4424_v21, 4  ;;  %v4458_v1 = vadd.f32 %v4457_v16, %v15962_v17  ;;  %v11736_v16 = vld [vmem:[%s19941_s4 + $0x188] ss:$28 sps:$4 sm:$0xff]   ;;  %v20807_v17 = vld [vmem:[#allocation97_spill] sm:$0xff] }
 0x448   :  { %v4762_v42 = vadd.f32 %v4761_v5, %v4584_v11  ;;  %v4440_v15 = vadd.f32 %v4439_v39, %v20804_v18  ;;  %v4600_v30 = vmul.f32 %v15992_v28, %v15992_v28  ;;  %v4607_v22 = vmul.f32 %v20804_v18, %v20804_v18 }
 0x449   :  { %v16004_v27 = vpop.f32.mrf.mxu0  ;;  %v16006_v2 = vpop.f32.mrf.mxu1  ;;  %v4742_v47 = vadd.f32 %v4741_v56, %v4591_v12  ;;  %v16016_v8 = vadd.f32 %v15854_v6, %v15840_v20  ;;  %v16022_v52 = vadd.f32 %v4404_v9, %v4403_v34  ;;  %v4729_v11 = vrot.slane %v4728_v55, 4  ;;  %v20806_v56 = vld [vmem:[#allocation43_spill] sm:$0xff] }
 0x44a   :  { %v4459_v39 = vadd.f32 %v4458_v1, %v15787_v25  ;;  %v4441_v12 = vadd.f32 %v4440_v15, %v20806_v56  ;;  %v4763_v5 = vadd.f32 %v4762_v42, %v4592_v61  ;;  %v4608_v6 = vmul.f32 %v20807_v17, %v20807_v17  ;;  %v11738_v9 = vld [vmem:[%s19941_s4 + $0x18c] ss:$28 sps:$4 sm:$0xff]  }
 0x44b   :  { %20805 = vst [vmem:[#allocation107_spill] sm:$0xff] %v16016_v8  ;;  %v16018_v51 = vpop.f32.mrf.mxu0  ;;  %v16020_v46 = vpop.f32.mrf.mxu1  ;;  %v4743_v18 = vadd.f32 %v4742_v47, %v4599_v33  ;;  %v4615_v20 = vmul.f32 %v20806_v56, %v20806_v56  ;;  %v16040_v1 = vadd.f32 %v4708_v35, %v4707_v59  ;;  %v16042_v15 = vadd.f32 %v4425_v10, %v4424_v21  ;;  %v11739_v42 = vld [vmem:[%s19941_s4 + $0x508] ss:$28 sps:$4 sm:$0xff]  }
 0x44c   :  { %v4460_v61 = vadd.f32 %v4459_v39, %v15992_v28  ;;  %v4442_v33 = vadd.f32 %v4441_v12, %v15868_v60  ;;  %v11741_v47 = vld [vmem:[%s19941_s4 + $0x50c] ss:$28 sps:$4 sm:$0xff]   ;;  %v4764_v56 = vadd.f32 %v4763_v5, %v4600_v30  ;;  %v4616_v59 = vmul.f32 %v16016_v8, %v16016_v8  ;;  %8623 = vmatprep.subr.bf16.mxu1 %v11738_v9 }
 0x44d   :  { %v16033_v32 = vpop.f32.mrf.mxu0  ;;  %v16035_v34 = vpop.f32.mrf.mxu1  ;;  %v4744_v25 = vadd.f32 %v4743_v18, %v4607_v22  ;;  %v4623_v21 = vmul.f32 %v15868_v60, %v15868_v60  ;;  %v11742_v39 = vld [vmem:[%s19941_s4 + $0x150] ss:$28 sps:$4 sm:$0xff]   ;;  %v4387_v12 = vrot.slane %v15878_v63, 1  ;;  %v16064_v28 = vadd.f32 %v4729_v11, %v4728_v55  ;;  %8624 = vmatpush1.bf16.msra.mxu1 %v11736_v16  ;;  %8736 = vmatprep.subr.bf16.mxu0 %v11741_v47 }
 0x44e   :  { %v4443_v18 = vadd.f32 %v4442_v33, %v15894_v13  ;;  %v16069_v30 = vadd.f32 %v15901_v0, %v15888_v36  ;;  %v11744_v22 = vld [vmem:[%s19941_s4 + $0x154] ss:$28 sps:$4 sm:$0xff]   ;;  %v4461_v5 = vadd.f32 %v4460_v61, %v20807_v17  ;;  %v4765_v9 = vadd.f32 %v4764_v56, %v4608_v6  ;;  %8737 = vmatpush1.bf16.msra.mxu0 %v11739_v42 }
 0x44f   :  { %v16056_v10 = vpop.f32.mrf.mxu0  ;;  %v16058_v35 = vpop.f32.mrf.mxu1  ;;  %v4745_v60 = vadd.f32 %v4744_v25, %v4615_v20  ;;  %v4624_v55 = vmul.f32 %v15882_v57, %v15882_v57  ;;  %v11745_v36 = vld [vmem:[%s19941_s4 + $0x4d0] ss:$28 sps:$4 sm:$0xff]   ;;  %v4406_v16 = vrot.slane %v16022_v52, 2  ;;  %v4710_v25 = vrot.slane %v16040_v1, 2  ;;  %8625 = vmatprep.subr.bf16.mxu1 %v11744_v22 }
 0x450   :  { %20808 = vst [vmem:[#allocation69_spill] sm:$0xff] %v16069_v30  ;;  %v11747_v0 = vld [vmem:[%s19941_s4 + $0x4d4] ss:$28 sps:$4 sm:$0xff]   ;;  %v4631_v56 = vmul.f32 %v15894_v13, %v15894_v13  ;;  %v4444_v6 = vadd.f32 %v4443_v18, %v15919_v49  ;;  %v4427_v20 = vrot.slane %v16042_v15, 2  ;;  %v4462_v61 = vadd.f32 %v4461_v5, %v16016_v8  ;;  %v11750_v18 = vld [vmem:[%s19941_s4 + $0x11c] ss:$28 sps:$4 sm:$0xff]  }
 0x451   :  { %v16077_v11 = vpop.f32.mrf.mxu0  ;;  %v16079_v33 = vpop.f32.mrf.mxu1  ;;  %v4766_v42 = vadd.f32 %v4765_v9, %v4616_v59  ;;  %v4746_v47 = vadd.f32 %v4745_v60, %v4623_v21  ;;  %8738 = vmatprep.subr.bf16.mxu0 %v11747_v0  ;;  %v4632_v22 = vmul.f32 %v16069_v30, %v16069_v30  ;;  %v4639_v59 = vmul.f32 %v15919_v49, %v15919_v49  ;;  %v11753_v5 = vld [vmem:[%s19941_s4 + $0x49c] ss:$28 sps:$4 sm:$0xff]  }
 0x452   :  { %v4445_v60 = vadd.f32 %v4444_v6, %v15946_v43  ;;  %v16111_v21 = vadd.f32 %v15953_v23, %v15941_v24  ;;  %8626 = vmatpush1.bf16.msra.mxu1 %v11742_v39  ;;  %v4388_v9 = vadd.f32 %v4387_v12, %v15878_v63  ;;  %v4731_v0 = vrot.slane %v16064_v28, 2  ;;  %8739 = vmatpush1.bf16.msra.mxu0 %v11745_v36  ;;  %v11751_v24 = vld [vmem:[%s19941_s4 + $0x498] ss:$28 sps:$4 sm:$0xff]   ;;  %v11756_v23 = vld [vmem:[%s19941_s4 + $0xe4] ss:$28 sps:$4 sm:$0xff]  }
 0x453   :  { %v16094_v17 = vpop.f32.mrf.mxu0  ;;  %v16096_v14 = vpop.f32.mrf.mxu1  ;;  %v4463_v13 = vadd.f32 %v4462_v61, %v15882_v57  ;;  %v4767_v8 = vadd.f32 %v4766_v42, %v4624_v55  ;;  %v4670_v63 = vrot.slane %v15857_v40, 1  ;;  %v4747_v39 = vadd.f32 %v4746_v47, %v4631_v56  ;;  %8627 = vmatprep.subr.bf16.mxu1 %v11750_v18  ;;  %8740 = vmatprep.subr.bf16.mxu0 %v11753_v5  ;;  %v11759_v47 = vld [vmem:[%s19941_s4 + $0x464] ss:$28 sps:$4 sm:$0xff]  }
 0x454   :  { %20809 = vst [vmem:[#allocation71_spill] sm:$0xff] %v16111_v21  ;;  %v4640_v12 = vmul.f32 %v15932_v62, %v15932_v62  ;;  %v4647_v55 = vmul.f32 %v15946_v43, %v15946_v43  ;;  %v4407_v36 = vadd.f32 %v4406_v16, %v16022_v52  ;;  %v4711_v6 = vadd.f32 %v4710_v25, %v16040_v1  ;;  %v11754_v1 = vld [vmem:[%s19941_s4 + $0xe0] ss:$28 sps:$4 sm:$0xff]  }
 0x455   :  { %v16119_v31 = vpop.f32.mrf.mxu0  ;;  %v16121_v49 = vpop.f32.mrf.mxu1  ;;  %v16137_v61 = vadd.f32 %v4427_v20, %v16042_v15  ;;  %v4464_v42 = vadd.f32 %v4463_v13, %v16069_v30  ;;  %v4768_v43 = vadd.f32 %v4767_v8, %v4632_v22  ;;  %v4748_v18 = vadd.f32 %v4747_v39, %v4639_v59  ;;  %v11762_v8 = vld [vmem:[%s19941_s4 + $0xac] ss:$28 sps:$4 sm:$0xff]  }
 0x456   :  { %v4446_v5 = vrot.slane %v4445_v60, 4  ;;  %v4648_v52 = vmul.f32 %v16111_v21, %v16111_v21  ;;  %8628 = vmatpush1.bf16.msra.mxu1 %v11748_v3  ;;  %v4691_v13 = vrot.slane %v15884_v50, 1  ;;  %v4732_v15 = vadd.f32 %v4731_v0, %v16064_v28  ;;  %8741 = vmatpush1.bf16.msra.mxu0 %v11751_v24  ;;  %v11757_v3 = vld [vmem:[%s19941_s4 + $0x460] ss:$28 sps:$4 sm:$0xff]   ;;  %v11765_v0 = vld [vmem:[%s19941_s4 + $0x42c] ss:$28 sps:$4 sm:$0xff]  }
 0x457   :  { %v16140_v57 = vpop.f32.mrf.mxu0  ;;  %v16142_v56 = vpop.f32.mrf.mxu1  ;;  %v4465_v16 = vadd.f32 %v4464_v42, %v15932_v62  ;;  %8629 = vmatprep.subr.bf16.mxu1 %v11756_v23  ;;  %v16165_v22 = vmul.f32 0.0078125, %v4388_v9  ;;  %v4769_v59 = vadd.f32 %v4768_v43, %v4640_v12  ;;  %v4749_v28 = vadd.f32 %v4748_v18, %v4647_v55  ;;  %8742 = vmatprep.subr.bf16.mxu0 %v11759_v47  ;;  %v11760_v43 = vld [vmem:[%s19941_s4 + $0xa8] ss:$28 sps:$4 sm:$0xff]  }
 0x458   :  { %v4408_v39 = vrot.slane %v4407_v36, 1  ;;  %v4712_v62 = vrot.slane %v4711_v6, 1  ;;  %v4429_v30 = vrot.slane %v16137_v61, 1  ;;  %v4447_v4 = vadd.f32 %v4446_v5, %v4445_v60  ;;  %v20810_v12 = vld [vmem:[#allocation94_spill] sm:$0xff] }
 0x459   :  { %v16155_v25 = vpop.f32.mrf.mxu0  ;;  %v16157_v20 = vpop.f32.mrf.mxu1  ;;  %v4466_v24 = vadd.f32 %v4465_v16, %v16111_v21  ;;  %v4770_v9 = vadd.f32 %v4769_v59, %v4648_v52  ;;  %v20811_v55 = vrot.slane %v20810_v12, 1  ;;  %v16183_v18 = vadd.f32 %v4670_v63, %v15857_v40  ;;  %v11763_v5 = vld [vmem:[%s19941_s4 + $0x428] ss:$28 sps:$4 sm:$0xff]   ;;  %v11768_v52 = vld [vmem:[%s19941_s4 + $0x74] ss:$28 sps:$4 sm:$0xff]  }
 0x45a   :  { %8630 = vmatpush1.bf16.msra.mxu1 %v11754_v1  ;;  %v16186_v16 = vadd.f32 %v4691_v13, %v15884_v50  ;;  %v4733_v21 = vrot.slane %v4732_v15, 1  ;;  %8743 = vmatpush1.bf16.msra.mxu0 %v11757_v3  ;;  %v16200_v40 = vmul.f32 %v16165_v22, %v16165_v22  ;;  %v4750_v50 = vrot.slane %v4749_v28, 4  ;;  %v11771_v13 = vld [vmem:[%s19941_s4 + $0x3f4] ss:$28 sps:$4 sm:$0xff]  }
 0x45b   :  { %v16171_v23 = vpop.f32.mrf.mxu0  ;;  %v16173_v42 = vpop.f32.mrf.mxu1  ;;  %v4367_v47 = vadd.f32 %v20811_v55, %v20810_v12  ;;  %8631 = vmatprep.subr.bf16.mxu1 %v11762_v8  ;;  %v16204_v63 = vadd.f32 %v15969_v38, %v15955_v26  ;;  %v16208_v1 = vadd.f32 %v15994_v53, %v15982_v7  ;;  %8744 = vmatprep.subr.bf16.mxu0 %v11765_v0  ;;  %v4467_v8 = vrot.slane %v4466_v24, 4 }
 0x45c   :  { %v16213_v3 = vadd.f32 %v4408_v39, %v4407_v36  ;;  %v16217_v59 = vadd.f32 %v15980_v45, %v15971_v37  ;;  %v16221_v38 = vadd.f32 %v16004_v27, %v15996_v54  ;;  %v16227_v53 = vadd.f32 %v4712_v62, %v4711_v6  ;;  %v11766_v37 = vld [vmem:[%s19941_s4 + $0x70] ss:$28 sps:$4 sm:$0xff]  }
 0x45d   :  { %v16188_v41 = vpop.f32.mrf.mxu0  ;;  %v16190_v60 = vpop.f32.mrf.mxu1  ;;  %20812 = vst [vmem:[#allocation8_spill] sm:$0xff] %v16204_v63  ;;  %20813 = vst [vmem:[#allocation75_spill] sm:$0xff] %v16208_v1  ;;  %v4448_v0 = vrot.slane %v4447_v4, 2  ;;  %v4771_v12 = vrot.slane %v4770_v9, 4  ;;  %v16231_v36 = vadd.f32 %v16018_v51, %v16006_v2  ;;  %v16237_v45 = vadd.f32 %v4429_v30, %v16137_v61  ;;  %v11769_v51 = vld [vmem:[%s19941_s4 + $0x3f0] ss:$28 sps:$4 sm:$0xff]  }
 0x45e   :  { %20814 = vst [vmem:[#allocation9_spill] sm:$0xff] %v16217_v59  ;;  %20815 = vst [vmem:[#allocation7_spill] sm:$0xff] %v16221_v38  ;;  %8632 = vmatpush1.bf16.msra.mxu1 %v11760_v43  ;;  %v16239_v54 = vadd.f32 %v4733_v21, %v4732_v15  ;;  %v16243_v62 = vadd.f32 %v16033_v32, %v16020_v46  ;;  %8745 = vmatpush1.bf16.msra.mxu0 %v11763_v5  ;;  %v11774_v2 = vld [vmem:[%s19941_s4 + $0x3c] ss:$28 sps:$4 sm:$0xff]  }
 0x45f   :  { %v16223_v26 = vpop.f32.mrf.mxu0  ;;  %v16225_v7 = vpop.f32.mrf.mxu1  ;;  %20816 = vst [vmem:[#allocation24_spill] sm:$0xff] %v16231_v36  ;;  %8633 = vmatprep.subr.bf16.mxu1 %v11768_v52  ;;  %v16255_v30 = vadd.f32 %v4750_v50, %v4749_v28  ;;  %v4529_v46 = vmul.f32 %v16204_v63, %v16204_v63  ;;  %v4537_v32 = vmul.f32 %v16208_v1, %v16208_v1  ;;  %v11777_v61 = vld [vmem:[%s19941_s4 + $0x3bc] ss:$28 sps:$4 sm:$0xff]  }
 0x460   :  { %20817 = vst [vmem:[#allocation78_spill] sm:$0xff] %v16243_v62  ;;  %v16263_v21 = vadd.f32 %v16056_v10, %v16035_v34  ;;  %8746 = vmatprep.subr.bf16.mxu0 %v11771_v13  ;;  %v16268_v15 = vadd.f32 %v4467_v8, %v4466_v24  ;;  %v4530_v28 = vmul.f32 %v16217_v59, %v16217_v59 }
 0x461   :  { %v16245_v27 = vpop.f32.mrf.mxu0  ;;  %v16247_v6 = vpop.f32.mrf.mxu1  ;;  %v4538_v39 = vmul.f32 %v16221_v38, %v16221_v38  ;;  %v16276_v43 = vadd.f32 %v16077_v11, %v16058_v35  ;;  %v16280_v10 = vadd.f32 %v4448_v0, %v4447_v4  ;;  %v16282_v5 = vadd.f32 %v4771_v12, %v4770_v9  ;;  %v11772_v35 = vld [vmem:[%s19941_s4 + $0x38] ss:$28 sps:$4 sm:$0xff]   ;;  %v11783_v12 = vld [vmem:[%s19941_s4 + $0x384] ss:$28 sps:$4 sm:$0xff]  }
 0x462   :  { %20818 = vst [vmem:[#allocation10_spill] sm:$0xff] %v16263_v21  ;;  %v4545_v24 = vmul.f32 %v16231_v36, %v16231_v36  ;;  %v16288_v52 = vadd.f32 %v16094_v17, %v16079_v33  ;;  %8634 = vmatpush1.bf16.msra.mxu1 %v11766_v37  ;;  %v16293_v11 = vmul.f32 0.0078125, %v4367_v47  ;;  %v4473_v4 = vadd.f32 %v16208_v1, %v16204_v63  ;;  %v11775_v33 = vld [vmem:[%s19941_s4 + $0x3b8] ss:$28 sps:$4 sm:$0xff]   ;;  %v11780_v47 = vld [vmem:[%s19941_s4 + $0x4] ss:$28 sps:$4 sm:$0xff]  }
 0x463   :  { %20819 = vst [vmem:[#allocation81_spill] sm:$0xff] %v16276_v43  ;;  %v4308_v55 = vpop.f32.mrf.mxu0  ;;  %v16278_v34 = vpop.f32.mrf.mxu1  ;;  %v4546_v9 = vmul.f32 %v16243_v62, %v16243_v62  ;;  %v16301_v50 = vadd.f32 %v16119_v31, %v16096_v14  ;;  %8747 = vmatpush1.bf16.msra.mxu0 %v11769_v51  ;;  %8635 = vmatprep.subr.bf16.mxu1 %v11774_v2 }
 0x464   :  { %20820 = vst [vmem:[#allocation25_spill] sm:$0xff] %v16288_v52  ;;  %v4777_v8 = vadd.f32 %v4537_v32, %v4529_v46  ;;  %v4494_v0 = vadd.f32 %v16221_v38, %v16217_v59  ;;  %v4553_v31 = vmul.f32 %v16263_v21, %v16263_v21  ;;  %v16319_v14 = vadd.f32 %v16140_v57, %v16121_v49  ;;  %v20892_v38 = vld [vmem:[#allocation77_spill] sm:$0xff]  ;;  %v20894_v59 = vld [vmem:[#allocation47_spill] sm:$0xff] }
 0x465   :  { %20821 = vst [vmem:[#allocation94_spill] sm:$0xff] %v16301_v50  ;;  %v16303_v13 = vpop.f32.mrf.mxu0  ;;  %v16305_v17 = vpop.f32.mrf.mxu1  ;;  %8748 = vmatprep.subr.bf16.mxu0 %v11777_v61  ;;  %v4798_v37 = vadd.f32 %v4538_v39, %v4530_v28  ;;  %v4474_v51 = vadd.f32 %v4473_v4, %v16231_v36  ;;  %v4554_v2 = vmul.f32 %v16276_v43, %v16276_v43  ;;  %v11778_v28 = vld [vmem:[%s19941_s4] ss:$28 sps:$4 sm:$0xff]   ;;  %v20886_v36 = vld [vmem:[#allocation11_spill] sm:$0xff] }
 0x466   :  { %20822 = vst [vmem:[#allocation112_spill] sm:$0xff] %v16319_v14  ;;  %v16329_v46 = vadd.f32 %v16155_v25, %v16142_v56  ;;  %v4778_v63 = vadd.f32 %v4777_v8, %v4545_v24  ;;  %v4495_v57 = vadd.f32 %v4494_v0, %v16243_v62  ;;  %v4561_v49 = vmul.f32 %v16288_v52, %v16288_v52  ;;  %v20888_v62 = vld [vmem:[#allocation72_spill] sm:$0xff] }
 0x467   :  { %v4312_v32 = vpop.f32.mrf.mxu0  ;;  %v4201_v1 = vpop.f32.mrf.mxu1  ;;  %v16336_v61 = vadd.f32 %v16171_v23, %v16157_v20  ;;  %8636 = vmatpush1.bf16.msra.mxu1 %v11772_v35  ;;  %v16342_v56 = vmul.f32 0.0078125, %v16183_v18  ;;  %v4799_v25 = vadd.f32 %v4798_v37, %v4546_v9  ;;  %v4475_v39 = vadd.f32 %v4474_v51, %v16263_v21  ;;  %8749 = vmatpush1.bf16.msra.mxu0 %v11775_v33  ;;  %v11781_v20 = vld [vmem:[%s19941_s4 + $0x380] ss:$28 sps:$4 sm:$0xff]   ;;  %v11786_v23 = vld [vmem:[%s19941_s4 + $0x34c] ss:$28 sps:$4 sm:$0xff]  }
 0x468   :  { %20823 = vst [vmem:[#allocation113_spill] sm:$0xff] %v16329_v46  ;;  %v4562_v24 = vmul.f32 %v16301_v50, %v16301_v50  ;;  %8637 = vmatprep.subr.bf16.mxu1 %v11780_v47  ;;  %v4779_v18 = vadd.f32 %v4778_v63, %v4553_v31  ;;  %v4569_v35 = vmul.f32 %v16319_v14, %v16319_v14  ;;  %v11789_v47 = vld [vmem:[%s19941_s4 + $0x6cc] ss:$28 sps:$4 sm:$0xff]   ;;  %v20885_v21 = vld [vmem:[#allocation37_spill] sm:$0xff] }
 0x469   :  { %20824 = vst [vmem:[#allocation114_spill] sm:$0xff] %v16336_v61  ;;  %v4314_v4 = vpop.f32.mrf.mxu0  ;;  %v4205_v8 = vpop.f32.mrf.mxu1  ;;  %v16357_v9 = vadd.f32 %v16188_v41, %v16173_v42  ;;  %v16361_v33 = vadd.f32 %v16223_v26, %v16190_v60  ;;  %8750 = vmatprep.subr.bf16.mxu0 %v11783_v12  ;;  %v4496_v0 = vadd.f32 %v4495_v57, %v16276_v43  ;;  %v4469_v57 = vrot.slane %v16268_v15, 2  ;;  %v20887_v43 = vld [vmem:[#allocation15_spill] sm:$0xff] }
 0x46a   :  { %v4800_v37 = vadd.f32 %v4799_v25, %v4554_v2  ;;  %v4476_v63 = vadd.f32 %v4475_v39, %v16288_v52  ;;  %v4570_v31 = vmul.f32 %v16329_v46, %v16329_v46  ;;  %v4780_v42 = vadd.f32 %v4779_v18, %v4561_v49  ;;  %v11784_v2 = vld [vmem:[%s19941_s4 + $0x348] ss:$28 sps:$4 sm:$0xff]  }
 0x46b   :  { %20825 = vst [vmem:[#allocation115_spill] sm:$0xff] %v16357_v9  ;;  %20826 = vst [vmem:[#allocation116_spill] sm:$0xff] %v16361_v33  ;;  %v4318_v51 = vpop.f32.mrf.mxu0  ;;  %v4207_v41 = vpop.f32.mrf.mxu1  ;;  %v4577_v60 = vmul.f32 %v16336_v61, %v16336_v61  ;;  %v16374_v26 = vadd.f32 %v16245_v27, %v16225_v7  ;;  %v16377_v12 = vadd.f32 %v4308_v55, %v16247_v6  ;;  %8638 = vmatpush1.bf16.msra.mxu1 %v11778_v28  ;;  %v11787_v7 = vld [vmem:[%s19941_s4 + $0x6c8] ss:$28 sps:$4 sm:$0xff]   ;;  %v11792_v27 = vld [vmem:[%s19941_s4 + $0x314] ss:$28 sps:$4 sm:$0xff]  }
 0x46c   :  { %v4497_v25 = vadd.f32 %v4496_v0, %v16301_v50  ;;  %v4801_v49 = vadd.f32 %v4800_v37, %v4562_v24  ;;  %v4477_v39 = vadd.f32 %v4476_v63, %v16319_v14  ;;  %8751 = vmatpush1.bf16.msra.mxu0 %v11781_v20  ;;  %8639 = vmatprep.subr.bf16.mxu1 %v11786_v23  ;;  %v11795_v20 = vld [vmem:[%s19941_s4 + $0x694] ss:$28 sps:$4 sm:$0xff]   ;;  %v20884_v50 = vld [vmem:[#allocation73_spill] sm:$0xff] }
 0x46d   :  { %20827 = vst [vmem:[#allocation117_spill] sm:$0xff] %v16374_v26  ;;  %20828 = vst [vmem:[#allocation118_spill] sm:$0xff] %v16377_v12  ;;  %v4320_v18 = vpop.f32.mrf.mxu0  ;;  %v4209_v52 = vpop.f32.mrf.mxu1  ;;  %v4781_v6 = vadd.f32 %v4780_v42, %v4569_v35  ;;  %v4578_v55 = vmul.f32 %v16357_v9, %v16357_v9  ;;  %v4585_v28 = vmul.f32 %v16361_v33, %v16361_v33  ;;  %8752 = vmatprep.subr.bf16.mxu0 %v11789_v47 }
 0x46e   :  { %v16397_v24 = vadd.f32 %v16303_v13, %v16278_v34  ;;  %v4498_v23 = vadd.f32 %v4497_v25, %v16329_v46  ;;  %v4802_v0 = vadd.f32 %v4801_v49, %v4570_v31  ;;  %v4478_v35 = vadd.f32 %v4477_v39, %v16336_v61  ;;  %v11790_v31 = vld [vmem:[%s19941_s4 + $0x310] ss:$28 sps:$4 sm:$0xff]  }
 0x46f   :  { %v16405_v37 = vadd.f32 %v4312_v32, %v16305_v17  ;;  %v4322_v63 = vpop.f32.mrf.mxu0  ;;  %v4211_v42 = vpop.f32.mrf.mxu1  ;;  %v4782_v14 = vadd.f32 %v4781_v6, %v4577_v60  ;;  %v4586_v34 = vmul.f32 %v16374_v26, %v16374_v26  ;;  %v4593_v13 = vmul.f32 %v16377_v12, %v16377_v12  ;;  %8640 = vmatpush2.bf16.msra.mxu1 %v11784_v2 }
 0x470   :  { %20829 = vst [vmem:[#allocation119_spill] sm:$0xff] %v16397_v24  ;;  %v16411_v47 = vadd.f32 %v4314_v4, %v4201_v1  ;;  %v16417_v25 = vmul.f32 0.0078125, %v16186_v16  ;;  %v16420_v17 = vadd.f32 %v4469_v57, %v16268_v15  ;;  %v4499_v32 = vadd.f32 %v4498_v23, %v16357_v9  ;;  %8753 = vmatpush2.bf16.msra.mxu0 %v11787_v7  ;;  %v11793_v1 = vld [vmem:[%s19941_s4 + $0x690] ss:$28 sps:$4 sm:$0xff]   ;;  %v11798_v16 = vld [vmem:[%s19941_s4 + $0x2dc] ss:$28 sps:$4 sm:$0xff]  }
 0x471   :  { %20830 = vst [vmem:[#allocation120_spill] sm:$0xff] %v16405_v37  ;;  %v16423_v60 = vadd.f32 %v4318_v51, %v4205_v8  ;;  %v4324_v49 = vpop.f32.mrf.mxu0  ;;  %v4215_v39 = vpop.f32.mrf.mxu1  ;;  %8641 = vmatprep.subr.bf16.mxu1 %v11792_v27  ;;  %v4803_v4 = vadd.f32 %v4802_v0, %v4578_v55  ;;  %v4479_v15 = vadd.f32 %v4478_v35, %v16361_v33  ;;  %v11801_v51 = vld [vmem:[%s19941_s4 + $0x65c] ss:$28 sps:$4 sm:$0xff]  }
 0x472   :  { %20831 = vst [vmem:[#allocation121_spill] sm:$0xff] %v16411_v47  ;;  %v4783_v2 = vadd.f32 %v4782_v14, %v4585_v28  ;;  %v4594_v8 = vmul.f32 %v16397_v24, %v16397_v24  ;;  %8754 = vmatprep.subr.bf16.mxu0 %v11795_v20  ;;  %v4500_v57 = vadd.f32 %v4499_v32, %v16374_v26  ;;  %v11796_v35 = vld [vmem:[%s19941_s4 + $0x2d8] ss:$28 sps:$4 sm:$0xff]   ;;  %v16451_v32 = vmul.f32 0.0078125, %v16213_v3  ;;  %v11804_v3 = vld [vmem:[%s19941_s4 + $0x2a4] ss:$28 sps:$4 sm:$0xff]  }
 0x473   :  { %20832 = vst [vmem:[#allocation122_spill] sm:$0xff] %v16423_v60  ;;  %v4601_v7 = vmul.f32 %v16405_v37, %v16405_v37  ;;  %v16440_v27 = vadd.f32 %v4320_v18, %v4207_v41  ;;  %v16442_v6 = vadd.f32 %v4322_v63, %v4209_v52  ;;  %v4328_v55 = vpop.f32.mrf.mxu0  ;;  %v4217_v23 = vpop.f32.mrf.mxu1  ;;  %v4804_v14 = vadd.f32 %v4803_v4, %v4586_v34 }
 0x474   :  { %v4480_v28 = vadd.f32 %v4479_v15, %v16377_v12  ;;  %v4784_v0 = vadd.f32 %v4783_v2, %v4593_v13  ;;  %v4602_v20 = vmul.f32 %v16411_v47, %v16411_v47  ;;  %8642 = vmatpush2.bf16.msra.mxu1 %v11790_v31  ;;  %v4609_v52 = vmul.f32 %v16423_v60, %v16423_v60  ;;  %v11799_v13 = vld [vmem:[%s19941_s4 + $0x658] ss:$28 sps:$4 sm:$0xff]  }
 0x475   :  { %20833 = vst [vmem:[#allocation123_spill] sm:$0xff] %v16440_v27  ;;  %20834 = vst [vmem:[#allocation124_spill] sm:$0xff] %v16442_v6  ;;  %v16455_v41 = vadd.f32 %v4324_v49, %v4211_v42  ;;  %v16457_v18 = vadd.f32 %v4328_v55, %v4215_v39  ;;  %v4330_v63 = vpop.f32.mrf.mxu0  ;;  %v4219_v34 = vpop.f32.mrf.mxu1  ;;  %8755 = vmatpush2.bf16.msra.mxu0 %v11793_v1  ;;  %8643 = vmatprep.subr.bf16.mxu1 %v11798_v16  ;;  %v4773_v31 = vrot.slane %v16282_v5, 2  ;;  %v11807_v39 = vld [vmem:[%s19941_s4 + $0x624] ss:$28 sps:$4 sm:$0xff]  }
 0x476   :  { %v4501_v4 = vadd.f32 %v4500_v57, %v16397_v24  ;;  %v4805_v42 = vadd.f32 %v4804_v14, %v4594_v8  ;;  %v4481_v49 = vadd.f32 %v4480_v28, %v16405_v37  ;;  %8756 = vmatprep.subr.bf16.mxu0 %v11801_v51  ;;  %v4785_v1 = vadd.f32 %v4784_v0, %v4601_v7  ;;  %v11802_v7 = vld [vmem:[%s19941_s4 + $0x2a0] ss:$28 sps:$4 sm:$0xff]  }
 0x477   :  { %20835 = vst [vmem:[#allocation125_spill] sm:$0xff] %v16455_v41  ;;  %20836 = vst [vmem:[#allocation126_spill] sm:$0xff] %v16457_v18  ;;  %v4610_v16 = vmul.f32 %v16440_v27, %v16440_v27  ;;  %v4617_v15 = vmul.f32 %v16442_v6, %v16442_v6  ;;  %v16475_v2 = vadd.f32 %v4330_v63, %v4217_v23  ;;  %v4332_v55 = vpop.f32.mrf.mxu0  ;;  %v4221_v12 = vpop.f32.mrf.mxu1  ;;  %v16485_v28 = vmul.f32 0.0078125, %v16237_v45  ;;  %v11810_v45 = vld [vmem:[%s19941_s4 + $0x26c] ss:$28 sps:$4 sm:$0xff]  }
 0x478   :  { %v4502_v8 = vadd.f32 %v4501_v4, %v16411_v47  ;;  %v4806_v57 = vadd.f32 %v4805_v42, %v4602_v20  ;;  %v4482_v51 = vadd.f32 %v4481_v49, %v16423_v60  ;;  %v16479_v14 = vadd.f32 %v4332_v55, %v4219_v34  ;;  %8644 = vmatpush2.bf16.msra.mxu1 %v11796_v35  ;;  %v11805_v35 = vld [vmem:[%s19941_s4 + $0x620] ss:$28 sps:$4 sm:$0xff]  }
 0x479   :  { %20837 = vst [vmem:[#allocation127_spill] sm:$0xff] %v16475_v2  ;;  %v4786_v0 = vadd.f32 %v4785_v1, %v4609_v52  ;;  %v4618_v23 = vmul.f32 %v16455_v41, %v16455_v41  ;;  %v4625_v63 = vmul.f32 %v16457_v18, %v16457_v18  ;;  %v4334_v20 = vpop.f32.mrf.mxu0  ;;  %v4225_v4 = vpop.f32.mrf.mxu1  ;;  %8757 = vmatpush2.bf16.msra.mxu0 %v11799_v13  ;;  %v4752_v52 = vrot.slane %v16255_v30, 2  ;;  %v11813_v13 = vld [vmem:[%s19941_s4 + $0x5ec] ss:$28 sps:$4 sm:$0xff]  }
 0x47a   :  { %20838 = vst [vmem:[#allocation128_spill] sm:$0xff] %v16479_v14  ;;  %8645 = vmatprep.subr.bf16.mxu1 %v11804_v3  ;;  %v4503_v34 = vadd.f32 %v4502_v8, %v16440_v27  ;;  %v4483_v42 = vadd.f32 %v4482_v51, %v16442_v6  ;;  %v16500_v49 = vadd.f32 %v4334_v20, %v4221_v12  ;;  %v20877_v27 = vld [vmem:[#allocation33_spill] sm:$0xff] }
 0x47b   :  { %8758 = vmatprep.subr.bf16.mxu0 %v11807_v39  ;;  %v4807_v3 = vadd.f32 %v4806_v57, %v4610_v16  ;;  %v4787_v1 = vadd.f32 %v4786_v0, %v4617_v15  ;;  %v4626_v55 = vmul.f32 %v16475_v2, %v16475_v2  ;;  %v4633_v60 = vmul.f32 %v16479_v14, %v16479_v14  ;;  %v4338_v37 = vpop.f32.mrf.mxu0  ;;  %v4227_v47 = vpop.f32.mrf.mxu1  ;;  %v11808_v16 = vld [vmem:[%s19941_s4 + $0x268] ss:$28 sps:$4 sm:$0xff]  }
 0x47c   :  { %20839 = vst [vmem:[#allocation129_spill] sm:$0xff] %v16500_v49  ;;  %v4774_v8 = vadd.f32 %v4773_v31, %v16282_v5  ;;  %v4504_v12 = vadd.f32 %v4503_v34, %v16455_v41  ;;  %v4484_v39 = vadd.f32 %v4483_v42, %v16457_v18  ;;  %v16512_v51 = vadd.f32 %v4338_v37, %v4225_v4  ;;  %v11811_v37 = vld [vmem:[%s19941_s4 + $0x5e8] ss:$28 sps:$4 sm:$0xff]   ;;  %v11816_v31 = vld [vmem:[%s19941_s4 + $0x234] ss:$28 sps:$4 sm:$0xff]  }
 0x47d   :  { %8646 = vmatpush2.bf16.msra.mxu1 %v11802_v7  ;;  %v4471_v15 = vrot.slane %v16420_v17, 1  ;;  %v4808_v57 = vadd.f32 %v4807_v3, %v4618_v23  ;;  %v4788_v0 = vadd.f32 %v4787_v1, %v4625_v63  ;;  %v4634_v20 = vmul.f32 %v16500_v49, %v16500_v49  ;;  %v4340_v6 = vpop.f32.mrf.mxu0  ;;  %v4229_v5 = vpop.f32.mrf.mxu1  ;;  %8759 = vmatpush2.bf16.msra.mxu0 %v11805_v35  ;;  %v11819_v35 = vld [vmem:[%s19941_s4 + $0x5b4] ss:$28 sps:$4 sm:$0xff]  }
 0x47e   :  { %20840 = vst [vmem:[#allocation130_spill] sm:$0xff] %v16512_v51  ;;  %8647 = vmatprep.subr.bf16.mxu1 %v11810_v45  ;;  %v4505_v7 = vadd.f32 %v4504_v12, %v16475_v2  ;;  %v4485_v23 = vadd.f32 %v4484_v39, %v16479_v14  ;;  %v4641_v63 = vmul.f32 %v16512_v51, %v16512_v51  ;;  %v4450_v45 = vrot.slane %v16280_v10, 1 }
 0x47f   :  { %v16530_v4 = vadd.f32 %v4340_v6, %v4227_v47  ;;  %8760 = vmatprep.subr.bf16.mxu0 %v11813_v13  ;;  %v4753_v34 = vadd.f32 %v4752_v52, %v16255_v30  ;;  %v4809_v42 = vadd.f32 %v4808_v57, %v4626_v55  ;;  %v4789_v3 = vadd.f32 %v4788_v0, %v4633_v60  ;;  %v4342_v1 = vpop.f32.mrf.mxu0  ;;  %v4231_v12 = vpop.f32.mrf.mxu1  ;;  %v11814_v13 = vld [vmem:[%s19941_s4 + $0x230] ss:$28 sps:$4 sm:$0xff]  }
 0x480   :  { %v4506_v39 = vadd.f32 %v4505_v7, %v16500_v49  ;;  %v4486_v14 = vadd.f32 %v4485_v23, %v16512_v51  ;;  %v16541_v6 = vadd.f32 %v4342_v1, %v4229_v5  ;;  %v4472_v30 = vadd.f32 %v4471_v15, %v16420_v17  ;;  %v11817_v0 = vld [vmem:[%s19941_s4 + $0x5b0] ss:$28 sps:$4 sm:$0xff]  }
 0x481   :  { %20841 = vst [vmem:[#allocation131_spill] sm:$0xff] %v16530_v4  ;;  %v4642_v47 = vmul.f32 %v16530_v4, %v16530_v4  ;;  %8648 = vmatpush2.bf16.msra.mxu1 %v11808_v16  ;;  %v4775_v52 = vrot.slane %v4774_v8, 1  ;;  %v4810_v60 = vadd.f32 %v4809_v42, %v4634_v20  ;;  %v4790_v55 = vadd.f32 %v4789_v3, %v4641_v63  ;;  %v4344_v57 = vpop.f32.mrf.mxu0  ;;  %v11822_v16 = vld [vmem:[%s19941_s4 + $0x1fc] ss:$28 sps:$4 sm:$0xff]  }
 0x482   :  { %20842 = vst [vmem:[#allocation132_spill] sm:$0xff] %v16541_v6  ;;  %8761 = vmatpush2.bf16.msra.mxu0 %v11811_v37  ;;  %8649 = vmatprep.subr.bf16.mxu1 %v11816_v31  ;;  %v4507_v5 = vadd.f32 %v4506_v39, %v16530_v4  ;;  %v4487_v7 = vadd.f32 %v4486_v14, %v16541_v6  ;;  %v11825_v20 = vld [vmem:[%s19941_s4 + $0x57c] ss:$28 sps:$4 sm:$0xff]   ;;  %v4822_v37 = vmul.f32 0.0078125, %v16239_v54  ;;  %v4754_v23 = vrot.slane %v4753_v34, 1  ;;  %v20871_v4 = vld [vmem:[#allocation18_spill] sm:$0xff] }
 0x483   :  { %v4649_v17 = vmul.f32 %v16541_v6, %v16541_v6  ;;  %v16557_v15 = vadd.f32 %v4344_v57, %v4231_v12  ;;  %8762 = vmatprep.subr.bf16.mxu0 %v11819_v35  ;;  %v4451_v31 = vadd.f32 %v4450_v45, %v16280_v10  ;;  %v4811_v63 = vadd.f32 %v4810_v60, %v4642_v47  ;;  %v11820_v35 = vld [vmem:[%s19941_s4 + $0x1f8] ss:$28 sps:$4 sm:$0xff]   ;;  %v11828_v47 = vld [vmem:[%s19941_s4 + $0x1c4] ss:$28 sps:$4 sm:$0xff]  }
 0x484   :  { %v4488_v42 = vrot.slane %v4487_v7, 4  ;;  %v4836_v12 = vsub.f32 %v16417_v25, %v16200_v40  ;;  %v4830_v54 = vmul.f32 %v16485_v28, %v16485_v28  ;;  %v16574_v10 = vmul.f32 0.0078125, %v4472_v30  ;;  %v11823_v39 = vld [vmem:[%s19941_s4 + $0x578] ss:$28 sps:$4 sm:$0xff]   ;;  %v11831_v25 = vld [vmem:[%s19941_s4 + $0x544] ss:$28 sps:$4 sm:$0xff]  }
 0x485   :  { %v4791_v3 = vadd.f32 %v4790_v55, %v4649_v17  ;;  %v4508_v14 = vadd.f32 %v4507_v5, %v16557_v15  ;;  %v4650_v1 = vmul.f32 %v16557_v15, %v16557_v15  ;;  %8650 = vmatpush2.bf16.msra.mxu1 %v11814_v13  ;;  %v4776_v45 = vadd.f32 %v4775_v52, %v4774_v8  ;;  %v11826_v17 = vld [vmem:[%s19941_s4 + $0x1c0] ss:$28 sps:$4 sm:$0xff]  }
 0x486   :  { %8763 = vmatpush2.bf16.msra.mxu0 %v11817_v0  ;;  %8651 = vmatprep.subr.bf16.mxu1 %v11822_v16  ;;  %v4489_v13 = vadd.f32 %v4488_v42, %v4487_v7  ;;  %v4821_v8 = vmul.f32 0.0078125, %v16227_v53  ;;  %v4829_v30 = vmul.f32 %v16451_v32, %v16451_v32  ;;  %v16588_v52 = vmul.f32 0.0078125, %v4451_v31  ;;  %v11834_v31 = vld [vmem:[%s19941_s4 + $0x88c] ss:$28 sps:$4 sm:$0xff]  }
 0x487   :  { %v4792_v60 = vrot.slane %v4791_v3, 4  ;;  %v4509_v55 = vrot.slane %v4508_v14, 4  ;;  %v4812_v40 = vadd.f32 %v4811_v63, %v4650_v1  ;;  %8764 = vmatprep.subr.bf16.mxu0 %v11825_v20  ;;  %v4755_v57 = vadd.f32 %v4754_v23, %v4753_v34  ;;  %v11829_v34 = vld [vmem:[%s19941_s4 + $0x540] ss:$28 sps:$4 sm:$0xff]  }
 0x488   :  { %v4490_v0 = vrot.slane %v4489_v13, 2  ;;  %v4827_v20 = vmul.f32 %v16293_v11, %v16293_v11  ;;  %v4838_v63 = vsub.f32 %v4822_v37, %v4830_v54  ;;  %v4824_v53 = vmul.f32 0.0078125, %v4776_v45  ;;  %v11837_v37 = vld [vmem:[%s19941_s4 + $0xc0c] ss:$28 sps:$4 sm:$0xff]  }
 0x489   :  { %v4793_v16 = vadd.f32 %v4792_v60, %v4791_v3  ;;  %v4510_v5 = vadd.f32 %v4509_v55, %v4508_v14  ;;  %v4813_v7 = vrot.slane %v4812_v40, 4  ;;  %8652 = vmatpush2.bf16.msra.mxu1 %v11820_v35  ;;  %v4832_v42 = vmul.f32 %v16574_v10, %v16574_v10 }
 0x48a   :  { %8765 = vmatpush2.bf16.msra.mxu0 %v11823_v39  ;;  %8653 = vmatprep.subr.bf16.mxu1 %v11828_v47  ;;  %v4491_v23 = vadd.f32 %v4490_v0, %v4489_v13  ;;  %v4844_v35 = vadd.f32 0.8, %v4836_v12  ;;  %v4837_v54 = vsub.f32 %v4821_v8, %v4829_v30  ;;  %v4823_v45 = vmul.f32 0.0078125, %v4755_v57 }
 0x48b   :  { %v4794_v3 = vrot.slane %v4793_v16, 2  ;;  %v4511_v14 = vrot.slane %v4510_v5, 2  ;;  %v4814_v1 = vadd.f32 %v4813_v7, %v4812_v40  ;;  %8766 = vmatprep.subr.bf16.mxu0 %v11831_v25  ;;  %v4831_v39 = vmul.f32 %v16588_v52, %v16588_v52 }
 0x48c   :  { %v4492_v47 = vrot.slane %v4491_v23, 1  ;;  %v4835_v13 = vsub.f32 %v16342_v56, %v4827_v20  ;;  %v4846_v0 = vadd.f32 0.8, %v4838_v63  ;;  %v4840_v40 = vsub.f32 %v4824_v53, %v4832_v42 }
 0x48d   :  { %v4795_v60 = vadd.f32 %v4794_v3, %v4793_v16  ;;  %v4512_v55 = vadd.f32 %v4511_v14, %v4510_v5  ;;  %v4815_v6 = vrot.slane %v4814_v1, 2  ;;  %8654 = vmatpush2.bf16.msra.mxu1 %v11826_v17  ;;  %12388 = vrsqrt.f32 %v4844_v35 }
 0x48e   :  { %8767 = vmatpush2.bf16.msra.mxu0 %v11829_v34  ;;  %8849 = vmatprep.subr.bf16.mxu1 %v11834_v31  ;;  %v4493_v25 = vadd.f32 %v4492_v47, %v4491_v23  ;;  %v4845_v8 = vadd.f32 0.8, %v4837_v54  ;;  %v4839_v30 = vsub.f32 %v4823_v45, %v4831_v39  ;;  %v4843_v17 = vadd.f32 0.8, %v4835_v13 }
 0x48f   :  { %v4796_v7 = vrot.slane %v4795_v60, 1  ;;  %v4513_v51 = vrot.slane %v4512_v55, 1  ;;  %v4816_v12 = vadd.f32 %v4815_v6, %v4814_v1  ;;  %8962 = vmatprep.subr.bf16.mxu0 %v11837_v37  ;;  %12390 = vrsqrt.f32 %v4846_v0  ;;  %v20843_v0 = vld [vmem:[#allocation3_spill] sm:$0xff] }
 0x490   :  { %v16609_v57 = vmul.f32 0.0078125, %v4493_v25  ;;  %v4848_v56 = vadd.f32 0.8, %v4840_v40  ;;  %12392 = vrsqrt.f32 %v4845_v8  ;;  %v4847_v6 = vadd.f32 0.8, %v4839_v30 }
 0x491   :  { %v4797_v16 = vadd.f32 %v4796_v7, %v4795_v60  ;;  %v4514_v5 = vadd.f32 %v4513_v51, %v4512_v55  ;;  %v4817_v3 = vrot.slane %v4816_v12, 1  ;;  %12394 = vrsqrt.f32 %v4843_v17  ;;  %v28_v17 = vld [vmem:[%s19939_s5 + $0xc] sm:$0xff] }
 0x492   :  { %v4833_v63 = vmul.f32 %v16609_v57, %v16609_v57  ;;  %12396 = vrsqrt.f32 %v4848_v56 }
 0x493   :  { %v4825_v20 = vmul.f32 0.0078125, %v4797_v16  ;;  %v4522_v53 = vmul.f32 0.0078125, %v4514_v5  ;;  %v4818_v42 = vadd.f32 %v4817_v3, %v4816_v12  ;;  %12398 = vrsqrt.f32 %v4847_v6 }
 0x495   :  { %v4841_v34 = vsub.f32 %v4825_v20, %v4833_v63  ;;  %v4826_v31 = vmul.f32 0.0078125, %v4818_v42  ;;  %v4834_v23 = vmul.f32 %v4522_v53, %v4522_v53  ;;  %v20844_v42 = vld [vmem:[#allocation2_spill] sm:$0xff] }
 0x496   :  { %v16623_v6 = vsub.s32 4, %v20844_v42 }
 0x497   :  { %v4849_v14 = vadd.f32 0.8, %v4841_v34  ;;  %v4842_v1 = vsub.f32 %v4826_v31, %v4834_v23  ;;  %v16626_v34 = vsub.s32 5, %v20844_v42  ;;  %v16629_v31 = vsub.s32 6, %v20844_v42 }
 0x498   :  { %20845 = vst [vmem:[#allocation3_spill] sm:$0xff] %v16623_v6  ;;  %v20246_v23 = vsub.s32 7, %v20844_v42 }
 0x499   :  { %v4850_v51 = vadd.f32 0.8, %v4842_v1  ;;  %12400 = vrsqrt.f32 %v4849_v14  ;;  %20846 = vst [vmem:[#allocation2_spill] sm:$0xff] %v16626_v34  ;;  %20847 = vst [vmem:[#allocation133_spill] sm:$0xff] %v16629_v31  ;;  %v20848_v1 = vld [vmem:[#allocation4_spill] sm:$0xff] }
 0x49a   :  { %v12389_v37 = vpop.eup %12388 }
 0x49b   :  { %12402 = vrsqrt.f32 %v4850_v51 }
 0x49c   :  { %v12391_v35 = vpop.eup %12390 }
 0x49d   :  { %v12393_v54 = vpop.eup %12392 }
 0x49e   :  { %v12395_v45 = vpop.eup %12394  ;;  %v4868_v39 = vcombine.low %v12393_v54, %v12391_v35  ;;  %v20851_v54 = vld [vmem:[#allocation59_spill] sm:$0xff] }
 0x49f   :  { %v12397_v47 = vpop.eup %12396  ;;  %v4867_v60 = vcombine.low %v12395_v45, %v12389_v37  ;;  %v20850_v37 = vld [vmem:[#allocation5_spill] sm:$0xff] }
 0x4a0   :  { %v12399_v55 = vpop.eup %12398  ;;  %v4884_v40 = vrot.slane %v4868_v39, %v20843_v0  ;;  %v20853_v39 = vld [vmem:[#allocation60_spill] sm:$0xff] }
 0x4a1   :  { %v4869_v25 = vcombine.low %v12399_v55, %v12397_v47  ;;  %v4877_v12 = vrot.slane %v4867_v60, %v20843_v0 }
 0x4a3   :  { %v4899_v30 = vcombine.low %v4877_v12, %v4884_v40  ;;  %v4891_v16 = vrot.slane %v4869_v25, %v20843_v0 }
 0x4a5   :  { %v4907_v56 = vrot.slane %v4899_v30, %v20843_v0 }
 0x4a6   :  { %v12401_v13 = vpop.eup %12400 }
 0x4a8   :  { %v12403_v7 = vpop.eup %12402 }
 0x4a9   :  { %v4870_v8 = vcombine.low %v12401_v13, %v12403_v7 }
 0x4ab   :  { %v4898_v5 = vrot.slane %v4870_v8, %v20843_v0 }
 0x4ad   :  { %v4900_v3 = vcombine.low %v4891_v16, %v4898_v5 }
 0x4af   :  { %v4914_v20 = vrot.slane %v4900_v3, %v20843_v0 }
 0x4b1   :  { %v4915_v63 = vcombine.low %v4907_v56, %v4914_v20  ;;  %v20858_v56 = vld [vmem:[#allocation22_spill] sm:$0xff]  ;;  %v20859_v20 = vld [vmem:[#allocation23_spill] sm:$0xff] }
 0x4b3   :  { %v4917_v14 = vmul.f32 %v4915_v63, %v28_v17  ;;  %v20860_v63 = vld [vmem:[#allocation62_spill] sm:$0xff] }
 0x4b5   :  { %v16633_v51 = vrot.slane %v4917_v14, %v20848_v1  ;;  %v16636_v35 = vrot.slane %v4917_v14, %v20850_v37  ;;  %v16639_v45 = vrot.slane %v4917_v14, %v20851_v54  ;;  %v16642_v47 = vrot.slane %v4917_v14, %v20853_v39 }
 0x4b6   :  { %v16645_v60 = vrot.slane %v4917_v14, %v16623_v6  ;;  %v16648_v55 = vrot.slane %v4917_v14, %v16626_v34  ;;  %v16651_v13 = vrot.slane %v4917_v14, %v16629_v31  ;;  %v16655_v40 = vrot.slane %v4917_v14, %v20246_v23  ;;  %v20861_v23 = vld [vmem:[#allocation89_spill] sm:$0xff] }
 0x4b7   :  { %20849 = vst [vmem:[#allocation134_spill] sm:$0xff] %v16633_v51  ;;  %20852 = vst [vmem:[#allocation135_spill] sm:$0xff] %v16639_v45  ;;  %v5087_v25 = vmul.f32 %v16633_v51, %v16293_v11  ;;  %v5088_v7 = vmul.f32 %v16636_v35, %v16165_v22  ;;  %v5089_v12 = vmul.f32 %v16639_v45, %v16451_v32 }
 0x4b8   :  { %20854 = vst [vmem:[#allocation136_spill] sm:$0xff] %v16645_v60  ;;  %20855 = vst [vmem:[#allocation137_spill] sm:$0xff] %v16648_v55  ;;  %v5090_v8 = vmul.f32 %v16642_v47, %v16485_v28  ;;  %v5091_v30 = vmul.f32 %v16645_v60, %v16588_v52  ;;  %v5092_v16 = vmul.f32 %v16648_v55, %v16574_v10  ;;  %v20891_v60 = vld [vmem:[#allocation84_spill] sm:$0xff]  ;;  %v20895_v55 = vld [vmem:[#allocation49_spill] sm:$0xff] }
 0x4b9   :  { %20856 = vst [vmem:[#allocation138_spill] sm:$0xff] %v16651_v13  ;;  %20857 = vst [vmem:[#allocation139_spill] sm:$0xff] %v16655_v40  ;;  %v5093_v5 = vmul.f32 %v16651_v13, %v16609_v57  ;;  %v16673_v11 = vmul.f32 %v16655_v40, %v16557_v15  ;;  %v5094_v22 = vmul.f32 %v16655_v40, %v4522_v53  ;;  %v20893_v40 = vld [vmem:[#allocation95_spill] sm:$0xff] }
 0x4ba   :  { %v5103_v3 = vcombine.low %v5087_v25, %v5088_v7  ;;  %v5104_v32 = vcombine.low %v5089_v12, %v5090_v8  ;;  %v5105_v17 = vcombine.low %v5091_v30, %v5092_v16  ;;  %v4960_v28 = vmul.f32 %v16636_v35, %v20858_v56  ;;  %v20862_v7 = vld [vmem:[#allocation14_spill] sm:$0xff]  ;;  %v20863_v8 = vld [vmem:[#allocation19_spill] sm:$0xff]  ;;  %v20864_v16 = vld [vmem:[#allocation61_spill] sm:$0xff] }
 0x4bb   :  { %v4968_v52 = vmul.f32 %v16636_v35, %v20859_v20  ;;  %v4962_v10 = vmul.f32 %v16642_v47, %v20860_v63  ;;  %v5106_v14 = vcombine.low %v5093_v5, %v5094_v22  ;;  %v4970_v53 = vmul.f32 %v16642_v47, %v20861_v23  ;;  %v20866_v20 = vld [vmem:[#allocation20_spill] sm:$0xff] }
 0x4bc   :  { %v5113_v57 = vrot.slane %v5103_v3, %v20843_v0  ;;  %v5120_v15 = vrot.slane %v5104_v32, %v20843_v0  ;;  %v5127_v25 = vrot.slane %v5105_v17, %v20843_v0  ;;  %v4959_v12 = vmul.f32 %v16633_v51, %v20862_v7  ;;  %v20865_v3 = vld [vmem:[#allocation63_spill] sm:$0xff]  ;;  %v20867_v17 = vld [vmem:[#allocation21_spill] sm:$0xff] }
 0x4bd   :  { %v4967_v30 = vmul.f32 %v16633_v51, %v20863_v8  ;;  %v4961_v56 = vmul.f32 %v16639_v45, %v20864_v16  ;;  %v5134_v5 = vrot.slane %v5106_v14, %v20843_v0  ;;  %v16696_v32 = vmul.f32 %v16639_v45, %v20865_v3  ;;  %v20868_v7 = vld [vmem:[#allocation65_spill] sm:$0xff]  ;;  %v20869_v16 = vld [vmem:[#allocation91_spill] sm:$0xff] }
 0x4be   :  { %v5135_v22 = vcombine.low %v5113_v57, %v5120_v15  ;;  %v16700_v23 = vmul.f32 %v16636_v35, %v20866_v20  ;;  %v16704_v63 = vmul.f32 %v16636_v35, %v20867_v17  ;;  %v16708_v8 = vmul.f32 %v16642_v47, %v20868_v7  ;;  %v20870_v57 = vld [vmem:[#allocation17_spill] sm:$0xff]  ;;  %v20872_v17 = vld [vmem:[#allocation64_spill] sm:$0xff] }
 0x4bf   :  { %v16712_v14 = vmul.f32 %v16642_v47, %v20869_v16  ;;  %v16716_v15 = vmul.f32 %v16633_v51, %v20870_v57  ;;  %v5136_v3 = vcombine.low %v5127_v25, %v5134_v5  ;;  %v16721_v18 = vmul.f32 %v16633_v51, %v20871_v4  ;;  %v29_v7 = vld [vmem:[%s19939_s5 + $0x14] sm:$0xff]  ;;  %v20873_v16 = vld [vmem:[#allocation66_spill] sm:$0xff]  ;;  %v20875_v5 = vld [vmem:[#allocation31_spill] sm:$0xff] }
 0x4c0   :  { %v5143_v20 = vrot.slane %v5135_v22, %v20843_v0  ;;  %v16725_v49 = vmul.f32 %v16639_v45, %v20872_v17  ;;  %v16732_v2 = vmul.f32 %v16639_v45, %v20873_v16  ;;  %v20874_v57 = vld [vmem:[#allocation30_spill] sm:$0xff]  ;;  %v16740_v4 = vmul.f32 %v16636_v35, %v20875_v5  ;;  %v20876_v22 = vld [vmem:[#allocation68_spill] sm:$0xff]  ;;  %v20880_v5 = vld [vmem:[#allocation67_spill] sm:$0xff] }
 0x4c1   :  { %v16736_v25 = vmul.f32 %v16636_v35, %v20874_v57  ;;  %v16744_v17 = vmul.f32 %v16642_v47, %v20876_v22  ;;  %v5150_v41 = vrot.slane %v5136_v3, %v20843_v0  ;;  %v16749_v24 = vmul.f32 %v16642_v47, %v20877_v27  ;;  %v20878_v16 = vld [vmem:[#allocation26_spill] sm:$0xff]  ;;  %v20879_v57 = vld [vmem:[#allocation27_spill] sm:$0xff]  ;;  %v20882_v0 = vld [vmem:[#allocation12_spill] sm:$0xff] }
 0x4c2   :  { %v16753_v33 = vmul.f32 %v16633_v51, %v20878_v16  ;;  %v16757_v61 = vmul.f32 %v16633_v51, %v20879_v57  ;;  %v16761_v26 = vmul.f32 %v16639_v45, %v20880_v5  ;;  %v20881_v22 = vld [vmem:[#allocation70_spill] sm:$0xff]  ;;  %v16769_v27 = vmul.f32 %v16636_v35, %v20882_v0  ;;  %v20883_v3 = vld [vmem:[#allocation16_spill] sm:$0xff] }
 0x4c3   :  { %v16765_v9 = vmul.f32 %v16639_v45, %v20881_v22  ;;  %v16773_v16 = vmul.f32 %v16636_v35, %v20883_v3  ;;  %v5151_v46 = vcombine.low %v5143_v20, %v5150_v41  ;;  %v16777_v57 = vmul.f32 %v16642_v47, %v20884_v50  ;;  %v20889_v41 = vld [vmem:[#allocation74_spill] sm:$0xff]  ;;  %v20890_v20 = vld [vmem:[#allocation48_spill] sm:$0xff] }
 0x4c4   :  { %v16781_v5 = vmul.f32 %v16642_v47, %v20885_v21  ;;  %v16785_v22 = vmul.f32 %v16633_v51, %v20886_v36  ;;  %v16789_v0 = vmul.f32 %v16633_v51, %v20887_v43  ;;  %v16793_v3 = vmul.f32 %v16639_v45, %v20888_v62 }
 0x4c5   :  { %v16797_v50 = vmul.f32 %v16639_v45, %v20889_v41  ;;  %v16801_v21 = vmul.f32 %v16636_v35, %v20890_v20  ;;  %v5153_v13 = vsub.f32 %v29_v7, %v5151_v46  ;;  %v16805_v36 = vmul.f32 %v16636_v35, %v20891_v60  ;;  %v20896_v46 = vld [vmem:[#allocation76_spill] sm:$0xff]  ;;  %v20897_v7 = vld [vmem:[#allocation6_spill] sm:$0xff] }
 0x4c6   :  { %v16809_v43 = vmul.f32 %v16642_v47, %v20892_v38  ;;  %v16813_v62 = vmul.f32 %v16642_v47, %v20893_v40  ;;  %v16817_v41 = vmul.f32 %v16633_v51, %v20894_v59  ;;  %v16821_v20 = vmul.f32 %v16633_v51, %v20895_v55 }
 0x4c7   :  { %v16825_v60 = vmul.f32 %v16639_v45, %v20896_v46  ;;  %v16829_v38 = vmul.f32 %v16639_v45, %v20897_v7  ;;  %v16832_v58 = vrot.slane %v5153_v13, %v20848_v1  ;;  %v16835_v40 = vrot.slane %v5153_v13, %v20850_v37  ;;  %v20901_v1 = vld [vmem:[#allocation51_spill] sm:$0xff] }
 0x4c8   :  { %v16838_v59 = vrot.slane %v5153_v13, %v20851_v54  ;;  %v16841_v55 = vrot.slane %v5153_v13, %v20853_v39  ;;  %v16844_v29 = vrot.slane %v5153_v13, %v16623_v6  ;;  %v16847_v46 = vrot.slane %v5153_v13, %v16626_v34 }
 0x4c9   :  { %v20900_v7 = vsub.s32 7, %v20844_v42  ;;  %v16855_v37 = vmul.f32 %v16636_v35, %v20901_v1  ;;  %v5196_v54 = vadd.f32 %v16835_v40, %v4960_v28  ;;  %v5204_v45 = vadd.f32 %v16835_v40, %v4968_v52 }
 0x4ca   :  { %20898 = vst [vmem:[#allocation22_spill] sm:$0xff] %v16844_v29  ;;  %20899 = vst [vmem:[#allocation23_spill] sm:$0xff] %v16847_v46  ;;  %v5198_v39 = vadd.f32 %v16841_v55, %v4962_v10  ;;  %v5206_v6 = vadd.f32 %v16841_v55, %v4970_v53  ;;  %v16862_v29 = vrot.slane %v5153_v13, %v16629_v31 }
 0x4cb   :  { %v16851_v44 = vrot.slane %v5153_v13, %v20900_v7  ;;  %v5195_v34 = vadd.f32 %v16832_v58, %v4959_v12  ;;  %v5203_v42 = vadd.f32 %v16832_v58, %v4967_v30  ;;  %v5197_v7 = vadd.f32 %v16838_v59, %v4961_v56 }
 0x4cc   :  { %20902 = vst [vmem:[#allocation62_spill] sm:$0xff] %v16862_v29  ;;  %vm5324_vm1 = vcmp.gt.f32.partialorder %v5196_v54, 0.0  ;;  %vm5332_vm2 = vcmp.gt.f32.partialorder %v5204_v45, 0.0  ;;  %v5452_v1 = vmul.f32 0.2, %v5196_v54  ;;  %vm5326_vm3 = vcmp.gt.f32.partialorder %v5198_v39, 0.0 }
 0x4cd   :  { %v5460_v46 = vmul.f32 0.2, %v5204_v45  ;;  %v16869_v28 = vadd.f32 %v16851_v44, %v16673_v11  ;;  %vm5334_vm4 = vcmp.gt.f32.partialorder %v5206_v6, 0.0  ;;  %v5454_v52 = vmul.f32 0.2, %v5198_v39 }
 0x4ce   :  { %v5580_v10 = vsel %vm5324_vm1, %v5196_v54, %v5452_v1  ;;  %v5462_v53 = vmul.f32 0.2, %v5206_v6  ;;  %vm5323_vm5 = vcmp.gt.f32.partialorder %v5195_v34, 0.0  ;;  %vm5331_vm6 = vcmp.gt.f32.partialorder %v5203_v42, 0.0  ;;  %v11832_v54 = vld [vmem:[%s19941_s4 + $0x888] ss:$28 sps:$4 sm:$0xff]  }
 0x4cf   :  { %v5588_v13 = vsel %vm5332_vm2, %v5204_v45, %v5460_v46  ;;  %v5582_v30 = vsel %vm5326_vm3, %v5198_v39, %v5454_v52  ;;  %v5451_v56 = vmul.f32 0.2, %v5195_v34  ;;  %v5459_v29 = vmul.f32 0.2, %v5203_v42 }
 0x4d0   :  { %v16871_v12 = vpack.c.bf16 %v5588_v13, %v5580_v10  ;;  %v5590_v31 = vsel %vm5334_vm4, %v5206_v6, %v5462_v53  ;;  %v5205_v51 = vadd.f32 %v16838_v59, %v16696_v32  ;;  %vm5325_vm7 = vcmp.gt.f32.partialorder %v5197_v7, 0.0  ;;  %v11835_v32 = vld [vmem:[%s19941_s4 + $0xc08] ss:$28 sps:$4 sm:$0xff]  }
 0x4d1   :  { %v16876_v11 = vpack.c.bf16 %v5590_v31, %v5582_v30  ;;  %v5579_v45 = vsel %vm5323_vm5, %v5195_v34, %v5451_v56  ;;  %v5453_v46 = vmul.f32 0.2, %v5197_v7  ;;  %v5212_v39 = vadd.f32 %v16835_v40, %v16700_v23 }
 0x4d2   :  { %8655 = vmatprep.mubr.bf16.mxu1 %v16871_v12  ;;  %v5587_v1 = vsel %vm5331_vm6, %v5203_v42, %v5459_v29  ;;  %vm5333_vm8 = vcmp.gt.f32.partialorder %v5205_v51, 0.0  ;;  %v5461_v6 = vmul.f32 0.2, %v5205_v51  ;;  %v5220_v31 = vadd.f32 %v16835_v40, %v16704_v63  ;;  %v11840_v29 = vld [vmem:[%s19941_s4 + $0x854] ss:$28 sps:$4 sm:$0xff]  }
 0x4d3   :  { %8768 = vmatprep.mubr.bf16.mxu0 %v16876_v11  ;;  %v16889_v52 = vpack.c.bf16 %v5587_v1, %v5579_v45  ;;  %v5581_v10 = vsel %vm5325_vm7, %v5197_v7, %v5453_v46  ;;  %vm5340_vm9 = vcmp.gt.f32.partialorder %v5212_v39, 0.0  ;;  %v5468_v34 = vmul.f32 0.2, %v5212_v39  ;;  %v11838_v63 = vld [vmem:[%s19941_s4 + $0x850] ss:$28 sps:$4 sm:$0xff]  }
 0x4d4   :  { %v5589_v23 = vsel %vm5333_vm8, %v5205_v51, %v5461_v6  ;;  %vm5348_vm10 = vcmp.gt.f32.partialorder %v5220_v31, 0.0  ;;  %v5476_v42 = vmul.f32 0.2, %v5220_v31  ;;  %v5214_v13 = vadd.f32 %v16841_v55, %v16708_v8  ;;  %v11843_v7 = vld [vmem:[%s19941_s4 + $0xbd4] ss:$28 sps:$4 sm:$0xff]  }
 0x4d5   :  { %8656 = vmatmul.mubr.bf16.vlgmr.msra.gmra.mxu1 %v16889_v52  ;;  %v16903_v53 = vpack.c.bf16 %v5589_v23, %v5581_v10  ;;  %v5596_v30 = vsel %vm5340_vm9, %v5212_v39, %v5468_v34  ;;  %v5222_v51 = vadd.f32 %v16841_v55, %v16712_v14  ;;  %v11846_v8 = vld [vmem:[%s19941_s4 + $0x81c] ss:$28 sps:$4 sm:$0xff]   ;;  %v5211_v56 = vadd.f32 %v16832_v58, %v16716_v15  ;;  %v11841_v1 = vld [vmem:[%s19941_s4 + $0xbd0] ss:$28 sps:$4 sm:$0xff]  }
 0x4d6   :  { %8850 = vmatpush1.bf16.msra.mxu1 %v11832_v54  ;;  %v5604_v45 = vsel %vm5348_vm10, %v5220_v31, %v5476_v42  ;;  %vm5342_vm11 = vcmp.gt.f32.partialorder %v5214_v13, 0.0  ;;  %v5470_v46 = vmul.f32 0.2, %v5214_v13  ;;  %v5219_v39 = vadd.f32 %v16832_v58, %v16721_v18  ;;  %v11849_v15 = vld [vmem:[%s19941_s4 + $0xb9c] ss:$28 sps:$4 sm:$0xff]  }
 0x4d7   :  { %8769 = vmatmul.mubr.bf16.vlgmr.msra.gmra.mxu0 %v16903_v53  ;;  %v16918_v14 = vpack.c.bf16 %v5604_v45, %v5596_v30  ;;  %vm5350_vm12 = vcmp.gt.f32.partialorder %v5222_v51, 0.0  ;;  %v5478_v6 = vmul.f32 0.2, %v5222_v51  ;;  %8851 = vmatprep.subr.bf16.mxu1 %v11840_v29  ;;  %vm5339_vm13 = vcmp.gt.f32.partialorder %v5211_v56, 0.0  ;;  %v11847_v30 = vld [vmem:[%s19941_s4 + $0xb98] ss:$28 sps:$4 sm:$0xff]  }
 0x4d8   :  { %v5598_v54 = vsel %vm5342_vm11, %v5214_v13, %v5470_v46  ;;  %8963 = vmatpush1.bf16.msra.mxu0 %v11835_v32  ;;  %vm5347_vm14 = vcmp.gt.f32.partialorder %v5219_v39, 0.0  ;;  %v5467_v31 = vmul.f32 0.2, %v5211_v56  ;;  %v5475_v10 = vmul.f32 0.2, %v5219_v39 }
 0x4d9   :  { %8665 = vmatprep.mubr.bf16.mxu1 %v16918_v14  ;;  %v5606_v18 = vsel %vm5350_vm12, %v5222_v51, %v5478_v6  ;;  %8964 = vmatprep.subr.bf16.mxu0 %v11843_v7  ;;  %v5213_v34 = vadd.f32 %v16838_v59, %v16725_v49  ;;  %v5221_v29 = vadd.f32 %v16838_v59, %v16732_v2  ;;  %v11844_v32 = vld [vmem:[%s19941_s4 + $0x818] ss:$28 sps:$4 sm:$0xff]  }
 0x4da   :  { %v16928_v23 = vpack.c.bf16 %v5606_v18, %v5598_v54  ;;  %8852 = vmatpush1.bf16.msra.mxu1 %v11838_v63  ;;  %v5595_v42 = vsel %vm5339_vm13, %v5211_v56, %v5467_v31  ;;  %v5603_v13 = vsel %vm5347_vm14, %v5219_v39, %v5475_v10  ;;  %v5228_v7 = vadd.f32 %v16835_v40, %v16736_v25  ;;  %v11852_v63 = vld [vmem:[%s19941_s4 + $0x7e4] ss:$28 sps:$4 sm:$0xff]   ;;  %v11858_v31 = vld [vmem:[%s19941_s4 + $0x7ac] ss:$28 sps:$4 sm:$0xff]  }
 0x4db   :  { %8853 = vmatprep.subr.bf16.mxu1 %v11846_v8  ;;  %v16938_v49 = vpack.c.bf16 %v5603_v13, %v5595_v42  ;;  %vm5341_vm15 = vcmp.gt.f32.partialorder %v5213_v34, 0.0  ;;  %vm5349_vm0 = vcmp.gt.f32.partialorder %v5221_v29, 0.0  ;;  %v5469_v2 = vmul.f32 0.2, %v5213_v34  ;;  %v11861_v42 = vld [vmem:[%s19941_s4 + $0xb2c] ss:$28 sps:$4 sm:$0xff]  }
 0x4dc   :  { %8778 = vmatprep.mubr.bf16.mxu0 %v16928_v23  ;;  %8965 = vmatpush1.bf16.msra.mxu0 %v11841_v1  ;;  %v5477_v51 = vmul.f32 0.2, %v5221_v29  ;;  %v5236_v56 = vadd.f32 %v16835_v40, %v16740_v4  ;;  %vm5356_vm1 = vcmp.gt.f32.partialorder %v5228_v7, 0.0  ;;  %v5484_v45 = vmul.f32 0.2, %v5228_v7 }
 0x4dd   :  { %8666 = vmatmul.mubr.bf16.gmra.mxu1 %v16938_v49  ;;  %v5597_v25 = vsel %vm5341_vm15, %v5213_v34, %v5469_v2  ;;  %8966 = vmatprep.subr.bf16.mxu0 %v11849_v15  ;;  %v5230_v8 = vadd.f32 %v16841_v55, %v16744_v17  ;;  %v5238_v46 = vadd.f32 %v16841_v55, %v16749_v24  ;;  %v11850_v1 = vld [vmem:[%s19941_s4 + $0x7e0] ss:$28 sps:$4 sm:$0xff]   ;;  %v11856_v34 = vld [vmem:[%s19941_s4 + $0x7a8] ss:$28 sps:$4 sm:$0xff]  }
 0x4de   :  { %v11855_v4 = vld [vmem:[%s19941_s4 + $0xb64] ss:$28 sps:$4 sm:$0xff]   ;;  %v5605_v39 = vsel %vm5349_vm0, %v5221_v29, %v5477_v51  ;;  %8854 = vmatpush1.bf16.msra.mxu1 %v11844_v32  ;;  %vm5364_vm2 = vcmp.gt.f32.partialorder %v5236_v56, 0.0  ;;  %v5492_v6 = vmul.f32 0.2, %v5236_v56  ;;  %v5612_v15 = vsel %vm5356_vm1, %v5228_v7, %v5484_v45 }
 0x4df   :  { %v11853_v17 = vld [vmem:[%s19941_s4 + $0xb60] ss:$28 sps:$4 sm:$0xff]   ;;  %v16961_v54 = vpack.c.bf16 %v5605_v39, %v5597_v25  ;;  %vm5358_vm3 = vcmp.gt.f32.partialorder %v5230_v8, 0.0  ;;  %vm5366_vm4 = vcmp.gt.f32.partialorder %v5238_v46, 0.0  ;;  %v5486_v24 = vmul.f32 0.2, %v5230_v8  ;;  %8855 = vmatprep.subr.bf16.mxu1 %v11852_v63 }
 0x4e0   :  { %v5620_v10 = vsel %vm5364_vm2, %v5236_v56, %v5492_v6  ;;  %v5494_v18 = vmul.f32 0.2, %v5238_v46  ;;  %8967 = vmatpush1.bf16.msra.mxu0 %v11847_v30  ;;  %v5227_v29 = vadd.f32 %v16832_v58, %v16753_v33  ;;  %v5235_v32 = vadd.f32 %v16832_v58, %v16757_v61  ;;  %v11864_v33 = vld [vmem:[%s19941_s4 + $0x774] ss:$28 sps:$4 sm:$0xff]   ;;  %v11859_v63 = vld [vmem:[%s19941_s4 + $0xb28] ss:$28 sps:$4 sm:$0xff]  }
 0x4e1   :  { %8779 = vmatmul.mubr.bf16.gmra.mxu0 %v16961_v54  ;;  %v16977_v13 = vpack.c.bf16 %v5620_v10, %v5612_v15  ;;  %v5614_v7 = vsel %vm5358_vm3, %v5230_v8, %v5486_v24  ;;  %8968 = vmatprep.subr.bf16.mxu0 %v11855_v4  ;;  %v5229_v30 = vadd.f32 %v16838_v59, %v16761_v26  ;;  %v11870_v10 = vld [vmem:[%s19941_s4 + $0x73c] ss:$28 sps:$4 sm:$0xff]  }
 0x4e2   :  { %v5622_v2 = vsel %vm5366_vm4, %v5238_v46, %v5494_v18  ;;  %8856 = vmatpush1.bf16.msra.mxu1 %v11850_v1  ;;  %vm5355_vm5 = vcmp.gt.f32.partialorder %v5227_v29, 0.0  ;;  %vm5363_vm6 = vcmp.gt.f32.partialorder %v5235_v32, 0.0  ;;  %v5483_v61 = vmul.f32 0.2, %v5227_v29 }
 0x4e3   :  { %8675 = vmatprep.mubr.bf16.mxu1 %v16977_v13  ;;  %v16989_v51 = vpack.c.bf16 %v5622_v2, %v5614_v7  ;;  %8857 = vmatprep.subr.bf16.mxu1 %v11858_v31  ;;  %v5491_v26 = vmul.f32 0.2, %v5235_v32  ;;  %v5237_v56 = vadd.f32 %v16838_v59, %v16765_v9  ;;  %vm5357_vm7 = vcmp.gt.f32.partialorder %v5229_v30, 0.0  ;;  %v11867_v9 = vld [vmem:[%s19941_s4 + $0xaf4] ss:$28 sps:$4 sm:$0xff]  }
 0x4e4   :  { %8969 = vmatpush1.bf16.msra.mxu0 %v11853_v17  ;;  %v5611_v45 = vsel %vm5355_vm5, %v5227_v29, %v5483_v61  ;;  %v5485_v25 = vmul.f32 0.2, %v5229_v30  ;;  %v5244_v8 = vadd.f32 %v16835_v40, %v16769_v27  ;;  %v5252_v46 = vadd.f32 %v16835_v40, %v16773_v16  ;;  %v11862_v27 = vld [vmem:[%s19941_s4 + $0x770] ss:$28 sps:$4 sm:$0xff]   ;;  %v11868_v29 = vld [vmem:[%s19941_s4 + $0x738] ss:$28 sps:$4 sm:$0xff]  }
 0x4e5   :  { %8788 = vmatprep.mubr.bf16.mxu0 %v16989_v51  ;;  %v5619_v1 = vsel %vm5363_vm6, %v5235_v32, %v5491_v26  ;;  %vm5365_vm8 = vcmp.gt.f32.partialorder %v5237_v56, 0.0  ;;  %v5493_v4 = vmul.f32 0.2, %v5237_v56  ;;  %8970 = vmatprep.subr.bf16.mxu0 %v11861_v42  ;;  %v5246_v39 = vadd.f32 %v16841_v55, %v16777_v57  ;;  %v11865_v16 = vld [vmem:[%s19941_s4 + $0xaf0] ss:$28 sps:$4 sm:$0xff]  }
 0x4e6   :  { %v17003_v6 = vpack.c.bf16 %v5619_v1, %v5611_v45  ;;  %v5613_v15 = vsel %vm5357_vm7, %v5229_v30, %v5485_v25  ;;  %8858 = vmatpush1.bf16.msra.mxu1 %v11856_v34  ;;  %vm5372_vm9 = vcmp.gt.f32.partialorder %v5244_v8, 0.0  ;;  %vm5380_vm10 = vcmp.gt.f32.partialorder %v5252_v46, 0.0  ;;  %v11873_v30 = vld [vmem:[%s19941_s4 + $0xabc] ss:$28 sps:$4 sm:$0xff]  }
 0x4e7   :  { %v5621_v17 = vsel %vm5365_vm8, %v5237_v56, %v5493_v4  ;;  %v5500_v57 = vmul.f32 0.2, %v5244_v8  ;;  %v5508_v24 = vmul.f32 0.2, %v5252_v46  ;;  %v5254_v31 = vadd.f32 %v16841_v55, %v16781_v5  ;;  %8859 = vmatprep.subr.bf16.mxu1 %v11864_v33  ;;  %v11871_v61 = vld [vmem:[%s19941_s4 + $0xab8] ss:$28 sps:$4 sm:$0xff]  }
 0x4e8   :  { %8676 = vmatmul.mubr.bf16.gmra.mxu1 %v17003_v6  ;;  %v17017_v18 = vpack.c.bf16 %v5621_v17, %v5613_v15  ;;  %vm5374_vm11 = vcmp.gt.f32.partialorder %v5246_v39, 0.0  ;;  %v5502_v34 = vmul.f32 0.2, %v5246_v39  ;;  %8971 = vmatpush1.bf16.msra.mxu0 %v11859_v63  ;;  %v5243_v32 = vadd.f32 %v16832_v58, %v16785_v22  ;;  %v11876_v63 = vld [vmem:[%s19941_s4 + $0x704] ss:$28 sps:$4 sm:$0xff]  }
 0x4e9   :  { %v5628_v5 = vsel %vm5372_vm9, %v5244_v8, %v5500_v57  ;;  %v5636_v42 = vsel %vm5380_vm10, %v5252_v46, %v5508_v24  ;;  %vm5382_vm12 = vcmp.gt.f32.partialorder %v5254_v31, 0.0  ;;  %v5510_v7 = vmul.f32 0.2, %v5254_v31  ;;  %8972 = vmatprep.subr.bf16.mxu0 %v11867_v9  ;;  %v11882_v57 = vld [vmem:[%s19941_s4 + $0xa4c] ss:$28 sps:$4 sm:$0xff]  }
 0x4ea   :  { %8789 = vmatmul.mubr.bf16.gmra.mxu0 %v17017_v18  ;;  %v17030_v33 = vpack.c.bf16 %v5636_v42, %v5628_v5  ;;  %v5630_v2 = vsel %vm5374_vm11, %v5246_v39, %v5502_v34  ;;  %8860 = vmatpush1.bf16.msra.mxu1 %v11862_v27  ;;  %v5251_v22 = vadd.f32 %v16832_v58, %v16789_v0  ;;  %vm5371_vm13 = vcmp.gt.f32.partialorder %v5243_v32, 0.0  ;;  %v11879_v0 = vld [vmem:[%s19941_s4 + $0xa84] ss:$28 sps:$4 sm:$0xff]  }
 0x4eb   :  { %v5638_v26 = vsel %vm5382_vm12, %v5254_v31, %v5510_v7  ;;  %8861 = vmatprep.subr.bf16.mxu1 %v11870_v10  ;;  %v5499_v56 = vmul.f32 0.2, %v5243_v32  ;;  %v5245_v45 = vadd.f32 %v16838_v59, %v16793_v3  ;;  %v5253_v25 = vadd.f32 %v16838_v59, %v16797_v50  ;;  %v11874_v3 = vld [vmem:[%s19941_s4 + $0x700] ss:$28 sps:$4 sm:$0xff]   ;;  %v11880_v42 = vld [vmem:[%s19941_s4 + $0xa48] ss:$28 sps:$4 sm:$0xff]  }
 0x4ec   :  { %8685 = vmatprep.mubr.bf16.mxu1 %v17030_v33  ;;  %v17048_v8 = vpack.c.bf16 %v5638_v26, %v5630_v2  ;;  %8973 = vmatpush1.bf16.msra.mxu0 %v11865_v16  ;;  %vm5379_vm14 = vcmp.gt.f32.partialorder %v5251_v22, 0.0  ;;  %v5507_v46 = vmul.f32 0.2, %v5251_v22  ;;  %v5260_v1 = vadd.f32 %v16835_v40, %v16801_v21 }
 0x4ed   :  { %v5627_v50 = vsel %vm5371_vm13, %v5243_v32, %v5499_v56  ;;  %vm5373_vm15 = vcmp.gt.f32.partialorder %v5245_v45, 0.0  ;;  %vm5381_vm0 = vcmp.gt.f32.partialorder %v5253_v25, 0.0  ;;  %v5501_v4 = vmul.f32 0.2, %v5245_v45  ;;  %8974 = vmatprep.subr.bf16.mxu0 %v11873_v30  ;;  %v11885_v32 = vld [vmem:[%s19941_s4 + $0xdcc] ss:$28 sps:$4 sm:$0xff]  }
 0x4ee   :  { %8798 = vmatprep.mubr.bf16.mxu0 %v17048_v8  ;;  %v5635_v39 = vsel %vm5379_vm14, %v5251_v22, %v5507_v46  ;;  %v5509_v9 = vmul.f32 0.2, %v5253_v25  ;;  %8862 = vmatpush1.bf16.msra.mxu1 %v11868_v29  ;;  %v5268_v15 = vadd.f32 %v16835_v40, %v16805_v36  ;;  %vm5388_vm1 = vcmp.gt.f32.partialorder %v5260_v1, 0.0  ;;  %v11877_v36 = vld [vmem:[%s19941_s4 + $0xa80] ss:$28 sps:$4 sm:$0xff]  }
 0x4ef   :  { %v17059_v21 = vpack.c.bf16 %v5635_v39, %v5627_v50  ;;  %v5629_v27 = vsel %vm5373_vm15, %v5245_v45, %v5501_v4  ;;  %v5516_v16 = vmul.f32 0.2, %v5260_v1  ;;  %v5262_v17 = vadd.f32 %v16841_v55, %v16809_v43  ;;  %8863 = vmatprep.subr.bf16.mxu1 %v11876_v63  ;;  %v11888_v63 = vld [vmem:[%s19941_s4 + $0xa14] ss:$28 sps:$4 sm:$0xff]   ;;  %v11883_v45 = vld [vmem:[%s19941_s4 + $0xdc8] ss:$28 sps:$4 sm:$0xff]  }
 0x4f0   :  { %v5637_v24 = vsel %vm5381_vm0, %v5253_v25, %v5509_v9  ;;  %vm5396_vm2 = vcmp.gt.f32.partialorder %v5268_v15, 0.0  ;;  %v5524_v31 = vmul.f32 0.2, %v5268_v15  ;;  %v5270_v10 = vadd.f32 %v16841_v55, %v16813_v62  ;;  %8975 = vmatpush1.bf16.msra.mxu0 %v11871_v61  ;;  %v11891_v46 = vld [vmem:[%s19941_s4 + $0xd94] ss:$28 sps:$4 sm:$0xff]  }
 0x4f1   :  { %8686 = vmatmul.mubr.bf16.gmra.mxu1 %v17059_v21  ;;  %v17072_v34 = vpack.c.bf16 %v5637_v24, %v5629_v27  ;;  %v5644_v43 = vsel %vm5388_vm1, %v5260_v1, %v5516_v16  ;;  %vm5390_vm3 = vcmp.gt.f32.partialorder %v5262_v17, 0.0  ;;  %v5518_v29 = vmul.f32 0.2, %v5262_v17  ;;  %8976 = vmatprep.subr.bf16.mxu0 %v11879_v0  ;;  %v11886_v9 = vld [vmem:[%s19941_s4 + $0xa10] ss:$28 sps:$4 sm:$0xff]  }
 0x4f2   :  { %v5652_v5 = vsel %vm5396_vm2, %v5268_v15, %v5524_v31  ;;  %vm5398_vm4 = vcmp.gt.f32.partialorder %v5270_v10, 0.0  ;;  %v5526_v62 = vmul.f32 0.2, %v5270_v10  ;;  %8864 = vmatpush1.bf16.msra.mxu1 %v11874_v3  ;;  %v5259_v7 = vadd.f32 %v16832_v58, %v16817_v41  ;;  %v20906_v3 = vld [vmem:[#allocation109_spill] sm:$0xff] }
 0x4f3   :  { %20903 = vst [vmem:[#allocation89_spill] sm:$0xff] %v17072_v34  ;;  %v17083_v30 = vmul.f32 0.2, %v16869_v28  ;;  %8799 = vmatmul.mubr.bf16.gmra.mxu0 %v17072_v34  ;;  %v17086_v2 = vpack.c.bf16 %v5652_v5, %v5644_v43  ;;  %v5646_v22 = vsel %vm5390_vm3, %v5262_v17, %v5518_v29  ;;  %8865 = vmatprep.subr.bf16.mxu1 %v11882_v57  ;;  %v11889_v57 = vld [vmem:[%s19941_s4 + $0xd90] ss:$28 sps:$4 sm:$0xff]  }
 0x4f4   :  { %v5267_v61 = vadd.f32 %v16832_v58, %v16821_v20  ;;  %v5654_v26 = vsel %vm5398_vm4, %v5270_v10, %v5526_v62  ;;  %8977 = vmatpush1.bf16.msra.mxu0 %v11877_v36  ;;  %vm5387_vm5 = vcmp.gt.f32.partialorder %v5259_v7, 0.0  ;;  %v5515_v41 = vmul.f32 0.2, %v5259_v7  ;;  %v11897_v36 = vld [vmem:[%s19941_s4 + $0xd5c] ss:$28 sps:$4 sm:$0xff]   ;;  %v20909_v62 = vld [vmem:[#allocation50_spill] sm:$0xff] }
 0x4f5   :  { %20904 = vst [vmem:[#allocation14_spill] sm:$0xff] %v17086_v2  ;;  %v5261_v56 = vadd.f32 %v16838_v59, %v16825_v60  ;;  %8695 = vmatprep.mubr.bf16.mxu1 %v17086_v2  ;;  %v17099_v25 = vpack.c.bf16 %v5654_v26, %v5646_v22  ;;  %v5269_v0 = vadd.f32 %v16838_v59, %v16829_v38  ;;  %v20911_v22 = vld [vmem:[#allocation52_spill] sm:$0xff] }
 0x4f6   :  { %vm5395_vm6 = vcmp.gt.f32.partialorder %v5267_v61, 0.0  ;;  %v5523_v20 = vmul.f32 0.2, %v5267_v61  ;;  %8978 = vmatprep.subr.bf16.mxu0 %v11885_v32  ;;  %v5643_v1 = vsel %vm5387_vm5, %v5259_v7, %v5515_v41  ;;  %8866 = vmatpush2.bf16.msra.mxu1 %v11880_v42  ;;  %v5048_v50 = vmul.f32 %v16636_v35, %v20906_v3  ;;  %v20910_v42 = vld [vmem:[#allocation134_spill] sm:$0xff]  ;;  %v20912_v41 = vld [vmem:[#allocation13_spill] sm:$0xff] }
 0x4f7   :  { %20905 = vst [vmem:[#allocation19_spill] sm:$0xff] %v17099_v25  ;;  %vm5389_vm7 = vcmp.gt.f32.partialorder %v5261_v56, 0.0  ;;  %v5517_v60 = vmul.f32 0.2, %v5261_v56  ;;  %8808 = vmatprep.mubr.bf16.mxu0 %v17099_v25  ;;  %vm5397_vm8 = vcmp.gt.f32.partialorder %v5269_v0, 0.0  ;;  %v5276_v38 = vadd.f32 %v16835_v40, %v16855_v37  ;;  %8867 = vmatprep.subr.bf16.mxu1 %v11888_v63 }
 0x4f8   :  { %v5651_v4 = vsel %vm5395_vm6, %v5267_v61, %v5523_v20  ;;  %v5525_v39 = vmul.f32 0.2, %v5269_v0  ;;  %v5284_v16 = vadd.f32 %v16835_v40, %v5048_v50  ;;  %v5042_v17 = vmul.f32 %v16642_v47, %v20782_v48  ;;  %8979 = vmatpush2.bf16.msra.mxu0 %v11883_v45  ;;  %v11894_v37 = vld [vmem:[%s19941_s4 + $0x9dc] ss:$28 sps:$4 sm:$0xff]   ;;  %v11900_v20 = vld [vmem:[%s19941_s4 + $0x9a4] ss:$28 sps:$4 sm:$0xff]  }
 0x4f9   :  { %v17114_v15 = vpack.c.bf16 %v5651_v4, %v5643_v1  ;;  %v5645_v27 = vsel %vm5389_vm7, %v5261_v56, %v5517_v60  ;;  %vm5404_vm9 = vcmp.gt.f32.partialorder %v5276_v38, 0.0  ;;  %v5532_v31 = vmul.f32 0.2, %v5276_v38  ;;  %8980 = vmatprep.subr.bf16.mxu0 %v11891_v46  ;;  %v11892_v48 = vld [vmem:[%s19941_s4 + $0x9d8] ss:$28 sps:$4 sm:$0xff]   ;;  %v20913_v56 = vld [vmem:[#allocation135_spill] sm:$0xff] }
 0x4fa   :  { %v5653_v24 = vsel %vm5397_vm8, %v5269_v0, %v5525_v39  ;;  %v5050_v10 = vmul.f32 %v16642_v47, %v15829_v19  ;;  %vm5412_vm10 = vcmp.gt.f32.partialorder %v5284_v16, 0.0  ;;  %v5540_v29 = vmul.f32 0.2, %v5284_v16  ;;  %8868 = vmatpush2.bf16.msra.mxu1 %v11886_v9  ;;  %v11895_v60 = vld [vmem:[%s19941_s4 + $0xd58] ss:$28 sps:$4 sm:$0xff]  }
 0x4fb   :  { %20907 = vst [vmem:[#allocation61_spill] sm:$0xff] %v17114_v15  ;;  %8696 = vmatmul.mubr.bf16.gmra.mxu1 %v17114_v15  ;;  %v17134_v43 = vpack.c.bf16 %v5653_v24, %v5645_v27  ;;  %v5278_v32 = vadd.f32 %v16841_v55, %v5042_v17  ;;  %v5660_v5 = vsel %vm5404_vm9, %v5276_v38, %v5532_v31  ;;  %v20915_v4 = vld [vmem:[#allocation108_spill] sm:$0xff]  ;;  %v11898_v9 = vld [vmem:[%s19941_s4 + $0x9a0] ss:$28 sps:$4 sm:$0xff]  }
 0x4fc   :  { %v5286_v19 = vadd.f32 %v16841_v55, %v5050_v10  ;;  %v5039_v7 = vmul.f32 %v20910_v42, %v20909_v62  ;;  %v5047_v61 = vmul.f32 %v20910_v42, %v20911_v22  ;;  %v5668_v63 = vsel %vm5412_vm10, %v5284_v16, %v5540_v29  ;;  %8869 = vmatprep.subr.bf16.mxu1 %v11894_v37  ;;  %v11903_v27 = vld [vmem:[%s19941_s4 + $0xd24] ss:$28 sps:$4 sm:$0xff]  }
 0x4fd   :  { %20908 = vst [vmem:[#allocation63_spill] sm:$0xff] %v17134_v43  ;;  %8809 = vmatmul.mubr.bf16.gmra.mxu0 %v17134_v43  ;;  %vm5406_vm11 = vcmp.gt.f32.partialorder %v5278_v32, 0.0  ;;  %v5534_v26 = vmul.f32 0.2, %v5278_v32  ;;  %v5041_v45 = vmul.f32 %v20913_v56, %v20912_v41  ;;  %v17148_v0 = vpack.c.bf16 %v5668_v63, %v5660_v5  ;;  %v20918_v5 = vld [vmem:[#allocation87_spill] sm:$0xff] }
 0x4fe   :  { %vm5414_vm12 = vcmp.gt.f32.partialorder %v5286_v19, 0.0  ;;  %v5542_v46 = vmul.f32 0.2, %v5286_v19  ;;  %8981 = vmatpush2.bf16.msra.mxu0 %v11889_v57  ;;  %v5275_v1 = vadd.f32 %v16832_v58, %v5039_v7  ;;  %v5283_v50 = vadd.f32 %v16832_v58, %v5047_v61  ;;  %8870 = vmatpush2.bf16.msra.mxu1 %v11892_v48  ;;  %v20916_v57 = vld [vmem:[#allocation54_spill] sm:$0xff]  ;;  %v11909_v61 = vld [vmem:[%s19941_s4 + $0xcec] ss:$28 sps:$4 sm:$0xff]  }
 0x4ff   :  { %20914 = vst [vmem:[#allocation20_spill] sm:$0xff] %v17148_v0  ;;  %v5662_v3 = vsel %vm5406_vm11, %v5278_v32, %v5534_v26  ;;  %v5049_v39 = vmul.f32 %v20913_v56, %v20915_v4  ;;  %v5277_v38 = vadd.f32 %v16838_v59, %v5041_v45  ;;  %8982 = vmatprep.subr.bf16.mxu0 %v11897_v36  ;;  %v11906_v36 = vld [vmem:[%s19941_s4 + $0x96c] ss:$28 sps:$4 sm:$0xff]   ;;  %v20920_v45 = vld [vmem:[#allocation80_spill] sm:$0xff] }
 0x500   :  { %8705 = vmatprep.mubr.bf16.mxu1 %v17148_v0  ;;  %v5670_v16 = vsel %vm5414_vm12, %v5286_v19, %v5542_v46  ;;  %vm5403_vm13 = vcmp.gt.f32.partialorder %v5275_v1, 0.0  ;;  %v5531_v17 = vmul.f32 0.2, %v5275_v1  ;;  %v5056_v37 = vmul.f32 %v16636_v35, %v20916_v57  ;;  %8871 = vmatprep.subr.bf16.mxu1 %v11900_v20  ;;  %v11901_v19 = vld [vmem:[%s19941_s4 + $0xd20] ss:$28 sps:$4 sm:$0xff]  }
 0x501   :  { %v17167_v24 = vpack.c.bf16 %v5670_v16, %v5662_v3  ;;  %vm5411_vm14 = vcmp.gt.f32.partialorder %v5283_v50, 0.0  ;;  %v5539_v31 = vmul.f32 0.2, %v5283_v50  ;;  %v5285_v10 = vadd.f32 %v16838_v59, %v5049_v39  ;;  %v11904_v46 = vld [vmem:[%s19941_s4 + $0x968] ss:$28 sps:$4 sm:$0xff]   ;;  %v20923_v57 = vld [vmem:[#allocation53_spill] sm:$0xff] }
 0x502   :  { %v5659_v29 = vsel %vm5403_vm13, %v5275_v1, %v5531_v17  ;;  %vm5405_vm15 = vcmp.gt.f32.partialorder %v5277_v38, 0.0  ;;  %v5533_v32 = vmul.f32 0.2, %v5277_v38  ;;  %v5064_v48 = vmul.f32 %v16636_v35, %v20918_v5  ;;  %8983 = vmatpush2.bf16.msra.mxu0 %v11895_v60  ;;  %8872 = vmatpush2.bf16.msra.mxu1 %v11898_v9  ;;  %v20921_v3 = vld [vmem:[#allocation98_spill] sm:$0xff]  ;;  %v11912_v4 = vld [vmem:[%s19941_s4 + $0x934] ss:$28 sps:$4 sm:$0xff]  }
 0x503   :  { %20917 = vst [vmem:[#allocation21_spill] sm:$0xff] %v17167_v24  ;;  %8818 = vmatprep.mubr.bf16.mxu0 %v17167_v24  ;;  %v5667_v62 = vsel %vm5411_vm14, %v5283_v50, %v5539_v31  ;;  %vm5413_vm0 = vcmp.gt.f32.partialorder %v5285_v10, 0.0  ;;  %v5541_v7 = vmul.f32 0.2, %v5285_v10  ;;  %v5292_v22 = vadd.f32 %v16835_v40, %v5056_v37  ;;  %8984 = vmatprep.subr.bf16.mxu0 %v11903_v27  ;;  %v11907_v27 = vld [vmem:[%s19941_s4 + $0xce8] ss:$28 sps:$4 sm:$0xff]  }
 0x504   :  { %v17183_v63 = vpack.c.bf16 %v5667_v62, %v5659_v29  ;;  %v5661_v26 = vsel %vm5405_vm15, %v5277_v38, %v5533_v32  ;;  %v5300_v41 = vadd.f32 %v16835_v40, %v5064_v48  ;;  %v5058_v20 = vmul.f32 %v16642_v47, %v20920_v45  ;;  %8873 = vmatprep.subr.bf16.mxu1 %v11906_v36  ;;  %v20924_v31 = vld [vmem:[#allocation55_spill] sm:$0xff]  ;;  %v11915_v29 = vld [vmem:[%s19941_s4 + $0xcb4] ss:$28 sps:$4 sm:$0xff]  }
 0x505   :  { %v5669_v1 = vsel %vm5413_vm0, %v5285_v10, %v5541_v7  ;;  %vm5420_vm1 = vcmp.gt.f32.partialorder %v5292_v22, 0.0  ;;  %v5548_v60 = vmul.f32 0.2, %v5292_v22  ;;  %v5066_v50 = vmul.f32 %v16642_v47, %v20921_v3  ;;  %v11910_v36 = vld [vmem:[%s19941_s4 + $0x930] ss:$28 sps:$4 sm:$0xff]  }
 0x506   :  { %20919 = vst [vmem:[#allocation65_spill] sm:$0xff] %v17183_v63  ;;  %8706 = vmatmul.mubr.bf16.gmra.mxu1 %v17183_v63  ;;  %v17197_v39 = vpack.c.bf16 %v5669_v1, %v5661_v26  ;;  %vm5428_vm2 = vcmp.gt.f32.partialorder %v5300_v41, 0.0  ;;  %v5556_v38 = vmul.f32 0.2, %v5300_v41  ;;  %v5294_v9 = vadd.f32 %v16841_v55, %v5058_v20  ;;  %8985 = vmatpush2.bf16.msra.mxu0 %v11901_v19  ;;  %v20925_v48 = vld [vmem:[#allocation79_spill] sm:$0xff]  ;;  %v20927_v45 = vld [vmem:[#allocation28_spill] sm:$0xff] }
 0x507   :  { %v5676_v16 = vsel %vm5420_vm1, %v5292_v22, %v5548_v60  ;;  %v5302_v17 = vadd.f32 %v16841_v55, %v5066_v50  ;;  %v5055_v37 = vmul.f32 %v20910_v42, %v20923_v57  ;;  %v5063_v10 = vmul.f32 %v20910_v42, %v20924_v31  ;;  %8986 = vmatprep.subr.bf16.mxu0 %v11909_v61  ;;  %v11918_v61 = vld [vmem:[%s19941_s4 + $0x8fc] ss:$28 sps:$4 sm:$0xff]   ;;  %v20930_v31 = vld [vmem:[#allocation39_spill] sm:$0xff] }
 0x508   :  { %20922 = vst [vmem:[#allocation91_spill] sm:$0xff] %v17197_v39  ;;  %8819 = vmatmul.mubr.bf16.gmra.mxu0 %v17197_v39  ;;  %v5684_v32 = vsel %vm5428_vm2, %v5300_v41, %v5556_v38  ;;  %vm5422_vm3 = vcmp.gt.f32.partialorder %v5294_v9, 0.0  ;;  %v5550_v5 = vmul.f32 0.2, %v5294_v9  ;;  %v5057_v19 = vmul.f32 %v20913_v56, %v20925_v48  ;;  %8874 = vmatpush2.bf16.msra.mxu1 %v11904_v46  ;;  %v11913_v46 = vld [vmem:[%s19941_s4 + $0xcb0] ss:$28 sps:$4 sm:$0xff]  }
 0x509   :  { %v17217_v62 = vpack.c.bf16 %v5684_v32, %v5676_v16  ;;  %vm5430_vm4 = vcmp.gt.f32.partialorder %v5302_v17, 0.0  ;;  %v5558_v7 = vmul.f32 0.2, %v5302_v17  ;;  %v5291_v22 = vadd.f32 %v16832_v58, %v5055_v37  ;;  %8875 = vmatprep.subr.bf16.mxu1 %v11912_v4  ;;  %v20928_v50 = vld [vmem:[#allocation57_spill] sm:$0xff] }
 0x50a   :  { %v5678_v26 = vsel %vm5422_vm3, %v5294_v9, %v5550_v5  ;;  %v5299_v41 = vadd.f32 %v16832_v58, %v5063_v10  ;;  %v5065_v20 = vmul.f32 %v20913_v56, %v20927_v45  ;;  %v5293_v1 = vadd.f32 %v16838_v59, %v5057_v19  ;;  %8987 = vmatpush2.bf16.msra.mxu0 %v11907_v27  ;;  %v11921_v38 = vld [vmem:[%s19941_s4 + $0xc7c] ss:$28 sps:$4 sm:$0xff]  }
 0x50b   :  { %20926 = vst [vmem:[#allocation17_spill] sm:$0xff] %v17217_v62  ;;  %8715 = vmatprep.mubr.bf16.mxu1 %v17217_v62  ;;  %v5686_v60 = vsel %vm5430_vm4, %v5302_v17, %v5558_v7  ;;  %vm5419_vm5 = vcmp.gt.f32.partialorder %v5291_v22, 0.0  ;;  %v5547_v3 = vmul.f32 0.2, %v5291_v22  ;;  %v5072_v4 = vmul.f32 %v16636_v35, %v20928_v50  ;;  %8988 = vmatprep.subr.bf16.mxu0 %v11915_v29  ;;  %v11916_v17 = vld [vmem:[%s19941_s4 + $0x8f8] ss:$28 sps:$4 sm:$0xff]  }
 0x50c   :  { %v17236_v9 = vpack.c.bf16 %v5686_v60, %v5678_v26  ;;  %vm5427_vm6 = vcmp.gt.f32.partialorder %v5299_v41, 0.0  ;;  %v5555_v27 = vmul.f32 0.2, %v5299_v41  ;;  %v5301_v16 = vadd.f32 %v16838_v59, %v5065_v20  ;;  %8876 = vmatpush2.bf16.msra.mxu1 %v11910_v36  ;;  %v11924_v29 = vld [vmem:[%s19941_s4 + $0x8c4] ss:$28 sps:$4 sm:$0xff]  }
 0x50d   :  { %v5675_v57 = vsel %vm5419_vm5, %v5291_v22, %v5547_v3  ;;  %vm5421_vm7 = vcmp.gt.f32.partialorder %v5293_v1, 0.0  ;;  %v5549_v37 = vmul.f32 0.2, %v5293_v1  ;;  %v5080_v10 = vmul.f32 %v16636_v35, %v20930_v31  ;;  %8877 = vmatprep.subr.bf16.mxu1 %v11918_v61  ;;  %v11919_v48 = vld [vmem:[%s19941_s4 + $0xc78] ss:$28 sps:$4 sm:$0xff]  }
 0x50e   :  { %20929 = vst [vmem:[#allocation18_spill] sm:$0xff] %v17236_v9  ;;  %8828 = vmatprep.mubr.bf16.mxu0 %v17236_v9  ;;  %v5683_v32 = vsel %vm5427_vm6, %v5299_v41, %v5555_v27  ;;  %vm5429_vm8 = vcmp.gt.f32.partialorder %v5301_v16, 0.0  ;;  %v5557_v36 = vmul.f32 0.2, %v5301_v16  ;;  %v5308_v5 = vadd.f32 %v16835_v40, %v5072_v4  ;;  %8989 = vmatpush2.bf16.msra.mxu0 %v11913_v46  ;;  %v20932_v22 = vld [vmem:[#allocation29_spill] sm:$0xff]  ;;  %v20933_v46 = vld [vmem:[#allocation103_spill] sm:$0xff] }
 0x50f   :  { %v17252_v19 = vpack.c.bf16 %v5683_v32, %v5675_v57  ;;  %v5677_v35 = vsel %vm5421_vm7, %v5293_v1, %v5549_v37  ;;  %v5316_v7 = vadd.f32 %v16835_v40, %v5080_v10  ;;  %v5074_v61 = vmul.f32 %v16642_v47, %v20932_v22  ;;  %8990 = vmatprep.subr.bf16.mxu0 %v11921_v38  ;;  %v11922_v26 = vld [vmem:[%s19941_s4 + $0x8c0] ss:$28 sps:$4 sm:$0xff]   ;;  %v11930_v50 = vld [vmem:[%s19941_s4 + $0x194] ss:$28 sps:$4 sm:$0xff]  }
 0x510   :  { %v11927_v41 = vld [vmem:[%s19941_s4 + $0xc44] ss:$28 sps:$4 sm:$0xff]   ;;  %v5685_v45 = vsel %vm5429_vm8, %v5301_v16, %v5557_v36  ;;  %vm5436_vm9 = vcmp.gt.f32.partialorder %v5308_v5, 0.0  ;;  %v5564_v20 = vmul.f32 0.2, %v5308_v5  ;;  %v5082_v1 = vmul.f32 %v16642_v47, %v20933_v46  ;;  %8878 = vmatpush2.bf16.msra.mxu1 %v11916_v17  ;;  %v20935_v27 = vld [vmem:[#allocation56_spill] sm:$0xff] }
 0x511   :  { %20931 = vst [vmem:[#allocation64_spill] sm:$0xff] %v17252_v19  ;;  %8716 = vmatmul.mubr.bf16.gmra.mxu1 %v17252_v19  ;;  %v17266_v40 = vpack.c.bf16 %v5685_v45, %v5677_v35  ;;  %vm5444_vm10 = vcmp.gt.f32.partialorder %v5316_v7, 0.0  ;;  %v5572_v60 = vmul.f32 0.2, %v5316_v7  ;;  %v5310_v3 = vadd.f32 %v16841_v55, %v5074_v61  ;;  %8879 = vmatprep.subr.bf16.mxu1 %v11924_v29  ;;  %v20936_v16 = vld [vmem:[#allocation58_spill] sm:$0xff]  ;;  %v20940_v45 = vld [vmem:[#allocation85_spill] sm:$0xff] }
 0x512   :  { %v5692_v4 = vsel %vm5436_vm9, %v5308_v5, %v5564_v20  ;;  %v5318_v38 = vadd.f32 %v16841_v55, %v5082_v1  ;;  %v5071_v47 = vmul.f32 %v20910_v42, %v20935_v27  ;;  %v5079_v17 = vmul.f32 %v20910_v42, %v20936_v16  ;;  %8991 = vmatpush2.bf16.msra.mxu0 %v11919_v48  ;;  %v11925_v57 = vld [vmem:[%s19941_s4 + $0xc40] ss:$28 sps:$4 sm:$0xff]   ;;  %v11933_v55 = vld [vmem:[%s19941_s4 + $0x514] ss:$28 sps:$4 sm:$0xff]   ;;  %v20944_v27 = vld [vmem:[#allocation23_spill] sm:$0xff] }
 0x513   :  { %20934 = vst [vmem:[#allocation66_spill] sm:$0xff] %v17266_v40  ;;  %8829 = vmatmul.mubr.bf16.gmra.mxu0 %v17266_v40  ;;  %v5700_v37 = vsel %vm5444_vm10, %v5316_v7, %v5572_v60  ;;  %vm5438_vm11 = vcmp.gt.f32.partialorder %v5310_v3, 0.0  ;;  %v5566_v31 = vmul.f32 0.2, %v5310_v3  ;;  %v20937_v10 = vld [vmem:[#allocation110_spill] sm:$0xff]  ;;  %8992 = vmatprep.subr.bf16.mxu0 %v11927_v41  ;;  %v20941_v20 = vld [vmem:[#allocation137_spill] sm:$0xff] }
 0x514   :  { %v5073_v29 = vmul.f32 %v20913_v56, %v20937_v10  ;;  %v17286_v32 = vpack.c.bf16 %v5700_v37, %v5692_v4  ;;  %vm5446_vm12 = vcmp.gt.f32.partialorder %v5318_v38, 0.0  ;;  %v5574_v42 = vmul.f32 0.2, %v5318_v38  ;;  %8880 = vmatpush2.bf16.msra.mxu1 %v11922_v26  ;;  %v20939_v35 = vld [vmem:[#allocation82_spill] sm:$0xff]  ;;  %v20947_v37 = vld [vmem:[#allocation139_spill] sm:$0xff] }
 0x515   :  { %v5307_v36 = vadd.f32 %v16832_v58, %v5071_v47  ;;  %v5694_v5 = vsel %vm5438_vm11, %v5310_v3, %v5566_v31  ;;  %v5315_v48 = vadd.f32 %v16832_v58, %v5079_v17  ;;  %v5081_v7 = vmul.f32 %v20913_v56, %v20939_v35  ;;  %9075 = vmatprep.subr.bf16.mxu1 %v11930_v50  ;;  %v20943_v3 = vld [vmem:[#allocation40_spill] sm:$0xff] }
 0x516   :  { %20938 = vst [vmem:[#allocation30_spill] sm:$0xff] %v17286_v32  ;;  %v5309_v22 = vadd.f32 %v16838_v59, %v5073_v29  ;;  %8725 = vmatprep.mubr.bf16.mxu1 %v17286_v32  ;;  %v5702_v61 = vsel %vm5446_vm12, %v5318_v38, %v5574_v42  ;;  %v4964_v46 = vmul.f32 %v20941_v20, %v20940_v45  ;;  %v20952_v45 = vld [vmem:[#allocation34_spill] sm:$0xff] }
 0x517   :  { %vm5435_vm13 = vcmp.gt.f32.partialorder %v5307_v36, 0.0  ;;  %v5563_v41 = vmul.f32 0.2, %v5307_v36  ;;  %8993 = vmatpush2.bf16.msra.mxu0 %v11925_v57  ;;  %v17296_v1 = vpack.c.bf16 %v5702_v61, %v5694_v5  ;;  %vm5443_vm14 = vcmp.gt.f32.partialorder %v5315_v48, 0.0  ;;  %v20951_v61 = vld [vmem:[#allocation136_spill] sm:$0xff] }
 0x518   :  { %v5571_v26 = vmul.f32 0.2, %v5315_v48  ;;  %v5317_v58 = vadd.f32 %v16838_v59, %v5081_v7  ;;  %9188 = vmatprep.subr.bf16.mxu0 %v11933_v55  ;;  %vm5437_vm15 = vcmp.gt.f32.partialorder %v5309_v22, 0.0  ;;  %v5565_v60 = vmul.f32 0.2, %v5309_v22  ;;  %v20946_v59 = vld [vmem:[#allocation9_spill] sm:$0xff] }
 0x519   :  { %20942 = vst [vmem:[#allocation31_spill] sm:$0xff] %v17296_v1  ;;  %v5691_v56 = vsel %vm5435_vm13, %v5307_v36, %v5563_v41  ;;  %v4972_v50 = vmul.f32 %v20941_v20, %v20943_v3  ;;  %8838 = vmatprep.mubr.bf16.mxu0 %v17296_v1  ;;  %v5200_v47 = vadd.f32 %v20944_v27, %v4964_v46  ;;  %v20948_v55 = vld [vmem:[#allocation7_spill] sm:$0xff] }
 0x51a   :  { %v5699_v4 = vsel %vm5443_vm14, %v5315_v48, %v5571_v26  ;;  %vm5445_vm0 = vcmp.gt.f32.partialorder %v5317_v58, 0.0  ;;  %v5573_v38 = vmul.f32 0.2, %v5317_v58  ;;  %v5693_v17 = vsel %vm5437_vm15, %v5309_v22, %v5565_v60  ;;  %v20950_v22 = vld [vmem:[#allocation83_spill] sm:$0xff]  ;;  %v20954_v60 = vld [vmem:[#allocation138_spill] sm:$0xff] }
 0x51b   :  { %v17303_v16 = vpack.c.bf16 %v5699_v4, %v5691_v56  ;;  %v5208_v57 = vadd.f32 %v20944_v27, %v4972_v50  ;;  %v4966_v31 = vmul.f32 %v20947_v37, %v20946_v59  ;;  %vm5328_vm1 = vcmp.gt.f32.partialorder %v5200_v47, 0.0  ;;  %v20953_v56 = vld [vmem:[#allocation8_spill] sm:$0xff] }
 0x51c   :  { %v5701_v10 = vsel %vm5445_vm0, %v5317_v58, %v5573_v38  ;;  %v5456_v29 = vmul.f32 0.2, %v5200_v47  ;;  %v4974_v42 = vmul.f32 %v20947_v37, %v20948_v55  ;;  %v4963_v41 = vmul.f32 %v20951_v61, %v20950_v22  ;;  %v20956_v38 = vld [vmem:[#allocation22_spill] sm:$0xff] }
 0x51d   :  { %20945 = vst [vmem:[#allocation68_spill] sm:$0xff] %v17303_v16  ;;  %8726 = vmatmul.mubr.bf16.gmra.mxu1 %v17303_v16  ;;  %v17311_v36 = vpack.c.bf16 %v5701_v10, %v5693_v17  ;;  %vm5336_vm2 = vcmp.gt.f32.partialorder %v5208_v57, 0.0  ;;  %v5464_v5 = vmul.f32 0.2, %v5208_v57  ;;  %v5202_v48 = vadd.f32 %v16851_v44, %v4966_v31  ;;  %v20957_v31 = vld [vmem:[#allocation75_spill] sm:$0xff] }
 0x51e   :  { %v5584_v35 = vsel %vm5328_vm1, %v5200_v47, %v5456_v29  ;;  %v5210_v7 = vadd.f32 %v16851_v44, %v4974_v42  ;;  %v4971_v46 = vmul.f32 %v20951_v61, %v20952_v45  ;;  %v4965_v3 = vmul.f32 %v20954_v60, %v20953_v56  ;;  %v20958_v29 = vld [vmem:[#allocation62_spill] sm:$0xff] }
 0x51f   :  { %20949 = vst [vmem:[#allocation33_spill] sm:$0xff] %v17311_v36  ;;  %8839 = vmatmul.mubr.bf16.gmra.mxu0 %v17311_v36  ;;  %v5592_v26 = vsel %vm5336_vm2, %v5208_v57, %v5464_v5  ;;  %vm5330_vm3 = vcmp.gt.f32.partialorder %v5202_v48, 0.0  ;;  %v5458_v58 = vmul.f32 0.2, %v5202_v48  ;;  %v5199_v47 = vadd.f32 %v20956_v38, %v4963_v41  ;;  %v20959_v5 = vld [vmem:[#allocation86_spill] sm:$0xff] }
 0x520   :  { %v17322_v50 = vpack.c.bf16 %v5592_v26, %v5584_v35  ;;  %vm5338_vm4 = vcmp.gt.f32.partialorder %v5210_v7, 0.0  ;;  %v5466_v4 = vmul.f32 0.2, %v5210_v7  ;;  %v5207_v59 = vadd.f32 %v20956_v38, %v4971_v46  ;;  %v20961_v26 = vld [vmem:[#allocation44_spill] sm:$0xff] }
 0x521   :  { %v5586_v17 = vsel %vm5330_vm3, %v5202_v48, %v5458_v58  ;;  %v4973_v10 = vmul.f32 %v20954_v60, %v20957_v31  ;;  %v5201_v55 = vadd.f32 %v20958_v29, %v4965_v3  ;;  %vm5327_vm5 = vcmp.gt.f32.partialorder %v5199_v47, 0.0 }
 0x522   :  { %20955 = vst [vmem:[#allocation26_spill] sm:$0xff] %v17322_v50  ;;  %8881 = vmatprep.mubr.bf16.mxu1 %v17322_v50  ;;  %v5594_v57 = vsel %vm5338_vm4, %v5210_v7, %v5466_v4  ;;  %v5455_v42 = vmul.f32 0.2, %v5199_v47  ;;  %v4980_v35 = vmul.f32 %v20941_v20, %v20959_v5  ;;  %vm5335_vm6 = vcmp.gt.f32.partialorder %v5207_v59, 0.0  ;;  %v11928_v7 = vld [vmem:[%s19941_s4 + $0x190] ss:$28 sps:$4 sm:$0xff]  }
 0x523   :  { %v17332_v22 = vpack.c.bf16 %v5594_v57, %v5586_v17  ;;  %v5463_v41 = vmul.f32 0.2, %v5207_v59  ;;  %v5209_v48 = vadd.f32 %v20958_v29, %v4973_v10  ;;  %vm5329_vm7 = vcmp.gt.f32.partialorder %v5201_v55, 0.0  ;;  %v20963_v57 = vld [vmem:[#allocation78_spill] sm:$0xff] }
 0x524   :  { %v5583_v45 = vsel %vm5327_vm5, %v5199_v47, %v5455_v42  ;;  %v5457_v46 = vmul.f32 0.2, %v5201_v55  ;;  %v4988_v58 = vmul.f32 %v20941_v20, %v20961_v26  ;;  %v5216_v4 = vadd.f32 %v20944_v27, %v4980_v35  ;;  %v11931_v47 = vld [vmem:[%s19941_s4 + $0x510] ss:$28 sps:$4 sm:$0xff]   ;;  %v20964_v35 = vld [vmem:[#allocation81_spill] sm:$0xff]  ;;  %v20975_v50 = vld [vmem:[#allocation94_spill] sm:$0xff] }
 0x525   :  { %20960 = vst [vmem:[#allocation27_spill] sm:$0xff] %v17332_v22  ;;  %8994 = vmatprep.mubr.bf16.mxu0 %v17332_v22  ;;  %v5591_v56 = vsel %vm5335_vm6, %v5207_v59, %v5463_v41  ;;  %vm5337_vm8 = vcmp.gt.f32.partialorder %v5209_v48, 0.0  ;;  %v5465_v3 = vmul.f32 0.2, %v5209_v48  ;;  %v4982_v42 = vmul.f32 %v20947_v37, %v20963_v57  ;;  %v11936_v59 = vld [vmem:[%s19941_s4 + $0x15c] ss:$28 sps:$4 sm:$0xff]  }
 0x526   :  { %v17342_v17 = vpack.c.bf16 %v5591_v56, %v5583_v45  ;;  %v5585_v31 = vsel %vm5329_vm7, %v5201_v55, %v5457_v46  ;;  %v5224_v10 = vadd.f32 %v20944_v27, %v4988_v58  ;;  %vm5344_vm9 = vcmp.gt.f32.partialorder %v5216_v4, 0.0  ;;  %v11939_v58 = vld [vmem:[%s19941_s4 + $0x4dc] ss:$28 sps:$4 sm:$0xff]   ;;  %v20966_v57 = vld [vmem:[#allocation38_spill] sm:$0xff] }
 0x527   :  { %v5593_v5 = vsel %vm5337_vm8, %v5209_v48, %v5465_v3  ;;  %v5472_v41 = vmul.f32 0.2, %v5216_v4  ;;  %v4990_v45 = vmul.f32 %v20947_v37, %v20964_v35  ;;  %v5218_v26 = vadd.f32 %v16851_v44, %v4982_v42  ;;  %v11934_v3 = vld [vmem:[%s19941_s4 + $0x158] ss:$28 sps:$4 sm:$0xff]  }
 0x528   :  { %20962 = vst [vmem:[#allocation67_spill] sm:$0xff] %v17342_v17  ;;  %8882 = vmatmul.mubr.bf16.vlgmr.msra.gmra.mxu1 %v17342_v17  ;;  %v17356_v55 = vpack.c.bf16 %v5593_v5, %v5585_v31  ;;  %vm5352_vm10 = vcmp.gt.f32.partialorder %v5224_v10, 0.0  ;;  %v5480_v46 = vmul.f32 0.2, %v5224_v10  ;;  %v4979_v31 = vmul.f32 %v20951_v61, %v20966_v57  ;;  %v20967_v5 = vld [vmem:[#allocation35_spill] sm:$0xff] }
 0x529   :  { %9076 = vmatpush1.bf16.msra.mxu1 %v11928_v7  ;;  %v5600_v56 = vsel %vm5344_vm9, %v5216_v4, %v5472_v41  ;;  %v5226_v48 = vadd.f32 %v16851_v44, %v4990_v45  ;;  %v4987_v35 = vmul.f32 %v20951_v61, %v20967_v5  ;;  %vm5346_vm11 = vcmp.gt.f32.partialorder %v5218_v26, 0.0  ;;  %v11942_v7 = vld [vmem:[%s19941_s4 + $0x124] ss:$28 sps:$4 sm:$0xff]   ;;  %v20968_v4 = vld [vmem:[#allocation24_spill] sm:$0xff] }
 0x52a   :  { %20965 = vst [vmem:[#allocation70_spill] sm:$0xff] %v17356_v55  ;;  %8995 = vmatmul.mubr.bf16.vlgmr.msra.gmra.mxu0 %v17356_v55  ;;  %v5608_v42 = vsel %vm5352_vm10, %v5224_v10, %v5480_v46  ;;  %v5474_v17 = vmul.f32 0.2, %v5218_v26  ;;  %9077 = vmatprep.subr.bf16.mxu1 %v11936_v59  ;;  %v4981_v41 = vmul.f32 %v20954_v60, %v20968_v4  ;;  %v11937_v5 = vld [vmem:[%s19941_s4 + $0x4d8] ss:$28 sps:$4 sm:$0xff]   ;;  %v20970_v4 = vld [vmem:[#allocation10_spill] sm:$0xff] }
 0x52b   :  { %v17376_v45 = vpack.c.bf16 %v5608_v42, %v5600_v56  ;;  %vm5354_vm12 = vcmp.gt.f32.partialorder %v5226_v48, 0.0  ;;  %v5482_v57 = vmul.f32 0.2, %v5226_v48  ;;  %9189 = vmatpush1.bf16.msra.mxu0 %v11931_v47  ;;  %v5215_v10 = vadd.f32 %v20956_v38, %v4979_v31  ;;  %v11940_v59 = vld [vmem:[%s19941_s4 + $0x120] ss:$28 sps:$4 sm:$0xff]  }
 0x52c   :  { %v5602_v46 = vsel %vm5346_vm11, %v5218_v26, %v5474_v17  ;;  %9190 = vmatprep.subr.bf16.mxu0 %v11939_v58  ;;  %v5223_v55 = vadd.f32 %v20956_v38, %v4987_v35  ;;  %v4989_v56 = vmul.f32 %v20954_v60, %v20970_v4  ;;  %v5217_v42 = vadd.f32 %v20958_v29, %v4981_v41  ;;  %v11945_v47 = vld [vmem:[%s19941_s4 + $0x4a4] ss:$28 sps:$4 sm:$0xff]   ;;  %v20971_v26 = vld [vmem:[#allocation88_spill] sm:$0xff]  ;;  %v11948_v4 = vld [vmem:[%s19941_s4 + $0xec] ss:$28 sps:$4 sm:$0xff]  }
 0x52d   :  { %20969 = vst [vmem:[#allocation12_spill] sm:$0xff] %v17376_v45  ;;  %8891 = vmatprep.mubr.bf16.mxu1 %v17376_v45  ;;  %v5610_v31 = vsel %vm5354_vm12, %v5226_v48, %v5482_v57  ;;  %9078 = vmatpush1.bf16.msra.mxu1 %v11934_v3  ;;  %vm5343_vm13 = vcmp.gt.f32.partialorder %v5215_v10, 0.0  ;;  %v5471_v17 = vmul.f32 0.2, %v5215_v10  ;;  %v4996_v58 = vmul.f32 %v20941_v20, %v20971_v26  ;;  %v11943_v3 = vld [vmem:[%s19941_s4 + $0x4a0] ss:$28 sps:$4 sm:$0xff]  }
 0x52e   :  { %v17395_v22 = vpack.c.bf16 %v5610_v31, %v5602_v46  ;;  %9079 = vmatprep.subr.bf16.mxu1 %v11942_v7  ;;  %vm5351_vm14 = vcmp.gt.f32.partialorder %v5223_v55, 0.0  ;;  %v5479_v35 = vmul.f32 0.2, %v5223_v55  ;;  %v5225_v41 = vadd.f32 %v20958_v29, %v4989_v56  ;;  %v20973_v57 = vld [vmem:[#allocation45_spill] sm:$0xff] }
 0x52f   :  { %9191 = vmatpush1.bf16.msra.mxu0 %v11937_v5  ;;  %v5599_v45 = vsel %vm5343_vm13, %v5215_v10, %v5471_v17  ;;  %vm5345_vm15 = vcmp.gt.f32.partialorder %v5217_v42, 0.0  ;;  %v5473_v48 = vmul.f32 0.2, %v5217_v42  ;;  %v5004_v46 = vmul.f32 %v20941_v20, %v20973_v57  ;;  %v11951_v5 = vld [vmem:[%s19941_s4 + $0x46c] ss:$28 sps:$4 sm:$0xff]  }
 0x530   :  { %20972 = vst [vmem:[#allocation16_spill] sm:$0xff] %v17395_v22  ;;  %9004 = vmatprep.mubr.bf16.mxu0 %v17395_v22  ;;  %v5607_v7 = vsel %vm5351_vm14, %v5223_v55, %v5479_v35  ;;  %vm5353_vm0 = vcmp.gt.f32.partialorder %v5225_v41, 0.0  ;;  %v5481_v56 = vmul.f32 0.2, %v5225_v41  ;;  %9192 = vmatprep.subr.bf16.mxu0 %v11945_v47  ;;  %v5232_v31 = vadd.f32 %v20944_v27, %v4996_v58  ;;  %v11946_v55 = vld [vmem:[%s19941_s4 + $0xe8] ss:$28 sps:$4 sm:$0xff]  }
 0x531   :  { %v17411_v10 = vpack.c.bf16 %v5607_v7, %v5599_v45  ;;  %v5601_v17 = vsel %vm5345_vm15, %v5217_v42, %v5473_v48  ;;  %9080 = vmatpush1.bf16.msra.mxu1 %v11940_v59  ;;  %v5240_v26 = vadd.f32 %v20944_v27, %v5004_v46  ;;  %v4998_v57 = vmul.f32 %v20947_v37, %v20975_v50  ;;  %v20976_v35 = vld [vmem:[#allocation113_spill] sm:$0xff]  ;;  %v11954_v45 = vld [vmem:[%s19941_s4 + $0xb4] ss:$28 sps:$4 sm:$0xff]   ;;  %v20978_v7 = vld [vmem:[#allocation111_spill] sm:$0xff] }
 0x532   :  { %v5609_v47 = vsel %vm5353_vm0, %v5225_v41, %v5481_v56  ;;  %vm5360_vm1 = vcmp.gt.f32.partialorder %v5232_v31, 0.0  ;;  %v5488_v58 = vmul.f32 0.2, %v5232_v31  ;;  %v5006_v22 = vmul.f32 %v20947_v37, %v20976_v35  ;;  %9081 = vmatprep.subr.bf16.mxu1 %v11948_v4  ;;  %v11949_v41 = vld [vmem:[%s19941_s4 + $0x468] ss:$28 sps:$4 sm:$0xff]  }
 0x533   :  { %20974 = vst [vmem:[#allocation73_spill] sm:$0xff] %v17411_v10  ;;  %8892 = vmatmul.mubr.bf16.gmra.mxu1 %v17411_v10  ;;  %v17425_v59 = vpack.c.bf16 %v5609_v47, %v5601_v17  ;;  %vm5368_vm2 = vcmp.gt.f32.partialorder %v5240_v26, 0.0  ;;  %v5496_v50 = vmul.f32 0.2, %v5240_v26  ;;  %v5234_v42 = vadd.f32 %v16851_v44, %v4998_v57  ;;  %9193 = vmatpush1.bf16.msra.mxu0 %v11943_v3  ;;  %v11952_v46 = vld [vmem:[%s19941_s4 + $0xb0] ss:$28 sps:$4 sm:$0xff]  }
 0x534   :  { %v5616_v48 = vsel %vm5360_vm1, %v5232_v31, %v5488_v58  ;;  %v5242_v4 = vadd.f32 %v16851_v44, %v5006_v22  ;;  %9194 = vmatprep.subr.bf16.mxu0 %v11951_v5  ;;  %v4995_v56 = vmul.f32 %v20951_v61, %v20978_v7  ;;  %v20979_v17 = vld [vmem:[#allocation90_spill] sm:$0xff]  ;;  %v11957_v3 = vld [vmem:[%s19941_s4 + $0x434] ss:$28 sps:$4 sm:$0xff]   ;;  %v20980_v5 = vld [vmem:[#allocation25_spill] sm:$0xff] }
 0x535   :  { %20977 = vst [vmem:[#allocation37_spill] sm:$0xff] %v17425_v59  ;;  %v5003_v47 = vmul.f32 %v20951_v61, %v20979_v17  ;;  %9005 = vmatmul.mubr.bf16.gmra.mxu0 %v17425_v59  ;;  %v5624_v31 = vsel %vm5368_vm2, %v5240_v26, %v5496_v50  ;;  %vm5362_vm3 = vcmp.gt.f32.partialorder %v5234_v42, 0.0  ;;  %v5490_v22 = vmul.f32 0.2, %v5234_v42  ;;  %9082 = vmatpush1.bf16.msra.mxu1 %v11946_v55  ;;  %v11955_v58 = vld [vmem:[%s19941_s4 + $0x430] ss:$28 sps:$4 sm:$0xff]  }
 0x536   :  { %v4997_v57 = vmul.f32 %v20954_v60, %v20980_v5  ;;  %v17448_v35 = vpack.c.bf16 %v5624_v31, %v5616_v48  ;;  %vm5370_vm4 = vcmp.gt.f32.partialorder %v5242_v4, 0.0  ;;  %v5498_v7 = vmul.f32 0.2, %v5242_v4  ;;  %9083 = vmatprep.subr.bf16.mxu1 %v11954_v45  ;;  %v11960_v26 = vld [vmem:[%s19941_s4 + $0x7c] ss:$28 sps:$4 sm:$0xff]   ;;  %v20982_v5 = vld [vmem:[#allocation112_spill] sm:$0xff] }
 0x537   :  { %v5231_v17 = vadd.f32 %v20956_v38, %v4995_v56  ;;  %v5618_v50 = vsel %vm5362_vm3, %v5234_v42, %v5490_v22  ;;  %9195 = vmatpush1.bf16.msra.mxu0 %v11949_v41  ;;  %v5239_v55 = vadd.f32 %v20956_v38, %v5003_v47  ;;  %v5005_v59 = vmul.f32 %v20954_v60, %v20982_v5  ;;  %v11958_v48 = vld [vmem:[%s19941_s4 + $0x78] ss:$28 sps:$4 sm:$0xff]  }
 0x538   :  { %20981 = vst [vmem:[#allocation11_spill] sm:$0xff] %v17448_v35  ;;  %v5233_v10 = vadd.f32 %v20958_v29, %v4997_v57  ;;  %8901 = vmatprep.mubr.bf16.mxu1 %v17448_v35  ;;  %v5626_v45 = vsel %vm5370_vm4, %v5242_v4, %v5498_v7  ;;  %9196 = vmatprep.subr.bf16.mxu0 %v11957_v3  ;;  %v20983_v31 = vld [vmem:[#allocation36_spill] sm:$0xff]  ;;  %v11963_v41 = vld [vmem:[%s19941_s4 + $0x3fc] ss:$28 sps:$4 sm:$0xff]   ;;  %v20987_v35 = vld [vmem:[#allocation115_spill] sm:$0xff] }
 0x539   :  { %vm5359_vm5 = vcmp.gt.f32.partialorder %v5231_v17, 0.0  ;;  %v5487_v56 = vmul.f32 0.2, %v5231_v17  ;;  %v5012_v42 = vmul.f32 %v20941_v20, %v20983_v31  ;;  %v17467_v47 = vpack.c.bf16 %v5626_v45, %v5618_v50  ;;  %9084 = vmatpush1.bf16.msra.mxu1 %v11952_v46  ;;  %v11961_v4 = vld [vmem:[%s19941_s4 + $0x3f8] ss:$28 sps:$4 sm:$0xff]  }
 0x53a   :  { %vm5367_vm6 = vcmp.gt.f32.partialorder %v5239_v55, 0.0  ;;  %v5495_v22 = vmul.f32 0.2, %v5239_v55  ;;  %v5241_v57 = vadd.f32 %v20958_v29, %v5005_v59  ;;  %vm5361_vm7 = vcmp.gt.f32.partialorder %v5233_v10, 0.0  ;;  %v20985_v5 = vld [vmem:[#allocation105_spill] sm:$0xff]  ;;  %9085 = vmatprep.subr.bf16.mxu1 %v11960_v26 }
 0x53b   :  { %20984 = vst [vmem:[#allocation15_spill] sm:$0xff] %v17467_v47  ;;  %v5615_v7 = vsel %vm5359_vm5, %v5231_v17, %v5487_v56  ;;  %v5489_v3 = vmul.f32 0.2, %v5233_v10  ;;  %v5020_v31 = vmul.f32 %v20941_v20, %v20985_v5  ;;  %v11966_v50 = vld [vmem:[%s19941_s4 + $0x44] ss:$28 sps:$4 sm:$0xff]   ;;  %9014 = vmatprep.mubr.bf16.mxu0 %v17467_v47  ;;  %v5248_v46 = vadd.f32 %v20944_v27, %v5012_v42  ;;  %v20991_v47 = vld [vmem:[#allocation92_spill] sm:$0xff] }
 0x53c   :  { %v5623_v45 = vsel %vm5367_vm6, %v5239_v55, %v5495_v22  ;;  %vm5369_vm8 = vcmp.gt.f32.partialorder %v5241_v57, 0.0  ;;  %v5497_v59 = vmul.f32 0.2, %v5241_v57  ;;  %9197 = vmatpush1.bf16.msra.mxu0 %v11955_v58  ;;  %v11964_v17 = vld [vmem:[%s19941_s4 + $0x40] ss:$28 sps:$4 sm:$0xff]   ;;  %v5014_v36 = vmul.f32 %v20947_v37, %v20987_v35 }
 0x53d   :  { %v17483_v56 = vpack.c.bf16 %v5623_v45, %v5615_v7  ;;  %v5617_v5 = vsel %vm5361_vm7, %v5233_v10, %v5489_v3  ;;  %v5256_v26 = vadd.f32 %v20944_v27, %v5020_v31  ;;  %9198 = vmatprep.subr.bf16.mxu0 %v11963_v41  ;;  %v11969_v55 = vld [vmem:[%s19941_s4 + $0x3c4] ss:$28 sps:$4 sm:$0xff]   ;;  %v11972_v58 = vld [vmem:[%s19941_s4 + $0xc] ss:$28 sps:$4 sm:$0xff]   ;;  %vm5376_vm9 = vcmp.gt.f32.partialorder %v5248_v46, 0.0  ;;  %v20988_v7 = vld [vmem:[#allocation117_spill] sm:$0xff]  ;;  %9086 = vmatpush1.bf16.msra.mxu1 %v11958_v48 }
 0x53e   :  { %v5625_v42 = vsel %vm5369_vm8, %v5241_v57, %v5497_v59  ;;  %v5504_v22 = vmul.f32 0.2, %v5248_v46  ;;  %v5022_v10 = vmul.f32 %v20947_v37, %v20988_v7  ;;  %v5250_v41 = vadd.f32 %v16851_v44, %v5014_v36  ;;  %9087 = vmatprep.subr.bf16.mxu1 %v11966_v50  ;;  %v20990_v57 = vld [vmem:[#allocation32_spill] sm:$0xff]  ;;  %v11967_v48 = vld [vmem:[%s19941_s4 + $0x3c0] ss:$28 sps:$4 sm:$0xff]  }
 0x53f   :  { %20986 = vst [vmem:[#allocation72_spill] sm:$0xff] %v17483_v56  ;;  %8902 = vmatmul.mubr.bf16.gmra.mxu1 %v17483_v56  ;;  %v17497_v3 = vpack.c.bf16 %v5625_v42, %v5617_v5  ;;  %vm5384_vm10 = vcmp.gt.f32.partialorder %v5256_v26, 0.0  ;;  %v5512_v35 = vmul.f32 0.2, %v5256_v26  ;;  %v5011_v59 = vmul.f32 %v20951_v61, %v20990_v57  ;;  %v20992_v50 = vld [vmem:[#allocation114_spill] sm:$0xff]  ;;  %v20994_v57 = vld [vmem:[#allocation116_spill] sm:$0xff] }
 0x540   :  { %v5632_v31 = vsel %vm5376_vm9, %v5248_v46, %v5504_v22  ;;  %v5258_v45 = vadd.f32 %v16851_v44, %v5022_v10  ;;  %9199 = vmatpush1.bf16.msra.mxu0 %v11961_v4  ;;  %v5019_v7 = vmul.f32 %v20951_v61, %v20991_v47  ;;  %vm5378_vm11 = vcmp.gt.f32.partialorder %v5250_v41, 0.0  ;;  %v11975_v4 = vld [vmem:[%s19941_s4 + $0x38c] ss:$28 sps:$4 sm:$0xff]  }
 0x541   :  { %20989 = vst [vmem:[#allocation74_spill] sm:$0xff] %v17497_v3  ;;  %9015 = vmatmul.mubr.bf16.gmra.mxu0 %v17497_v3  ;;  %v5640_v5 = vsel %vm5384_vm10, %v5256_v26, %v5512_v35  ;;  %v5506_v36 = vmul.f32 0.2, %v5250_v41  ;;  %v5013_v46 = vmul.f32 %v20954_v60, %v20992_v50  ;;  %9200 = vmatprep.subr.bf16.mxu0 %v11969_v55  ;;  %v11970_v26 = vld [vmem:[%s19941_s4 + $0x8] ss:$28 sps:$4 sm:$0xff]  }
 0x542   :  { %v17514_v42 = vpack.c.bf16 %v5640_v5, %v5632_v31  ;;  %vm5386_vm12 = vcmp.gt.f32.partialorder %v5258_v45, 0.0  ;;  %v5514_v47 = vmul.f32 0.2, %v5258_v45  ;;  %v5247_v22 = vadd.f32 %v20956_v38, %v5011_v59  ;;  %9088 = vmatpush1.bf16.msra.mxu1 %v11964_v17  ;;  %v11973_v31 = vld [vmem:[%s19941_s4 + $0x388] ss:$28 sps:$4 sm:$0xff]  }
 0x543   :  { %v5634_v10 = vsel %vm5378_vm11, %v5250_v41, %v5506_v36  ;;  %v5255_v35 = vadd.f32 %v20956_v38, %v5019_v7  ;;  %v5021_v55 = vmul.f32 %v20954_v60, %v20994_v57  ;;  %v5249_v50 = vadd.f32 %v20958_v29, %v5013_v46  ;;  %9089 = vmatprep.subr.bf16.mxu1 %v11972_v58  ;;  %v11978_v17 = vld [vmem:[%s19941_s4 + $0x354] ss:$28 sps:$4 sm:$0xff]   ;;  %v20995_v7 = vld [vmem:[#allocation42_spill] sm:$0xff] }
 0x544   :  { %20993 = vst [vmem:[#allocation48_spill] sm:$0xff] %v17514_v42  ;;  %8911 = vmatprep.mubr.bf16.mxu1 %v17514_v42  ;;  %v5642_v59 = vsel %vm5386_vm12, %v5258_v45, %v5514_v47  ;;  %vm5375_vm13 = vcmp.gt.f32.partialorder %v5247_v22, 0.0  ;;  %v5503_v41 = vmul.f32 0.2, %v5247_v22  ;;  %v5028_v5 = vmul.f32 %v20941_v20, %v20995_v7  ;;  %9201 = vmatpush1.bf16.msra.mxu0 %v11967_v48  ;;  %v11981_v57 = vld [vmem:[%s19941_s4 + $0x6d4] ss:$28 sps:$4 sm:$0xff]  }
 0x545   :  { %v17533_v36 = vpack.c.bf16 %v5642_v59, %v5634_v10  ;;  %vm5383_vm14 = vcmp.gt.f32.partialorder %v5255_v35, 0.0  ;;  %v5511_v58 = vmul.f32 0.2, %v5255_v35  ;;  %v5257_v46 = vadd.f32 %v20958_v29, %v5021_v55  ;;  %9202 = vmatprep.subr.bf16.mxu0 %v11975_v4  ;;  %v20997_v47 = vld [vmem:[#allocation106_spill] sm:$0xff]  ;;  %v11976_v48 = vld [vmem:[%s19941_s4 + $0x350] ss:$28 sps:$4 sm:$0xff]  }
 0x546   :  { %v5631_v3 = vsel %vm5375_vm13, %v5247_v22, %v5503_v41  ;;  %vm5377_vm15 = vcmp.gt.f32.partialorder %v5249_v50, 0.0  ;;  %v5505_v45 = vmul.f32 0.2, %v5249_v50  ;;  %v5036_v42 = vmul.f32 %v20941_v20, %v20997_v47  ;;  %9090 = vmatpush1.bf16.msra.mxu1 %v11970_v26  ;;  %v20999_v7 = vld [vmem:[#allocation119_spill] sm:$0xff] }
 0x547   :  { %20996 = vst [vmem:[#allocation84_spill] sm:$0xff] %v17533_v36  ;;  %9024 = vmatprep.mubr.bf16.mxu0 %v17533_v36  ;;  %v5639_v10 = vsel %vm5383_vm14, %v5255_v35, %v5511_v58  ;;  %vm5385_vm0 = vcmp.gt.f32.partialorder %v5257_v46, 0.0  ;;  %v5513_v4 = vmul.f32 0.2, %v5257_v46  ;;  %v5264_v55 = vadd.f32 %v20944_v27, %v5028_v5  ;;  %9091 = vmatprep.subr.bf16.mxu1 %v11978_v17  ;;  %v11979_v47 = vld [vmem:[%s19941_s4 + $0x6d0] ss:$28 sps:$4 sm:$0xff]  }
 0x548   :  { %v17546_v59 = vpack.c.bf16 %v5639_v10, %v5631_v3  ;;  %v5633_v22 = vsel %vm5377_vm15, %v5249_v50, %v5505_v45  ;;  %v5272_v41 = vadd.f32 %v20944_v27, %v5036_v42  ;;  %v5030_v26 = vmul.f32 %v20947_v37, %v20999_v7  ;;  %9203 = vmatpush1.bf16.msra.mxu0 %v11973_v31  ;;  %v11984_v35 = vld [vmem:[%s19941_s4 + $0x31c] ss:$28 sps:$4 sm:$0xff]  }
 0x549   :  { %v5641_v58 = vsel %vm5385_vm0, %v5257_v46, %v5513_v4  ;;  %vm5392_vm1 = vcmp.gt.f32.partialorder %v5264_v55, 0.0  ;;  %v5520_v17 = vmul.f32 0.2, %v5264_v55  ;;  %v21000_v3 = vld [vmem:[#allocation121_spill] sm:$0xff]  ;;  %9204 = vmatprep.subr.bf16.mxu0 %v11981_v57 }
 0x54a   :  { %20998 = vst [vmem:[#allocation77_spill] sm:$0xff] %v17546_v59  ;;  %v5038_v50 = vmul.f32 %v20947_v37, %v21000_v3  ;;  %v11982_v42 = vld [vmem:[%s19941_s4 + $0x318] ss:$28 sps:$4 sm:$0xff]   ;;  %8912 = vmatmul.mubr.bf16.gmra.mxu1 %v17546_v59  ;;  %v17563_v31 = vpack.c.bf16 %v5641_v58, %v5633_v22  ;;  %vm5400_vm2 = vcmp.gt.f32.partialorder %v5272_v41, 0.0  ;;  %v5528_v5 = vmul.f32 0.2, %v5272_v41 }
 0x54b   :  { %v5266_v45 = vadd.f32 %v16851_v44, %v5030_v26  ;;  %v11987_v46 = vld [vmem:[%s19941_s4 + $0x69c] ss:$28 sps:$4 sm:$0xff]   ;;  %v5648_v10 = vsel %vm5392_vm1, %v5264_v55, %v5520_v17  ;;  %v21003_v3 = vld [vmem:[#allocation46_spill] sm:$0xff]  ;;  %9092 = vmatpush2.bf16.msra.mxu1 %v11976_v48 }
 0x54c   :  { %21001 = vst [vmem:[#allocation95_spill] sm:$0xff] %v17563_v31  ;;  %v5274_v4 = vadd.f32 %v16851_v44, %v5038_v50  ;;  %v21002_v57 = vld [vmem:[#allocation93_spill] sm:$0xff]  ;;  %v5035_v36 = vmul.f32 %v20951_v61, %v21003_v3  ;;  %v11990_v26 = vld [vmem:[%s19941_s4 + $0x2e4] ss:$28 sps:$4 sm:$0xff]   ;;  %9025 = vmatmul.mubr.bf16.gmra.mxu0 %v17563_v31  ;;  %v5656_v55 = vsel %vm5400_vm2, %v5272_v41, %v5528_v5  ;;  %v21006_v5 = vld [vmem:[#allocation120_spill] sm:$0xff]  ;;  %vm5450_vm2 = vcmp.gt.f32.partialorder %v16869_v28, 0.0 }
 0x54d   :  { %v5027_v7 = vmul.f32 %v20951_v61, %v21002_v57  ;;  %v11985_v22 = vld [vmem:[%s19941_s4 + $0x698] ss:$28 sps:$4 sm:$0xff]   ;;  %vm5394_vm3 = vcmp.gt.f32.partialorder %v5266_v45, 0.0  ;;  %v5522_v58 = vmul.f32 0.2, %v5266_v45  ;;  %v21004_v17 = vld [vmem:[#allocation118_spill] sm:$0xff]  ;;  %9093 = vmatprep.subr.bf16.mxu1 %v11984_v35  ;;  %v17583_v57 = vpack.c.bf16 %v5656_v55, %v5648_v10  ;;  %9205 = vmatpush2.bf16.msra.mxu0 %v11979_v47 }
 0x54e   :  { %v5029_v50 = vmul.f32 %v20954_v60, %v21004_v17  ;;  %vm5402_vm4 = vcmp.gt.f32.partialorder %v5274_v4, 0.0  ;;  %v5530_v48 = vmul.f32 0.2, %v5274_v4  ;;  %v11988_v59 = vld [vmem:[%s19941_s4 + $0x2e0] ss:$28 sps:$4 sm:$0xff]   ;;  %v5271_v41 = vadd.f32 %v20956_v38, %v5035_v36  ;;  %9206 = vmatprep.subr.bf16.mxu0 %v11987_v46 }
 0x54f   :  { %21005 = vst [vmem:[#allocation47_spill] sm:$0xff] %v17583_v57  ;;  %v5263_v3 = vadd.f32 %v20956_v38, %v5027_v7  ;;  %v5650_v56 = vsel %vm5394_vm3, %v5266_v45, %v5522_v58  ;;  %v5037_v31 = vmul.f32 %v20954_v60, %v21006_v5  ;;  %v11993_v35 = vld [vmem:[%s19941_s4 + $0x664] ss:$28 sps:$4 sm:$0xff]   ;;  %8921 = vmatprep.mubr.bf16.mxu1 %v17583_v57  ;;  %v21007_v7 = vld [vmem:[#allocation97_spill] sm:$0xff]  ;;  %v11996_v46 = vld [vmem:[%s19941_s4 + $0x2ac] ss:$28 sps:$4 sm:$0xff]  }
 0x550   :  { %v5265_v17 = vadd.f32 %v20958_v29, %v5029_v50  ;;  %v5658_v47 = vsel %vm5402_vm4, %v5274_v4, %v5530_v48  ;;  %v5044_v45 = vmul.f32 %v20941_v20, %v21007_v7  ;;  %9094 = vmatpush2.bf16.msra.mxu1 %v11982_v42  ;;  %vm5399_vm6 = vcmp.gt.f32.partialorder %v5271_v41, 0.0  ;;  %v21009_v48 = vld [vmem:[#allocation107_spill] sm:$0xff] }
 0x551   :  { %vm5391_vm5 = vcmp.gt.f32.partialorder %v5263_v3, 0.0  ;;  %v5519_v10 = vmul.f32 0.2, %v5263_v3  ;;  %v17599_v36 = vpack.c.bf16 %v5658_v47, %v5650_v56  ;;  %v5527_v55 = vmul.f32 0.2, %v5271_v41  ;;  %9095 = vmatprep.subr.bf16.mxu1 %v11990_v26  ;;  %9207 = vmatpush2.bf16.msra.mxu0 %v11985_v22  ;;  %v21011_v7 = vld [vmem:[#allocation123_spill] sm:$0xff] }
 0x552   :  { %v5273_v58 = vadd.f32 %v20958_v29, %v5037_v31  ;;  %vm5393_vm7 = vcmp.gt.f32.partialorder %v5265_v17, 0.0  ;;  %v5521_v4 = vmul.f32 0.2, %v5265_v17  ;;  %v5052_v5 = vmul.f32 %v20941_v20, %v21009_v48  ;;  %v11991_v56 = vld [vmem:[%s19941_s4 + $0x660] ss:$28 sps:$4 sm:$0xff]   ;;  %9208 = vmatprep.subr.bf16.mxu0 %v11993_v35 }
 0x553   :  { %21008 = vst [vmem:[#allocation49_spill] sm:$0xff] %v17599_v36  ;;  %v5647_v50 = vsel %vm5391_vm5, %v5263_v3, %v5519_v10  ;;  %9034 = vmatprep.mubr.bf16.mxu0 %v17599_v36  ;;  %v5655_v42 = vsel %vm5399_vm6, %v5271_v41, %v5527_v55  ;;  %v5280_v26 = vadd.f32 %v20944_v27, %v5044_v45  ;;  %v11999_v3 = vld [vmem:[%s19941_s4 + $0x62c] ss:$28 sps:$4 sm:$0xff]   ;;  %v12002_v45 = vld [vmem:[%s19941_s4 + $0x274] ss:$28 sps:$4 sm:$0xff]  }
 0x554   :  { %vm5401_vm8 = vcmp.gt.f32.partialorder %v5273_v58, 0.0  ;;  %v5529_v31 = vmul.f32 0.2, %v5273_v58  ;;  %v17615_v47 = vpack.c.bf16 %v5655_v42, %v5647_v50  ;;  %v5649_v10 = vsel %vm5393_vm7, %v5265_v17, %v5521_v4  ;;  %9096 = vmatpush2.bf16.msra.mxu1 %v11988_v59  ;;  %v11994_v41 = vld [vmem:[%s19941_s4 + $0x2a8] ss:$28 sps:$4 sm:$0xff]   ;;  %v21012_v50 = vld [vmem:[#allocation125_spill] sm:$0xff] }
 0x555   :  { %v5288_v22 = vadd.f32 %v20944_v27, %v5052_v5  ;;  %v5046_v48 = vmul.f32 %v20947_v37, %v21011_v7  ;;  %v11997_v35 = vld [vmem:[%s19941_s4 + $0x628] ss:$28 sps:$4 sm:$0xff]   ;;  %vm5408_vm9 = vcmp.gt.f32.partialorder %v5280_v26, 0.0  ;;  %v5536_v17 = vmul.f32 0.2, %v5280_v26  ;;  %9097 = vmatprep.subr.bf16.mxu1 %v11996_v46  ;;  %9209 = vmatpush2.bf16.msra.mxu0 %v11991_v56  ;;  %v21014_v36 = vld [vmem:[#allocation96_spill] sm:$0xff] }
 0x556   :  { %21010 = vst [vmem:[#allocation76_spill] sm:$0xff] %v17615_v47  ;;  %v5657_v55 = vsel %vm5401_vm8, %v5273_v58, %v5529_v31  ;;  %v5054_v4 = vmul.f32 %v20947_v37, %v21012_v50  ;;  %8922 = vmatmul.mubr.bf16.gmra.mxu1 %v17615_v47  ;;  %v12000_v7 = vld [vmem:[%s19941_s4 + $0x270] ss:$28 sps:$4 sm:$0xff]   ;;  %v5043_v50 = vmul.f32 %v20951_v61, %v21014_v36 }
 0x557   :  { %v17632_v59 = vpack.c.bf16 %v5657_v55, %v5649_v10  ;;  %vm5416_vm10 = vcmp.gt.f32.partialorder %v5288_v22, 0.0  ;;  %v5544_v5 = vmul.f32 0.2, %v5288_v22  ;;  %v5282_v42 = vadd.f32 %v16851_v44, %v5046_v48  ;;  %v21015_v46 = vld [vmem:[#allocation43_spill] sm:$0xff]  ;;  %9210 = vmatprep.subr.bf16.mxu0 %v11999_v3  ;;  %v12005_v10 = vld [vmem:[%s19941_s4 + $0x5f4] ss:$28 sps:$4 sm:$0xff]  }
 0x558   :  { %v5664_v58 = vsel %vm5408_vm9, %v5280_v26, %v5536_v17  ;;  %v5290_v31 = vadd.f32 %v16851_v44, %v5054_v4  ;;  %v5051_v47 = vmul.f32 %v20951_v61, %v21015_v46  ;;  %v21016_v55 = vld [vmem:[#allocation122_spill] sm:$0xff]  ;;  %9098 = vmatpush2.bf16.msra.mxu1 %v11994_v41  ;;  %v5279_v4 = vadd.f32 %v20956_v38, %v5043_v50  ;;  %v12008_v3 = vld [vmem:[%s19941_s4 + $0x23c] ss:$28 sps:$4 sm:$0xff]   ;;  %v12003_v41 = vld [vmem:[%s19941_s4 + $0x5f0] ss:$28 sps:$4 sm:$0xff]  }
 0x559   :  { %21013 = vst [vmem:[#allocation6_spill] sm:$0xff] %v17632_v59  ;;  %9035 = vmatmul.mubr.bf16.gmra.mxu0 %v17632_v59  ;;  %v5672_v56 = vsel %vm5416_vm10, %v5288_v22, %v5544_v5  ;;  %vm5410_vm11 = vcmp.gt.f32.partialorder %v5282_v42, 0.0  ;;  %v5538_v48 = vmul.f32 0.2, %v5282_v42  ;;  %v5045_v26 = vmul.f32 %v20954_v60, %v21016_v55  ;;  %9099 = vmatprep.subr.bf16.mxu1 %v12002_v45  ;;  %v21018_v5 = vld [vmem:[#allocation124_spill] sm:$0xff] }
 0x55a   :  { %v17649_v17 = vpack.c.bf16 %v5672_v56, %v5664_v58  ;;  %vm5418_vm12 = vcmp.gt.f32.partialorder %v5290_v31, 0.0  ;;  %v5546_v36 = vmul.f32 0.2, %v5290_v31  ;;  %v5287_v22 = vadd.f32 %v20956_v38, %v5051_v47  ;;  %9211 = vmatpush2.bf16.msra.mxu0 %v11997_v35  ;;  %v12006_v45 = vld [vmem:[%s19941_s4 + $0x238] ss:$28 sps:$4 sm:$0xff]  }
 0x55b   :  { %v5666_v46 = vsel %vm5410_vm11, %v5282_v42, %v5538_v48  ;;  %v5053_v59 = vmul.f32 %v20954_v60, %v21018_v5  ;;  %v5281_v55 = vadd.f32 %v20958_v29, %v5045_v26  ;;  %v12011_v42 = vld [vmem:[%s19941_s4 + $0x5bc] ss:$28 sps:$4 sm:$0xff]   ;;  %vm5407_vm13 = vcmp.gt.f32.partialorder %v5279_v4, 0.0  ;;  %v21019_v50 = vld [vmem:[#allocation100_spill] sm:$0xff]  ;;  %9212 = vmatprep.subr.bf16.mxu0 %v12005_v10  ;;  %v12014_v10 = vld [vmem:[%s19941_s4 + $0x204] ss:$28 sps:$4 sm:$0xff]  }
 0x55c   :  { %21017 = vst [vmem:[#allocation51_spill] sm:$0xff] %v17649_v17  ;;  %8931 = vmatprep.mubr.bf16.mxu1 %v17649_v17  ;;  %v5674_v47 = vsel %vm5418_vm12, %v5290_v31, %v5546_v36  ;;  %v5535_v58 = vmul.f32 0.2, %v5279_v4  ;;  %v5060_v35 = vmul.f32 %v20941_v20, %v21019_v50  ;;  %vm5415_vm14 = vcmp.gt.f32.partialorder %v5287_v22, 0.0  ;;  %9100 = vmatpush2.bf16.msra.mxu1 %v12000_v7  ;;  %v12009_v5 = vld [vmem:[%s19941_s4 + $0x5b8] ss:$28 sps:$4 sm:$0xff]  }
 0x55d   :  { %v17671_v56 = vpack.c.bf16 %v5674_v47, %v5666_v46  ;;  %v5543_v48 = vmul.f32 0.2, %v5287_v22  ;;  %v5289_v26 = vadd.f32 %v20958_v29, %v5053_v59  ;;  %vm5409_vm15 = vcmp.gt.f32.partialorder %v5281_v55, 0.0  ;;  %v21021_v36 = vld [vmem:[#allocation69_spill] sm:$0xff]  ;;  %9101 = vmatprep.subr.bf16.mxu1 %v12008_v3  ;;  %v21023_v50 = vld [vmem:[#allocation127_spill] sm:$0xff] }
 0x55e   :  { %v5663_v57 = vsel %vm5407_vm13, %v5279_v4, %v5535_v58  ;;  %v5537_v31 = vmul.f32 0.2, %v5281_v55  ;;  %v5068_v17 = vmul.f32 %v20941_v20, %v21021_v36  ;;  %v5296_v7 = vadd.f32 %v20944_v27, %v5060_v35  ;;  %9213 = vmatpush2.bf16.msra.mxu0 %v12003_v41  ;;  %v12012_v4 = vld [vmem:[%s19941_s4 + $0x200] ss:$28 sps:$4 sm:$0xff]  }
 0x55f   :  { %21020 = vst [vmem:[#allocation109_spill] sm:$0xff] %v17671_v56  ;;  %9044 = vmatprep.mubr.bf16.mxu0 %v17671_v56  ;;  %v5671_v46 = vsel %vm5415_vm14, %v5287_v22, %v5543_v48  ;;  %vm5417_vm0 = vcmp.gt.f32.partialorder %v5289_v26, 0.0  ;;  %v5545_v59 = vmul.f32 0.2, %v5289_v26  ;;  %v5062_v36 = vmul.f32 %v20947_v37, %v21023_v50  ;;  %9214 = vmatprep.subr.bf16.mxu0 %v12011_v42  ;;  %v12017_v22 = vld [vmem:[%s19941_s4 + $0x584] ss:$28 sps:$4 sm:$0xff]  }
 0x560   :  { %v17687_v47 = vpack.c.bf16 %v5671_v46, %v5663_v57  ;;  %v5665_v58 = vsel %vm5409_vm15, %v5281_v55, %v5537_v31  ;;  %v5304_v3 = vadd.f32 %v20944_v27, %v5068_v17  ;;  %vm5424_vm1 = vcmp.gt.f32.partialorder %v5296_v7, 0.0  ;;  %v21024_v35 = vld [vmem:[#allocation129_spill] sm:$0xff]  ;;  %9102 = vmatpush2.bf16.msra.mxu1 %v12006_v45  ;;  %v12020_v42 = vld [vmem:[%s19941_s4 + $0x1cc] ss:$28 sps:$4 sm:$0xff]  }
 0x561   :  { %v5673_v48 = vsel %vm5417_vm0, %v5289_v26, %v5545_v59  ;;  %v5552_v41 = vmul.f32 0.2, %v5296_v7  ;;  %v5070_v56 = vmul.f32 %v20947_v37, %v21024_v35  ;;  %v5298_v55 = vadd.f32 %v16851_v44, %v5062_v36  ;;  %9103 = vmatprep.subr.bf16.mxu1 %v12014_v10  ;;  %v21026_v46 = vld [vmem:[#allocation99_spill] sm:$0xff]  ;;  %v21027_v45 = vld [vmem:[#allocation101_spill] sm:$0xff]  ;;  %v21028_v36 = vld [vmem:[#allocation126_spill] sm:$0xff] }
 0x562   :  { %21022 = vst [vmem:[#allocation50_spill] sm:$0xff] %v17687_v47  ;;  %8932 = vmatmul.mubr.bf16.gmra.mxu1 %v17687_v47  ;;  %v17699_v57 = vpack.c.bf16 %v5673_v48, %v5665_v58  ;;  %vm5432_vm3 = vcmp.gt.f32.partialorder %v5304_v3, 0.0  ;;  %v5560_v17 = vmul.f32 0.2, %v5304_v3  ;;  %v5059_v59 = vmul.f32 %v20951_v61, %v21026_v46  ;;  %9215 = vmatpush2.bf16.msra.mxu0 %v12009_v5  ;;  %v12015_v58 = vld [vmem:[%s19941_s4 + $0x580] ss:$28 sps:$4 sm:$0xff]  }
 0x563   :  { %v5680_v26 = vsel %vm5424_vm1, %v5296_v7, %v5552_v41  ;;  %v5306_v31 = vadd.f32 %v16851_v44, %v5070_v56  ;;  %v5067_v50 = vmul.f32 %v20951_v61, %v21027_v45  ;;  %v12023_v10 = vld [vmem:[%s19941_s4 + $0x54c] ss:$28 sps:$4 sm:$0xff]   ;;  %vm5426_vm4 = vcmp.gt.f32.partialorder %v5298_v55, 0.0  ;;  %9216 = vmatprep.subr.bf16.mxu0 %v12017_v22  ;;  %v12026_v22 = vld [vmem:[%s19941_s4 + $0x894] ss:$28 sps:$4 sm:$0xff]  }
 0x564   :  { %21025 = vst [vmem:[#allocation134_spill] sm:$0xff] %v17699_v57  ;;  %9045 = vmatmul.mubr.bf16.gmra.mxu0 %v17699_v57  ;;  %v5688_v7 = vsel %vm5432_vm3, %v5304_v3, %v5560_v17  ;;  %v5554_v56 = vmul.f32 0.2, %v5298_v55  ;;  %v5061_v48 = vmul.f32 %v20954_v60, %v21028_v36  ;;  %v5295_v35 = vadd.f32 %v20956_v38, %v5059_v59  ;;  %v12018_v46 = vld [vmem:[%s19941_s4 + $0x1c8] ss:$28 sps:$4 sm:$0xff]   ;;  %v21030_v17 = vld [vmem:[#allocation128_spill] sm:$0xff] }
 0x565   :  { %v17719_v41 = vpack.c.bf16 %v5688_v7, %v5680_v26  ;;  %vm5434_vm5 = vcmp.gt.f32.partialorder %v5306_v31, 0.0  ;;  %v5562_v5 = vmul.f32 0.2, %v5306_v31  ;;  %9104 = vmatpush2.bf16.msra.mxu1 %v12012_v4  ;;  %v5303_v3 = vadd.f32 %v20956_v38, %v5067_v50  ;;  %v21031_v59 = vld [vmem:[#allocation102_spill] sm:$0xff] }
 0x566   :  { %v5682_v45 = vsel %vm5426_vm4, %v5298_v55, %v5554_v56  ;;  %v5069_v57 = vmul.f32 %v20954_v60, %v21030_v17  ;;  %v5297_v36 = vadd.f32 %v20958_v29, %v5061_v48  ;;  %9105 = vmatprep.subr.bf16.mxu1 %v12020_v42  ;;  %vm5423_vm6 = vcmp.gt.f32.partialorder %v5295_v35, 0.0  ;;  %9217 = vmatpush2.bf16.msra.mxu0 %v12015_v58  ;;  %v12021_v50 = vld [vmem:[%s19941_s4 + $0x548] ss:$28 sps:$4 sm:$0xff]  }
 0x567   :  { %21029 = vst [vmem:[#allocation52_spill] sm:$0xff] %v17719_v41  ;;  %8941 = vmatprep.mubr.bf16.mxu1 %v17719_v41  ;;  %v5690_v4 = vsel %vm5434_vm5, %v5306_v31, %v5562_v5  ;;  %v5551_v26 = vmul.f32 0.2, %v5295_v35  ;;  %v5076_v55 = vmul.f32 %v20941_v20, %v21031_v59  ;;  %vm5431_vm7 = vcmp.gt.f32.partialorder %v5303_v3, 0.0  ;;  %9218 = vmatprep.subr.bf16.mxu0 %v12023_v10  ;;  %v12029_v31 = vld [vmem:[%s19941_s4 + $0xc14] ss:$28 sps:$4 sm:$0xff]  }
 0x568   :  { %v17738_v7 = vpack.c.bf16 %v5690_v4, %v5682_v45  ;;  %v5559_v42 = vmul.f32 0.2, %v5303_v3  ;;  %v5305_v56 = vadd.f32 %v20958_v29, %v5069_v57  ;;  %vm5425_vm8 = vcmp.gt.f32.partialorder %v5297_v36, 0.0  ;;  %v21033_v17 = vld [vmem:[#allocation71_spill] sm:$0xff] }
 0x569   :  { %v5679_v48 = vsel %vm5423_vm6, %v5295_v35, %v5551_v26  ;;  %v5553_v5 = vmul.f32 0.2, %v5297_v36  ;;  %v5084_v58 = vmul.f32 %v20941_v20, %v21033_v17  ;;  %9106 = vmatpush2.bf16.msra.mxu1 %v12018_v46  ;;  %v5312_v59 = vadd.f32 %v20944_v27, %v5076_v55  ;;  %v21035_v35 = vld [vmem:[#allocation131_spill] sm:$0xff] }
 0x56a   :  { %21032 = vst [vmem:[#allocation13_spill] sm:$0xff] %v17738_v7  ;;  %9054 = vmatprep.mubr.bf16.mxu0 %v17738_v7  ;;  %v5687_v45 = vsel %vm5431_vm7, %v5303_v3, %v5559_v42  ;;  %vm5433_vm9 = vcmp.gt.f32.partialorder %v5305_v56, 0.0  ;;  %v5561_v4 = vmul.f32 0.2, %v5305_v56  ;;  %9301 = vmatprep.subr.bf16.mxu1 %v12026_v22  ;;  %v5078_v26 = vmul.f32 %v20947_v37, %v21035_v35  ;;  %v21037_v37 = vld [vmem:[#allocation41_spill] sm:$0xff] }
 0x56b   :  { %v17748_v57 = vpack.c.bf16 %v5687_v45, %v5679_v48  ;;  %v5681_v10 = vsel %vm5425_vm8, %v5297_v36, %v5553_v5  ;;  %v5320_v41 = vadd.f32 %v20944_v27, %v5084_v58  ;;  %9219 = vmatpush2.bf16.msra.mxu0 %v12021_v50  ;;  %vm5440_vm10 = vcmp.gt.f32.partialorder %v5312_v59, 0.0  ;;  %v21038_v50 = vld [vmem:[#allocation104_spill] sm:$0xff] }
 0x56c   :  { %v5689_v47 = vsel %vm5433_vm9, %v5305_v56, %v5561_v4  ;;  %v5568_v20 = vmul.f32 0.2, %v5312_v59  ;;  %v5706_v46 = vsel %vm5450_vm2, %v16869_v28, %v17083_v30  ;;  %9414 = vmatprep.subr.bf16.mxu0 %v12029_v31  ;;  %v5314_v27 = vadd.f32 %v16851_v44, %v5078_v26  ;;  %v21039_v56 = vld [vmem:[#allocation130_spill] sm:$0xff] }
 0x56d   :  { %21034 = vst [vmem:[#allocation135_spill] sm:$0xff] %v17748_v57  ;;  %8942 = vmatmul.mubr.bf16.gmra.mxu1 %v17748_v57  ;;  %v17758_v3 = vpack.c.bf16 %v5689_v47, %v5681_v10  ;;  %vm5448_vm11 = vcmp.gt.f32.partialorder %v5320_v41, 0.0  ;;  %v5576_v36 = vmul.f32 0.2, %v5320_v41  ;;  %v5075_v55 = vmul.f32 %v20951_v61, %v21037_v37  ;;  %v21040_v47 = vld [vmem:[#allocation132_spill] sm:$0xff] }
 0x56e   :  { %v5696_v22 = vsel %vm5440_vm10, %v5312_v59, %v5568_v20  ;;  %v5083_v42 = vmul.f32 %v20951_v61, %v21038_v50  ;;  %v5077_v48 = vmul.f32 %v20954_v60, %v21039_v56  ;;  %vm5442_vm12 = vcmp.gt.f32.partialorder %v5314_v27, 0.0  ;;  %v12032_v37 = vld [vmem:[%s19941_s4 + $0x85c] ss:$28 sps:$4 sm:$0xff]   ;;  %v12038_v50 = vld [vmem:[%s19941_s4 + $0x824] ss:$28 sps:$4 sm:$0xff]  }
 0x56f   :  { %21036 = vst [vmem:[#allocation108_spill] sm:$0xff] %v17758_v3  ;;  %9055 = vmatmul.mubr.bf16.gmra.mxu0 %v17758_v3  ;;  %v5704_v28 = vsel %vm5448_vm11, %v5320_v41, %v5576_v36  ;;  %v5570_v30 = vmul.f32 0.2, %v5314_v27  ;;  %v5085_v31 = vmul.f32 %v20954_v60, %v21040_v47  ;;  %v5311_v44 = vadd.f32 %v20956_v38, %v5075_v55  ;;  %v12035_v55 = vld [vmem:[%s19941_s4 + $0xbdc] ss:$28 sps:$4 sm:$0xff]  }
 0x570   :  { %v17770_v5 = vpack.c.bf16 %v5704_v28, %v5696_v22  ;;  %v5319_v17 = vadd.f32 %v20956_v38, %v5083_v42  ;;  %v5313_v58 = vadd.f32 %v20958_v29, %v5077_v48  ;;  %v12030_v22 = vld [vmem:[%s19941_s4 + $0x858] ss:$28 sps:$4 sm:$0xff]   ;;  %v12041_v56 = vld [vmem:[%s19941_s4 + $0xba4] ss:$28 sps:$4 sm:$0xff]   ;;  %v12044_v47 = vld [vmem:[%s19941_s4 + $0x7ec] ss:$28 sps:$4 sm:$0xff]  }
 0x571   :  { %v5698_v61 = vsel %vm5442_vm12, %v5314_v27, %v5570_v30  ;;  %v5321_v45 = vadd.f32 %v20958_v29, %v5085_v31  ;;  %vm5439_vm13 = vcmp.gt.f32.partialorder %v5311_v44, 0.0  ;;  %v5567_v41 = vmul.f32 0.2, %v5311_v44  ;;  %v12027_v27 = vld [vmem:[%s19941_s4 + $0xc10] ss:$28 sps:$4 sm:$0xff]  }
 0x572   :  { %21041 = vst [vmem:[#allocation54_spill] sm:$0xff] %v17770_v5  ;;  %8951 = vmatprep.mubr.bf16.mxu1 %v17770_v5  ;;  %v17777_v4 = vpack.c.bf16 %v5706_v46, %v5698_v61  ;;  %vm5447_vm14 = vcmp.gt.f32.partialorder %v5319_v17, 0.0  ;;  %v5575_v59 = vmul.f32 0.2, %v5319_v17  ;;  %vm5441_vm15 = vcmp.gt.f32.partialorder %v5313_v58, 0.0 }
 0x573   :  { %vm5449_vm0 = vcmp.gt.f32.partialorder %v5321_v45, 0.0  ;;  %v5569_v60 = vmul.f32 0.2, %v5313_v58  ;;  %v5695_v10 = vsel %vm5439_vm13, %v5311_v44, %v5567_v41  ;;  %v5577_v38 = vmul.f32 0.2, %v5321_v45 }
 0x574   :  { %21042 = vst [vmem:[#allocation87_spill] sm:$0xff] %v17777_v4  ;;  %9064 = vmatprep.mubr.bf16.mxu0 %v17777_v4  ;;  %v5703_v35 = vsel %vm5447_vm14, %v5319_v17, %v5575_v59  ;;  %v12024_v46 = vld [vmem:[%s19941_s4 + $0x890] ss:$28 sps:$4 sm:$0xff]   ;;  %v12033_v42 = vld [vmem:[%s19941_s4 + $0xbd8] ss:$28 sps:$4 sm:$0xff]   ;;  %vm10485_vm1 = vcmask 130048  }
 0x575   :  { %v5697_v26 = vsel %vm5441_vm15, %v5313_v58, %v5569_v60  ;;  %v17780_v20 = vpack.c.bf16 %v5703_v35, %v5695_v10  ;;  %v5705_v29 = vsel %vm5449_vm0, %v5321_v45, %v5577_v38  ;;  %v12036_v48 = vld [vmem:[%s19941_s4 + $0x820] ss:$28 sps:$4 sm:$0xff]   ;;  %v12042_v30 = vld [vmem:[%s19941_s4 + $0x7e8] ss:$28 sps:$4 sm:$0xff]   ;;  %v12050_v44 = vld [vmem:[%s19941_s4 + $0x7b4] ss:$28 sps:$4 sm:$0xff]  }
 0x576   :  { %v17782_v36 = vpack.c.bf16 %v5705_v29, %v5697_v26  ;;  %v12039_v28 = vld [vmem:[%s19941_s4 + $0xba0] ss:$28 sps:$4 sm:$0xff]   ;;  %v12047_v31 = vld [vmem:[%s19941_s4 + $0xb6c] ss:$28 sps:$4 sm:$0xff]   ;;  %v12053_v58 = vld [vmem:[%s19941_s4 + $0xb34] ss:$28 sps:$4 sm:$0xff]  }
 0x577   :  { %21043 = vst [vmem:[#allocation80_spill] sm:$0xff] %v17780_v20  ;;  %8952 = vmatmul.mubr.bf16.gmra.mxu1 %v17780_v20  ;;  %v12045_v17 = vld [vmem:[%s19941_s4 + $0xb68] ss:$28 sps:$4 sm:$0xff]   ;;  %v12048_v61 = vld [vmem:[%s19941_s4 + $0x7b0] ss:$28 sps:$4 sm:$0xff]  }
 0x578   :  { %21044 = vst [vmem:[#allocation98_spill] sm:$0xff] %v17782_v36  ;;  %9065 = vmatmul.mubr.bf16.gmra.mxu0 %v17782_v36  ;;  %9107 = vmatprep.mubr.bf16.mxu1 %v16871_v12  ;;  %v12051_v45 = vld [vmem:[%s19941_s4 + $0xb30] ss:$28 sps:$4 sm:$0xff]   ;;  %v12054_v41 = vld [vmem:[%s19941_s4 + $0x778] ss:$28 sps:$4 sm:$0xff]  }
 0x579   :  { %9220 = vmatprep.mubr.bf16.mxu0 %v16876_v11  ;;  %v12056_v59 = vld [vmem:[%s19941_s4 + $0x77c] ss:$28 sps:$4 sm:$0xff]   ;;  %v12062_v10 = vld [vmem:[%s19941_s4 + $0x744] ss:$28 sps:$4 sm:$0xff]  }
 0x57a   :  { %v12059_v60 = vld [vmem:[%s19941_s4 + $0xafc] ss:$28 sps:$4 sm:$0xff]   ;;  %v12065_v26 = vld [vmem:[%s19941_s4 + $0xac4] ss:$28 sps:$4 sm:$0xff]  }
 0x57b   :  { %v12057_v38 = vld [vmem:[%s19941_s4 + $0xaf8] ss:$28 sps:$4 sm:$0xff]   ;;  %v12060_v35 = vld [vmem:[%s19941_s4 + $0x740] ss:$28 sps:$4 sm:$0xff]  }
 0x57c   :  { %v12063_v29 = vld [vmem:[%s19941_s4 + $0xac0] ss:$28 sps:$4 sm:$0xff]  }
 0x57f   :  { %9108 = vmatmul.mubr.bf16.vlgmr.msra.gmra.mxu1 %v16889_v52 }
 0x580   :  { %9221 = vmatmul.mubr.bf16.vlgmr.msra.gmra.mxu0 %v16903_v53  ;;  %9302 = vmatpush1.bf16.msra.mxu1 %v12024_v46  ;;  %v12068_v46 = vld [vmem:[%s19941_s4 + $0x70c] ss:$28 sps:$4 sm:$0xff]  }
 0x581   :  { %9117 = vmatprep.mubr.bf16.mxu1 %v16918_v14  ;;  %9230 = vmatprep.mubr.bf16.mxu0 %v16928_v23 }
 0x582   :  { %9415 = vmatpush1.bf16.msra.mxu0 %v12027_v27  ;;  %9303 = vmatprep.subr.bf16.mxu1 %v12032_v37  ;;  %v12066_v27 = vld [vmem:[%s19941_s4 + $0x708] ss:$28 sps:$4 sm:$0xff]  }
 0x583   :  { %9416 = vmatprep.subr.bf16.mxu0 %v12035_v55  ;;  %v12069_v37 = vld [vmem:[%s19941_s4 + $0xa88] ss:$28 sps:$4 sm:$0xff]   ;;  %v12074_v55 = vld [vmem:[%s19941_s4 + $0xa54] ss:$28 sps:$4 sm:$0xff]  }
 0x584   :  { %9304 = vmatpush1.bf16.msra.mxu1 %v12030_v22  ;;  %v12071_v22 = vld [vmem:[%s19941_s4 + $0xa8c] ss:$28 sps:$4 sm:$0xff]  }
 0x585   :  { %9305 = vmatprep.subr.bf16.mxu1 %v12038_v50  ;;  %v12077_v50 = vld [vmem:[%s19941_s4 + $0xdd4] ss:$28 sps:$4 sm:$0xff]  }
 0x586   :  { %9417 = vmatpush1.bf16.msra.mxu0 %v12033_v42 }
 0x587   :  { %9118 = vmatmul.mubr.bf16.gmra.mxu1 %v16938_v49  ;;  %9418 = vmatprep.subr.bf16.mxu0 %v12041_v56  ;;  %v12072_v56 = vld [vmem:[%s19941_s4 + $0xa50] ss:$28 sps:$4 sm:$0xff]  }
 0x588   :  { %9231 = vmatmul.mubr.bf16.gmra.mxu0 %v16961_v54  ;;  %9306 = vmatpush1.bf16.msra.mxu1 %v12036_v48 }
 0x589   :  { %9127 = vmatprep.mubr.bf16.mxu1 %v16977_v13  ;;  %9240 = vmatprep.mubr.bf16.mxu0 %v16989_v51 }
 0x58a   :  { %9419 = vmatpush1.bf16.msra.mxu0 %v12039_v28  ;;  %9307 = vmatprep.subr.bf16.mxu1 %v12044_v47 }
 0x58b   :  { %9420 = vmatprep.subr.bf16.mxu0 %v12047_v31 }
 0x58c   :  { %9308 = vmatpush1.bf16.msra.mxu1 %v12042_v30  ;;  %v12075_v30 = vld [vmem:[%s19941_s4 + $0xdd0] ss:$28 sps:$4 sm:$0xff]  }
 0x58d   :  { %9309 = vmatprep.subr.bf16.mxu1 %v12050_v44  ;;  %v12080_v44 = vld [vmem:[%s19941_s4 + $0xa1c] ss:$28 sps:$4 sm:$0xff]  }
 0x58e   :  { %9421 = vmatpush1.bf16.msra.mxu0 %v12045_v17  ;;  %v12083_v17 = vld [vmem:[%s19941_s4 + $0xd9c] ss:$28 sps:$4 sm:$0xff]  }
 0x58f   :  { %9128 = vmatmul.mubr.bf16.gmra.mxu1 %v17003_v6  ;;  %9422 = vmatprep.subr.bf16.mxu0 %v12053_v58 }
 0x590   :  { %9241 = vmatmul.mubr.bf16.gmra.mxu0 %v17017_v18  ;;  %9310 = vmatpush1.bf16.msra.mxu1 %v12048_v61 }
 0x591   :  { %9137 = vmatprep.mubr.bf16.mxu1 %v17030_v33  ;;  %9250 = vmatprep.mubr.bf16.mxu0 %v17048_v8 }
 0x592   :  { %9423 = vmatpush1.bf16.msra.mxu0 %v12051_v45  ;;  %9311 = vmatprep.subr.bf16.mxu1 %v12056_v59  ;;  %v12078_v45 = vld [vmem:[%s19941_s4 + $0xa18] ss:$28 sps:$4 sm:$0xff]  }
 0x593   :  { %9424 = vmatprep.subr.bf16.mxu0 %v12059_v60 }
 0x594   :  { %9312 = vmatpush1.bf16.msra.mxu1 %v12054_v41  ;;  %v12086_v41 = vld [vmem:[%s19941_s4 + $0x9e4] ss:$28 sps:$4 sm:$0xff]  }
 0x595   :  { %9313 = vmatprep.subr.bf16.mxu1 %v12062_v10  ;;  %v17900_v42 = vpop.f32.mrf.mxu1  ;;  %v12081_v10 = vld [vmem:[%s19941_s4 + $0xd98] ss:$28 sps:$4 sm:$0xff]  }
 0x596   :  { %9425 = vmatpush1.bf16.msra.mxu0 %v12057_v38  ;;  %v12089_v38 = vld [vmem:[%s19941_s4 + $0xd64] ss:$28 sps:$4 sm:$0xff]  }
 0x597   :  { %9138 = vmatmul.mubr.bf16.gmra.mxu1 %v17059_v21  ;;  %9426 = vmatprep.subr.bf16.mxu0 %v12065_v26  ;;  %v17905_v48 = vpop.f32.mrf.mxu0  ;;  %v17907_v28 = vpop.f32.mrf.mxu1  ;;  %v12084_v26 = vld [vmem:[%s19941_s4 + $0x9e0] ss:$28 sps:$4 sm:$0xff]  }
 0x598   :  { %9251 = vmatmul.mubr.bf16.gmra.mxu0 %v17072_v34  ;;  %9314 = vmatpush1.bf16.msra.mxu1 %v12060_v35 }
 0x599   :  { %9147 = vmatprep.mubr.bf16.mxu1 %v17086_v2  ;;  %9260 = vmatprep.mubr.bf16.mxu0 %v17099_v25  ;;  %v17912_v47 = vpop.f32.mrf.mxu0  ;;  %v17914_v31 = vpop.f32.mrf.mxu1 }
 0x59a   :  { %9427 = vmatpush1.bf16.msra.mxu0 %v12063_v29  ;;  %9315 = vmatprep.subr.bf16.mxu1 %v12068_v46 }
 0x59b   :  { %9428 = vmatprep.subr.bf16.mxu0 %v12071_v22  ;;  %v17923_v58 = vpop.f32.mrf.mxu0  ;;  %v17925_v61 = vpop.f32.mrf.mxu1  ;;  %v12092_v22 = vld [vmem:[%s19941_s4 + $0x9ac] ss:$28 sps:$4 sm:$0xff]  }
 0x59c   :  { %9316 = vmatpush1.bf16.msra.mxu1 %v12066_v27  ;;  %v12087_v27 = vld [vmem:[%s19941_s4 + $0xd60] ss:$28 sps:$4 sm:$0xff]  }
 0x59d   :  { %9317 = vmatprep.subr.bf16.mxu1 %v12074_v55  ;;  %v17936_v59 = vpop.f32.mrf.mxu0  ;;  %v17938_v60 = vpop.f32.mrf.mxu1 }
 0x59e   :  { %9429 = vmatpush1.bf16.msra.mxu0 %v12069_v37  ;;  %v12095_v37 = vld [vmem:[%s19941_s4 + $0xd2c] ss:$28 sps:$4 sm:$0xff]  }
 0x59f   :  { %9148 = vmatmul.mubr.bf16.gmra.mxu1 %v17114_v15  ;;  %9430 = vmatprep.subr.bf16.mxu0 %v12077_v50  ;;  %v17946_v35 = vpop.f32.mrf.mxu1  ;;  %v30_v50 = vld [vmem:[%s19939_s5 + $0x1c] sm:$0x7f]  ;;  %v21050_v15 = vld [vmem:[#allocation67_spill] sm:$0xff] }
 0x5a0   :  { %9261 = vmatmul.mubr.bf16.gmra.mxu0 %v17134_v43  ;;  %9318 = vmatpush2.bf16.msra.mxu1 %v12072_v56  ;;  %v12090_v56 = vld [vmem:[%s19941_s4 + $0x9a8] ss:$28 sps:$4 sm:$0xff]  }
 0x5a1   :  { %9157 = vmatprep.mubr.bf16.mxu1 %v17148_v0  ;;  %9270 = vmatprep.mubr.bf16.mxu0 %v17167_v24  ;;  %v17951_v29 = vpop.f32.mrf.mxu0  ;;  %v17953_v46 = vpop.f32.mrf.mxu1 }
 0x5a2   :  { %9431 = vmatpush2.bf16.msra.mxu0 %v12075_v30  ;;  %9319 = vmatprep.subr.bf16.mxu1 %v12080_v44  ;;  %v12098_v44 = vld [vmem:[%s19941_s4 + $0x974] ss:$28 sps:$4 sm:$0xff]  }
 0x5a3   :  { %9432 = vmatprep.subr.bf16.mxu0 %v12083_v17  ;;  %v17965_v55 = vpop.f32.mrf.mxu0  ;;  %v17974_v30 = vpop.f32.mrf.mxu1 }
 0x5a4   :  { %9320 = vmatpush2.bf16.msra.mxu1 %v12078_v45  ;;  %v12093_v45 = vld [vmem:[%s19941_s4 + $0xd28] ss:$28 sps:$4 sm:$0xff]  }
 0x5a5   :  { %9321 = vmatprep.subr.bf16.mxu1 %v12086_v41  ;;  %v17981_v17 = vpop.f32.mrf.mxu0  ;;  %v12101_v41 = vld [vmem:[%s19941_s4 + $0xcf4] ss:$28 sps:$4 sm:$0xff]  }
 0x5a6   :  { %9433 = vmatpush2.bf16.msra.mxu0 %v12081_v10  ;;  %v21045_v10 = vld [vmem:[#allocation4_spill] sm:$0xff] }
 0x5a7   :  { %9158 = vmatmul.mubr.bf16.gmra.mxu1 %v17183_v63  ;;  %9434 = vmatprep.subr.bf16.mxu0 %v12089_v38  ;;  %v17990_v38 = vrot.slane %v30_v50, %v21045_v10  ;;  %v12099_v10 = vld [vmem:[%s19941_s4 + $0xcf0] ss:$28 sps:$4 sm:$0xff]  }
 0x5a8   :  { %9271 = vmatmul.mubr.bf16.gmra.mxu0 %v17197_v39  ;;  %9322 = vmatpush2.bf16.msra.mxu1 %v12084_v26  ;;  %v17992_v26 = vpop.f32.mrf.mxu0 }
 0x5a9   :  { %9167 = vmatprep.mubr.bf16.mxu1 %v17217_v62  ;;  %9280 = vmatprep.mubr.bf16.mxu0 %v17236_v9  ;;  %v21046_v9 = vld [vmem:[#allocation5_spill] sm:$0xff] }
 0x5aa   :  { %9435 = vmatpush2.bf16.msra.mxu0 %v12087_v27  ;;  %9323 = vmatprep.subr.bf16.mxu1 %v12092_v22  ;;  %v12096_v27 = vld [vmem:[%s19941_s4 + $0x970] ss:$28 sps:$4 sm:$0xff]   ;;  %v8677_v22 = vpop.f32.mrf.mxu1  ;;  %v17998_v39 = vrot.slane %v30_v50, %v21046_v9  ;;  %v8790_v62 = vpop.f32.mrf.mxu0  ;;  %v12107_v9 = vld [vmem:[%s19941_s4 + $0xcbc] ss:$28 sps:$4 sm:$0xff]  }
 0x5ab   :  { %9436 = vmatprep.subr.bf16.mxu0 %v12095_v37  ;;  %v8678_v37 = vadd.f32 %v8677_v22, %v17990_v38 }
 0x5ac   :  { %9324 = vmatpush2.bf16.msra.mxu1 %v12090_v56  ;;  %v12104_v56 = vld [vmem:[%s19941_s4 + $0x93c] ss:$28 sps:$4 sm:$0xff]   ;;  %v8679_v63 = vpop.f32.mrf.mxu1  ;;  %v8792_v22 = vpop.f32.mrf.mxu0 }
 0x5ad   :  { %9325 = vmatprep.subr.bf16.mxu1 %v12098_v44  ;;  %v18011_v50 = vadd.f32 %v8790_v62, %v8678_v37  ;;  %v8680_v44 = vadd.f32 %v8679_v63, %v17998_v39  ;;  %v12110_v62 = vld [vmem:[%s19941_s4 + $0x904] ss:$28 sps:$4 sm:$0xff]  }
 0x5ae   :  { %9437 = vmatpush2.bf16.msra.mxu0 %v12093_v45  ;;  %v12102_v45 = vld [vmem:[%s19941_s4 + $0x938] ss:$28 sps:$4 sm:$0xff]   ;;  %v8681_v24 = vpop.f32.mrf.mxu1  ;;  %v8794_v37 = vpop.f32.mrf.mxu0 }
 0x5af   :  { %9168 = vmatmul.mubr.bf16.gmra.mxu1 %v17252_v19  ;;  %9438 = vmatprep.subr.bf16.mxu0 %v12101_v41  ;;  %v18023_v41 = vadd.f32 %v8792_v22, %v8680_v44  ;;  %v8682_v63 = vadd.f32 %v8681_v24, %v17990_v38  ;;  %v12108_v24 = vld [vmem:[%s19941_s4 + $0x900] ss:$28 sps:$4 sm:$0xff]  }
 0x5b0   :  { %9281 = vmatmul.mubr.bf16.gmra.mxu0 %v17266_v40  ;;  %9326 = vmatpush2.bf16.msra.mxu1 %v12096_v27  ;;  %v12105_v27 = vld [vmem:[%s19941_s4 + $0xcb8] ss:$28 sps:$4 sm:$0xff]   ;;  %v8683_v40 = vpop.f32.mrf.mxu1  ;;  %v21048_v19 = vld [vmem:[#allocation26_spill] sm:$0xff] }
 0x5b1   :  { %9177 = vmatprep.mubr.bf16.mxu1 %v17286_v32  ;;  %9290 = vmatprep.mubr.bf16.mxu0 %v17296_v1  ;;  %v12113_v1 = vld [vmem:[%s19941_s4 + $0xc84] ss:$28 sps:$4 sm:$0xff]   ;;  %v18032_v32 = vadd.f32 %v8794_v37, %v8682_v63  ;;  %v8684_v44 = vadd.f32 %v8683_v40, %v17998_v39  ;;  %v12116_v63 = vld [vmem:[%s19941_s4 + $0x8cc] ss:$28 sps:$4 sm:$0xff]  }
 0x5b2   :  { %9439 = vmatpush2.bf16.msra.mxu0 %v12099_v10  ;;  %9327 = vmatprep.subr.bf16.mxu1 %v12104_v56  ;;  %v8796_v10 = vpop.f32.mrf.mxu0  ;;  %v8687_v22 = vpop.f32.mrf.mxu1 }
 0x5b3   :  { %9440 = vmatprep.subr.bf16.mxu0 %v12107_v9  ;;  %v18038_v56 = vadd.f32 %v8796_v10, %v8684_v44  ;;  %v12111_v9 = vld [vmem:[%s19941_s4 + $0xc80] ss:$28 sps:$4 sm:$0xff]   ;;  %v8688_v40 = vadd.f32 %v8687_v22, %v17990_v38  ;;  %v12114_v44 = vld [vmem:[%s19941_s4 + $0x8c8] ss:$28 sps:$4 sm:$0xff]  }
 0x5b4   :  { %9328 = vmatpush2.bf16.msra.mxu1 %v12102_v45  ;;  %v12119_v45 = vld [vmem:[%s19941_s4 + $0xc4c] ss:$28 sps:$4 sm:$0xff]   ;;  %v8689_v37 = vpop.f32.mrf.mxu1 }
 0x5b5   :  { %9329 = vmatprep.subr.bf16.mxu1 %v12110_v62  ;;  %v8800_v62 = vpop.f32.mrf.mxu0  ;;  %v8690_v22 = vadd.f32 %v8689_v37, %v17998_v39  ;;  %v12125_v37 = vld [vmem:[%s19941_s4 + $0x51c] ss:$28 sps:$4 sm:$0xff]  }
 0x5b6   :  { %9441 = vmatpush2.bf16.msra.mxu0 %v12105_v27  ;;  %v21047_v27 = vld [vmem:[#allocation33_spill] sm:$0xff]  ;;  %v18055_v10 = vadd.f32 %v8800_v62, %v8688_v40  ;;  %v8691_v0 = vpop.f32.mrf.mxu1 }
 0x5b7   :  { %9178 = vmatmul.mubr.bf16.gmra.mxu1 %v17303_v16  ;;  %9442 = vmatprep.subr.bf16.mxu0 %v12113_v1  ;;  %v21049_v1 = vld [vmem:[#allocation27_spill] sm:$0xff]  ;;  %v12122_v16 = vld [vmem:[%s19941_s4 + $0x19c] ss:$28 sps:$4 sm:$0xff]   ;;  %v8802_v43 = vpop.f32.mrf.mxu0  ;;  %v8692_v62 = vadd.f32 %v8691_v0, %v17990_v38 }
 0x5b8   :  { %9291 = vmatmul.mubr.bf16.gmra.mxu0 %v21047_v27  ;;  %9330 = vmatpush2.bf16.msra.mxu1 %v12108_v24  ;;  %v12117_v24 = vld [vmem:[%s19941_s4 + $0xc48] ss:$28 sps:$4 sm:$0xff]   ;;  %v18066_v40 = vadd.f32 %v8802_v43, %v8690_v22  ;;  %v8693_v27 = vpop.f32.mrf.mxu1 }
 0x5b9   :  { %9333 = vmatprep.mubr.bf16.mxu1 %v21048_v19  ;;  %9446 = vmatprep.mubr.bf16.mxu0 %v21049_v1  ;;  %v8804_v1 = vpop.f32.mrf.mxu0  ;;  %v8694_v19 = vadd.f32 %v8693_v27, %v17998_v39  ;;  %v12128_v43 = vld [vmem:[%s19941_s4 + $0x164] ss:$28 sps:$4 sm:$0xff]  }
 0x5ba   :  { %9443 = vmatpush2.bf16.msra.mxu0 %v12111_v9  ;;  %9331 = vmatprep.subr.bf16.mxu1 %v12116_v63  ;;  %v12120_v9 = vld [vmem:[%s19941_s4 + $0x198] ss:$28 sps:$4 sm:$0xff]   ;;  %v18075_v63 = vadd.f32 %v8804_v1, %v8692_v62 }
 0x5bb   :  { %9444 = vmatprep.subr.bf16.mxu0 %v12119_v45  ;;  %v8806_v0 = vpop.f32.mrf.mxu0  ;;  %v12123_v45 = vld [vmem:[%s19941_s4 + $0x518] ss:$28 sps:$4 sm:$0xff]   ;;  %v8697_v22 = vpop.f32.mrf.mxu1 }
 0x5bc   :  { %9332 = vmatpush2.bf16.msra.mxu1 %v12114_v44  ;;  %v18084_v44 = vadd.f32 %v8806_v0, %v8694_v19  ;;  %v8698_v27 = vadd.f32 %v8697_v22, %v17990_v38  ;;  %v21051_v1 = vld [vmem:[#allocation12_spill] sm:$0xff]  ;;  %v21052_v0 = vld [vmem:[#allocation70_spill] sm:$0xff] }
 0x5bd   :  { %9527 = vmatprep.subr.bf16.mxu1 %v12122_v16  ;;  %v12131_v16 = vld [vmem:[%s19941_s4 + $0x4e4] ss:$28 sps:$4 sm:$0xff]   ;;  %v8810_v62 = vpop.f32.mrf.mxu0  ;;  %v8699_v19 = vpop.f32.mrf.mxu1 }
 0x5be   :  { %9445 = vmatpush2.bf16.msra.mxu0 %v12117_v24  ;;  %v12126_v24 = vld [vmem:[%s19941_s4 + $0x160] ss:$28 sps:$4 sm:$0xff]   ;;  %v8700_v22 = vadd.f32 %v8699_v19, %v17998_v39 }
 0x5bf   :  { %9334 = vmatmul.mubr.bf16.vlgmr.msra.gmra.mxu1 %v21050_v15  ;;  %9640 = vmatprep.subr.bf16.mxu0 %v12125_v37  ;;  %v12134_v37 = vld [vmem:[%s19941_s4 + $0x12c] ss:$28 sps:$4 sm:$0xff]   ;;  %v18099_v15 = vadd.f32 %v8810_v62, %v8698_v27  ;;  %v8812_v25 = vpop.f32.mrf.mxu0  ;;  %v8701_v34 = vpop.f32.mrf.mxu1 }
 0x5c0   :  { %9528 = vmatpush1.bf16.msra.mxu1 %v12120_v9  ;;  %9343 = vmatprep.mubr.bf16.mxu1 %v21051_v1  ;;  %v21054_v9 = vld [vmem:[#allocation16_spill] sm:$0xff]  ;;  %v12129_v1 = vld [vmem:[%s19941_s4 + $0x4e0] ss:$28 sps:$4 sm:$0xff]   ;;  %v8702_v27 = vadd.f32 %v8701_v34, %v17990_v38  ;;  %v12135_v34 = vld [vmem:[%s19941_s4 + $0x4a8] ss:$28 sps:$4 sm:$0xff]  }
 0x5c1   :  { %9447 = vmatmul.mubr.bf16.vlgmr.msra.gmra.mxu0 %v21052_v0  ;;  %9529 = vmatprep.subr.bf16.mxu1 %v12128_v43  ;;  %21053 = vst [vmem:[#allocation53_spill] sm:$0xff] %v18099_v15  ;;  %v12137_v43 = vld [vmem:[%s19941_s4 + $0x4ac] ss:$28 sps:$4 sm:$0xff]   ;;  %v18109_v0 = vadd.f32 %v8812_v25, %v8700_v22  ;;  %v8814_v62 = vpop.f32.mrf.mxu0  ;;  %v8703_v19 = vpop.f32.mrf.mxu1 }
 0x5c2   :  { %9456 = vmatprep.mubr.bf16.mxu0 %v21054_v9  ;;  %9641 = vmatpush1.bf16.msra.mxu0 %v12123_v45  ;;  %v12132_v45 = vld [vmem:[%s19941_s4 + $0x128] ss:$28 sps:$4 sm:$0xff]   ;;  %v18118_v9 = vadd.f32 %v8814_v62, %v8702_v27  ;;  %v8704_v2 = vadd.f32 %v8703_v19, %v17998_v39  ;;  %v21060_v62 = vld [vmem:[#allocation37_spill] sm:$0xff] }
 0x5c3   :  { %9642 = vmatprep.subr.bf16.mxu0 %v12131_v16  ;;  %21055 = vst [vmem:[#allocation55_spill] sm:$0xff] %v18109_v0  ;;  %v12140_v16 = vld [vmem:[%s19941_s4 + $0xf4] ss:$28 sps:$4 sm:$0xff]   ;;  %v8816_v25 = vpop.f32.mrf.mxu0  ;;  %v21059_v27 = vld [vmem:[#allocation11_spill] sm:$0xff] }
 0x5c4   :  { %9530 = vmatpush1.bf16.msra.mxu1 %v12126_v24  ;;  %21056 = vst [vmem:[#allocation79_spill] sm:$0xff] %v18118_v9  ;;  %v21057_v24 = vld [vmem:[#allocation73_spill] sm:$0xff]  ;;  %v18128_v22 = vadd.f32 %v8816_v25, %v8704_v2  ;;  %v12141_v2 = vld [vmem:[%s19941_s4 + $0x470] ss:$28 sps:$4 sm:$0xff]  }
 0x5c5   :  { %9531 = vmatprep.subr.bf16.mxu1 %v12134_v37  ;;  %v12143_v37 = vld [vmem:[%s19941_s4 + $0x474] ss:$28 sps:$4 sm:$0xff]   ;;  %v12149_v25 = vld [vmem:[%s19941_s4 + $0x43c] ss:$28 sps:$4 sm:$0xff]   ;;  %v21072_v15 = vld [vmem:[#allocation95_spill] sm:$0xff] }
 0x5c6   :  { %9643 = vmatpush1.bf16.msra.mxu0 %v12129_v1  ;;  %21058 = vst [vmem:[#allocation28_spill] sm:$0xff] %v18128_v22  ;;  %v12138_v1 = vld [vmem:[%s19941_s4 + $0xf0] ss:$28 sps:$4 sm:$0xff]   ;;  %v8707_v19 = vpop.f32.mrf.mxu1 }
 0x5c7   :  { %9344 = vmatmul.mubr.bf16.gmra.mxu1 %v21057_v24  ;;  %9644 = vmatprep.subr.bf16.mxu0 %v12137_v43  ;;  %v12146_v43 = vld [vmem:[%s19941_s4 + $0xbc] ss:$28 sps:$4 sm:$0xff]   ;;  %v21061_v24 = vld [vmem:[#allocation15_spill] sm:$0xff] }
 0x5c8   :  { %9532 = vmatpush1.bf16.msra.mxu1 %v12132_v45  ;;  %9353 = vmatprep.mubr.bf16.mxu1 %v21059_v27  ;;  %v8708_v45 = vadd.f32 %v8707_v19, %v17990_v38  ;;  %v12144_v27 = vld [vmem:[%s19941_s4 + $0xb8] ss:$28 sps:$4 sm:$0xff]  }
 0x5c9   :  { %9457 = vmatmul.mubr.bf16.gmra.mxu0 %v21060_v62  ;;  %9533 = vmatprep.subr.bf16.mxu1 %v12140_v16  ;;  %v8820_v16 = vpop.f32.mrf.mxu0  ;;  %v8709_v62 = vpop.f32.mrf.mxu1 }
 0x5ca   :  { %9466 = vmatprep.mubr.bf16.mxu0 %v21061_v24  ;;  %9645 = vmatpush1.bf16.msra.mxu0 %v12135_v34  ;;  %v18149_v24 = vadd.f32 %v8820_v16, %v8708_v45  ;;  %v8710_v34 = vadd.f32 %v8709_v62, %v17998_v39  ;;  %v21064_v45 = vld [vmem:[#allocation72_spill] sm:$0xff]  ;;  %v12155_v62 = vld [vmem:[%s19941_s4 + $0x404] ss:$28 sps:$4 sm:$0xff]  }
 0x5cb   :  { %9646 = vmatprep.subr.bf16.mxu0 %v12143_v37  ;;  %v12152_v37 = vld [vmem:[%s19941_s4 + $0x84] ss:$28 sps:$4 sm:$0xff]   ;;  %v8822_v19 = vpop.f32.mrf.mxu0  ;;  %v8711_v22 = vpop.f32.mrf.mxu1 }
 0x5cc   :  { %9534 = vmatpush1.bf16.msra.mxu1 %v12138_v1  ;;  %21062 = vst [vmem:[#allocation57_spill] sm:$0xff] %v18149_v24  ;;  %v12147_v1 = vld [vmem:[%s19941_s4 + $0x438] ss:$28 sps:$4 sm:$0xff]   ;;  %v18158_v9 = vadd.f32 %v8822_v19, %v8710_v34  ;;  %v8712_v0 = vadd.f32 %v8711_v22, %v17990_v38  ;;  %v21067_v19 = vld [vmem:[#allocation74_spill] sm:$0xff] }
 0x5cd   :  { %9535 = vmatprep.subr.bf16.mxu1 %v12146_v43  ;;  %v8824_v43 = vpop.f32.mrf.mxu0  ;;  %v8713_v16 = vpop.f32.mrf.mxu1  ;;  %v21065_v24 = vld [vmem:[#allocation48_spill] sm:$0xff] }
 0x5ce   :  { %9647 = vmatpush1.bf16.msra.mxu0 %v12141_v2  ;;  %21063 = vst [vmem:[#allocation39_spill] sm:$0xff] %v18158_v9  ;;  %v12150_v2 = vld [vmem:[%s19941_s4 + $0x80] ss:$28 sps:$4 sm:$0xff]   ;;  %v18169_v34 = vadd.f32 %v8824_v43, %v8712_v0  ;;  %v8714_v22 = vadd.f32 %v8713_v16, %v17998_v39  ;;  %v21068_v9 = vld [vmem:[#allocation84_spill] sm:$0xff]  ;;  %v12161_v0 = vld [vmem:[%s19941_s4 + $0x3cc] ss:$28 sps:$4 sm:$0xff]  }
 0x5cf   :  { %9354 = vmatmul.mubr.bf16.gmra.mxu1 %v21064_v45  ;;  %9648 = vmatprep.subr.bf16.mxu0 %v12149_v25  ;;  %v12158_v25 = vld [vmem:[%s19941_s4 + $0x4c] ss:$28 sps:$4 sm:$0xff]   ;;  %v8826_v45 = vpop.f32.mrf.mxu0 }
 0x5d0   :  { %9536 = vmatpush1.bf16.msra.mxu1 %v12144_v27  ;;  %9363 = vmatprep.mubr.bf16.mxu1 %v21065_v24  ;;  %21066 = vst [vmem:[#allocation29_spill] sm:$0xff] %v18169_v34  ;;  %v12153_v27 = vld [vmem:[%s19941_s4 + $0x400] ss:$28 sps:$4 sm:$0xff]   ;;  %v18180_v24 = vadd.f32 %v8826_v45, %v8714_v22  ;;  %v12159_v45 = vld [vmem:[%s19941_s4 + $0x3c8] ss:$28 sps:$4 sm:$0xff]  }
 0x5d1   :  { %9467 = vmatmul.mubr.bf16.gmra.mxu0 %v21067_v19  ;;  %9537 = vmatprep.subr.bf16.mxu1 %v12152_v37  ;;  %v12156_v37 = vld [vmem:[%s19941_s4 + $0x48] ss:$28 sps:$4 sm:$0xff]   ;;  %v8717_v43 = vpop.f32.mrf.mxu1 }
 0x5d2   :  { %9476 = vmatprep.mubr.bf16.mxu0 %v21068_v9  ;;  %9649 = vmatpush1.bf16.msra.mxu0 %v12147_v1  ;;  %21069 = vst [vmem:[#allocation103_spill] sm:$0xff] %v18180_v24  ;;  %v12164_v1 = vld [vmem:[%s19941_s4 + $0x14] ss:$28 sps:$4 sm:$0xff]   ;;  %v8718_v16 = vadd.f32 %v8717_v43, %v17990_v38  ;;  %v21071_v43 = vld [vmem:[#allocation47_spill] sm:$0xff] }
 0x5d3   :  { %9650 = vmatprep.subr.bf16.mxu0 %v12155_v62  ;;  %v8830_v62 = vpop.f32.mrf.mxu0  ;;  %v8719_v22 = vpop.f32.mrf.mxu1 }
 0x5d4   :  { %9538 = vmatpush1.bf16.msra.mxu1 %v12150_v2  ;;  %v21070_v2 = vld [vmem:[#allocation77_spill] sm:$0xff]  ;;  %v18199_v9 = vadd.f32 %v8830_v62, %v8718_v16  ;;  %v8720_v19 = vadd.f32 %v8719_v22, %v17998_v39  ;;  %v12165_v22 = vld [vmem:[%s19941_s4 + $0x390] ss:$28 sps:$4 sm:$0xff]  }
 0x5d5   :  { %9539 = vmatprep.subr.bf16.mxu1 %v12158_v25  ;;  %v12167_v25 = vld [vmem:[%s19941_s4 + $0x394] ss:$28 sps:$4 sm:$0xff]   ;;  %v8832_v24 = vpop.f32.mrf.mxu0  ;;  %v8721_v34 = vpop.f32.mrf.mxu1 }
 0x5d6   :  { %9651 = vmatpush1.bf16.msra.mxu0 %v12153_v27  ;;  %v12162_v27 = vld [vmem:[%s19941_s4 + $0x10] ss:$28 sps:$4 sm:$0xff]   ;;  %v18210_v16 = vadd.f32 %v8832_v24, %v8720_v19  ;;  %v8722_v62 = vadd.f32 %v8721_v34, %v17990_v38  ;;  %v12168_v34 = vld [vmem:[%s19941_s4 + $0x358] ss:$28 sps:$4 sm:$0xff]  }
 0x5d7   :  { %9364 = vmatmul.mubr.bf16.gmra.mxu1 %v21070_v2  ;;  %9652 = vmatprep.subr.bf16.mxu0 %v12161_v0  ;;  %v12170_v0 = vld [vmem:[%s19941_s4 + $0x35c] ss:$28 sps:$4 sm:$0xff]   ;;  %v8723_v2 = vpop.f32.mrf.mxu1 }
 0x5d8   :  { %9540 = vmatpush1.bf16.msra.mxu1 %v12156_v37  ;;  %9373 = vmatprep.mubr.bf16.mxu1 %v21071_v43  ;;  %21073 = vst [vmem:[#allocation56_spill] sm:$0xff] %v18210_v16  ;;  %v21074_v37 = vld [vmem:[#allocation49_spill] sm:$0xff]  ;;  %v8834_v43 = vpop.f32.mrf.mxu0  ;;  %v8724_v24 = vadd.f32 %v8723_v2, %v17998_v39  ;;  %v12179_v2 = vld [vmem:[%s19941_s4 + $0x6a4] ss:$28 sps:$4 sm:$0xff]  }
 0x5d9   :  { %9477 = vmatmul.mubr.bf16.gmra.mxu0 %v21072_v15  ;;  %9541 = vmatprep.subr.bf16.mxu1 %v12164_v1  ;;  %v12173_v1 = vld [vmem:[%s19941_s4 + $0x6dc] ss:$28 sps:$4 sm:$0xff]   ;;  %v18220_v15 = vadd.f32 %v8834_v43, %v8722_v62  ;;  %v21077_v62 = vld [vmem:[#allocation76_spill] sm:$0xff] }
 0x5da   :  { %9486 = vmatprep.mubr.bf16.mxu0 %v21074_v37  ;;  %9653 = vmatpush1.bf16.msra.mxu0 %v12159_v45  ;;  %v8836_v19 = vpop.f32.mrf.mxu0  ;;  %v12176_v45 = vld [vmem:[%s19941_s4 + $0x324] ss:$28 sps:$4 sm:$0xff]   ;;  %v12171_v43 = vld [vmem:[%s19941_s4 + $0x6d8] ss:$28 sps:$4 sm:$0xff]  }
 0x5db   :  { %9654 = vmatprep.subr.bf16.mxu0 %v12167_v25  ;;  %21075 = vst [vmem:[#allocation58_spill] sm:$0xff] %v18220_v15  ;;  %v18229_v25 = vadd.f32 %v8836_v19, %v8724_v24  ;;  %v12174_v24 = vld [vmem:[%s19941_s4 + $0x320] ss:$28 sps:$4 sm:$0xff]  }
 0x5dc   :  { %9542 = vmatpush1.bf16.msra.mxu1 %v12162_v27  ;;  %v21079_v19 = vld [vmem:[#allocation6_spill] sm:$0xff] }
 0x5dd   :  { %9543 = vmatprep.subr.bf16.mxu1 %v12170_v0  ;;  %21076 = vst [vmem:[#allocation110_spill] sm:$0xff] %v18229_v25  ;;  %v8727_v27 = vpop.f32.mrf.mxu1  ;;  %v21078_v0 = vld [vmem:[#allocation51_spill] sm:$0xff]  ;;  %v21080_v25 = vld [vmem:[#allocation109_spill] sm:$0xff] }
 0x5de   :  { %9655 = vmatpush1.bf16.msra.mxu0 %v12165_v22  ;;  %v8728_v22 = vadd.f32 %v8727_v27, %v17990_v38 }
 0x5df   :  { %9374 = vmatmul.mubr.bf16.gmra.mxu1 %v21077_v62  ;;  %9656 = vmatprep.subr.bf16.mxu0 %v12173_v1  ;;  %v12182_v1 = vld [vmem:[%s19941_s4 + $0x2ec] ss:$28 sps:$4 sm:$0xff]   ;;  %v8840_v62 = vpop.f32.mrf.mxu0  ;;  %v8729_v37 = vpop.f32.mrf.mxu1 }
 0x5e0   :  { %9544 = vmatpush2.bf16.msra.mxu1 %v12168_v34  ;;  %9383 = vmatprep.mubr.bf16.mxu1 %v21078_v0  ;;  %v12177_v34 = vld [vmem:[%s19941_s4 + $0x6a0] ss:$28 sps:$4 sm:$0xff]   ;;  %v18251_v0 = vadd.f32 %v8840_v62, %v8728_v22  ;;  %v8730_v27 = vadd.f32 %v8729_v37, %v17998_v39  ;;  %v8658_v62 = vadd.f32 %v17900_v42, %v17990_v38  ;;  %v12188_v37 = vld [vmem:[%s19941_s4 + $0x2b4] ss:$28 sps:$4 sm:$0xff]  }
 0x5e1   :  { %9487 = vmatmul.mubr.bf16.gmra.mxu0 %v21079_v19  ;;  %9545 = vmatprep.subr.bf16.mxu1 %v12176_v45  ;;  %v12185_v45 = vld [vmem:[%s19941_s4 + $0x66c] ss:$28 sps:$4 sm:$0xff]   ;;  %v8842_v19 = vpop.f32.mrf.mxu0  ;;  %v8731_v15 = vpop.f32.mrf.mxu1  ;;  %v21082_v42 = vld [vmem:[#allocation50_spill] sm:$0xff] }
 0x5e2   :  { %9496 = vmatprep.mubr.bf16.mxu0 %v21080_v25  ;;  %9657 = vmatpush2.bf16.msra.mxu0 %v12171_v43  ;;  %21081 = vst [vmem:[#allocation82_spill] sm:$0xff] %v18251_v0  ;;  %v12180_v43 = vld [vmem:[%s19941_s4 + $0x2e8] ss:$28 sps:$4 sm:$0xff]   ;;  %v18260_v25 = vadd.f32 %v8842_v19, %v8730_v27  ;;  %v8732_v16 = vadd.f32 %v8731_v15, %v17990_v38 }
 0x5e3   :  { %9658 = vmatprep.subr.bf16.mxu0 %v12179_v2  ;;  %v8844_v2 = vpop.f32.mrf.mxu0  ;;  %v8733_v22 = vpop.f32.mrf.mxu1  ;;  %v8660_v15 = vadd.f32 %v17907_v28, %v17998_v39  ;;  %v8662_v28 = vadd.f32 %v17914_v31, %v17990_v38  ;;  %v8664_v31 = vadd.f32 %v17925_v61, %v17998_v39 }
 0x5e4   :  { %9546 = vmatpush2.bf16.msra.mxu1 %v12174_v24  ;;  %v12183_v24 = vld [vmem:[%s19941_s4 + $0x668] ss:$28 sps:$4 sm:$0xff]   ;;  %v18271_v0 = vadd.f32 %v8844_v2, %v8732_v16  ;;  %v8734_v19 = vadd.f32 %v8733_v22, %v17998_v39  ;;  %v12186_v16 = vld [vmem:[%s19941_s4 + $0x2b0] ss:$28 sps:$4 sm:$0xff]   ;;  %v8771_v22 = vadd.f32 %v17905_v48, %v8658_v62  ;;  %v12197_v62 = vld [vmem:[%s19941_s4 + $0x5fc] ss:$28 sps:$4 sm:$0xff]  }
 0x5e5   :  { %9547 = vmatprep.subr.bf16.mxu1 %v12182_v1  ;;  %v12191_v1 = vld [vmem:[%s19941_s4 + $0x634] ss:$28 sps:$4 sm:$0xff]   ;;  %v8846_v27 = vpop.f32.mrf.mxu0  ;;  %v8773_v48 = vadd.f32 %v17912_v47, %v8660_v15  ;;  %v12200_v47 = vld [vmem:[%s19941_s4 + $0x244] ss:$28 sps:$4 sm:$0xff]  }
 0x5e6   :  { %9659 = vmatpush2.bf16.msra.mxu0 %v12177_v34  ;;  %v21083_v34 = vld [vmem:[#allocation52_spill] sm:$0xff]  ;;  %v18284_v2 = vadd.f32 %v8846_v27, %v8734_v19 }
 0x5e7   :  { %9384 = vmatmul.mubr.bf16.gmra.mxu1 %v21082_v42  ;;  %9660 = vmatprep.subr.bf16.mxu0 %v12185_v45  ;;  %v21084_v45 = vld [vmem:[#allocation134_spill] sm:$0xff]  ;;  %v12189_v19 = vld [vmem:[%s19941_s4 + $0x630] ss:$28 sps:$4 sm:$0xff]  }
 0x5e8   :  { %9548 = vmatpush2.bf16.msra.mxu1 %v12180_v43  ;;  %9393 = vmatprep.mubr.bf16.mxu1 %v21083_v34  ;;  %v12194_v43 = vld [vmem:[%s19941_s4 + $0x27c] ss:$28 sps:$4 sm:$0xff]   ;;  %v8883_v27 = vpop.f32.mrf.mxu1  ;;  %v8775_v34 = vadd.f32 %v17923_v58, %v8662_v28  ;;  %v12203_v58 = vld [vmem:[%s19941_s4 + $0x5c4] ss:$28 sps:$4 sm:$0xff]  }
 0x5e9   :  { %9497 = vmatmul.mubr.bf16.gmra.mxu0 %v21084_v45  ;;  %9549 = vmatprep.subr.bf16.mxu1 %v12188_v37  ;;  %v8884_v37 = vadd.f32 %v8883_v27, %v8771_v22  ;;  %v8777_v27 = vadd.f32 %v17936_v59, %v8664_v31  ;;  %v12198_v59 = vld [vmem:[%s19941_s4 + $0x240] ss:$28 sps:$4 sm:$0xff]  }
 0x5ea   :  { %9506 = vmatprep.mubr.bf16.mxu0 %v17738_v7  ;;  %9661 = vmatpush2.bf16.msra.mxu0 %v12183_v24  ;;  %v12192_v24 = vld [vmem:[%s19941_s4 + $0x278] ss:$28 sps:$4 sm:$0xff]   ;;  %v8996_v7 = vpop.f32.mrf.mxu0  ;;  %v8885_v45 = vpop.f32.mrf.mxu1 }
 0x5eb   :  { %9662 = vmatprep.subr.bf16.mxu0 %v12191_v1  ;;  %v8997_v61 = vadd.f32 %v8996_v7, %v8884_v37  ;;  %v8886_v15 = vadd.f32 %v8885_v45, %v8773_v48  ;;  %v12195_v1 = vld [vmem:[%s19941_s4 + $0x5f8] ss:$28 sps:$4 sm:$0xff]   ;;  %v8668_v45 = vadd.f32 %v17938_v60, %v17990_v38  ;;  %v12206_v48 = vld [vmem:[%s19941_s4 + $0x20c] ss:$28 sps:$4 sm:$0xff]   ;;  %v8670_v60 = vadd.f32 %v17946_v35, %v17998_v39 }
 0x5ec   :  { %9550 = vmatpush2.bf16.msra.mxu1 %v12186_v16  ;;  %v8998_v16 = vpop.f32.mrf.mxu0  ;;  %v8887_v22 = vpop.f32.mrf.mxu1  ;;  %v8672_v35 = vadd.f32 %v17953_v46, %v17990_v38  ;;  %v12207_v46 = vld [vmem:[%s19941_s4 + $0x588] ss:$28 sps:$4 sm:$0xff]  }
 0x5ed   :  { %9551 = vmatprep.subr.bf16.mxu1 %v12194_v43  ;;  %12404 = vtanh.f32 %v8997_v61  ;;  %v8999_v28 = vadd.f32 %v8998_v16, %v8886_v15  ;;  %v8888_v7 = vadd.f32 %v8887_v22, %v8775_v34  ;;  %v8781_v61 = vadd.f32 %v17951_v29, %v8668_v45  ;;  %v12204_v15 = vld [vmem:[%s19941_s4 + $0x208] ss:$28 sps:$4 sm:$0xff]   ;;  %v12218_v45 = vld [vmem:[%s19941_s4 + $0x89c] ss:$28 sps:$4 sm:$0xff]  }
 0x5ee   :  { %9663 = vmatpush2.bf16.msra.mxu0 %v12189_v19  ;;  %v9000_v43 = vpop.f32.mrf.mxu0  ;;  %v8889_v19 = vpop.f32.mrf.mxu1  ;;  %v8783_v22 = vadd.f32 %v17965_v55, %v8670_v60  ;;  %v8674_v29 = vadd.f32 %v17974_v30, %v17998_v39  ;;  %v8785_v55 = vadd.f32 %v17981_v17, %v8672_v35  ;;  %v12210_v39 = vld [vmem:[%s19941_s4 + $0x1d0] ss:$28 sps:$4 sm:$0xff]  }
 0x5ef   :  { %9394 = vmatmul.mubr.bf16.gmra.mxu1 %v17748_v57  ;;  %9664 = vmatprep.subr.bf16.mxu0 %v12197_v62  ;;  %12406 = vtanh.f32 %v8999_v28  ;;  %v9001_v34 = vadd.f32 %v9000_v43, %v8888_v7  ;;  %v8890_v31 = vadd.f32 %v8889_v19, %v8777_v27  ;;  %v12201_v62 = vld [vmem:[%s19941_s4 + $0x5c0] ss:$28 sps:$4 sm:$0xff]   ;;  %v12215_v27 = vld [vmem:[%s19941_s4 + $0x554] ss:$28 sps:$4 sm:$0xff]  }
 0x5f0   :  { %9552 = vmatpush2.bf16.msra.mxu1 %v12192_v24  ;;  %9403 = vmatprep.mubr.bf16.mxu1 %v17770_v5  ;;  %v9002_v37 = vpop.f32.mrf.mxu0  ;;  %v12209_v24 = vld [vmem:[%s19941_s4 + $0x58c] ss:$28 sps:$4 sm:$0xff]   ;;  %v8787_v17 = vadd.f32 %v17992_v26, %v8674_v29  ;;  %v12216_v26 = vld [vmem:[%s19941_s4 + $0x898] ss:$28 sps:$4 sm:$0xff]  }
 0x5f1   :  { %9507 = vmatmul.mubr.bf16.gmra.mxu0 %v17758_v3  ;;  %9553 = vmatprep.subr.bf16.mxu1 %v12200_v47  ;;  %12408 = vtanh.f32 %v9001_v34  ;;  %v9003_v47 = vadd.f32 %v9002_v37, %v8890_v31  ;;  %v12213_v19 = vld [vmem:[%s19941_s4 + $0x550] ss:$28 sps:$4 sm:$0xff]   ;;  %v12221_v31 = vld [vmem:[%s19941_s4 + $0xc1c] ss:$28 sps:$4 sm:$0xff]  }
 0x5f2   :  { %9516 = vmatprep.mubr.bf16.mxu0 %v17777_v4  ;;  %9665 = vmatpush2.bf16.msra.mxu0 %v12195_v1  ;;  %v12212_v1 = vld [vmem:[%s19941_s4 + $0x1d4] ss:$28 sps:$4 sm:$0xff]  }
 0x5f3   :  { %9666 = vmatprep.subr.bf16.mxu0 %v12203_v58  ;;  %12410 = vtanh.f32 %v9003_v47  ;;  %v8893_v16 = vpop.f32.mrf.mxu1 }
 0x5f4   :  { %9554 = vmatpush2.bf16.msra.mxu1 %v12198_v59  ;;  %v8894_v38 = vadd.f32 %v8893_v16, %v8781_v61  ;;  %v12224_v61 = vld [vmem:[%s19941_s4 + $0x864] ss:$28 sps:$4 sm:$0xff]  }
 0x5f5   :  { %9555 = vmatprep.subr.bf16.mxu1 %v12206_v48  ;;  %v9006_v58 = vpop.f32.mrf.mxu0  ;;  %v8895_v28 = vpop.f32.mrf.mxu1 }
 0x5f6   :  { %9667 = vmatpush2.bf16.msra.mxu0 %v12201_v62  ;;  %v9007_v30 = vadd.f32 %v9006_v58, %v8894_v38  ;;  %v8896_v7 = vadd.f32 %v8895_v28, %v8783_v22  ;;  %v12227_v22 = vld [vmem:[%s19941_s4 + $0xbe4] ss:$28 sps:$4 sm:$0xff]  }
 0x5f7   :  { %9404 = vmatmul.mubr.bf16.gmra.mxu1 %v17780_v20  ;;  %9668 = vmatprep.subr.bf16.mxu0 %v12209_v24  ;;  %v9008_v59 = vpop.f32.mrf.mxu0  ;;  %v8897_v43 = vpop.f32.mrf.mxu1 }
 0x5f8   :  { %9556 = vmatpush2.bf16.msra.mxu1 %v12204_v15  ;;  %9559 = vmatprep.mubr.bf16.mxu1 %v16871_v12  ;;  %12412 = vtanh.f32 %v9007_v30  ;;  %v9009_v48 = vadd.f32 %v9008_v59, %v8896_v7  ;;  %v8898_v34 = vadd.f32 %v8897_v43, %v8785_v55  ;;  %v12225_v55 = vld [vmem:[%s19941_s4 + $0xbe0] ss:$28 sps:$4 sm:$0xff]   ;;  %v12233_v7 = vld [vmem:[%s19941_s4 + $0xbac] ss:$28 sps:$4 sm:$0xff]  }
 0x5f9   :  { %9517 = vmatmul.mubr.bf16.gmra.mxu0 %v17782_v36  ;;  %9557 = vmatprep.subr.bf16.mxu1 %v12212_v1  ;;  %v9010_v60 = vpop.f32.mrf.mxu0  ;;  %v8899_v62 = vpop.f32.mrf.mxu1  ;;  %v12219_v1 = vld [vmem:[%s19941_s4 + $0xc18] ss:$28 sps:$4 sm:$0xff]   ;;  %v12228_v59 = vld [vmem:[%s19941_s4 + $0x828] ss:$28 sps:$4 sm:$0xff]  }
 0x5fa   :  { %9669 = vmatpush2.bf16.msra.mxu0 %v12207_v46  ;;  %9672 = vmatprep.mubr.bf16.mxu0 %v16876_v11  ;;  %v12405_v37 = vpop.eup %12404  ;;  %12414 = vtanh.f32 %v9009_v48  ;;  %v9011_v24 = vadd.f32 %v9010_v60, %v8898_v34  ;;  %v8900_v47 = vadd.f32 %v8899_v62, %v8787_v17  ;;  %v12222_v46 = vld [vmem:[%s19941_s4 + $0x860] ss:$28 sps:$4 sm:$0xff]  }
 0x5fb   :  { %9670 = vmatprep.subr.bf16.mxu0 %v12215_v27  ;;  %10479 = vst [vmem:[%s19942_s6] sm:$0xff] %v12405_v37  ;;  %v9012_v35 = vpop.f32.mrf.mxu0  ;;  %v12230_v27 = vld [vmem:[%s19941_s4 + $0x82c] ss:$28 sps:$4 sm:$0xff]   ;;  %v12239_v37 = vld [vmem:[%s19941_s4 + $0xb74] ss:$28 sps:$4 sm:$0xff]  }
 0x5fc   :  { %9558 = vmatpush2.bf16.msra.mxu1 %v12210_v39  ;;  %v12407_v15 = vpop.eup %12406  ;;  %12416 = vtanh.f32 %v9011_v24  ;;  %v9013_v16 = vadd.f32 %v9012_v35, %v8900_v47 }
 0x5fd   :  { %9753 = vmatprep.subr.bf16.mxu1 %v12218_v45  ;;  %10480 = vst [vmem:[%s19942_s6 + $0x8] sm:$0xff] %v12407_v15  ;;  %v12237_v15 = vld [vmem:[%s19941_s4 + $0xb70] ss:$28 sps:$4 sm:$0xff]  }
 0x5fe   :  { %9671 = vmatpush2.bf16.msra.mxu0 %v12213_v19  ;;  %v12409_v29 = vpop.eup %12408  ;;  %12418 = vtanh.f32 %v9013_v16  ;;  %v12236_v19 = vld [vmem:[%s19941_s4 + $0x7f4] ss:$28 sps:$4 sm:$0xff]   ;;  %v12245_v16 = vld [vmem:[%s19941_s4 + $0xb3c] ss:$28 sps:$4 sm:$0xff]  }
 0x5ff   :  { %9560 = vmatmul.mubr.bf16.vlgmr.msra.gmra.mxu1 %v16889_v52  ;;  %9866 = vmatprep.subr.bf16.mxu0 %v12221_v31  ;;  %v8903_v38 = vpop.f32.mrf.mxu1  ;;  %10487 = vst [vmem:[%s19942_s6 + $0x38] sm:$0xff] %v12409_v29  ;;  %v12240_v29 = vld [vmem:[%s19941_s4 + $0x7b8] ss:$28 sps:$4 sm:$0xff]  }
 0x600   :  { %9754 = vmatpush1.bf16.msra.mxu1 %v12216_v26  ;;  %9569 = vmatprep.mubr.bf16.mxu1 %v16918_v14  ;;  %v8904_v58 = vadd.f32 %v8903_v38, %v18011_v50  ;;  %v12411_v28 = vpop.eup %12410 }
 0x601   :  { %9673 = vmatmul.mubr.bf16.vlgmr.msra.gmra.mxu0 %v16903_v53  ;;  %9755 = vmatprep.subr.bf16.mxu1 %v12224_v61  ;;  %v9016_v39 = vpop.f32.mrf.mxu0  ;;  %v8905_v30 = vpop.f32.mrf.mxu1  ;;  %10488 = vst [vmem:[%s19942_s6 + $0x40] sm:$0xff] %v12411_v28 }
 0x602   :  { %9682 = vmatprep.mubr.bf16.mxu0 %v16928_v23  ;;  %9867 = vmatpush1.bf16.msra.mxu0 %v12219_v1  ;;  %v9017_v50 = vadd.f32 %v9016_v39, %v8904_v58  ;;  %v8906_v45 = vadd.f32 %v8905_v30, %v18023_v41  ;;  %v12231_v41 = vld [vmem:[%s19941_s4 + $0xba8] ss:$28 sps:$4 sm:$0xff]  }
 0x603   :  { %9868 = vmatprep.subr.bf16.mxu0 %v12227_v22  ;;  %v9018_v43 = vpop.f32.mrf.mxu0  ;;  %v8907_v17 = vpop.f32.mrf.mxu1  ;;  %v12251_v30 = vld [vmem:[%s19941_s4 + $0xb04] ss:$28 sps:$4 sm:$0xff]  }
 0x604   :  { %9756 = vmatpush1.bf16.msra.mxu1 %v12222_v46  ;;  %12420 = vtanh.f32 %v9017_v50  ;;  %v9019_v48 = vadd.f32 %v9018_v43, %v8906_v45  ;;  %v8908_v34 = vadd.f32 %v8907_v17, %v18032_v32  ;;  %v12234_v32 = vld [vmem:[%s19941_s4 + $0x7f0] ss:$28 sps:$4 sm:$0xff]   ;;  %v12246_v45 = vld [vmem:[%s19941_s4 + $0x780] ss:$28 sps:$4 sm:$0xff]  }
 0x605   :  { %9757 = vmatprep.subr.bf16.mxu1 %v12230_v27  ;;  %v9020_v31 = vpop.f32.mrf.mxu0  ;;  %v8909_v60 = vpop.f32.mrf.mxu1  ;;  %v12248_v27 = vld [vmem:[%s19941_s4 + $0x784] ss:$28 sps:$4 sm:$0xff]   ;;  %v12254_v43 = vld [vmem:[%s19941_s4 + $0x74c] ss:$28 sps:$4 sm:$0xff]  }
 0x606   :  { %9869 = vmatpush1.bf16.msra.mxu0 %v12225_v55  ;;  %v12413_v62 = vpop.eup %12412  ;;  %12422 = vtanh.f32 %v9019_v48  ;;  %v9021_v26 = vadd.f32 %v9020_v31, %v8908_v34  ;;  %v8910_v24 = vadd.f32 %v8909_v60, %v18038_v56  ;;  %v12242_v56 = vld [vmem:[%s19941_s4 + $0x7bc] ss:$28 sps:$4 sm:$0xff]   ;;  %v12257_v31 = vld [vmem:[%s19941_s4 + $0xacc] ss:$28 sps:$4 sm:$0xff]  }
 0x607   :  { %9570 = vmatmul.mubr.bf16.gmra.mxu1 %v16938_v49  ;;  %9870 = vmatprep.subr.bf16.mxu0 %v12233_v7  ;;  %10494 = vst [vmem:[%s19942_s6 + $0x70] sm:$0xff] %v12413_v62  ;;  %v9022_v47 = vpop.f32.mrf.mxu0  ;;  %v12415_v61 = vpop.eup %12414  ;;  %v12243_v55 = vld [vmem:[%s19941_s4 + $0xb38] ss:$28 sps:$4 sm:$0xff]   ;;  %v12249_v34 = vld [vmem:[%s19941_s4 + $0xb00] ss:$28 sps:$4 sm:$0xff]  }
 0x608   :  { %9758 = vmatpush1.bf16.msra.mxu1 %v12228_v59  ;;  %9579 = vmatprep.mubr.bf16.mxu1 %v16977_v13  ;;  %12424 = vtanh.f32 %v9021_v26  ;;  %v9023_v35 = vadd.f32 %v9022_v47, %v8910_v24  ;;  %10495 = vst [vmem:[%s19942_s6 + $0x78] sm:$0xff] %v12415_v61  ;;  %v12263_v61 = vld [vmem:[%s19941_s4 + $0xa94] ss:$28 sps:$4 sm:$0xff]  }
 0x609   :  { %9683 = vmatmul.mubr.bf16.gmra.mxu0 %v16961_v54  ;;  %9759 = vmatprep.subr.bf16.mxu1 %v12236_v19  ;;  %v12417_v1 = vpop.eup %12416 }
 0x60a   :  { %9692 = vmatprep.mubr.bf16.mxu0 %v16989_v51  ;;  %9871 = vmatpush1.bf16.msra.mxu0 %v12231_v41  ;;  %12426 = vtanh.f32 %v9023_v35  ;;  %v8913_v22 = vpop.f32.mrf.mxu1  ;;  %10501 = vst [vmem:[%s19942_s6 + $0xa8] sm:$0xff] %v12417_v1  ;;  %v21086_v1 = vld [vmem:[#allocation14_spill] sm:$0xff] }
 0x60b   :  { %9872 = vmatprep.subr.bf16.mxu0 %v12239_v37  ;;  %v8914_v46 = vadd.f32 %v8913_v22, %v18055_v10  ;;  %v12419_v38 = vpop.eup %12418  ;;  %v12252_v37 = vld [vmem:[%s19941_s4 + $0x748] ss:$28 sps:$4 sm:$0xff]  }
 0x60c   :  { %9760 = vmatpush1.bf16.msra.mxu1 %v12234_v32  ;;  %v9026_v58 = vpop.f32.mrf.mxu0  ;;  %v8915_v28 = vpop.f32.mrf.mxu1  ;;  %10502 = vst [vmem:[%s19942_s6 + $0xb0] sm:$0xff] %v12419_v38  ;;  %v12255_v32 = vld [vmem:[%s19941_s4 + $0xac8] ss:$28 sps:$4 sm:$0xff]   ;;  %v12266_v38 = vld [vmem:[%s19941_s4 + $0xa5c] ss:$28 sps:$4 sm:$0xff]  }
 0x60d   :  { %9761 = vmatprep.subr.bf16.mxu1 %v12242_v56  ;;  %v9027_v39 = vadd.f32 %v9026_v58, %v8914_v46  ;;  %v8916_v10 = vadd.f32 %v8915_v28, %v18066_v40  ;;  %v21085_v56 = vld [vmem:[#allocation53_spill] sm:$0xff]  ;;  %v21088_v58 = vld [vmem:[#allocation55_spill] sm:$0xff] }
 0x60e   :  { %9873 = vmatpush1.bf16.msra.mxu0 %v12237_v15  ;;  %v9028_v7 = vpop.f32.mrf.mxu0  ;;  %v8917_v50 = vpop.f32.mrf.mxu1  ;;  %v21087_v46 = vld [vmem:[#allocation89_spill] sm:$0xff] }
 0x60f   :  { %9580 = vmatmul.mubr.bf16.gmra.mxu1 %v17003_v6  ;;  %9874 = vmatprep.subr.bf16.mxu0 %v12245_v16  ;;  %12428 = vtanh.f32 %v9027_v39  ;;  %v9029_v59 = vadd.f32 %v9028_v7, %v8916_v10  ;;  %v8918_v40 = vadd.f32 %v8917_v50, %v18075_v63  ;;  %v12258_v16 = vld [vmem:[%s19941_s4 + $0x710] ss:$28 sps:$4 sm:$0xff]   ;;  %v12269_v7 = vld [vmem:[%s19941_s4 + $0xddc] ss:$28 sps:$4 sm:$0xff]  }
 0x610   :  { %9762 = vmatpush1.bf16.msra.mxu1 %v12240_v29  ;;  %9589 = vmatprep.mubr.bf16.mxu1 %v17030_v33  ;;  %v9030_v17 = vpop.f32.mrf.mxu0  ;;  %v8919_v19 = vpop.f32.mrf.mxu1  ;;  %v12261_v39 = vld [vmem:[%s19941_s4 + $0xa90] ss:$28 sps:$4 sm:$0xff]  }
 0x611   :  { %9693 = vmatmul.mubr.bf16.gmra.mxu0 %v17017_v18  ;;  %9763 = vmatprep.subr.bf16.mxu1 %v12248_v27  ;;  %v12421_v48 = vpop.eup %12420  ;;  %12430 = vtanh.f32 %v9029_v59  ;;  %v9031_v41 = vadd.f32 %v9030_v17, %v8918_v40  ;;  %v8920_v63 = vadd.f32 %v8919_v19, %v18084_v44  ;;  %v12260_v44 = vld [vmem:[%s19941_s4 + $0x714] ss:$28 sps:$4 sm:$0xff]  }
 0x612   :  { %9702 = vmatprep.mubr.bf16.mxu0 %v17048_v8  ;;  %9875 = vmatpush1.bf16.msra.mxu0 %v12243_v55  ;;  %10508 = vst [vmem:[%s19942_s6 + $0xe0] sm:$0xff] %v12421_v48  ;;  %v9032_v60 = vpop.f32.mrf.mxu0  ;;  %v21089_v55 = vld [vmem:[#allocation19_spill] sm:$0xff]  ;;  %v12264_v40 = vld [vmem:[%s19941_s4 + $0xa58] ss:$28 sps:$4 sm:$0xff]   ;;  %v12272_v48 = vld [vmem:[%s19941_s4 + $0xa24] ss:$28 sps:$4 sm:$0xff]  }
 0x613   :  { %9876 = vmatprep.subr.bf16.mxu0 %v12251_v30  ;;  %v12423_v62 = vpop.eup %12422  ;;  %12432 = vtanh.f32 %v9031_v41  ;;  %v9033_v26 = vadd.f32 %v9032_v60, %v8920_v63  ;;  %v21091_v41 = vld [vmem:[#allocation28_spill] sm:$0xff] }
 0x614   :  { %9764 = vmatpush1.bf16.msra.mxu1 %v12246_v45  ;;  %10509 = vst [vmem:[%s19942_s6 + $0xe8] sm:$0xff] %v12423_v62  ;;  %v21090_v45 = vld [vmem:[#allocation79_spill] sm:$0xff] }
 0x615   :  { %9765 = vmatprep.subr.bf16.mxu1 %v12254_v43  ;;  %v12425_v24 = vpop.eup %12424  ;;  %12434 = vtanh.f32 %v9033_v26  ;;  %v12275_v26 = vld [vmem:[%s19941_s4 + $0xda4] ss:$28 sps:$4 sm:$0xff]  }
 0x616   :  { %9877 = vmatpush1.bf16.msra.mxu0 %v12249_v34  ;;  %v8923_v47 = vpop.f32.mrf.mxu1  ;;  %10515 = vst [vmem:[%s19942_s6 + $0x118] sm:$0xff] %v12425_v24  ;;  %v21093_v24 = vld [vmem:[#allocation20_spill] sm:$0xff] }
 0x617   :  { %9590 = vmatmul.mubr.bf16.gmra.mxu1 %v17059_v21  ;;  %9878 = vmatprep.subr.bf16.mxu0 %v12257_v31  ;;  %v8924_v35 = vadd.f32 %v8923_v47, %v21085_v56  ;;  %v12427_v15 = vpop.eup %12426  ;;  %v12267_v31 = vld [vmem:[%s19941_s4 + $0xdd8] ss:$28 sps:$4 sm:$0xff]   ;;  %v12278_v56 = vld [vmem:[%s19941_s4 + $0x9ec] ss:$28 sps:$4 sm:$0xff]  }
 0x618   :  { %9766 = vmatpush1.bf16.msra.mxu1 %v12252_v37  ;;  %9599 = vmatprep.mubr.bf16.mxu1 %v21086_v1  ;;  %v8925_v29 = vpop.f32.mrf.mxu1  ;;  %10516 = vst [vmem:[%s19942_s6 + $0x120] sm:$0xff] %v12427_v15  ;;  %v21092_v37 = vld [vmem:[#allocation61_spill] sm:$0xff] }
 0x619   :  { %v9036_v22 = vpop.f32.mrf.mxu0  ;;  %9703 = vmatmul.mubr.bf16.gmra.mxu0 %v21087_v46  ;;  %9767 = vmatprep.subr.bf16.mxu1 %v12260_v44  ;;  %v8926_v28 = vadd.f32 %v8925_v29, %v21088_v58  ;;  %v21095_v15 = vld [vmem:[#allocation21_spill] sm:$0xff]  ;;  %v12281_v58 = vld [vmem:[%s19941_s4 + $0xd6c] ss:$28 sps:$4 sm:$0xff]   ;;  %v21137_v46 = vld [vmem:[#allocation6_spill] sm:$0xff] }
 0x61a   :  { %v9037_v27 = vadd.f32 %v9036_v22, %v8924_v35  ;;  %9712 = vmatprep.mubr.bf16.mxu0 %v21089_v55  ;;  %9879 = vmatpush1.bf16.msra.mxu0 %v12255_v32  ;;  %v8927_v30 = vpop.f32.mrf.mxu1  ;;  %v12270_v32 = vld [vmem:[%s19941_s4 + $0xa20] ss:$28 sps:$4 sm:$0xff]  }
 0x61b   :  { %v9038_v10 = vpop.f32.mrf.mxu0  ;;  %9880 = vmatprep.subr.bf16.mxu0 %v12263_v61  ;;  %v8928_v59 = vadd.f32 %v8927_v30, %v21090_v45  ;;  %v21094_v61 = vld [vmem:[#allocation63_spill] sm:$0xff]  ;;  %v21096_v22 = vld [vmem:[#allocation57_spill] sm:$0xff]  ;;  %v12284_v45 = vld [vmem:[%s19941_s4 + $0x9b4] ss:$28 sps:$4 sm:$0xff]  }
 0x61c   :  { %12436 = vtanh.f32 %v9037_v27  ;;  %v9039_v50 = vadd.f32 %v9038_v10, %v8926_v28  ;;  %9768 = vmatpush1.bf16.msra.mxu1 %v12258_v16  ;;  %v8929_v17 = vpop.f32.mrf.mxu1  ;;  %v12429_v19 = vpop.eup %12428  ;;  %v12273_v16 = vld [vmem:[%s19941_s4 + $0xda0] ss:$28 sps:$4 sm:$0xff]   ;;  %v21097_v30 = vld [vmem:[#allocation39_spill] sm:$0xff] }
 0x61d   :  { %v9040_v43 = vpop.f32.mrf.mxu0  ;;  %9769 = vmatprep.subr.bf16.mxu1 %v12266_v38  ;;  %v8930_v63 = vadd.f32 %v8929_v17, %v21091_v41  ;;  %10522 = vst [vmem:[%s19942_s6 + $0x150] sm:$0xff] %v12429_v19  ;;  %v21098_v17 = vld [vmem:[#allocation29_spill] sm:$0xff]  ;;  %v12287_v41 = vld [vmem:[%s19941_s4 + $0xd34] ss:$28 sps:$4 sm:$0xff]  }
 0x61e   :  { %12438 = vtanh.f32 %v9039_v50  ;;  %v9041_v34 = vadd.f32 %v9040_v43, %v8928_v59  ;;  %9881 = vmatpush1.bf16.msra.mxu0 %v12261_v39  ;;  %v12431_v62 = vpop.eup %12430  ;;  %v12276_v39 = vld [vmem:[%s19941_s4 + $0x9e8] ss:$28 sps:$4 sm:$0xff]  }
 0x61f   :  { %v9042_v60 = vpop.f32.mrf.mxu0  ;;  %9600 = vmatmul.mubr.bf16.gmra.mxu1 %v21092_v37  ;;  %9882 = vmatprep.subr.bf16.mxu0 %v12269_v7  ;;  %10523 = vst [vmem:[%s19942_s6 + $0x158] sm:$0xff] %v12431_v62  ;;  %v12282_v62 = vld [vmem:[%s19941_s4 + $0x9b0] ss:$28 sps:$4 sm:$0xff]  }
 0x620   :  { %12440 = vtanh.f32 %v9041_v34  ;;  %v9043_v44 = vadd.f32 %v9042_v60, %v8930_v63  ;;  %9770 = vmatpush2.bf16.msra.mxu1 %v12264_v40  ;;  %9609 = vmatprep.mubr.bf16.mxu1 %v21093_v24  ;;  %v12433_v47 = vpop.eup %12432  ;;  %v12279_v40 = vld [vmem:[%s19941_s4 + $0xd68] ss:$28 sps:$4 sm:$0xff]   ;;  %v21100_v60 = vld [vmem:[#allocation17_spill] sm:$0xff]  ;;  %v21134_v37 = vld [vmem:[#allocation76_spill] sm:$0xff] }
 0x621   :  { %9713 = vmatmul.mubr.bf16.gmra.mxu0 %v21094_v61  ;;  %9771 = vmatprep.subr.bf16.mxu1 %v12272_v48  ;;  %10529 = vst [vmem:[%s19942_s6 + $0x188] sm:$0xff] %v12433_v47  ;;  %v21099_v48 = vld [vmem:[#allocation65_spill] sm:$0xff]  ;;  %v21102_v47 = vld [vmem:[#allocation91_spill] sm:$0xff] }
 0x622   :  { %12442 = vtanh.f32 %v9043_v44  ;;  %v8933_v35 = vpop.f32.mrf.mxu1  ;;  %9722 = vmatprep.mubr.bf16.mxu0 %v21095_v15  ;;  %9883 = vmatpush2.bf16.msra.mxu0 %v12267_v31  ;;  %v12435_v38 = vpop.eup %12434  ;;  %v21101_v44 = vld [vmem:[#allocation103_spill] sm:$0xff] }
 0x623   :  { %v8934_v29 = vadd.f32 %v8933_v35, %v21096_v22  ;;  %9884 = vmatprep.subr.bf16.mxu0 %v12275_v26  ;;  %10530 = vst [vmem:[%s19942_s6 + $0x190] sm:$0xff] %v12435_v38  ;;  %v12290_v35 = vld [vmem:[%s19941_s4 + $0x97c] ss:$28 sps:$4 sm:$0xff]   ;;  %v21103_v22 = vld [vmem:[#allocation18_spill] sm:$0xff] }
 0x624   :  { %v9046_v27 = vpop.f32.mrf.mxu0  ;;  %v8935_v28 = vpop.f32.mrf.mxu1  ;;  %9772 = vmatpush2.bf16.msra.mxu1 %v12270_v32 }
 0x625   :  { %v9047_v10 = vadd.f32 %v9046_v27, %v8934_v29  ;;  %v8936_v7 = vadd.f32 %v8935_v28, %v21097_v30  ;;  %9773 = vmatprep.subr.bf16.mxu1 %v12278_v56  ;;  %v12285_v29 = vld [vmem:[%s19941_s4 + $0xd30] ss:$28 sps:$4 sm:$0xff]   ;;  %v12293_v27 = vld [vmem:[%s19941_s4 + $0xcfc] ss:$28 sps:$4 sm:$0xff]   ;;  %v12296_v30 = vld [vmem:[%s19941_s4 + $0x944] ss:$28 sps:$4 sm:$0xff]  }
 0x626   :  { %v9048_v50 = vpop.f32.mrf.mxu0  ;;  %v8937_v59 = vpop.f32.mrf.mxu1  ;;  %9885 = vmatpush2.bf16.msra.mxu0 %v12273_v16  ;;  %v12288_v28 = vld [vmem:[%s19941_s4 + $0x978] ss:$28 sps:$4 sm:$0xff]  }
 0x627   :  { %12444 = vtanh.f32 %v9047_v10  ;;  %v9049_v43 = vadd.f32 %v9048_v50, %v8936_v7  ;;  %v8938_v19 = vadd.f32 %v8937_v59, %v21098_v17  ;;  %9610 = vmatmul.mubr.bf16.gmra.mxu1 %v21099_v48  ;;  %9886 = vmatprep.subr.bf16.mxu0 %v12281_v58  ;;  %v21130_v48 = vld [vmem:[#allocation95_spill] sm:$0xff] }
 0x628   :  { %v9050_v34 = vpop.f32.mrf.mxu0  ;;  %v8939_v63 = vpop.f32.mrf.mxu1  ;;  %9774 = vmatpush2.bf16.msra.mxu1 %v12276_v39  ;;  %9619 = vmatprep.mubr.bf16.mxu1 %v21100_v60  ;;  %v21129_v60 = vld [vmem:[#allocation47_spill] sm:$0xff] }
 0x629   :  { %v12437_v31 = vpop.eup %12436  ;;  %12446 = vtanh.f32 %v9049_v43  ;;  %v9051_v26 = vadd.f32 %v9050_v34, %v8938_v19  ;;  %v8940_v32 = vadd.f32 %v8939_v63, %v21101_v44  ;;  %9723 = vmatmul.mubr.bf16.gmra.mxu0 %v21102_v47  ;;  %9775 = vmatprep.subr.bf16.mxu1 %v12284_v45  ;;  %v12291_v45 = vld [vmem:[%s19941_s4 + $0xcf8] ss:$28 sps:$4 sm:$0xff]   ;;  %v12299_v19 = vld [vmem:[%s19941_s4 + $0xcc4] ss:$28 sps:$4 sm:$0xff]  }
 0x62a   :  { %10536 = vst [vmem:[%s19942_s6 + $0x1c0] sm:$0xff] %v12437_v31  ;;  %v9052_v56 = vpop.f32.mrf.mxu0  ;;  %9732 = vmatprep.mubr.bf16.mxu0 %v21103_v22  ;;  %9887 = vmatpush2.bf16.msra.mxu0 %v12279_v40  ;;  %v21104_v43 = vld [vmem:[#allocation64_spill] sm:$0xff]  ;;  %v21106_v34 = vld [vmem:[#allocation30_spill] sm:$0xff] }
 0x62b   :  { %v12439_v16 = vpop.eup %12438  ;;  %12448 = vtanh.f32 %v9051_v26  ;;  %v9053_v38 = vadd.f32 %v9052_v56, %v8940_v32  ;;  %9888 = vmatprep.subr.bf16.mxu0 %v12287_v41  ;;  %v12294_v63 = vld [vmem:[%s19941_s4 + $0x940] ss:$28 sps:$4 sm:$0xff]   ;;  %v12302_v56 = vld [vmem:[%s19941_s4 + $0x90c] ss:$28 sps:$4 sm:$0xff]  }
 0x62c   :  { %10537 = vst [vmem:[%s19942_s6 + $0x1c8] sm:$0xff] %v12439_v16  ;;  %9776 = vmatpush2.bf16.msra.mxu1 %v12282_v62  ;;  %v21107_v62 = vld [vmem:[#allocation66_spill] sm:$0xff] }
 0x62d   :  { %v12441_v58 = vpop.eup %12440  ;;  %12450 = vtanh.f32 %v9053_v38  ;;  %v8943_v39 = vpop.f32.mrf.mxu1  ;;  %9777 = vmatprep.subr.bf16.mxu1 %v12290_v35  ;;  %v21108_v44 = vld [vmem:[#allocation58_spill] sm:$0xff]  ;;  %v21109_v35 = vld [vmem:[#allocation31_spill] sm:$0xff] }
 0x62e   :  { %10543 = vst [vmem:[%s19942_s6 + $0x1f8] sm:$0xff] %v12441_v58  ;;  %v8944_v10 = vadd.f32 %v8943_v39, %v18199_v9  ;;  %9889 = vmatpush2.bf16.msra.mxu0 %v12285_v29  ;;  %v21105_v9 = vld [vmem:[#allocation56_spill] sm:$0xff]  ;;  %v12297_v29 = vld [vmem:[%s19941_s4 + $0xcc0] ss:$28 sps:$4 sm:$0xff]  }
 0x62f   :  { %v12443_v7 = vpop.eup %12442  ;;  %v9056_v50 = vpop.f32.mrf.mxu0  ;;  %9620 = vmatmul.mubr.bf16.gmra.mxu1 %v21104_v43  ;;  %9890 = vmatprep.subr.bf16.mxu0 %v12293_v27 }
 0x630   :  { %v8945_v59 = vpop.f32.mrf.mxu1  ;;  %10544 = vst [vmem:[%s19942_s6 + $0x200] sm:$0xff] %v12443_v7  ;;  %v9057_v40 = vadd.f32 %v9056_v50, %v8944_v10  ;;  %9778 = vmatpush2.bf16.msra.mxu1 %v12288_v28  ;;  %9629 = vmatprep.mubr.bf16.mxu1 %v21106_v34  ;;  %v21110_v28 = vld [vmem:[#allocation110_spill] sm:$0xff]  ;;  %v12305_v10 = vld [vmem:[%s19941_s4 + $0xc8c] ss:$28 sps:$4 sm:$0xff]  }
 0x631   :  { %v8946_v17 = vadd.f32 %v8945_v59, %v21105_v9  ;;  %v9058_v41 = vpop.f32.mrf.mxu0  ;;  %9733 = vmatmul.mubr.bf16.gmra.mxu0 %v21107_v62  ;;  %9779 = vmatprep.subr.bf16.mxu1 %v12296_v30  ;;  %v12300_v7 = vld [vmem:[%s19941_s4 + $0x908] ss:$28 sps:$4 sm:$0xff]   ;;  %v12308_v59 = vld [vmem:[%s19941_s4 + $0x8d4] ss:$28 sps:$4 sm:$0xff]  }
 0x632   :  { %v8947_v31 = vpop.f32.mrf.mxu1  ;;  %12452 = vtanh.f32 %v9057_v40  ;;  %9742 = vmatprep.mubr.bf16.mxu0 %v21109_v35  ;;  %9891 = vmatpush2.bf16.msra.mxu0 %v12291_v45  ;;  %v12303_v40 = vld [vmem:[%s19941_s4 + $0xc88] ss:$28 sps:$4 sm:$0xff]   ;;  %v21127_v62 = vld [vmem:[#allocation84_spill] sm:$0xff] }
 0x633   :  { %v9059_v26 = vadd.f32 %v9058_v41, %v8946_v17  ;;  %v8948_v32 = vadd.f32 %v8947_v31, %v21108_v44  ;;  %v9060_v16 = vpop.f32.mrf.mxu0  ;;  %9892 = vmatprep.subr.bf16.mxu0 %v12299_v19  ;;  %v21111_v19 = vld [vmem:[#allocation68_spill] sm:$0xff]  ;;  %v21113_v44 = vld [vmem:[#allocation26_spill] sm:$0xff] }
 0x634   :  { %v8949_v38 = vpop.f32.mrf.mxu1  ;;  %v12445_v27 = vpop.eup %12444  ;;  %9780 = vmatpush2.bf16.msra.mxu1 %v12294_v63  ;;  %v12311_v41 = vld [vmem:[%s19941_s4 + $0xc54] ss:$28 sps:$4 sm:$0xff]   ;;  %v21112_v63 = vld [vmem:[#allocation82_spill] sm:$0xff] }
 0x635   :  { %12454 = vtanh.f32 %v9059_v26  ;;  %v9061_v58 = vadd.f32 %v9060_v16, %v8948_v32  ;;  %v8950_v39 = vadd.f32 %v8949_v38, %v21110_v28  ;;  %10550 = vst [vmem:[%s19942_s6 + $0x230] sm:$0xff] %v12445_v27  ;;  %v9062_v30 = vpop.f32.mrf.mxu0  ;;  %9781 = vmatprep.subr.bf16.mxu1 %v12302_v56  ;;  %v12306_v32 = vld [vmem:[%s19941_s4 + $0x8d0] ss:$28 sps:$4 sm:$0xff]   ;;  %v21114_v16 = vld [vmem:[#allocation33_spill] sm:$0xff]  ;;  %v21126_v35 = vld [vmem:[#allocation74_spill] sm:$0xff] }
 0x636   :  { %v12447_v50 = vpop.eup %12446  ;;  %9893 = vmatpush2.bf16.msra.mxu0 %v12297_v29  ;;  %v12312_v38 = vld [vmem:[%s19941_s4 + $0x360] ss:$28 sps:$4 sm:$0xff]  }
 0x637   :  { %12456 = vtanh.f32 %v9061_v58  ;;  %v9063_v45 = vadd.f32 %v9062_v30, %v8950_v39  ;;  %10551 = vst [vmem:[%s19942_s6 + $0x238] sm:$0xff] %v12447_v50  ;;  %v8953_v17 = vpop.f32.mrf.mxu1  ;;  %9630 = vmatmul.mubr.bf16.gmra.mxu1 %v21111_v19  ;;  %9894 = vmatprep.subr.bf16.mxu0 %v12305_v10  ;;  %v21115_v58 = vld [vmem:[#allocation27_spill] sm:$0xff] }
 0x638   :  { %v12449_v9 = vpop.eup %12448  ;;  %v8954_v31 = vadd.f32 %v8953_v17, %v21112_v63  ;;  %v9066_v26 = vpop.f32.mrf.mxu0  ;;  %9782 = vmatpush2.bf16.msra.mxu1 %v12300_v7  ;;  %9785 = vmatprep.mubr.bf16.mxu1 %v21113_v44  ;;  %v12309_v10 = vld [vmem:[%s19941_s4 + $0xc50] ss:$28 sps:$4 sm:$0xff]   ;;  %v12314_v7 = vld [vmem:[%s19941_s4 + $0x6e0] ss:$28 sps:$4 sm:$0xff]   ;;  %v12333_v19 = vld [vmem:[%s19941_s4 + $0x88] ss:$28 sps:$4 sm:$0xff]  }
 0x639   :  { %12458 = vtanh.f32 %v9063_v45  ;;  %10557 = vst [vmem:[%s19942_s6 + $0x268] sm:$0xff] %v12449_v9  ;;  %9743 = vmatmul.mubr.bf16.gmra.mxu0 %v21114_v16  ;;  %v8955_v29 = vpop.f32.mrf.mxu1  ;;  %9783 = vmatprep.subr.bf16.mxu1 %v12308_v59  ;;  %v12316_v9 = vld [vmem:[%s19941_s4 + $0x328] ss:$28 sps:$4 sm:$0xff]   ;;  %v21124_v44 = vld [vmem:[#allocation72_spill] sm:$0xff] }
 0x63a   :  { %v12451_v56 = vpop.eup %12450  ;;  %v9067_v27 = vadd.f32 %v9066_v26, %v8954_v31  ;;  %9895 = vmatpush2.bf16.msra.mxu0 %v12303_v40  ;;  %9898 = vmatprep.mubr.bf16.mxu0 %v21115_v58  ;;  %v8956_v28 = vadd.f32 %v8955_v29, %v18260_v25  ;;  %v9068_v39 = vpop.f32.mrf.mxu0  ;;  %v12313_v25 = vld [vmem:[%s19941_s4 + $0x1a0] ss:$28 sps:$4 sm:$0xff]  }
 0x63b   :  { %10558 = vst [vmem:[%s19942_s6 + $0x270] sm:$0xff] %v12451_v56  ;;  %v8957_v30 = vpop.f32.mrf.mxu1  ;;  %9896 = vmatprep.subr.bf16.mxu0 %v12311_v41  ;;  %v12318_v56 = vld [vmem:[%s19941_s4 + $0x6a8] ss:$28 sps:$4 sm:$0xff]  }
 0x63c   :  { %12460 = vtanh.f32 %v9067_v27  ;;  %v9069_v50 = vadd.f32 %v9068_v39, %v8956_v28  ;;  %v8958_v45 = vadd.f32 %v8957_v30, %v18271_v0  ;;  %v9070_v59 = vpop.f32.mrf.mxu0  ;;  %9784 = vmatpush2.bf16.msra.mxu1 %v12306_v32  ;;  %v12315_v0 = vld [vmem:[%s19941_s4 + $0x520] ss:$28 sps:$4 sm:$0xff]   ;;  %v21116_v32 = vld [vmem:[#allocation67_spill] sm:$0xff]  ;;  %v21117_v27 = vld [vmem:[#allocation12_spill] sm:$0xff] }
 0x63d   :  { %v8959_v40 = vpop.f32.mrf.mxu1  ;;  %11376 = vmatprep.subr.bf16.mxu1 %v12312_v38  ;;  %v12317_v28 = vld [vmem:[%s19941_s4 + $0x168] ss:$28 sps:$4 sm:$0xff]   ;;  %v12320_v30 = vld [vmem:[%s19941_s4 + $0x2f0] ss:$28 sps:$4 sm:$0xff]  }
 0x63e   :  { %12462 = vtanh.f32 %v9069_v50  ;;  %v9071_v41 = vadd.f32 %v9070_v59, %v8958_v45  ;;  %9897 = vmatpush2.bf16.msra.mxu0 %v12309_v10  ;;  %v8960_v63 = vadd.f32 %v8959_v40, %v18284_v2  ;;  %v9072_v31 = vpop.f32.mrf.mxu0  ;;  %v21118_v39 = vld [vmem:[#allocation70_spill] sm:$0xff]  ;;  %v21119_v50 = vld [vmem:[#allocation16_spill] sm:$0xff] }
 0x63f   :  { %v12453_v17 = vpop.eup %12452  ;;  %v18705_v26 = vpop.f32.mrf.mxu1  ;;  %9786 = vmatmul.mubr.bf16.vlgmr.msra.gmra.mxu1 %v21116_v32  ;;  %11440 = vmatprep.subr.bf16.mxu0 %v12314_v7  ;;  %v12319_v59 = vld [vmem:[%s19941_s4 + $0x4e8] ss:$28 sps:$4 sm:$0xff]   ;;  %v12322_v40 = vld [vmem:[%s19941_s4 + $0x670] ss:$28 sps:$4 sm:$0xff]  }
 0x640   :  { %10564 = vst [vmem:[%s19942_s6 + $0x2a0] sm:$0xff] %v12453_v17  ;;  %12464 = vtanh.f32 %v9071_v41  ;;  %v9073_v2 = vadd.f32 %v9072_v31, %v8960_v63  ;;  %v18711_v38 = vpop.f32.mrf.mxu0  ;;  %11377 = vmatpush3.bf16.msra.mxu1 %v12313_v25  ;;  %9795 = vmatprep.mubr.bf16.mxu1 %v21117_v27  ;;  %v12321_v41 = vld [vmem:[%s19941_s4 + $0x130] ss:$28 sps:$4 sm:$0xff]   ;;  %v12324_v31 = vld [vmem:[%s19941_s4 + $0x2b8] ss:$28 sps:$4 sm:$0xff]  }
 0x641   :  { %9899 = vmatmul.mubr.bf16.vlgmr.msra.gmra.mxu0 %v21118_v39  ;;  %v18721_v10 = vpop.f32.mrf.mxu1  ;;  %11378 = vmatprep.subr.bf16.mxu1 %v12316_v9 }
 0x642   :  { %v12455_v29 = vpop.eup %12454  ;;  %12466 = vtanh.f32 %v9073_v2  ;;  %9908 = vmatprep.mubr.bf16.mxu0 %v21119_v50  ;;  %v18727_v45 = vpop.f32.mrf.mxu0  ;;  %11441 = vmatpush3.bf16.msra.mxu0 %v12315_v0  ;;  %v21120_v2 = vld [vmem:[#allocation73_spill] sm:$0xff] }
 0x643   :  { %10565 = vst [vmem:[%s19942_s6 + $0x2a8] sm:$0xff] %v12455_v29  ;;  %v18735_v25 = vpop.f32.mrf.mxu1  ;;  %11442 = vmatprep.subr.bf16.mxu0 %v12318_v56  ;;  %v12323_v56 = vld [vmem:[%s19941_s4 + $0x4b0] ss:$28 sps:$4 sm:$0xff]   ;;  %v21122_v50 = vld [vmem:[#allocation37_spill] sm:$0xff] }
 0x644   :  { %v12457_v7 = vpop.eup %12456  ;;  %v18740_v17 = vpop.f32.mrf.mxu0  ;;  %11379 = vmatpush3.bf16.msra.mxu1 %v12317_v28  ;;  %v12326_v28 = vld [vmem:[%s19941_s4 + $0x638] ss:$28 sps:$4 sm:$0xff]  }
 0x645   :  { %10571 = vst [vmem:[%s19942_s6 + $0x2d8] sm:$0xff] %v12457_v7  ;;  %v18748_v63 = vpop.f32.mrf.mxu1  ;;  %11380 = vmatprep.subr.bf16.mxu1 %v12320_v30  ;;  %v21121_v7 = vld [vmem:[#allocation11_spill] sm:$0xff] }
 0x646   :  { %v12459_v9 = vpop.eup %12458  ;;  %v18753_v0 = vpop.f32.mrf.mxu0  ;;  %11443 = vmatpush3.bf16.msra.mxu0 %v12319_v59  ;;  %v12325_v59 = vld [vmem:[%s19941_s4 + $0xf8] ss:$28 sps:$4 sm:$0xff]  }
 0x647   :  { %10572 = vst [vmem:[%s19942_s6 + $0x2e0] sm:$0xff] %v12459_v9  ;;  %v18758_v29 = vpop.f32.mrf.mxu1  ;;  %9796 = vmatmul.mubr.bf16.gmra.mxu1 %v21120_v2  ;;  %11444 = vmatprep.subr.bf16.mxu0 %v12322_v40  ;;  %v12328_v40 = vld [vmem:[%s19941_s4 + $0x280] ss:$28 sps:$4 sm:$0xff]  }
 0x648   :  { %v18764_v30 = vpop.f32.mrf.mxu0  ;;  %9805 = vmatprep.mubr.bf16.mxu1 %v21121_v7  ;;  %11381 = vmatpush3.bf16.msra.mxu1 %v12321_v41  ;;  %v21123_v7 = vld [vmem:[#allocation15_spill] sm:$0xff] }
 0x649   :  { %v12461_v9 = vpop.eup %12460  ;;  %9909 = vmatmul.mubr.bf16.gmra.mxu0 %v21122_v50  ;;  %v18771_v39 = vpop.f32.mrf.mxu1  ;;  %11382 = vmatprep.subr.bf16.mxu1 %v12324_v31  ;;  %v12327_v50 = vld [vmem:[%s19941_s4 + $0x478] ss:$28 sps:$4 sm:$0xff]   ;;  %v12330_v31 = vld [vmem:[%s19941_s4 + $0x600] ss:$28 sps:$4 sm:$0xff]  }
 0x64a   :  { %10578 = vst [vmem:[%s19942_s6 + $0x310] sm:$0xff] %v12461_v9  ;;  %9918 = vmatprep.mubr.bf16.mxu0 %v21123_v7  ;;  %v18780_v41 = vpop.f32.mrf.mxu0  ;;  %11445 = vmatpush3.bf16.msra.mxu0 %v12323_v56  ;;  %v12329_v56 = vld [vmem:[%s19941_s4 + $0xc0] ss:$28 sps:$4 sm:$0xff]  }
 0x64b   :  { %v12463_v2 = vpop.eup %12462  ;;  %v18785_v27 = vpop.f32.mrf.mxu1  ;;  %11446 = vmatprep.subr.bf16.mxu0 %v12326_v28  ;;  %v12332_v28 = vld [vmem:[%s19941_s4 + $0x248] ss:$28 sps:$4 sm:$0xff]  }
 0x64c   :  { %10579 = vst [vmem:[%s19942_s6 + $0x318] sm:$0xff] %v12463_v2  ;;  %v18793_v9 = vpop.f32.mrf.mxu0  ;;  %11383 = vmatpush3.bf16.msra.mxu1 %v12325_v59  ;;  %v12331_v59 = vld [vmem:[%s19941_s4 + $0x440] ss:$28 sps:$4 sm:$0xff]  }
 0x64d   :  { %v12465_v7 = vpop.eup %12464  ;;  %v18798_v32 = vpop.f32.mrf.mxu1  ;;  %11384 = vmatprep.subr.bf16.mxu1 %v12328_v40  ;;  %v12334_v40 = vld [vmem:[%s19941_s4 + $0x5c8] ss:$28 sps:$4 sm:$0xff]  }
 0x64e   :  { %10585 = vst [vmem:[%s19942_s6 + $0x348] sm:$0xff] %v12465_v7  ;;  %v18806_v2 = vpop.f32.mrf.mxu0  ;;  %11447 = vmatpush3.bf16.msra.mxu0 %v12327_v50  ;;  %v21125_v50 = vld [vmem:[#allocation48_spill] sm:$0xff] }
 0x64f   :  { %v12467_v58 = vpop.eup %12466  ;;  %v18811_v16 = vpop.f32.mrf.mxu1  ;;  %9806 = vmatmul.mubr.bf16.gmra.mxu1 %v21124_v44  ;;  %11448 = vmatprep.subr.bf16.mxu0 %v12330_v31  ;;  %v12336_v44 = vld [vmem:[%s19941_s4 + $0x210] ss:$28 sps:$4 sm:$0xff]  }
 0x650   :  { %10586 = vst [vmem:[%s19942_s6 + $0x350] sm:$0xff] %v12467_v58  ;;  %v18820_v7 = vpop.f32.mrf.mxu0  ;;  %9815 = vmatprep.mubr.bf16.mxu1 %v21125_v50  ;;  %11385 = vmatpush3.bf16.msra.mxu1 %v12329_v56  ;;  %v12335_v56 = vld [vmem:[%s19941_s4 + $0x408] ss:$28 sps:$4 sm:$0xff]  }
 0x651   :  { %9919 = vmatmul.mubr.bf16.gmra.mxu0 %v21126_v35  ;;  %v18827_v31 = vpop.f32.mrf.mxu1  ;;  %11386 = vmatprep.subr.bf16.mxu1 %v12332_v28  ;;  %v12338_v28 = vld [vmem:[%s19941_s4 + $0x590] ss:$28 sps:$4 sm:$0xff]  }
 0x652   :  { %9928 = vmatprep.mubr.bf16.mxu0 %v21127_v62  ;;  %v18833_v58 = vpop.f32.mrf.mxu0  ;;  %11449 = vmatpush3.bf16.msra.mxu0 %v12331_v59  ;;  %v12337_v62 = vld [vmem:[%s19941_s4 + $0x50] ss:$28 sps:$4 sm:$0xff]   ;;  %v12340_v59 = vld [vmem:[%s19941_s4 + $0x1d8] ss:$28 sps:$4 sm:$0xff]  }
 0x653   :  { %v18838_v50 = vpop.f32.mrf.mxu1  ;;  %11450 = vmatprep.subr.bf16.mxu0 %v12334_v40  ;;  %v12339_v40 = vld [vmem:[%s19941_s4 + $0x3d0] ss:$28 sps:$4 sm:$0xff]  }
 0x654   :  { %v18843_v35 = vpop.f32.mrf.mxu0  ;;  %11387 = vmatpush3.bf16.msra.mxu1 %v12333_v19  ;;  %v21128_v19 = vld [vmem:[#allocation77_spill] sm:$0xff] }
 0x655   :  { %v18848_v34 = vpop.f32.mrf.mxu1  ;;  %11388 = vmatprep.subr.bf16.mxu1 %v12336_v44  ;;  %v12342_v44 = vld [vmem:[%s19941_s4 + $0x558] ss:$28 sps:$4 sm:$0xff]  }
 0x656   :  { %v18853_v43 = vpop.f32.mrf.mxu0  ;;  %11451 = vmatpush3.bf16.msra.mxu0 %v12335_v56  ;;  %v12341_v56 = vld [vmem:[%s19941_s4 + $0x18] ss:$28 sps:$4 sm:$0xff]  }
 0x657   :  { %v18858_v22 = vpop.f32.mrf.mxu1  ;;  %9816 = vmatmul.mubr.bf16.gmra.mxu1 %v21128_v19  ;;  %11452 = vmatprep.subr.bf16.mxu0 %v12338_v28  ;;  %v12344_v28 = vld [vmem:[%s19941_s4 + $0xa60] ss:$28 sps:$4 sm:$0xff]  }
 0x658   :  { %v18864_v47 = vpop.f32.mrf.mxu0  ;;  %9825 = vmatprep.mubr.bf16.mxu1 %v21129_v60  ;;  %11389 = vmatpush3.bf16.msra.mxu1 %v12337_v62  ;;  %v21131_v19 = vld [vmem:[#allocation49_spill] sm:$0xff] }
 0x659   :  { %9929 = vmatmul.mubr.bf16.gmra.mxu0 %v21130_v48  ;;  %v18871_v15 = vpop.f32.mrf.mxu1  ;;  %11390 = vmatprep.subr.bf16.mxu1 %v12340_v59  ;;  %v12343_v62 = vld [vmem:[%s19941_s4 + $0x398] ss:$28 sps:$4 sm:$0xff]   ;;  %v12346_v59 = vld [vmem:[%s19941_s4 + $0xde0] ss:$28 sps:$4 sm:$0xff]  }
 0x65a   :  { %9938 = vmatprep.mubr.bf16.mxu0 %v21131_v19  ;;  %v18877_v61 = vpop.f32.mrf.mxu0  ;;  %11453 = vmatpush3.bf16.msra.mxu0 %v12339_v40 }
 0x65b   :  { %v18882_v60 = vpop.f32.mrf.mxu1  ;;  %11454 = vmatprep.subr.bf16.mxu0 %v12342_v44  ;;  %v21136_v44 = vld [vmem:[#allocation51_spill] sm:$0xff] }
 0x65c   :  { %v18887_v48 = vpop.f32.mrf.mxu0  ;;  %11391 = vmatpush3.bf16.msra.mxu1 %v12341_v56  ;;  %v21138_v56 = vld [vmem:[#allocation109_spill] sm:$0xff] }
 0x65d   :  { %21132 = vst [vmem:[#allocation85_spill] sm:$0xff] %v18887_v48  ;;  %v18889_v24 = vpop.f32.mrf.mxu1  ;;  %11504 = vmatprep.subr.bf16.mxu1 %v12344_v28 }
 0x65e   :  { %v18891_v19 = vpop.f32.mrf.mxu0  ;;  %11455 = vmatpush3.bf16.msra.mxu0 %v12343_v62 }
 0x65f   :  { %21133 = vst [vmem:[#allocation137_spill] sm:$0xff] %v18891_v19  ;;  %v18893_v40 = vpop.f32.mrf.mxu1  ;;  %9826 = vmatmul.mubr.bf16.gmra.mxu1 %v21134_v37  ;;  %11568 = vmatprep.subr.bf16.mxu0 %v12346_v59 }
 0x660   :  { %v18896_v55 = vpop.f32.mrf.mxu0  ;;  %9835 = vmatprep.mubr.bf16.mxu1 %v21136_v44 }
 0x661   :  { %21135 = vst [vmem:[#allocation40_spill] sm:$0xff] %v18896_v55  ;;  %9939 = vmatmul.mubr.bf16.gmra.mxu0 %v21137_v46  ;;  %v18900_v1 = vpop.f32.mrf.mxu1  ;;  %v21145_v46 = vld [vmem:[#allocation52_spill] sm:$0xff]  ;;  %v21146_v55 = vld [vmem:[#allocation134_spill] sm:$0xff] }
 0x662   :  { %9948 = vmatprep.mubr.bf16.mxu0 %v21138_v56  ;;  %v18903_v48 = vpop.f32.mrf.mxu0 }
 0x663   :  { %21139 = vst [vmem:[#allocation23_spill] sm:$0xff] %v18903_v48  ;;  %v18905_v28 = vpop.f32.mrf.mxu1  ;;  %v21147_v48 = vld [vmem:[#allocation13_spill] sm:$0xff] }
 0x664   :  { %21140 = vst [vmem:[#allocation9_spill] sm:$0xff] %v18905_v28  ;;  %v18907_v62 = vpop.f32.mrf.mxu0 }
 0x665   :  { %21141 = vst [vmem:[#allocation139_spill] sm:$0xff] %v18907_v62  ;;  %v18909_v19 = vpop.f32.mrf.mxu1 }
 0x666   :  { %21142 = vst [vmem:[#allocation7_spill] sm:$0xff] %v18909_v19  ;;  %v18911_v37 = vpop.f32.mrf.mxu0 }
 0x667   :  { %21143 = vst [vmem:[#allocation83_spill] sm:$0xff] %v18911_v37  ;;  %v18913_v59 = vpop.f32.mrf.mxu1  ;;  %9836 = vmatmul.mubr.bf16.gmra.mxu1 %v21082_v42 }
 0x668   :  { %21144 = vst [vmem:[#allocation136_spill] sm:$0xff] %v18913_v59  ;;  %v18916_v44 = vpop.f32.mrf.mxu0  ;;  %9845 = vmatprep.mubr.bf16.mxu1 %v21145_v46 }
 0x669   :  { %9949 = vmatmul.mubr.bf16.gmra.mxu0 %v21146_v55  ;;  %v18920_v56 = vpop.f32.mrf.mxu1 }
 0x66a   :  { %9958 = vmatprep.mubr.bf16.mxu0 %v21147_v48  ;;  %v18923_v28 = vpop.f32.mrf.mxu0 }
 0x66b   :  { %v18925_v62 = vpop.f32.mrf.mxu1 }
 0x66c   :  { %v18927_v19 = vpop.f32.mrf.mxu0 }
 0x66d   :  { %21148 = vst [vmem:[#allocation34_spill] sm:$0xff] %v18927_v19  ;;  %v18929_v37 = vpop.f32.mrf.mxu1 }
 0x66e   :  { %21149 = vst [vmem:[#allocation8_spill] sm:$0xff] %v18929_v37  ;;  %v18931_v59 = vpop.f32.mrf.mxu0 }
 0x66f   :  { %21150 = vst [vmem:[#allocation138_spill] sm:$0xff] %v18931_v59  ;;  %v18933_v42 = vpop.f32.mrf.mxu1  ;;  %9846 = vmatmul.mubr.bf16.gmra.mxu1 %v17748_v57  ;;  %v18954_v57 = vld [vmem:[%s19939_s5 + $0x1c] sm:$0x7f] }
 0x670   :  { %v18936_v46 = vpop.f32.mrf.mxu0  ;;  %9855 = vmatprep.mubr.bf16.mxu1 %v17770_v5  ;;  %21156 = vst [vmem:[#allocation78_spill] sm:$0xff] %v18954_v57  ;;  %v21157_v5 = vld [vmem:[#allocation59_spill] sm:$0xff] }
 0x671   :  { %21151 = vst [vmem:[#allocation22_spill] sm:$0xff] %v18936_v46  ;;  %9959 = vmatmul.mubr.bf16.gmra.mxu0 %v17758_v3  ;;  %v18940_v48 = vpop.f32.mrf.mxu1  ;;  %v18958_v3 = vrot.slane %v18954_v57, %v21157_v5 }
 0x672   :  { %9968 = vmatprep.mubr.bf16.mxu0 %v17777_v4  ;;  %v18943_v55 = vpop.f32.mrf.mxu0 }
 0x673   :  { %21152 = vst [vmem:[#allocation75_spill] sm:$0xff] %v18943_v55  ;;  %v18945_v19 = vpop.f32.mrf.mxu1  ;;  %v21159_v55 = vld [vmem:[#allocation60_spill] sm:$0xff]  ;;  %v9110_v5 = vadd.f32 %v18705_v26, %v18958_v3  ;;  %v12348_v26 = vld [vmem:[%s19941_s4 + $0xa28] ss:$28 sps:$4 sm:$0xff]  }
 0x674   :  { %21153 = vst [vmem:[#allocation62_spill] sm:$0xff] %v18945_v19  ;;  %v18947_v37 = vpop.f32.mrf.mxu0 }
 0x675   :  { %21154 = vst [vmem:[#allocation86_spill] sm:$0xff] %v18947_v37  ;;  %v18949_v59 = vpop.f32.mrf.mxu1  ;;  %v18967_v37 = vrot.slane %v18954_v57, %v21159_v55 }
 0x676   :  { %21155 = vst [vmem:[#allocation44_spill] sm:$0xff] %v18949_v59  ;;  %v18960_v46 = vpop.f32.mrf.mxu0 }
 0x677   :  { %21158 = vst [vmem:[#allocation81_spill] sm:$0xff] %v18960_v46  ;;  %v18962_v4 = vpop.f32.mrf.mxu1  ;;  %9856 = vmatmul.mubr.bf16.gmra.mxu1 %v17780_v20  ;;  %v9112_v55 = vadd.f32 %v18721_v10, %v18967_v37  ;;  %v12347_v10 = vld [vmem:[%s19941_s4 + $0xc20] ss:$28 sps:$4 sm:$0xff]  }
 0x678   :  { %v18969_v59 = vpop.f32.mrf.mxu0  ;;  %10011 = vmatprep.mubr.bf16.mxu1 %v16871_v12  ;;  %v12345_v12 = vld [vmem:[%s19941_s4 + $0x8a0] ss:$28 sps:$4 sm:$0xff]  }
 0x679   :  { %21160 = vst [vmem:[#allocation38_spill] sm:$0xff] %v18969_v59  ;;  %9969 = vmatmul.mubr.bf16.gmra.mxu0 %v17782_v36  ;;  %v18973_v19 = vpop.f32.mrf.mxu1  ;;  %v9225_v59 = vadd.f32 %v18727_v45, %v9112_v55  ;;  %v12352_v45 = vld [vmem:[%s19941_s4 + $0x9f0] ss:$28 sps:$4 sm:$0xff]  }
 0x67a   :  { %21161 = vst [vmem:[#allocation35_spill] sm:$0xff] %v18973_v19  ;;  %10108 = vmatprep.mubr.bf16.mxu0 %v16876_v11  ;;  %v18978_v46 = vpop.f32.mrf.mxu0  ;;  %v9223_v11 = vadd.f32 %v18711_v38, %v9110_v5  ;;  %v9116_v38 = vadd.f32 %v18748_v63, %v18967_v37 }
 0x67b   :  { %21162 = vst [vmem:[#allocation24_spill] sm:$0xff] %v18978_v46  ;;  %v18980_v20 = vpop.f32.mrf.mxu1  ;;  %v9114_v46 = vadd.f32 %v18735_v25, %v18958_v3  ;;  %v12349_v25 = vld [vmem:[%s19941_s4 + $0x868] ss:$28 sps:$4 sm:$0xff]  }
 0x67c   :  { %21163 = vst [vmem:[#allocation10_spill] sm:$0xff] %v18980_v20  ;;  %v18984_v57 = vpop.f32.mrf.mxu0 }
 0x67d   :  { %21164 = vst [vmem:[#allocation88_spill] sm:$0xff] %v18984_v57  ;;  %v18989_v36 = vpop.f32.mrf.mxu1 }
 0x67e   :  { %21165 = vst [vmem:[#allocation45_spill] sm:$0xff] %v18989_v36  ;;  %v18997_v20 = vpop.f32.mrf.mxu0  ;;  %v12350_v36 = vld [vmem:[%s19941_s4 + $0xda8] ss:$28 sps:$4 sm:$0xff]  }
 0x67f   :  { %21166 = vst [vmem:[#allocation94_spill] sm:$0xff] %v18997_v20  ;;  %v9335_v57 = vpop.f32.mrf.mxu1  ;;  %10012 = vmatmul.mubr.bf16.vlgmr.msra.gmra.mxu1 %v16889_v52  ;;  %v9120_v52 = vadd.f32 %v18758_v29, %v18958_v3  ;;  %v12351_v29 = vld [vmem:[%s19941_s4 + $0xbe8] ss:$28 sps:$4 sm:$0xff]  }
 0x680   :  { %v9336_v5 = vadd.f32 %v9335_v57, %v9223_v11  ;;  %11505 = vmatpush3.bf16.msra.mxu1 %v12345_v12  ;;  %10019 = vmatprep.mubr.bf16.mxu1 %v16918_v14  ;;  %v9227_v57 = vadd.f32 %v18740_v17, %v9114_v46  ;;  %v12353_v17 = vld [vmem:[%s19941_s4 + $0x830] ss:$28 sps:$4 sm:$0xff]  }
 0x681   :  { %v9448_v20 = vpop.f32.mrf.mxu0  ;;  %10109 = vmatmul.mubr.bf16.vlgmr.msra.gmra.mxu0 %v16903_v53  ;;  %v9337_v19 = vpop.f32.mrf.mxu1  ;;  %11506 = vmatprep.subr.bf16.mxu1 %v12348_v26  ;;  %v9122_v53 = vadd.f32 %v18771_v39, %v18967_v37  ;;  %v12354_v26 = vld [vmem:[%s19941_s4 + $0xd70] ss:$28 sps:$4 sm:$0xff]  }
 0x682   :  { %v9449_v63 = vadd.f32 %v9448_v20, %v9336_v5  ;;  %10116 = vmatprep.mubr.bf16.mxu0 %v16928_v23  ;;  %v9338_v14 = vadd.f32 %v9337_v19, %v9225_v59  ;;  %11569 = vmatpush3.bf16.msra.mxu0 %v12347_v10  ;;  %v9229_v20 = vadd.f32 %v18753_v0, %v9116_v38  ;;  %v12355_v38 = vld [vmem:[%s19941_s4 + $0xbb0] ss:$28 sps:$4 sm:$0xff]  }
 0x683   :  { %v9450_v55 = vpop.f32.mrf.mxu0  ;;  %v9339_v12 = vpop.f32.mrf.mxu1  ;;  %11570 = vmatprep.subr.bf16.mxu0 %v12350_v36  ;;  %v9233_v19 = vadd.f32 %v18764_v30, %v9120_v52  ;;  %v12356_v36 = vld [vmem:[%s19941_s4 + $0x9b8] ss:$28 sps:$4 sm:$0xff]   ;;  %v9124_v0 = vadd.f32 %v18785_v27, %v18958_v3  ;;  %v9235_v30 = vadd.f32 %v18780_v41, %v9122_v53  ;;  %v9126_v27 = vadd.f32 %v18798_v32, %v18967_v37  ;;  %v12360_v32 = vld [vmem:[%s19941_s4 + $0x980] ss:$28 sps:$4 sm:$0xff]  }
 0x684   :  { %12468 = vtanh.f32 %v9449_v63  ;;  %v9451_v23 = vadd.f32 %v9450_v55, %v9338_v14  ;;  %v9340_v46 = vadd.f32 %v9339_v12, %v9227_v57  ;;  %11507 = vmatpush3.bf16.msra.mxu1 %v12349_v25  ;;  %v12358_v52 = vld [vmem:[%s19941_s4 + $0xd38] ss:$28 sps:$4 sm:$0xff]  }
 0x685   :  { %v9452_v39 = vpop.f32.mrf.mxu0  ;;  %v9341_v59 = vpop.f32.mrf.mxu1  ;;  %11508 = vmatprep.subr.bf16.mxu1 %v12352_v45  ;;  %v12357_v41 = vld [vmem:[%s19941_s4 + $0x7f8] ss:$28 sps:$4 sm:$0xff]  }
 0x686   :  { %12470 = vtanh.f32 %v9451_v23  ;;  %v9453_v11 = vadd.f32 %v9452_v39, %v9340_v46  ;;  %v9342_v10 = vadd.f32 %v9341_v59, %v9229_v20  ;;  %11571 = vmatpush3.bf16.msra.mxu0 %v12351_v29  ;;  %v9237_v29 = vadd.f32 %v18793_v9, %v9124_v0  ;;  %v12362_v9 = vld [vmem:[%s19941_s4 + $0xd00] ss:$28 sps:$4 sm:$0xff]  }
 0x687   :  { %v9454_v5 = vpop.f32.mrf.mxu0  ;;  %v9345_v25 = vpop.f32.mrf.mxu1  ;;  %10020 = vmatmul.mubr.bf16.gmra.mxu1 %v16938_v49  ;;  %11572 = vmatprep.subr.bf16.mxu0 %v12354_v26  ;;  %v9130_v49 = vadd.f32 %v18811_v16, %v18958_v3  ;;  %v12359_v16 = vld [vmem:[%s19941_s4 + $0xb78] ss:$28 sps:$4 sm:$0xff]   ;;  %v9239_v26 = vadd.f32 %v18806_v2, %v9126_v27  ;;  %v12361_v23 = vld [vmem:[%s19941_s4 + $0x7c0] ss:$28 sps:$4 sm:$0xff]   ;;  %v9134_v2 = vadd.f32 %v18838_v50, %v18958_v3 }
 0x688   :  { %12472 = vtanh.f32 %v9453_v11  ;;  %v9455_v45 = vadd.f32 %v9454_v5, %v9342_v10  ;;  %v9346_v57 = vadd.f32 %v9345_v25, %v9233_v19  ;;  %10027 = vmatprep.mubr.bf16.mxu1 %v16977_v13  ;;  %11509 = vmatpush3.bf16.msra.mxu1 %v12353_v17  ;;  %v12364_v19 = vld [vmem:[%s19941_s4 + $0x948] ss:$28 sps:$4 sm:$0xff]   ;;  %v9136_v50 = vadd.f32 %v18848_v34, %v18967_v37  ;;  %v12368_v34 = vld [vmem:[%s19941_s4 + $0x910] ss:$28 sps:$4 sm:$0xff]  }
 0x689   :  { %v9458_v63 = vpop.f32.mrf.mxu0  ;;  %10117 = vmatmul.mubr.bf16.gmra.mxu0 %v16961_v54  ;;  %v9347_v14 = vpop.f32.mrf.mxu1  ;;  %11510 = vmatprep.subr.bf16.mxu1 %v12356_v36  ;;  %v9132_v54 = vadd.f32 %v18827_v31, %v18967_v37  ;;  %v9243_v46 = vadd.f32 %v18820_v7, %v9130_v49  ;;  %v12363_v36 = vld [vmem:[%s19941_s4 + $0xb40] ss:$28 sps:$4 sm:$0xff]   ;;  %v12366_v10 = vld [vmem:[%s19941_s4 + $0xcc8] ss:$28 sps:$4 sm:$0xff]   ;;  %v12370_v49 = vld [vmem:[%s19941_s4 + $0xc90] ss:$28 sps:$4 sm:$0xff]  }
 0x68a   :  { %12474 = vtanh.f32 %v9455_v45  ;;  %v9459_v13 = vadd.f32 %v9458_v63, %v9346_v57  ;;  %10124 = vmatprep.mubr.bf16.mxu0 %v16989_v51  ;;  %v9348_v53 = vadd.f32 %v9347_v14, %v9235_v30  ;;  %11573 = vmatpush3.bf16.msra.mxu0 %v12355_v38  ;;  %v9142_v57 = vadd.f32 %v18871_v15, %v18967_v37  ;;  %v12369_v15 = vld [vmem:[%s19941_s4 + $0x750] ss:$28 sps:$4 sm:$0xff]  }
 0x68b   :  { %v9460_v55 = vpop.f32.mrf.mxu0  ;;  %v9349_v12 = vpop.f32.mrf.mxu1  ;;  %11574 = vmatprep.subr.bf16.mxu0 %v12358_v52  ;;  %v9245_v7 = vadd.f32 %v18833_v58, %v9132_v54  ;;  %v12365_v58 = vld [vmem:[%s19941_s4 + $0x788] ss:$28 sps:$4 sm:$0xff]   ;;  %v9249_v63 = vadd.f32 %v18853_v43, %v9136_v50  ;;  %v12372_v43 = vld [vmem:[%s19941_s4 + $0x8d8] ss:$28 sps:$4 sm:$0xff]  }
 0x68c   :  { %12476 = vtanh.f32 %v9459_v13  ;;  %v9461_v51 = vadd.f32 %v9460_v55, %v9348_v53  ;;  %v9350_v20 = vadd.f32 %v9349_v12, %v9237_v29  ;;  %11511 = vmatpush3.bf16.msra.mxu1 %v12357_v41 }
 0x68d   :  { %v9462_v31 = vpop.f32.mrf.mxu0  ;;  %v9351_v17 = vpop.f32.mrf.mxu1  ;;  %11512 = vmatprep.subr.bf16.mxu1 %v12360_v32 }
 0x68e   :  { %12478 = vtanh.f32 %v9461_v51  ;;  %v9463_v39 = vadd.f32 %v9462_v31, %v9350_v20  ;;  %v9352_v59 = vadd.f32 %v9351_v17, %v9239_v26  ;;  %11575 = vmatpush3.bf16.msra.mxu0 %v12359_v16  ;;  %v9144_v16 = vadd.f32 %v18882_v60, %v18958_v3  ;;  %v12374_v60 = vld [vmem:[%s19941_s4 + $0xc58] ss:$28 sps:$4 sm:$0xff]  }
 0x68f   :  { %v9464_v0 = vpop.f32.mrf.mxu0  ;;  %v9355_v11 = vpop.f32.mrf.mxu1  ;;  %10028 = vmatmul.mubr.bf16.gmra.mxu1 %v17003_v6  ;;  %11576 = vmatprep.subr.bf16.mxu0 %v12362_v9  ;;  %v9140_v6 = vadd.f32 %v18858_v22, %v18958_v3  ;;  %v9255_v9 = vadd.f32 %v18877_v61, %v9142_v57  ;;  %v9146_v20 = vadd.f32 %v18889_v24, %v18967_v37  ;;  %v21167_v61 = vld [vmem:[#allocation14_spill] sm:$0xff]  ;;  %v21168_v24 = vld [vmem:[#allocation89_spill] sm:$0xff] }
 0x690   :  { %12480 = vtanh.f32 %v9463_v39  ;;  %v9465_v38 = vadd.f32 %v9464_v0, %v9352_v59  ;;  %v9356_v30 = vadd.f32 %v9355_v11, %v9243_v46  ;;  %10035 = vmatprep.mubr.bf16.mxu1 %v17030_v33  ;;  %11513 = vmatpush3.bf16.msra.mxu1 %v12361_v23  ;;  %v9247_v33 = vadd.f32 %v18843_v35, %v9134_v2  ;;  %v21169_v39 = vld [vmem:[#allocation85_spill] sm:$0xff] }
 0x691   :  { %v12469_v5 = vpop.eup %12468  ;;  %v9468_v25 = vpop.f32.mrf.mxu0  ;;  %10125 = vmatmul.mubr.bf16.gmra.mxu0 %v17017_v18  ;;  %11514 = vmatprep.subr.bf16.mxu1 %v12364_v19  ;;  %v12367_v18 = vld [vmem:[%s19941_s4 + $0xb08] ss:$28 sps:$4 sm:$0xff]   ;;  %v9253_v29 = vadd.f32 %v18864_v47, %v9140_v6  ;;  %v12371_v47 = vld [vmem:[%s19941_s4 + $0xad0] ss:$28 sps:$4 sm:$0xff]   ;;  %v9150_v17 = vadd.f32 %v18893_v40, %v18958_v3  ;;  %v9257_v59 = vadd.f32 %v21169_v39, %v9144_v16  ;;  %v12375_v40 = vld [vmem:[%s19941_s4 + $0xa98] ss:$28 sps:$4 sm:$0xff]  }
 0x692   :  { %v9357_v52 = vpop.f32.mrf.mxu1  ;;  %10481 = vst [vmem:[%s19942_s6 + $0x10] sm:$0xff] %v12469_v5  ;;  %12482 = vtanh.f32 %v9465_v38  ;;  %v9469_v27 = vadd.f32 %v9468_v25, %v9356_v30  ;;  %10132 = vmatprep.mubr.bf16.mxu0 %v17048_v8  ;;  %11577 = vmatpush3.bf16.msra.mxu0 %v12363_v36  ;;  %v21171_v30 = vld [vmem:[#allocation137_spill] sm:$0xff] }
 0x693   :  { %v9358_v22 = vadd.f32 %v9357_v52, %v9245_v7  ;;  %v12471_v45 = vpop.eup %12470  ;;  %v9470_v41 = vpop.f32.mrf.mxu0  ;;  %11578 = vmatprep.subr.bf16.mxu0 %v12366_v10  ;;  %v21170_v7 = vld [vmem:[#allocation19_spill] sm:$0xff]  ;;  %v9152_v10 = vadd.f32 %v18900_v1, %v18967_v37  ;;  %v21172_v52 = vld [vmem:[#allocation40_spill] sm:$0xff]  ;;  %v21173_v1 = vld [vmem:[#allocation9_spill] sm:$0xff] }
 0x694   :  { %v9359_v35 = vpop.f32.mrf.mxu1  ;;  %10482 = vst [vmem:[%s19942_s6 + $0x18] sm:$0xff] %v12471_v45  ;;  %12484 = vtanh.f32 %v9469_v27  ;;  %11515 = vmatpush3.bf16.msra.mxu1 %v12365_v58  ;;  %v9259_v58 = vadd.f32 %v21171_v30, %v9146_v20 }
 0x695   :  { %v9471_v8 = vadd.f32 %v9470_v41, %v9358_v22  ;;  %v9360_v14 = vadd.f32 %v9359_v35, %v9247_v33  ;;  %v12473_v32 = vpop.eup %12472  ;;  %v9472_v13 = vpop.f32.mrf.mxu0  ;;  %11516 = vmatprep.subr.bf16.mxu1 %v12368_v34  ;;  %v9263_v34 = vadd.f32 %v21172_v52, %v9150_v17  ;;  %v9154_v22 = vadd.f32 %v21173_v1, %v18958_v3  ;;  %v21174_v41 = vld [vmem:[#allocation23_spill] sm:$0xff]  ;;  %v21188_v1 = vld [vmem:[#allocation18_spill] sm:$0xff] }
 0x696   :  { %v9361_v53 = vpop.f32.mrf.mxu1  ;;  %10489 = vst [vmem:[%s19942_s6 + $0x48] sm:$0xff] %v12473_v32  ;;  %11579 = vmatpush3.bf16.msra.mxu0 %v12367_v18  ;;  %v9265_v35 = vadd.f32 %v21174_v41, %v9152_v10  ;;  %v21189_v41 = vld [vmem:[#allocation138_spill] sm:$0xff] }
 0x697   :  { %12486 = vtanh.f32 %v9471_v8  ;;  %v9473_v54 = vadd.f32 %v9472_v13, %v9360_v14  ;;  %v9362_v55 = vadd.f32 %v9361_v53, %v9249_v63  ;;  %v12475_v12 = vpop.eup %12474  ;;  %v9474_v26 = vpop.f32.mrf.mxu0  ;;  %10036 = vmatmul.mubr.bf16.gmra.mxu1 %v17059_v21  ;;  %11580 = vmatprep.subr.bf16.mxu0 %v12370_v49  ;;  %v12373_v21 = vld [vmem:[%s19941_s4 + $0x718] ss:$28 sps:$4 sm:$0xff]   ;;  %v21176_v14 = vld [vmem:[#allocation7_spill] sm:$0xff] }
 0x698   :  { %v9365_v51 = vpop.f32.mrf.mxu1  ;;  %10490 = vst [vmem:[%s19942_s6 + $0x50] sm:$0xff] %v12475_v12  ;;  %10043 = vmatprep.mubr.bf16.mxu1 %v21167_v61  ;;  %11517 = vmatpush3.bf16.msra.mxu1 %v12369_v15  ;;  %v21175_v8 = vld [vmem:[#allocation61_spill] sm:$0xff]  ;;  %v9156_v15 = vadd.f32 %v21176_v14, %v18967_v37  ;;  %v21177_v13 = vld [vmem:[#allocation20_spill] sm:$0xff]  ;;  %v21180_v12 = vld [vmem:[#allocation139_spill] sm:$0xff] }
 0x699   :  { %12488 = vtanh.f32 %v9473_v54  ;;  %v9475_v23 = vadd.f32 %v9474_v26, %v9362_v55  ;;  %v9366_v46 = vadd.f32 %v9365_v51, %v9253_v29  ;;  %v12477_v31 = vpop.eup %12476  ;;  %v9478_v19 = vpop.f32.mrf.mxu0  ;;  %10133 = vmatmul.mubr.bf16.gmra.mxu0 %v21168_v24  ;;  %11518 = vmatprep.subr.bf16.mxu1 %v12372_v43  ;;  %v21178_v43 = vld [vmem:[#allocation136_spill] sm:$0xff]  ;;  %v21179_v55 = vld [vmem:[#allocation63_spill] sm:$0xff]  ;;  %v21181_v51 = vld [vmem:[#allocation21_spill] sm:$0xff] }
 0x69a   :  { %v9367_v2 = vpop.f32.mrf.mxu1  ;;  %10496 = vst [vmem:[%s19942_s6 + $0x80] sm:$0xff] %v12477_v31  ;;  %10140 = vmatprep.mubr.bf16.mxu0 %v21170_v7  ;;  %11581 = vmatpush3.bf16.msra.mxu0 %v12371_v47  ;;  %v9160_v16 = vadd.f32 %v21178_v43, %v18958_v3  ;;  %v21190_v14 = vld [vmem:[#allocation22_spill] sm:$0xff] }
 0x69b   :  { %12490 = vtanh.f32 %v9475_v23  ;;  %v9479_v36 = vadd.f32 %v9478_v19, %v9366_v46  ;;  %v9368_v0 = vadd.f32 %v9367_v2, %v9255_v9  ;;  %v12479_v11 = vpop.eup %12478  ;;  %v9480_v50 = vpop.f32.mrf.mxu0  ;;  %11582 = vmatprep.subr.bf16.mxu0 %v12374_v60  ;;  %v9267_v9 = vadd.f32 %v21180_v12, %v9154_v22 }
 0x69c   :  { %v9369_v38 = vpop.f32.mrf.mxu1  ;;  %10497 = vst [vmem:[%s19942_s6 + $0x88] sm:$0xff] %v12479_v11  ;;  %11519 = vmatpush3.bf16.msra.mxu1 %v12373_v21  ;;  %v9162_v23 = vadd.f32 %v18920_v56, %v18967_v37  ;;  %v21182_v21 = vld [vmem:[#allocation83_spill] sm:$0xff]  ;;  %v9273_v2 = vadd.f32 %v18916_v44, %v9160_v16  ;;  %v21184_v44 = vld [vmem:[#allocation8_spill] sm:$0xff] }
 0x69d   :  { %12492 = vtanh.f32 %v9479_v36  ;;  %v9481_v5 = vadd.f32 %v9480_v50, %v9368_v0  ;;  %v9370_v6 = vadd.f32 %v9369_v38, %v9257_v59  ;;  %v12481_v25 = vpop.eup %12480  ;;  %v9482_v33 = vpop.f32.mrf.mxu0  ;;  %v9269_v31 = vadd.f32 %v21182_v21, %v9156_v15  ;;  %v21183_v50 = vld [vmem:[#allocation65_spill] sm:$0xff] }
 0x69e   :  { %v9371_v27 = vpop.f32.mrf.mxu1  ;;  %10503 = vst [vmem:[%s19942_s6 + $0xb8] sm:$0xff] %v12481_v25  ;;  %11583 = vmatpush3.bf16.msra.mxu0 %v12375_v40  ;;  %v9164_v36 = vadd.f32 %v18925_v62, %v18958_v3  ;;  %v9275_v40 = vadd.f32 %v18923_v28, %v9162_v23  ;;  %v9166_v38 = vadd.f32 %v21184_v44, %v18967_v37  ;;  %v21186_v25 = vld [vmem:[#allocation91_spill] sm:$0xff]  ;;  %v21195_v23 = vld [vmem:[#allocation30_spill] sm:$0xff] }
 0x69f   :  { %12494 = vtanh.f32 %v9481_v5  ;;  %v9483_v18 = vadd.f32 %v9482_v33, %v9370_v6  ;;  %v9372_v45 = vadd.f32 %v9371_v27, %v9259_v58  ;;  %v12483_v57 = vpop.eup %12482  ;;  %v9484_v49 = vpop.f32.mrf.mxu0  ;;  %10044 = vmatmul.mubr.bf16.gmra.mxu1 %v21175_v8  ;;  %v21185_v58 = vld [vmem:[#allocation17_spill] sm:$0xff]  ;;  %v9170_v28 = vadd.f32 %v18933_v42, %v18958_v3 }
 0x6a0   :  { %v9375_v63 = vpop.f32.mrf.mxu1  ;;  %10504 = vst [vmem:[%s19942_s6 + $0xc0] sm:$0xff] %v12483_v57  ;;  %10051 = vmatprep.mubr.bf16.mxu1 %v21177_v13  ;;  %v21191_v13 = vld [vmem:[#allocation62_spill] sm:$0xff] }
 0x6a1   :  { %12496 = vtanh.f32 %v9483_v18  ;;  %v9485_v32 = vadd.f32 %v9484_v49, %v9372_v45  ;;  %v9376_v29 = vadd.f32 %v9375_v63, %v9263_v34  ;;  %v12485_v53 = vpop.eup %12484  ;;  %v9488_v54 = vpop.f32.mrf.mxu0  ;;  %10141 = vmatmul.mubr.bf16.gmra.mxu0 %v21179_v55  ;;  %v21187_v34 = vld [vmem:[#allocation34_spill] sm:$0xff]  ;;  %v9172_v45 = vadd.f32 %v18940_v48, %v18967_v37 }
 0x6a2   :  { %v9377_v47 = vpop.f32.mrf.mxu1  ;;  %10510 = vst [vmem:[%s19942_s6 + $0xf0] sm:$0xff] %v12485_v53  ;;  %10148 = vmatprep.mubr.bf16.mxu0 %v21181_v51  ;;  %v9277_v33 = vadd.f32 %v21187_v34, %v9164_v36  ;;  %v9283_v15 = vadd.f32 %v21190_v14, %v9170_v28  ;;  %v9174_v53 = vadd.f32 %v21191_v13, %v18958_v3  ;;  %v21203_v34 = vld [vmem:[#allocation24_spill] sm:$0xff] }
 0x6a3   :  { %12498 = vtanh.f32 %v9485_v32  ;;  %v9489_v26 = vadd.f32 %v9488_v54, %v9376_v29  ;;  %v9378_v60 = vadd.f32 %v9377_v47, %v9265_v35  ;;  %v9490_v46 = vpop.f32.mrf.mxu0  ;;  %v9279_v35 = vadd.f32 %v21189_v41, %v9166_v38  ;;  %v21192_v54 = vld [vmem:[#allocation75_spill] sm:$0xff]  ;;  %v21201_v38 = vld [vmem:[#allocation38_spill] sm:$0xff] }
 0x6a4   :  { %v12487_v20 = vpop.eup %12486  ;;  %v9379_v61 = vpop.f32.mrf.mxu1  ;;  %v9285_v55 = vadd.f32 %v21192_v54, %v9172_v45 }
 0x6a5   :  { %10511 = vst [vmem:[%s19942_s6 + $0xf8] sm:$0xff] %v12487_v20  ;;  %12500 = vtanh.f32 %v9489_v26  ;;  %v9491_v17 = vadd.f32 %v9490_v46, %v9378_v60  ;;  %v9380_v19 = vadd.f32 %v9379_v61, %v9267_v9  ;;  %v9492_v39 = vpop.f32.mrf.mxu0  ;;  %v21193_v9 = vld [vmem:[#allocation64_spill] sm:$0xff]  ;;  %v9180_v61 = vadd.f32 %v18962_v4, %v18958_v3 }
 0x6a6   :  { %v12489_v24 = vpop.eup %12488  ;;  %v9381_v59 = vpop.f32.mrf.mxu1  ;;  %v21194_v26 = vld [vmem:[#allocation44_spill] sm:$0xff] }
 0x6a7   :  { %10517 = vst [vmem:[%s19942_s6 + $0x128] sm:$0xff] %v12489_v24  ;;  %12502 = vtanh.f32 %v9491_v17  ;;  %v9493_v56 = vadd.f32 %v9492_v39, %v9380_v19  ;;  %v9382_v7 = vadd.f32 %v9381_v59, %v9269_v31  ;;  %v9494_v11 = vpop.f32.mrf.mxu0  ;;  %10052 = vmatmul.mubr.bf16.gmra.mxu1 %v21183_v50  ;;  %v9176_v51 = vadd.f32 %v21194_v26, %v18967_v37  ;;  %v21196_v31 = vld [vmem:[#allocation66_spill] sm:$0xff]  ;;  %v21198_v39 = vld [vmem:[#allocation31_spill] sm:$0xff] }
 0x6a8   :  { %v12491_v0 = vpop.eup %12490  ;;  %v9385_v10 = vpop.f32.mrf.mxu1  ;;  %10059 = vmatprep.mubr.bf16.mxu1 %v21185_v58  ;;  %v21197_v19 = vld [vmem:[#allocation86_spill] sm:$0xff] }
 0x6a9   :  { %10518 = vst [vmem:[%s19942_s6 + $0x130] sm:$0xff] %v12491_v0  ;;  %12504 = vtanh.f32 %v9493_v56  ;;  %v9495_v62 = vadd.f32 %v9494_v11, %v9382_v7  ;;  %v9386_v30 = vadd.f32 %v9385_v10, %v9273_v2  ;;  %v9498_v6 = vpop.f32.mrf.mxu0  ;;  %10149 = vmatmul.mubr.bf16.gmra.mxu0 %v21186_v25  ;;  %v9287_v24 = vadd.f32 %v21197_v19, %v9174_v53  ;;  %v21199_v56 = vld [vmem:[#allocation35_spill] sm:$0xff] }
 0x6aa   :  { %v12493_v5 = vpop.eup %12492  ;;  %v9387_v52 = vpop.f32.mrf.mxu1  ;;  %10156 = vmatprep.mubr.bf16.mxu0 %v21188_v1  ;;  %v9182_v7 = vadd.f32 %v21199_v56, %v18967_v37 }
 0x6ab   :  { %10524 = vst [vmem:[%s19942_s6 + $0x160] sm:$0xff] %v12493_v5  ;;  %12506 = vtanh.f32 %v9495_v62  ;;  %v9499_v27 = vadd.f32 %v9498_v6, %v9386_v30  ;;  %v9388_v22 = vadd.f32 %v9387_v52, %v9275_v40  ;;  %v9500_v42 = vpop.f32.mrf.mxu0  ;;  %v21200_v40 = vld [vmem:[#allocation81_spill] sm:$0xff]  ;;  %v9293_v62 = vadd.f32 %v21201_v38, %v9180_v61  ;;  %v21202_v5 = vld [vmem:[#allocation10_spill] sm:$0xff]  ;;  %v21212_v61 = vld [vmem:[#allocation12_spill] sm:$0xff] }
 0x6ac   :  { %v12495_v18 = vpop.eup %12494  ;;  %v9389_v57 = vpop.f32.mrf.mxu1  ;;  %v9289_v11 = vadd.f32 %v21200_v40, %v9176_v51  ;;  %v9184_v28 = vadd.f32 %v21202_v5, %v18958_v3  ;;  %v21217_v38 = vld [vmem:[#allocation37_spill] sm:$0xff] }
 0x6ad   :  { %10525 = vst [vmem:[%s19942_s6 + $0x168] sm:$0xff] %v12495_v18  ;;  %12508 = vtanh.f32 %v9499_v27  ;;  %v9501_v49 = vadd.f32 %v9500_v42, %v9388_v22  ;;  %v9390_v63 = vadd.f32 %v9389_v57, %v9277_v33  ;;  %v9502_v32 = vpop.f32.mrf.mxu0  ;;  %v9295_v33 = vadd.f32 %v21203_v34, %v9182_v7  ;;  %v21204_v22 = vld [vmem:[#allocation68_spill] sm:$0xff]  ;;  %v21205_v18 = vld [vmem:[#allocation45_spill] sm:$0xff]  ;;  %v21206_v57 = vld [vmem:[#allocation26_spill] sm:$0xff] }
 0x6ae   :  { %v12497_v8 = vpop.eup %12496  ;;  %v9391_v29 = vpop.f32.mrf.mxu1  ;;  %v9186_v45 = vadd.f32 %v21205_v18, %v18967_v37 }
 0x6af   :  { %10531 = vst [vmem:[%s19942_s6 + $0x198] sm:$0xff] %v12497_v8  ;;  %12510 = vtanh.f32 %v9501_v49  ;;  %v9503_v48 = vadd.f32 %v9502_v32, %v9390_v63  ;;  %v9392_v43 = vadd.f32 %v9391_v29, %v9279_v35  ;;  %v9504_v47 = vpop.f32.mrf.mxu0  ;;  %10060 = vmatmul.mubr.bf16.gmra.mxu1 %v21193_v9  ;;  %v21207_v49 = vld [vmem:[#allocation33_spill] sm:$0xff]  ;;  %v21208_v8 = vld [vmem:[#allocation88_spill] sm:$0xff] }
 0x6b0   :  { %v12499_v16 = vpop.eup %12498  ;;  %v9395_v12 = vpop.f32.mrf.mxu1  ;;  %10067 = vmatprep.mubr.bf16.mxu1 %v21195_v23  ;;  %v9297_v14 = vadd.f32 %v21208_v8, %v9184_v28  ;;  %v21211_v23 = vld [vmem:[#allocation67_spill] sm:$0xff] }
 0x6b1   :  { %10532 = vst [vmem:[%s19942_s6 + $0x1a0] sm:$0xff] %v12499_v16  ;;  %12512 = vtanh.f32 %v9503_v48  ;;  %v9505_v60 = vadd.f32 %v9504_v47, %v9392_v43  ;;  %v9396_v20 = vadd.f32 %v9395_v12, %v9283_v15  ;;  %v9508_v21 = vpop.f32.mrf.mxu0  ;;  %10157 = vmatmul.mubr.bf16.gmra.mxu0 %v21196_v31  ;;  %v21209_v15 = vld [vmem:[#allocation27_spill] sm:$0xff]  ;;  %v21210_v48 = vld [vmem:[#allocation94_spill] sm:$0xff] }
 0x6b2   :  { %v12501_v46 = vpop.eup %12500  ;;  %v9397_v17 = vpop.f32.mrf.mxu1  ;;  %10164 = vmatprep.mubr.bf16.mxu0 %v21198_v39  ;;  %v9299_v43 = vadd.f32 %v21210_v48, %v9186_v45  ;;  %v21221_v45 = vld [vmem:[#allocation74_spill] sm:$0xff] }
 0x6b3   :  { %10538 = vst [vmem:[%s19942_s6 + $0x1d0] sm:$0xff] %v12501_v46  ;;  %12514 = vtanh.f32 %v9505_v60  ;;  %v9509_v2 = vadd.f32 %v9508_v21, %v9396_v20  ;;  %v9398_v59 = vadd.f32 %v9397_v17, %v9285_v55  ;;  %v9510_v4 = vpop.f32.mrf.mxu0  ;;  %v21213_v17 = vld [vmem:[#allocation70_spill] sm:$0xff] }
 0x6b4   :  { %v12503_v36 = vpop.eup %12502  ;;  %v9399_v0 = vpop.f32.mrf.mxu1 }
 0x6b5   :  { %10539 = vst [vmem:[%s19942_s6 + $0x1d8] sm:$0xff] %v12503_v36  ;;  %12516 = vtanh.f32 %v9509_v2  ;;  %v9511_v10 = vadd.f32 %v9510_v4, %v9398_v59  ;;  %v9400_v50 = vadd.f32 %v9399_v0, %v9287_v24  ;;  %v9512_v30 = vpop.f32.mrf.mxu0  ;;  %v21214_v24 = vld [vmem:[#allocation16_spill] sm:$0xff] }
 0x6b6   :  { %v12505_v44 = vpop.eup %12504  ;;  %v9401_v58 = vpop.f32.mrf.mxu1 }
 0x6b7   :  { %10545 = vst [vmem:[%s19942_s6 + $0x208] sm:$0xff] %v12505_v44  ;;  %12518 = vtanh.f32 %v9511_v10  ;;  %v9513_v6 = vadd.f32 %v9512_v30, %v9400_v50  ;;  %v9402_v25 = vadd.f32 %v9401_v58, %v9289_v11  ;;  %v9514_v27 = vpop.f32.mrf.mxu0  ;;  %10068 = vmatmul.mubr.bf16.gmra.mxu1 %v21204_v22  ;;  %v21215_v11 = vld [vmem:[#allocation73_spill] sm:$0xff]  ;;  %v21216_v10 = vld [vmem:[#allocation11_spill] sm:$0xff]  ;;  %v21220_v22 = vld [vmem:[#allocation48_spill] sm:$0xff] }
 0x6b8   :  { %v12507_v52 = vpop.eup %12506  ;;  %v9405_v1 = vpop.f32.mrf.mxu1  ;;  %10205 = vmatprep.mubr.bf16.mxu1 %v21206_v57  ;;  %v21218_v30 = vld [vmem:[#allocation15_spill] sm:$0xff] }
 0x6b9   :  { %10546 = vst [vmem:[%s19942_s6 + $0x210] sm:$0xff] %v12507_v52  ;;  %12520 = vtanh.f32 %v9513_v6  ;;  %v9515_v3 = vadd.f32 %v9514_v27, %v9402_v25  ;;  %v9406_v42 = vadd.f32 %v9405_v1, %v9293_v62  ;;  %v9518_v35 = vpop.f32.mrf.mxu0  ;;  %10165 = vmatmul.mubr.bf16.gmra.mxu0 %v21207_v49  ;;  %v21219_v1 = vld [vmem:[#allocation72_spill] sm:$0xff] }
 0x6ba   :  { %v12509_v41 = vpop.eup %12508  ;;  %v9407_v63 = vpop.f32.mrf.mxu1  ;;  %10302 = vmatprep.mubr.bf16.mxu0 %v21209_v15 }
 0x6bb   :  { %10552 = vst [vmem:[%s19942_s6 + $0x240] sm:$0xff] %v12509_v41  ;;  %12522 = vtanh.f32 %v9515_v3  ;;  %v9519_v37 = vadd.f32 %v9518_v35, %v9406_v42  ;;  %v9408_v32 = vadd.f32 %v9407_v63, %v9295_v33  ;;  %v9520_v13 = vpop.f32.mrf.mxu0  ;;  %v21222_v42 = vld [vmem:[#allocation84_spill] sm:$0xff] }
 0x6bc   :  { %v12511_v29 = vpop.eup %12510  ;;  %v9409_v53 = vpop.f32.mrf.mxu1 }
 0x6bd   :  { %10553 = vst [vmem:[%s19942_s6 + $0x248] sm:$0xff] %v12511_v29  ;;  %12524 = vtanh.f32 %v9519_v37  ;;  %v9521_v16 = vadd.f32 %v9520_v13, %v9408_v32  ;;  %v9410_v54 = vadd.f32 %v9409_v53, %v9297_v14  ;;  %v9522_v47 = vpop.f32.mrf.mxu0  ;;  %v21223_v14 = vld [vmem:[#allocation77_spill] sm:$0xff]  ;;  %v21224_v37 = vld [vmem:[#allocation47_spill] sm:$0xff] }
 0x6be   :  { %v12513_v55 = vpop.eup %12512  ;;  %v9411_v12 = vpop.f32.mrf.mxu1  ;;  %v21225_v32 = vld [vmem:[#allocation95_spill] sm:$0xff]  ;;  %v21226_v13 = vld [vmem:[#allocation49_spill] sm:$0xff] }
 0x6bf   :  { %10559 = vst [vmem:[%s19942_s6 + $0x278] sm:$0xff] %v12513_v55  ;;  %12526 = vtanh.f32 %v9521_v16  ;;  %v9523_v9 = vadd.f32 %v9522_v47, %v9410_v54  ;;  %v9412_v26 = vadd.f32 %v9411_v12, %v9299_v43  ;;  %v9524_v60 = vpop.f32.mrf.mxu0  ;;  %10206 = vmatmul.mubr.bf16.vlgmr.msra.gmra.mxu1 %v21211_v23  ;;  %v21227_v47 = vld [vmem:[#allocation76_spill] sm:$0xff]  ;;  %v21228_v12 = vld [vmem:[#allocation51_spill] sm:$0xff] }
 0x6c0   :  { %v12515_v51 = vpop.eup %12514  ;;  %v19273_v20 = vpop.f32.mrf.mxu1  ;;  %10213 = vmatprep.mubr.bf16.mxu1 %v21212_v61 }
 0x6c1   :  { %10560 = vst [vmem:[%s19942_s6 + $0x280] sm:$0xff] %v12515_v51  ;;  %12528 = vtanh.f32 %v9523_v9  ;;  %v9525_v46 = vadd.f32 %v9524_v60, %v9412_v26  ;;  %v19280_v31 = vpop.f32.mrf.mxu0  ;;  %10303 = vmatmul.mubr.bf16.vlgmr.msra.gmra.mxu0 %v21213_v17  ;;  %v21229_v26 = vld [vmem:[#allocation6_spill] sm:$0xff]  ;;  %v21230_v60 = vld [vmem:[#allocation109_spill] sm:$0xff] }
 0x6c2   :  { %v12517_v21 = vpop.eup %12516  ;;  %v19283_v19 = vpop.f32.mrf.mxu1  ;;  %10310 = vmatprep.mubr.bf16.mxu0 %v21214_v24 }
 0x6c3   :  { %10566 = vst [vmem:[%s19942_s6 + $0x2b0] sm:$0xff] %v12517_v21  ;;  %12530 = vtanh.f32 %v9525_v46  ;;  %v19289_v39 = vpop.f32.mrf.mxu0 }
 0x6c4   :  { %v12519_v2 = vpop.eup %12518  ;;  %v19291_v59 = vpop.f32.mrf.mxu1 }
 0x6c5   :  { %10567 = vst [vmem:[%s19942_s6 + $0x2b8] sm:$0xff] %v12519_v2  ;;  %v19296_v56 = vpop.f32.mrf.mxu0  ;;  %v21231_v2 = vld [vmem:[#allocation50_spill] sm:$0xff] }
 0x6c6   :  { %v12521_v36 = vpop.eup %12520  ;;  %v19298_v7 = vpop.f32.mrf.mxu1 }
 0x6c7   :  { %10573 = vst [vmem:[%s19942_s6 + $0x2e8] sm:$0xff] %v12521_v36  ;;  %v19303_v0 = vpop.f32.mrf.mxu0  ;;  %10214 = vmatmul.mubr.bf16.gmra.mxu1 %v21215_v11  ;;  %v21232_v36 = vld [vmem:[#allocation52_spill] sm:$0xff]  ;;  %v21233_v11 = vld [vmem:[#allocation134_spill] sm:$0xff] }
 0x6c8   :  { %v12523_v4 = vpop.eup %12522  ;;  %v19305_v40 = vpop.f32.mrf.mxu1  ;;  %10221 = vmatprep.mubr.bf16.mxu1 %v21216_v10 }
 0x6c9   :  { %10574 = vst [vmem:[%s19942_s6 + $0x2f0] sm:$0xff] %v12523_v4  ;;  %v19312_v44 = vpop.f32.mrf.mxu0  ;;  %10311 = vmatmul.mubr.bf16.gmra.mxu0 %v21217_v38 }
 0x6ca   :  { %v12525_v50 = vpop.eup %12524  ;;  %v19315_v62 = vpop.f32.mrf.mxu1  ;;  %10318 = vmatprep.mubr.bf16.mxu0 %v21218_v30 }
 0x6cb   :  { %10580 = vst [vmem:[%s19942_s6 + $0x320] sm:$0xff] %v12525_v50  ;;  %v19321_v5 = vpop.f32.mrf.mxu0  ;;  %v21234_v50 = vld [vmem:[#allocation13_spill] sm:$0xff] }
 0x6cc   :  { %v12527_v58 = vpop.eup %12526  ;;  %v19323_v28 = vpop.f32.mrf.mxu1 }
 0x6cd   :  { %10581 = vst [vmem:[%s19942_s6 + $0x328] sm:$0xff] %v12527_v58  ;;  %v19328_v25 = vpop.f32.mrf.mxu0 }
 0x6ce   :  { %v12529_v6 = vpop.eup %12528  ;;  %v19330_v52 = vpop.f32.mrf.mxu1 }
 0x6cf   :  { %10587 = vst [vmem:[%s19942_s6 + $0x358] sm:$0xff] %v12529_v6  ;;  %v19335_v33 = vpop.f32.mrf.mxu0  ;;  %10222 = vmatmul.mubr.bf16.gmra.mxu1 %v21219_v1 }
 0x6d0   :  { %v12531_v34 = vpop.eup %12530  ;;  %v19337_v27 = vpop.f32.mrf.mxu1  ;;  %10229 = vmatprep.mubr.bf16.mxu1 %v21220_v22  ;;  %v21236_v22 = vld [vmem:[#allocation135_spill] sm:$0xff] }
 0x6d1   :  { %10588 = vst [vmem:[%s19942_s6 + $0x360] sm:$0xff] %v12531_v34  ;;  %v19344_v18 = vpop.f32.mrf.mxu0  ;;  %10319 = vmatmul.mubr.bf16.gmra.mxu0 %v21221_v45  ;;  %v21237_v45 = vld [vmem:[#allocation54_spill] sm:$0xff] }
 0x6d2   :  { %v19347_v3 = vpop.f32.mrf.mxu1  ;;  %10326 = vmatprep.mubr.bf16.mxu0 %v21222_v42 }
 0x6d3   :  { %v19350_v57 = vpop.f32.mrf.mxu0 }
 0x6d4   :  { %v19352_v41 = vpop.f32.mrf.mxu1 }
 0x6d5   :  { %v19354_v35 = vpop.f32.mrf.mxu0 }
 0x6d6   :  { %v19356_v49 = vpop.f32.mrf.mxu1 }
 0x6d7   :  { %v19358_v63 = vpop.f32.mrf.mxu0  ;;  %10230 = vmatmul.mubr.bf16.gmra.mxu1 %v21223_v14  ;;  %v21239_v14 = vld [vmem:[#allocation108_spill] sm:$0xff] }
 0x6d8   :  { %v19360_v8 = vpop.f32.mrf.mxu1  ;;  %10237 = vmatprep.mubr.bf16.mxu1 %v21224_v37 }
 0x6d9   :  { %v19364_v15 = vpop.f32.mrf.mxu0  ;;  %10327 = vmatmul.mubr.bf16.gmra.mxu0 %v21225_v32  ;;  %v21240_v32 = vld [vmem:[#allocation87_spill] sm:$0xff] }
 0x6da   :  { %v19367_v29 = vpop.f32.mrf.mxu1  ;;  %10334 = vmatprep.mubr.bf16.mxu0 %v21226_v13 }
 0x6db   :  { %v19370_v53 = vpop.f32.mrf.mxu0 }
 0x6dc   :  { %v19372_v48 = vpop.f32.mrf.mxu1 }
 0x6dd   :  { %v19374_v43 = vpop.f32.mrf.mxu0 }
 0x6de   :  { %v19376_v16 = vpop.f32.mrf.mxu1 }
 0x6df   :  { %v19378_v54 = vpop.f32.mrf.mxu0  ;;  %10238 = vmatmul.mubr.bf16.gmra.mxu1 %v21227_v47 }
 0x6e0   :  { %v19380_v55 = vpop.f32.mrf.mxu1  ;;  %10245 = vmatprep.mubr.bf16.mxu1 %v21228_v12 }
 0x6e1   :  { %v19384_v9 = vpop.f32.mrf.mxu0  ;;  %10335 = vmatmul.mubr.bf16.gmra.mxu0 %v21229_v26 }
 0x6e2   :  { %v19387_v51 = vpop.f32.mrf.mxu1  ;;  %10342 = vmatprep.mubr.bf16.mxu0 %v21230_v60  ;;  %v21245_v60 = vld [vmem:[#allocation3_spill] sm:$0xff] }
 0x6e3   :  { %v19390_v23 = vpop.f32.mrf.mxu0 }
 0x6e4   :  { %v19392_v46 = vpop.f32.mrf.mxu1 }
 0x6e5   :  { %v19394_v61 = vpop.f32.mrf.mxu0 }
 0x6e6   :  { %v19396_v21 = vpop.f32.mrf.mxu1 }
 0x6e7   :  { %v19398_v17 = vpop.f32.mrf.mxu0  ;;  %10246 = vmatmul.mubr.bf16.gmra.mxu1 %v21231_v2  ;;  %v21246_v2 = vld [vmem:[#allocation78_spill] sm:$0xff] }
 0x6e8   :  { %v19400_v24 = vpop.f32.mrf.mxu1  ;;  %10253 = vmatprep.mubr.bf16.mxu1 %v21232_v36  ;;  %v19440_v36 = vrot.slane %v21246_v2, %v21245_v60 }
 0x6e9   :  { %v19404_v4 = vpop.f32.mrf.mxu0  ;;  %10343 = vmatmul.mubr.bf16.gmra.mxu0 %v21233_v11 }
 0x6ea   :  { %v19407_v10 = vpop.f32.mrf.mxu1  ;;  %10350 = vmatprep.mubr.bf16.mxu0 %v21234_v50  ;;  %v9562_v60 = vadd.f32 %v19273_v20, %v19440_v36 }
 0x6eb   :  { %v19410_v38 = vpop.f32.mrf.mxu0 }
 0x6ec   :  { %v19412_v30 = vpop.f32.mrf.mxu1 }
 0x6ed   :  { %v19414_v58 = vpop.f32.mrf.mxu0 }
 0x6ee   :  { %v19416_v6 = vpop.f32.mrf.mxu1 }
 0x6ef   :  { %v19418_v34 = vpop.f32.mrf.mxu0  ;;  %10254 = vmatmul.mubr.bf16.gmra.mxu1 %v21236_v22  ;;  %v21249_v22 = vld [vmem:[#allocation80_spill] sm:$0xff] }
 0x6f0   :  { %21235 = vst [vmem:[#allocation113_spill] sm:$0xff] %v19418_v34  ;;  %v19420_v1 = vpop.f32.mrf.mxu1  ;;  %10261 = vmatprep.mubr.bf16.mxu1 %v21237_v45  ;;  %v21250_v45 = vld [vmem:[#allocation2_spill] sm:$0xff]  ;;  %v9576_v34 = vadd.f32 %v19323_v28, %v19440_v36 }
 0x6f1   :  { %v19424_v42 = vpop.f32.mrf.mxu0  ;;  %10351 = vmatmul.mubr.bf16.gmra.mxu0 %v21239_v14  ;;  %v19449_v14 = vrot.slane %v21246_v2, %v21250_v45  ;;  %v9675_v45 = vadd.f32 %v19280_v31, %v9562_v60 }
 0x6f2   :  { %21238 = vst [vmem:[#allocation111_spill] sm:$0xff] %v19424_v42  ;;  %v19427_v37 = vpop.f32.mrf.mxu1  ;;  %10358 = vmatprep.mubr.bf16.mxu0 %v21240_v32  ;;  %v9689_v28 = vadd.f32 %v19328_v25, %v9576_v34  ;;  %v9586_v25 = vadd.f32 %v19352_v41, %v19440_v36 }
 0x6f3   :  { %v19430_v13 = vpop.f32.mrf.mxu0 }
 0x6f4   :  { %21241 = vst [vmem:[#allocation90_spill] sm:$0xff] %v19430_v13  ;;  %v19432_v47 = vpop.f32.mrf.mxu1  ;;  %v21252_v13 = vld [vmem:[#allocation98_spill] sm:$0xff]  ;;  %v9699_v41 = vadd.f32 %v19354_v35, %v9586_v25 }
 0x6f5   :  { %21242 = vst [vmem:[#allocation25_spill] sm:$0xff] %v19432_v47  ;;  %v19434_v12 = vpop.f32.mrf.mxu0 }
 0x6f6   :  { %21243 = vst [vmem:[#allocation112_spill] sm:$0xff] %v19434_v12  ;;  %v19436_v26 = vpop.f32.mrf.mxu1 }
 0x6f7   :  { %21244 = vst [vmem:[#allocation36_spill] sm:$0xff] %v19436_v26  ;;  %v19442_v11 = vpop.f32.mrf.mxu0  ;;  %10262 = vmatmul.mubr.bf16.gmra.mxu1 %v21249_v22  ;;  %v9564_v22 = vadd.f32 %v19283_v19, %v19449_v14  ;;  %v9572_v19 = vadd.f32 %v19305_v40, %v19440_v36 }
 0x6f8   :  { %21247 = vst [vmem:[#allocation105_spill] sm:$0xff] %v19442_v11  ;;  %v19444_v50 = vpop.f32.mrf.mxu1 }
 0x6f9   :  { %21248 = vst [vmem:[#allocation115_spill] sm:$0xff] %v19444_v50  ;;  %v19451_v32 = vpop.f32.mrf.mxu0  ;;  %10359 = vmatmul.mubr.bf16.gmra.mxu0 %v21252_v13  ;;  %v9566_v13 = vadd.f32 %v19291_v59, %v19440_v36  ;;  %v9677_v20 = vadd.f32 %v19289_v39, %v9564_v22  ;;  %v9574_v59 = vadd.f32 %v19315_v62, %v19449_v14 }
 0x6fa   :  { %21251 = vst [vmem:[#allocation117_spill] sm:$0xff] %v19451_v32  ;;  %v19454_v12 = vpop.f32.mrf.mxu1 }
 0x6fb   :  { %21253 = vst [vmem:[#allocation32_spill] sm:$0xff] %v19454_v12  ;;  %v19458_v26 = vpop.f32.mrf.mxu0 }
 0x6fc   :  { %21254 = vst [vmem:[#allocation92_spill] sm:$0xff] %v19458_v26  ;;  %v19460_v11 = vpop.f32.mrf.mxu1  ;;  %v9568_v26 = vadd.f32 %v19298_v7, %v19449_v14 }
 0x6fd   :  { %21255 = vst [vmem:[#allocation114_spill] sm:$0xff] %v19460_v11  ;;  %v19464_v50 = vpop.f32.mrf.mxu0 }
 0x6fe   :  { %21256 = vst [vmem:[#allocation116_spill] sm:$0xff] %v19464_v50  ;;  %v19466_v2 = vpop.f32.mrf.mxu1  ;;  %v9681_v39 = vadd.f32 %v19303_v0, %v9568_v26  ;;  %v9578_v0 = vadd.f32 %v19330_v52, %v19449_v14 }
 0x6ff   :  { %21257 = vst [vmem:[#allocation42_spill] sm:$0xff] %v19466_v2  ;;  %v19471_v32 = vpop.f32.mrf.mxu0  ;;  %v9679_v2 = vadd.f32 %v19296_v56, %v9566_v13 }
 0x700   :  { %21258 = vst [vmem:[#allocation106_spill] sm:$0xff] %v19471_v32  ;;  %v9787_v12 = vpop.f32.mrf.mxu1  ;;  %v9691_v52 = vadd.f32 %v19335_v33, %v9578_v0  ;;  %v9588_v33 = vadd.f32 %v19356_v49, %v19449_v14  ;;  %v9594_v49 = vadd.f32 %v19367_v29, %v19449_v14 }
 0x701   :  { %v9788_v11 = vadd.f32 %v9787_v12, %v9675_v45  ;;  %v9900_v50 = vpop.f32.mrf.mxu0  ;;  %v9685_v12 = vadd.f32 %v19312_v44, %v9572_v19  ;;  %v9582_v44 = vadd.f32 %v19337_v27, %v19440_v36 }
 0x702   :  { %v9789_v47 = vpop.f32.mrf.mxu1 }
 0x703   :  { %v9901_v31 = vadd.f32 %v9900_v50, %v9788_v11  ;;  %v9790_v60 = vadd.f32 %v9789_v47, %v9677_v20  ;;  %v9902_v32 = vpop.f32.mrf.mxu0  ;;  %v9687_v11 = vadd.f32 %v19321_v5, %v9574_v59  ;;  %v9584_v5 = vadd.f32 %v19347_v3, %v19449_v14 }
 0x704   :  { %v9791_v42 = vpop.f32.mrf.mxu1 }
 0x705   :  { %12532 = vtanh.f32 %v9901_v31  ;;  %v9903_v22 = vadd.f32 %v9902_v32, %v9790_v60  ;;  %v9792_v7 = vadd.f32 %v9791_v42, %v9679_v2  ;;  %v9904_v45 = vpop.f32.mrf.mxu0 }
 0x706   :  { %v9793_v40 = vpop.f32.mrf.mxu1 }
 0x707   :  { %12534 = vtanh.f32 %v9903_v22  ;;  %v9905_v56 = vadd.f32 %v9904_v45, %v9792_v7  ;;  %v9794_v47 = vadd.f32 %v9793_v40, %v9681_v39  ;;  %v9906_v62 = vpop.f32.mrf.mxu0  ;;  %v9695_v39 = vadd.f32 %v19344_v18, %v9582_v44 }
 0x708   :  { %v9797_v50 = vpop.f32.mrf.mxu1  ;;  %v9592_v18 = vadd.f32 %v19360_v8, %v19440_v36  ;;  %v9701_v44 = vadd.f32 %v19358_v63, %v9588_v33 }
 0x709   :  { %12536 = vtanh.f32 %v9905_v56  ;;  %v9907_v26 = vadd.f32 %v9906_v62, %v9794_v47  ;;  %v9798_v42 = vadd.f32 %v9797_v50, %v9685_v12  ;;  %v9910_v32 = vpop.f32.mrf.mxu0  ;;  %v9697_v12 = vadd.f32 %v19350_v57, %v9584_v5 }
 0x70a   :  { %v9799_v2 = vpop.f32.mrf.mxu1 }
 0x70b   :  { %12538 = vtanh.f32 %v9907_v26  ;;  %v9911_v13 = vadd.f32 %v9910_v32, %v9798_v42  ;;  %v9800_v20 = vadd.f32 %v9799_v2, %v9687_v11  ;;  %v9912_v19 = vpop.f32.mrf.mxu0  ;;  %v9705_v2 = vadd.f32 %v19364_v15, %v9592_v18 }
 0x70c   :  { %v9801_v31 = vpop.f32.mrf.mxu1  ;;  %v9598_v15 = vadd.f32 %v19376_v16, %v19449_v14  ;;  %v9606_v18 = vadd.f32 %v19392_v46, %v19440_v36 }
 0x70d   :  { %12540 = vtanh.f32 %v9911_v13  ;;  %v9913_v60 = vadd.f32 %v9912_v19, %v9800_v20  ;;  %v9802_v59 = vadd.f32 %v9801_v31, %v9689_v28  ;;  %v9914_v27 = vpop.f32.mrf.mxu0  ;;  %v9596_v20 = vadd.f32 %v19372_v48, %v19440_v36 }
 0x70e   :  { %v9803_v22 = vpop.f32.mrf.mxu1  ;;  %v9707_v19 = vadd.f32 %v19370_v53, %v9594_v49  ;;  %v9612_v49 = vadd.f32 %v19400_v24, %v19440_v36 }
 0x70f   :  { %12542 = vtanh.f32 %v9913_v60  ;;  %v9915_v34 = vadd.f32 %v9914_v27, %v9802_v59  ;;  %v9804_v7 = vadd.f32 %v9803_v22, %v9691_v52  ;;  %v9916_v3 = vpop.f32.mrf.mxu0  ;;  %v9709_v53 = vadd.f32 %v19374_v43, %v9596_v20 }
 0x710   :  { %v9807_v45 = vpop.f32.mrf.mxu1  ;;  %v9725_v20 = vadd.f32 %v19404_v4, %v9612_v49  ;;  %v9618_v4 = vadd.f32 %v19416_v6, %v19449_v14 }
 0x711   :  { %12544 = vtanh.f32 %v9915_v34  ;;  %v9917_v40 = vadd.f32 %v9916_v3, %v9804_v7  ;;  %v9808_v56 = vadd.f32 %v9807_v45, %v9695_v39  ;;  %v9920_v11 = vpop.f32.mrf.mxu0  ;;  %v9602_v39 = vadd.f32 %v19380_v55, %v19440_v36 }
 0x712   :  { %v12533_v47 = vpop.eup %12532  ;;  %v9809_v62 = vpop.f32.mrf.mxu1  ;;  %v9604_v7 = vadd.f32 %v19387_v51, %v19449_v14  ;;  %v9711_v45 = vadd.f32 %v19378_v54, %v9598_v15 }
 0x713   :  { %10483 = vst [vmem:[%s19942_s6 + $0x20] sm:$0xff] %v12533_v47  ;;  %12546 = vtanh.f32 %v9917_v40  ;;  %v9921_v57 = vadd.f32 %v9920_v11, %v9808_v56  ;;  %v9810_v50 = vadd.f32 %v9809_v62, %v9697_v12  ;;  %v9922_v26 = vpop.f32.mrf.mxu0  ;;  %v9715_v40 = vadd.f32 %v19384_v9, %v9602_v39 }
 0x714   :  { %v12535_v0 = vpop.eup %12534  ;;  %v9811_v42 = vpop.f32.mrf.mxu1  ;;  %v9717_v62 = vadd.f32 %v19390_v23, %v9604_v7  ;;  %v9608_v9 = vadd.f32 %v19396_v21, %v19449_v14  ;;  %v9719_v23 = vadd.f32 %v19394_v61, %v9606_v18  ;;  %v21259_v7 = vld [vmem:[#allocation113_spill] sm:$0xff] }
 0x715   :  { %10484 = vst [vmem:[%s19942_s6 + $0x28] sm:$0xff] %v12535_v0  ;;  %12548 = vtanh.f32 %v9921_v57  ;;  %v9923_v35 = vadd.f32 %v9922_v26, %v9810_v50  ;;  %v9812_v8 = vadd.f32 %v9811_v42, %v9699_v41  ;;  %v9924_v28 = vpop.f32.mrf.mxu0 }
 0x716   :  { %v12537_v32 = vpop.eup %12536  ;;  %v9813_v13 = vpop.f32.mrf.mxu1 }
 0x717   :  { %10491 = vst [vmem:[%s19942_s6 + $0x58] sm:$0xff] %v12537_v32  ;;  %12550 = vtanh.f32 %v9923_v35  ;;  %v9925_v63 = vadd.f32 %v9924_v28, %v9812_v8  ;;  %v9814_v29 = vadd.f32 %v9813_v13, %v9701_v44  ;;  %v9926_v31 = vpop.f32.mrf.mxu0  ;;  %v9614_v8 = vadd.f32 %v19407_v10, %v19449_v14 }
 0x718   :  { %v12539_v5 = vpop.eup %12538  ;;  %v9817_v52 = vpop.f32.mrf.mxu1  ;;  %v9721_v28 = vadd.f32 %v19398_v17, %v9608_v9 }
 0x719   :  { %10492 = vst [vmem:[%s19942_s6 + $0x60] sm:$0xff] %v12539_v5  ;;  %12552 = vtanh.f32 %v9925_v63  ;;  %v9927_v48 = vadd.f32 %v9926_v31, %v9814_v29  ;;  %v9818_v60 = vadd.f32 %v9817_v52, %v9705_v2  ;;  %v9930_v27 = vpop.f32.mrf.mxu0  ;;  %v9616_v5 = vadd.f32 %v19412_v30, %v19440_v36 }
 0x71a   :  { %v12541_v59 = vpop.eup %12540  ;;  %v9819_v22 = vpop.f32.mrf.mxu1  ;;  %v9727_v31 = vadd.f32 %v19410_v38, %v9614_v8 }
 0x71b   :  { %10498 = vst [vmem:[%s19942_s6 + $0x90] sm:$0xff] %v12541_v59  ;;  %12554 = vtanh.f32 %v9927_v48  ;;  %v9931_v16 = vadd.f32 %v9930_v27, %v9818_v60  ;;  %v9820_v25 = vadd.f32 %v9819_v22, %v9707_v19  ;;  %v9932_v12 = vpop.f32.mrf.mxu0  ;;  %v9622_v59 = vadd.f32 %v19420_v1, %v19440_v36 }
 0x71c   :  { %v12543_v34 = vpop.eup %12542  ;;  %v9821_v3 = vpop.f32.mrf.mxu1  ;;  %v9729_v38 = vadd.f32 %v19414_v58, %v9616_v5  ;;  %v21268_v5 = vld [vmem:[#allocation117_spill] sm:$0xff] }
 0x71d   :  { %10499 = vst [vmem:[%s19942_s6 + $0x98] sm:$0xff] %v12543_v34  ;;  %12556 = vtanh.f32 %v9931_v16  ;;  %v9933_v43 = vadd.f32 %v9932_v12, %v9820_v25  ;;  %v9822_v55 = vadd.f32 %v9821_v3, %v9709_v53  ;;  %v9934_v56 = vpop.f32.mrf.mxu0  ;;  %v9624_v16 = vadd.f32 %v19427_v37, %v19449_v14 }
 0x71e   :  { %v12545_v33 = vpop.eup %12544  ;;  %v9823_v47 = vpop.f32.mrf.mxu1  ;;  %v9731_v12 = vadd.f32 %v21259_v7, %v9618_v4 }
 0x71f   :  { %10505 = vst [vmem:[%s19942_s6 + $0xc8] sm:$0xff] %v12545_v33  ;;  %12558 = vtanh.f32 %v9933_v43  ;;  %v9935_v54 = vadd.f32 %v9934_v56, %v9822_v55  ;;  %v9824_v51 = vadd.f32 %v9823_v47, %v9711_v45  ;;  %v9936_v41 = vpop.f32.mrf.mxu0  ;;  %v21260_v45 = vld [vmem:[#allocation111_spill] sm:$0xff] }
 0x720   :  { %v12547_v11 = vpop.eup %12546  ;;  %v9827_v57 = vpop.f32.mrf.mxu1  ;;  %v9735_v43 = vadd.f32 %v21260_v45, %v9622_v59 }
 0x721   :  { %10506 = vst [vmem:[%s19942_s6 + $0xd0] sm:$0xff] %v12547_v11  ;;  %12560 = vtanh.f32 %v9935_v54  ;;  %v9937_v46 = vadd.f32 %v9936_v41, %v9824_v51  ;;  %v9828_v50 = vadd.f32 %v9827_v57, %v9715_v40  ;;  %v9940_v26 = vpop.f32.mrf.mxu0  ;;  %v21261_v40 = vld [vmem:[#allocation25_spill] sm:$0xff]  ;;  %v21262_v54 = vld [vmem:[#allocation90_spill] sm:$0xff]  ;;  %v21263_v41 = vld [vmem:[#allocation36_spill] sm:$0xff] }
 0x722   :  { %v12549_v0 = vpop.eup %12548  ;;  %v9829_v42 = vpop.f32.mrf.mxu1  ;;  %v9626_v56 = vadd.f32 %v21261_v40, %v19440_v36  ;;  %v9737_v51 = vadd.f32 %v21262_v54, %v9624_v16  ;;  %v9628_v57 = vadd.f32 %v21263_v41, %v19449_v14 }
 0x723   :  { %10512 = vst [vmem:[%s19942_s6 + $0x100] sm:$0xff] %v12549_v0  ;;  %12562 = vtanh.f32 %v9937_v46  ;;  %v9941_v21 = vadd.f32 %v9940_v26, %v9828_v50  ;;  %v9830_v44 = vadd.f32 %v9829_v42, %v9717_v62  ;;  %v9942_v32 = vpop.f32.mrf.mxu0  ;;  %v21264_v0 = vld [vmem:[#allocation115_spill] sm:$0xff] }
 0x724   :  { %v12551_v35 = vpop.eup %12550  ;;  %v9831_v2 = vpop.f32.mrf.mxu1  ;;  %v9632_v49 = vadd.f32 %v21264_v0, %v19440_v36 }
 0x725   :  { %10513 = vst [vmem:[%s19942_s6 + $0x108] sm:$0xff] %v12551_v35  ;;  %12564 = vtanh.f32 %v9941_v21  ;;  %v9943_v61 = vadd.f32 %v9942_v32, %v9830_v44  ;;  %v9832_v24 = vadd.f32 %v9831_v2, %v9719_v23  ;;  %v9944_v63 = vpop.f32.mrf.mxu0  ;;  %v21265_v23 = vld [vmem:[#allocation112_spill] sm:$0xff] }
 0x726   :  { %v12553_v13 = vpop.eup %12552  ;;  %v9833_v29 = vpop.f32.mrf.mxu1  ;;  %v9739_v21 = vadd.f32 %v21265_v23, %v9626_v56  ;;  %v21266_v32 = vld [vmem:[#allocation32_spill] sm:$0xff] }
 0x727   :  { %10519 = vst [vmem:[%s19942_s6 + $0x138] sm:$0xff] %v12553_v13  ;;  %12566 = vtanh.f32 %v9943_v61  ;;  %v9945_v17 = vadd.f32 %v9944_v63, %v9832_v24  ;;  %v9834_v10 = vadd.f32 %v9833_v29, %v9721_v28  ;;  %v9946_v52 = vpop.f32.mrf.mxu0  ;;  %v9634_v2 = vadd.f32 %v21266_v32, %v19449_v14  ;;  %v21267_v24 = vld [vmem:[#allocation105_spill] sm:$0xff] }
 0x728   :  { %v12555_v19 = vpop.eup %12554  ;;  %v9837_v15 = vpop.f32.mrf.mxu1  ;;  %v9741_v13 = vadd.f32 %v21267_v24, %v9628_v57 }
 0x729   :  { %10520 = vst [vmem:[%s19942_s6 + $0x140] sm:$0xff] %v12555_v19  ;;  %12568 = vtanh.f32 %v9945_v17  ;;  %v9947_v30 = vadd.f32 %v9946_v52, %v9834_v10  ;;  %v9838_v48 = vadd.f32 %v9837_v15, %v9725_v20  ;;  %v9950_v39 = vpop.f32.mrf.mxu0  ;;  %v9745_v17 = vadd.f32 %v21268_v5, %v9632_v49 }
 0x72a   :  { %v12557_v60 = vpop.eup %12556  ;;  %v9839_v27 = vpop.f32.mrf.mxu1 }
 0x72b   :  { %10526 = vst [vmem:[%s19942_s6 + $0x170] sm:$0xff] %v12557_v60  ;;  %12570 = vtanh.f32 %v9947_v30  ;;  %v9951_v6 = vadd.f32 %v9950_v39, %v9838_v48  ;;  %v9840_v22 = vadd.f32 %v9839_v27, %v9727_v31  ;;  %v9952_v25 = vpop.f32.mrf.mxu0  ;;  %v21269_v31 = vld [vmem:[#allocation114_spill] sm:$0xff]  ;;  %v21270_v48 = vld [vmem:[#allocation92_spill] sm:$0xff] }
 0x72c   :  { %v12559_v53 = vpop.eup %12558  ;;  %v9841_v34 = vpop.f32.mrf.mxu1  ;;  %v9636_v52 = vadd.f32 %v21269_v31, %v19440_v36  ;;  %v9747_v60 = vadd.f32 %v21270_v48, %v9634_v2  ;;  %v21271_v27 = vld [vmem:[#allocation42_spill] sm:$0xff] }
 0x72d   :  { %10527 = vst [vmem:[%s19942_s6 + $0x178] sm:$0xff] %v12559_v53  ;;  %12572 = vtanh.f32 %v9951_v6  ;;  %v9953_v58 = vadd.f32 %v9952_v25, %v9840_v22  ;;  %v9842_v1 = vadd.f32 %v9841_v34, %v9729_v38  ;;  %v9954_v55 = vpop.f32.mrf.mxu0  ;;  %v9638_v38 = vadd.f32 %v21271_v27, %v19449_v14  ;;  %v21272_v25 = vld [vmem:[#allocation116_spill] sm:$0xff] }
 0x72e   :  { %v12561_v3 = vpop.eup %12560  ;;  %v9843_v33 = vpop.f32.mrf.mxu1  ;;  %v9749_v34 = vadd.f32 %v21272_v25, %v9636_v52 }
 0x72f   :  { %10533 = vst [vmem:[%s19942_s6 + $0x1a8] sm:$0xff] %v12561_v3  ;;  %12574 = vtanh.f32 %v9953_v58  ;;  %v9955_v37 = vadd.f32 %v9954_v55, %v9842_v1  ;;  %v9844_v47 = vadd.f32 %v9843_v33, %v9731_v12  ;;  %v9956_v11 = vpop.f32.mrf.mxu0  ;;  %v21273_v3 = vld [vmem:[#allocation106_spill] sm:$0xff] }
 0x730   :  { %v12563_v18 = vpop.eup %12562  ;;  %v9847_v62 = vpop.f32.mrf.mxu1  ;;  %v9751_v45 = vadd.f32 %v21273_v3, %v9638_v38 }
 0x731   :  { %10534 = vst [vmem:[%s19942_s6 + $0x1b0] sm:$0xff] %v12563_v18  ;;  %12576 = vtanh.f32 %v9955_v37  ;;  %v9957_v9 = vadd.f32 %v9956_v11, %v9844_v47  ;;  %v9848_v46 = vadd.f32 %v9847_v62, %v9735_v43  ;;  %v9960_v26 = vpop.f32.mrf.mxu0 }
 0x732   :  { %v12565_v50 = vpop.eup %12564  ;;  %v9849_v42 = vpop.f32.mrf.mxu1 }
 0x733   :  { %10540 = vst [vmem:[%s19942_s6 + $0x1e0] sm:$0xff] %v12565_v50  ;;  %12578 = vtanh.f32 %v9957_v9  ;;  %v9961_v44 = vadd.f32 %v9960_v26, %v9848_v46  ;;  %v9850_v35 = vadd.f32 %v9849_v42, %v9737_v51  ;;  %v9962_v28 = vpop.f32.mrf.mxu0 }
 0x734   :  { %v12567_v8 = vpop.eup %12566  ;;  %v9851_v61 = vpop.f32.mrf.mxu1 }
 0x735   :  { %10541 = vst [vmem:[%s19942_s6 + $0x1e8] sm:$0xff] %v12567_v8  ;;  %12580 = vtanh.f32 %v9961_v44  ;;  %v9963_v20 = vadd.f32 %v9962_v28, %v9850_v35  ;;  %v9852_v63 = vadd.f32 %v9851_v61, %v9739_v21  ;;  %v9964_v10 = vpop.f32.mrf.mxu0 }
 0x736   :  { %v12569_v29 = vpop.eup %12568  ;;  %v9853_v19 = vpop.f32.mrf.mxu1 }
 0x737   :  { %10547 = vst [vmem:[%s19942_s6 + $0x218] sm:$0xff] %v12569_v29  ;;  %12582 = vtanh.f32 %v9963_v20  ;;  %v9965_v15 = vadd.f32 %v9964_v10, %v9852_v63  ;;  %v9854_v4 = vadd.f32 %v9853_v19, %v9741_v13  ;;  %v9966_v59 = vpop.f32.mrf.mxu0 }
 0x738   :  { %v12571_v30 = vpop.eup %12570  ;;  %v9857_v39 = vpop.f32.mrf.mxu1 }
 0x739   :  { %10548 = vst [vmem:[%s19942_s6 + $0x220] sm:$0xff] %v12571_v30  ;;  %12584 = vtanh.f32 %v9965_v15  ;;  %v9967_v36 = vadd.f32 %v9966_v59, %v9854_v4  ;;  %v9858_v6 = vadd.f32 %v9857_v39, %v9745_v17  ;;  %v9970_v53 = vpop.f32.mrf.mxu0 }
 0x73a   :  { %v12573_v22 = vpop.eup %12572  ;;  %v9859_v16 = vpop.f32.mrf.mxu1 }
 0x73b   :  { %10554 = vst [vmem:[%s19942_s6 + $0x250] sm:$0xff] %v12573_v22  ;;  %12586 = vtanh.f32 %v9967_v36  ;;  %v9971_v7 = vadd.f32 %v9970_v53, %v9858_v6  ;;  %v9860_v12 = vadd.f32 %v9859_v16, %v9747_v60  ;;  %v9972_v58 = vpop.f32.mrf.mxu0 }
 0x73c   :  { %v12575_v14 = vpop.eup %12574  ;;  %v9861_v1 = vpop.f32.mrf.mxu1 }
 0x73d   :  { %10555 = vst [vmem:[%s19942_s6 + $0x258] sm:$0xff] %v12575_v14  ;;  %12588 = vtanh.f32 %v9971_v7  ;;  %v9973_v43 = vadd.f32 %v9972_v58, %v9860_v12  ;;  %v9862_v55 = vadd.f32 %v9861_v1, %v9749_v34  ;;  %v9974_v40 = vpop.f32.mrf.mxu0 }
 0x73e   :  { %v12577_v33 = vpop.eup %12576  ;;  %v9863_v56 = vpop.f32.mrf.mxu1 }
 0x73f   :  { %10561 = vst [vmem:[%s19942_s6 + $0x288] sm:$0xff] %v12577_v33  ;;  %12590 = vtanh.f32 %v9973_v43  ;;  %v9975_v37 = vadd.f32 %v9974_v40, %v9862_v55  ;;  %v9864_v47 = vadd.f32 %v9863_v56, %v9751_v45  ;;  %v9976_v54 = vpop.f32.mrf.mxu0 }
 0x740   :  { %v12579_v18 = vpop.eup %12578  ;;  %v19631_v51 = vpop.f32.mrf.mxu1 }
 0x741   :  { %10562 = vst [vmem:[%s19942_s6 + $0x290] sm:$0xff] %v12579_v18  ;;  %12592 = vtanh.f32 %v9975_v37  ;;  %v9977_v11 = vadd.f32 %v9976_v54, %v9864_v47  ;;  %v19636_v41 = vpop.f32.mrf.mxu0 }
 0x742   :  { %v12581_v62 = vpop.eup %12580  ;;  %v19638_v57 = vpop.f32.mrf.mxu1 }
 0x743   :  { %10568 = vst [vmem:[%s19942_s6 + $0x2c0] sm:$0xff] %v12581_v62  ;;  %12594 = vtanh.f32 %v9977_v11  ;;  %v19643_v46 = vpop.f32.mrf.mxu0 }
 0x744   :  { %v12583_v9 = vpop.eup %12582  ;;  %v19645_v50 = vpop.f32.mrf.mxu1 }
 0x745   :  { %10569 = vst [vmem:[%s19942_s6 + $0x2c8] sm:$0xff] %v12583_v9  ;;  %v19650_v49 = vpop.f32.mrf.mxu0 }
 0x746   :  { %v12585_v0 = vpop.eup %12584  ;;  %v19652_v26 = vpop.f32.mrf.mxu1 }
 0x747   :  { %10575 = vst [vmem:[%s19942_s6 + $0x2f8] sm:$0xff] %v12585_v0  ;;  %v19657_v23 = vpop.f32.mrf.mxu0 }
 0x748   :  { %v12587_v42 = vpop.eup %12586  ;;  %v19659_v21 = vpop.f32.mrf.mxu1 }
 0x749   :  { %10576 = vst [vmem:[%s19942_s6 + $0x300] sm:$0xff] %v12587_v42  ;;  %v19664_v35 = vpop.f32.mrf.mxu0  ;;  %v12629_v42 = vld [vmem:[%s19939_s5 + $0x1c] sm:$0x7f] }
 0x74a   :  { %v12589_v44 = vpop.eup %12588  ;;  %v19666_v8 = vpop.f32.mrf.mxu1 }
 0x74b   :  { %10582 = vst [vmem:[%s19942_s6 + $0x330] sm:$0xff] %v12589_v44  ;;  %v19671_v2 = vpop.f32.mrf.mxu0  ;;  %v21284_v44 = vld [vmem:[#allocation133_spill] sm:$0xff] }
 0x74c   :  { %v12591_v32 = vpop.eup %12590  ;;  %v19673_v28 = vpop.f32.mrf.mxu1 }
 0x74d   :  { %10583 = vst [vmem:[%s19942_s6 + $0x338] sm:$0xff] %v12591_v32  ;;  %v19678_v24 = vpop.f32.mrf.mxu0  ;;  %v19780_v32 = vrot.slane %v12629_v42, %v21284_v44  ;;  %v11458_v44 = vadd.f32 %v19643_v46, %v19636_v41 }
 0x74e   :  { %v12593_v61 = vpop.eup %12592  ;;  %v19680_v13 = vpop.f32.mrf.mxu1 }
 0x74f   :  { %10589 = vst [vmem:[%s19942_s6 + $0x368] sm:$0xff] %v12593_v61  ;;  %v19685_v63 = vpop.f32.mrf.mxu0  ;;  %v11394_v61 = vadd.f32 %v19638_v57, %v19631_v51  ;;  %v11403_v46 = vadd.f32 %v19680_v13, %v19673_v28 }
 0x750   :  { %v12595_v20 = vpop.eup %12594  ;;  %v19687_v29 = vpop.f32.mrf.mxu1 }
 0x751   :  { %10590 = vst [vmem:[%s19942_s6 + $0x370] sm:$0xff] %v12595_v20  ;;  %v19692_v5 = vpop.f32.mrf.mxu0 }
 0x752   :  { %v19694_v17 = vpop.f32.mrf.mxu1 }
 0x753   :  { %v19696_v10 = vpop.f32.mrf.mxu0 }
 0x754   :  { %v19698_v19 = vpop.f32.mrf.mxu1 }
 0x755   :  { %v19700_v31 = vpop.f32.mrf.mxu0 }
 0x756   :  { %v19702_v52 = vpop.f32.mrf.mxu1 }
 0x757   :  { %v19704_v15 = vpop.f32.mrf.mxu0 }
 0x758   :  { %v19706_v4 = vpop.f32.mrf.mxu1 }
 0x759   :  { %v19708_v30 = vpop.f32.mrf.mxu0 }
 0x75a   :  { %v19710_v48 = vpop.f32.mrf.mxu1 }
 0x75b   :  { %v19712_v60 = vpop.f32.mrf.mxu0 }
 0x75c   :  { %v19714_v59 = vpop.f32.mrf.mxu1 }
 0x75d   :  { %v19716_v39 = vpop.f32.mrf.mxu0 }
 0x75e   :  { %v19718_v27 = vpop.f32.mrf.mxu1 }
 0x75f   :  { %v19720_v38 = vpop.f32.mrf.mxu0 }
 0x760   :  { %v19722_v36 = vpop.f32.mrf.mxu1 }
 0x761   :  { %v19724_v6 = vpop.f32.mrf.mxu0 }
 0x762   :  { %v19726_v22 = vpop.f32.mrf.mxu1 }
 0x763   :  { %v19728_v53 = vpop.f32.mrf.mxu0 }
 0x764   :  { %v19730_v16 = vpop.f32.mrf.mxu1 }
 0x765   :  { %v19732_v25 = vpop.f32.mrf.mxu0 }
 0x766   :  { %v19734_v34 = vpop.f32.mrf.mxu1 }
 0x767   :  { %v19736_v7 = vpop.f32.mrf.mxu0 }
 0x768   :  { %v19738_v12 = vpop.f32.mrf.mxu1 }
 0x769   :  { %v19740_v14 = vpop.f32.mrf.mxu0 }
 0x76a   :  { %v19742_v58 = vpop.f32.mrf.mxu1 }
 0x76b   :  { %v19744_v1 = vpop.f32.mrf.mxu0 }
 0x76c   :  { %v19746_v3 = vpop.f32.mrf.mxu1 }
 0x76d   :  { %v19748_v45 = vpop.f32.mrf.mxu0 }
 0x76e   :  { %v19750_v43 = vpop.f32.mrf.mxu1 }
 0x76f   :  { %v19752_v55 = vpop.f32.mrf.mxu0 }
 0x770   :  { %21274 = vst [vmem:[#allocation119_spill] sm:$0xff] %v19752_v55  ;;  %v19754_v33 = vpop.f32.mrf.mxu1 }
 0x771   :  { %v19756_v40 = vpop.f32.mrf.mxu0 }
 0x772   :  { %21275 = vst [vmem:[#allocation121_spill] sm:$0xff] %v19756_v40  ;;  %v19758_v56 = vpop.f32.mrf.mxu1 }
 0x773   :  { %v19760_v37 = vpop.f32.mrf.mxu0 }
 0x774   :  { %21276 = vst [vmem:[#allocation93_spill] sm:$0xff] %v19760_v37  ;;  %v19762_v47 = vpop.f32.mrf.mxu1 }
 0x775   :  { %21277 = vst [vmem:[#allocation46_spill] sm:$0xff] %v19762_v47  ;;  %v19764_v18 = vpop.f32.mrf.mxu0 }
 0x776   :  { %21278 = vst [vmem:[#allocation118_spill] sm:$0xff] %v19764_v18  ;;  %v19766_v54 = vpop.f32.mrf.mxu1 }
 0x777   :  { %21279 = vst [vmem:[#allocation120_spill] sm:$0xff] %v19766_v54  ;;  %v19768_v11 = vpop.f32.mrf.mxu0 }
 0x778   :  { %21280 = vst [vmem:[#allocation97_spill] sm:$0xff] %v19768_v11  ;;  %v19770_v62 = vpop.f32.mrf.mxu1  ;;  %v11397_v11 = vadd.f32 %v19652_v26, %v19645_v50  ;;  %v11400_v50 = vadd.f32 %v19666_v8, %v19659_v21  ;;  %v11464_v8 = vadd.f32 %v19671_v2, %v19664_v35 }
 0x779   :  { %21281 = vst [vmem:[#allocation107_spill] sm:$0xff] %v19770_v62  ;;  %v19772_v9 = vpop.f32.mrf.mxu0  ;;  %v10014_v62 = vadd.f32 %v11394_v61, %v19780_v32 }
 0x77a   :  { %21282 = vst [vmem:[#allocation123_spill] sm:$0xff] %v19772_v9  ;;  %v19774_v0 = vpop.f32.mrf.mxu1  ;;  %v10017_v51 = vadd.f32 %v11397_v11, %v19780_v32  ;;  %v10022_v41 = vadd.f32 %v11400_v50, %v19780_v32 }
 0x77b   :  { %21283 = vst [vmem:[#allocation125_spill] sm:$0xff] %v19774_v0  ;;  %v19784_v20 = vpop.f32.mrf.mxu0 }
 0x77c   :  { %21285 = vst [vmem:[#allocation96_spill] sm:$0xff] %v19784_v20  ;;  %v19786_v18 = vpop.f32.mrf.mxu1 }
 0x77d   :  { %21286 = vst [vmem:[#allocation43_spill] sm:$0xff] %v19786_v18  ;;  %v19790_v9 = vpop.f32.mrf.mxu0  ;;  %v10111_v18 = vadd.f32 %v11458_v44, %v10014_v62 }
 0x77e   :  { %21287 = vst [vmem:[#allocation122_spill] sm:$0xff] %v19790_v9  ;;  %v19792_v0 = vpop.f32.mrf.mxu1  ;;  %v11461_v9 = vadd.f32 %v19657_v23, %v19650_v49 }
 0x77f   :  { %21288 = vst [vmem:[#allocation124_spill] sm:$0xff] %v19792_v0  ;;  %v19795_v37 = vpop.f32.mrf.mxu0 }
 0x780   :  { %21289 = vst [vmem:[#allocation100_spill] sm:$0xff] %v19795_v37  ;;  %v11520_v42 = vpop.f32.mrf.mxu1  ;;  %v10114_v54 = vadd.f32 %v11461_v9, %v10017_v51 }
 0x781   :  { %v11584_v57 = vpop.f32.mrf.mxu0 }
 0x782   :  { %v11521_v20 = vpop.f32.mrf.mxu1 }
 0x783   :  { %v11522_v26 = vadd.f32 %v11521_v20, %v11520_v42  ;;  %v11585_v0 = vpop.f32.mrf.mxu0  ;;  %v10119_v20 = vadd.f32 %v11464_v8, %v10022_v41  ;;  %v10025_v42 = vadd.f32 %v11403_v46, %v19780_v32 }
 0x784   :  { %v11523_v61 = vpop.f32.mrf.mxu1  ;;  %v11586_v37 = vadd.f32 %v11585_v0, %v11584_v57 }
 0x785   :  { %v10208_v40 = vadd.f32 %v11522_v26, %v10111_v18  ;;  %v11587_v47 = vpop.f32.mrf.mxu0  ;;  %v11406_v18 = vadd.f32 %v19694_v17, %v19687_v29  ;;  %v11409_v17 = vadd.f32 %v19702_v52, %v19698_v19  ;;  %v11470_v26 = vadd.f32 %v19696_v10, %v19692_v5 }
 0x786   :  { %v11524_v55 = vpop.f32.mrf.mxu1  ;;  %v11473_v5 = vadd.f32 %v19704_v15, %v19700_v31 }
 0x787   :  { %v10305_v11 = vadd.f32 %v11586_v37, %v10208_v40  ;;  %v11525_v62 = vadd.f32 %v11524_v55, %v11523_v61  ;;  %v11588_v44 = vpop.f32.mrf.mxu0  ;;  %v11467_v40 = vadd.f32 %v19685_v63, %v19678_v24  ;;  %v10030_v37 = vadd.f32 %v11406_v18, %v19780_v32 }
 0x788   :  { %v11526_v21 = vpop.f32.mrf.mxu1  ;;  %v11589_v23 = vadd.f32 %v11588_v44, %v11587_v47  ;;  %v10033_v44 = vadd.f32 %v11409_v17, %v19780_v32 }
 0x789   :  { %12596 = vtanh.f32 %v10305_v11  ;;  %v10211_v49 = vadd.f32 %v11525_v62, %v10114_v54  ;;  %v11590_v9 = vpop.f32.mrf.mxu0  ;;  %v10122_v29 = vadd.f32 %v11467_v40, %v10025_v42  ;;  %v10127_v46 = vadd.f32 %v11470_v26, %v10030_v37 }
 0x78a   :  { %v11527_v0 = vpop.f32.mrf.mxu1  ;;  %v10130_v42 = vadd.f32 %v11473_v5, %v10033_v44  ;;  %v11418_v37 = vadd.f32 %v19726_v22, %v19722_v36  ;;  %v11421_v22 = vadd.f32 %v19734_v34, %v19730_v16  ;;  %v11485_v5 = vadd.f32 %v19736_v7, %v19732_v25 }
 0x78b   :  { %v10308_v51 = vadd.f32 %v11589_v23, %v10211_v49  ;;  %v11528_v28 = vadd.f32 %v11527_v0, %v11526_v21  ;;  %v11591_v13 = vpop.f32.mrf.mxu0  ;;  %v11412_v21 = vadd.f32 %v19710_v48, %v19706_v4  ;;  %v11488_v25 = vadd.f32 %v19744_v1, %v19740_v14 }
 0x78c   :  { %v11529_v55 = vpop.f32.mrf.mxu1  ;;  %v11592_v2 = vadd.f32 %v11591_v13, %v11590_v9  ;;  %v11415_v9 = vadd.f32 %v19718_v27, %v19714_v59  ;;  %v10046_v36 = vadd.f32 %v11418_v37, %v19780_v32 }
 0x78d   :  { %12598 = vtanh.f32 %v10308_v51  ;;  %v10216_v35 = vadd.f32 %v11528_v28, %v10119_v20  ;;  %v11593_v47 = vpop.f32.mrf.mxu0  ;;  %v10038_v4 = vadd.f32 %v11412_v21, %v19780_v32  ;;  %v11476_v28 = vadd.f32 %v19712_v60, %v19708_v30 }
 0x78e   :  { %v11530_v54 = vpop.f32.mrf.mxu1  ;;  %v11479_v30 = vadd.f32 %v19720_v38, %v19716_v39  ;;  %v11424_v21 = vadd.f32 %v19742_v58, %v19738_v12 }
 0x78f   :  { %v10313_v57 = vadd.f32 %v11592_v2, %v10216_v35  ;;  %v11531_v50 = vadd.f32 %v11530_v54, %v11529_v55  ;;  %v11594_v61 = vpop.f32.mrf.mxu0  ;;  %v10041_v55 = vadd.f32 %v11415_v9, %v19780_v32  ;;  %v10135_v2 = vadd.f32 %v11476_v28, %v10038_v4 }
 0x790   :  { %v11532_v41 = vpop.f32.mrf.mxu1  ;;  %v11595_v63 = vadd.f32 %v11594_v61, %v11593_v47 }
 0x791   :  { %12600 = vtanh.f32 %v10313_v57  ;;  %v10219_v24 = vadd.f32 %v11531_v50, %v10122_v29  ;;  %v11596_v11 = vpop.f32.mrf.mxu0  ;;  %v10138_v26 = vadd.f32 %v11479_v30, %v10041_v55  ;;  %v21292_v30 = vld [vmem:[#allocation120_spill] sm:$0xff] }
 0x792   :  { %v11533_v62 = vpop.f32.mrf.mxu1 }
 0x793   :  { %v10316_v8 = vadd.f32 %v11595_v63, %v10219_v24  ;;  %v11534_v19 = vadd.f32 %v11533_v62, %v11532_v41  ;;  %v11597_v52 = vpop.f32.mrf.mxu0 }
 0x794   :  { %v11535_v49 = vpop.f32.mrf.mxu1  ;;  %v11598_v23 = vadd.f32 %v11597_v52, %v11596_v11 }
 0x795   :  { %12602 = vtanh.f32 %v10316_v8  ;;  %v10224_v10 = vadd.f32 %v11534_v19, %v10127_v46  ;;  %v11599_v0 = vpop.f32.mrf.mxu0  ;;  %v11482_v46 = vadd.f32 %v19728_v53, %v19724_v6  ;;  %v10049_v19 = vadd.f32 %v11421_v22, %v19780_v32 }
 0x796   :  { %v12597_v18 = vpop.eup %12596  ;;  %v11536_v20 = vpop.f32.mrf.mxu1 }
 0x797   :  { %10486 = vst.msk [vmem:[%s19942_s6 + $0x30] sm:$0xff] %vm10485_vm1, %v12597_v18  ;;  %v10321_v48 = vadd.f32 %v11598_v23, %v10224_v10  ;;  %v11537_v51 = vadd.f32 %v11536_v20, %v11535_v49  ;;  %v11600_v31 = vpop.f32.mrf.mxu0  ;;  %v10143_v8 = vadd.f32 %v11482_v46, %v10046_v36  ;;  %v10054_v23 = vadd.f32 %v11424_v21, %v19780_v32 }
 0x798   :  { %v11538_v15 = vpop.f32.mrf.mxu1  ;;  %v11601_v59 = vadd.f32 %v11600_v31, %v11599_v0  ;;  %v10146_v0 = vadd.f32 %v11485_v5, %v10049_v19  ;;  %v11427_v20 = vadd.f32 %v19750_v43, %v19746_v3  ;;  %v11430_v43 = vadd.f32 %v19758_v56, %v19754_v33  ;;  %v21298_v19 = vld [vmem:[#allocation97_spill] sm:$0xff] }
 0x799   :  { %12604 = vtanh.f32 %v10321_v48  ;;  %v10227_v13 = vadd.f32 %v11537_v51, %v10130_v42  ;;  %v11602_v40 = vpop.f32.mrf.mxu0  ;;  %v10151_v28 = vadd.f32 %v11488_v25, %v10054_v23 }
 0x79a   :  { %v12599_v27 = vpop.eup %12598  ;;  %v11539_v35 = vpop.f32.mrf.mxu1  ;;  %v10057_v3 = vadd.f32 %v11427_v20, %v19780_v32 }
 0x79b   :  { %10493 = vst.msk [vmem:[%s19942_s6 + $0x68] sm:$0xff] %vm10485_vm1, %v12599_v27  ;;  %v10324_v47 = vadd.f32 %v11601_v59, %v10227_v13  ;;  %v11540_v54 = vadd.f32 %v11539_v35, %v11538_v15  ;;  %v11603_v60 = vpop.f32.mrf.mxu0 }
 0x79c   :  { %v11541_v29 = vpop.f32.mrf.mxu1  ;;  %v11604_v57 = vadd.f32 %v11603_v60, %v11602_v40  ;;  %v21290_v40 = vld [vmem:[#allocation119_spill] sm:$0xff] }
 0x79d   :  { %12606 = vtanh.f32 %v10324_v47  ;;  %v10232_v17 = vadd.f32 %v11540_v54, %v10135_v2  ;;  %v11605_v61 = vpop.f32.mrf.mxu0  ;;  %v11491_v35 = vadd.f32 %v21290_v40, %v19748_v45  ;;  %v21291_v54 = vld [vmem:[#allocation46_spill] sm:$0xff] }
 0x79e   :  { %v12601_v50 = vpop.eup %12600  ;;  %v11542_v41 = vpop.f32.mrf.mxu1  ;;  %v11433_v60 = vadd.f32 %v21292_v30, %v21291_v54 }
 0x79f   :  { %10500 = vst.msk [vmem:[%s19942_s6 + $0xa0] sm:$0xff] %vm10485_vm1, %v12601_v50  ;;  %v10329_v39 = vadd.f32 %v11604_v57, %v10232_v17  ;;  %v11543_v38 = vadd.f32 %v11542_v41, %v11541_v29  ;;  %v11606_v24 = vpop.f32.mrf.mxu0  ;;  %v10154_v29 = vadd.f32 %v11491_v35, %v10057_v3  ;;  %v10062_v17 = vadd.f32 %v11430_v43, %v19780_v32  ;;  %v21294_v41 = vld [vmem:[#allocation93_spill] sm:$0xff]  ;;  %v21303_v35 = vld [vmem:[#allocation122_spill] sm:$0xff] }
 0x7a0   :  { %v11544_v63 = vpop.f32.mrf.mxu1  ;;  %v11607_v62 = vadd.f32 %v11606_v24, %v11605_v61  ;;  %v21293_v61 = vld [vmem:[#allocation121_spill] sm:$0xff]  ;;  %v10065_v24 = vadd.f32 %v11433_v60, %v19780_v32 }
 0x7a1   :  { %12608 = vtanh.f32 %v10329_v39  ;;  %v10235_v11 = vadd.f32 %v11543_v38, %v10138_v26  ;;  %v11608_v16 = vpop.f32.mrf.mxu0  ;;  %v11494_v36 = vadd.f32 %v21294_v41, %v21293_v61 }
 0x7a2   :  { %v12603_v44 = vpop.eup %12602  ;;  %v11545_v34 = vpop.f32.mrf.mxu1 }
 0x7a3   :  { %10507 = vst.msk [vmem:[%s19942_s6 + $0xd8] sm:$0xff] %vm10485_vm1, %v12603_v44  ;;  %v10332_v52 = vadd.f32 %v11607_v62, %v10235_v11  ;;  %v11546_v49 = vadd.f32 %v11545_v34, %v11544_v63  ;;  %v11609_v6 = vpop.f32.mrf.mxu0  ;;  %v10159_v11 = vadd.f32 %v11494_v36, %v10062_v17  ;;  %v21295_v62 = vld [vmem:[#allocation107_spill] sm:$0xff]  ;;  %v21296_v44 = vld [vmem:[#allocation125_spill] sm:$0xff] }
 0x7a4   :  { %v11547_v53 = vpop.f32.mrf.mxu1  ;;  %v11610_v12 = vadd.f32 %v11609_v6, %v11608_v16  ;;  %v11436_v21 = vadd.f32 %v21296_v44, %v21295_v62 }
 0x7a5   :  { %12610 = vtanh.f32 %v10332_v52  ;;  %v10240_v10 = vadd.f32 %v11546_v49, %v10143_v8  ;;  %v11611_v18 = vpop.f32.mrf.mxu0  ;;  %v21297_v8 = vld [vmem:[#allocation118_spill] sm:$0xff] }
 0x7a6   :  { %v12605_v58 = vpop.eup %12604  ;;  %v11548_v9 = vpop.f32.mrf.mxu1  ;;  %v11497_v52 = vadd.f32 %v21298_v19, %v21297_v8 }
 0x7a7   :  { %10514 = vst.msk [vmem:[%s19942_s6 + $0x110] sm:$0xff] %vm10485_vm1, %v12605_v58  ;;  %v10337_v42 = vadd.f32 %v11610_v12, %v10240_v10  ;;  %v11549_v4 = vadd.f32 %v11548_v9, %v11547_v53  ;;  %v11612_v7 = vpop.f32.mrf.mxu0  ;;  %v21299_v9 = vld [vmem:[#allocation43_spill] sm:$0xff] }
 0x7a8   :  { %v11550_v48 = vpop.f32.mrf.mxu1  ;;  %v11613_v31 = vadd.f32 %v11612_v7, %v11611_v18  ;;  %v10162_v12 = vadd.f32 %v11497_v52, %v10065_v24  ;;  %v10070_v18 = vadd.f32 %v11436_v21, %v19780_v32 }
 0x7a9   :  { %12612 = vtanh.f32 %v10337_v42  ;;  %v10243_v51 = vadd.f32 %v11549_v4, %v10146_v0  ;;  %v11614_v13 = vpop.f32.mrf.mxu0  ;;  %v21300_v0 = vld [vmem:[#allocation124_spill] sm:$0xff] }
 0x7aa   :  { %v12607_v15 = vpop.eup %12606  ;;  %v11551_v59 = vpop.f32.mrf.mxu1  ;;  %v11439_v20 = vadd.f32 %v21300_v0, %v21299_v9 }
 0x7ab   :  { %10521 = vst.msk [vmem:[%s19942_s6 + $0x148] sm:$0xff] %vm10485_vm1, %v12607_v15  ;;  %v10340_v14 = vadd.f32 %v11613_v31, %v10243_v51  ;;  %v11552_v1 = vadd.f32 %v11551_v59, %v11550_v48  ;;  %v11615_v27 = vpop.f32.mrf.mxu0  ;;  %v21301_v48 = vld [vmem:[#allocation123_spill] sm:$0xff]  ;;  %v21302_v51 = vld [vmem:[#allocation96_spill] sm:$0xff] }
 0x7ac   :  { %v11553_v55 = vpop.f32.mrf.mxu1  ;;  %v11616_v37 = vadd.f32 %v11615_v27, %v11614_v13  ;;  %v11500_v31 = vadd.f32 %v21302_v51, %v21301_v48 }
 0x7ad   :  { %12614 = vtanh.f32 %v10340_v14  ;;  %v10248_v2 = vadd.f32 %v11552_v1, %v10151_v28  ;;  %v11617_v33 = vpop.f32.mrf.mxu0  ;;  %v10073_v14 = vadd.f32 %v11439_v20, %v19780_v32 }
 0x7ae   :  { %v12609_v47 = vpop.eup %12608  ;;  %v11554_v56 = vpop.f32.mrf.mxu1  ;;  %v10167_v43 = vadd.f32 %v11500_v31, %v10070_v18 }
 0x7af   :  { %10528 = vst.msk [vmem:[%s19942_s6 + $0x180] sm:$0xff] %vm10485_vm1, %v12609_v47  ;;  %v10345_v57 = vadd.f32 %v11616_v37, %v10248_v2  ;;  %v11555_v50 = vadd.f32 %v11554_v56, %v11553_v55  ;;  %v11618_v45 = vpop.f32.mrf.mxu0  ;;  %v21304_v2 = vld [vmem:[#allocation100_spill] sm:$0xff] }
 0x7b0   :  { %v11556_v26 = vpop.f32.mrf.mxu1  ;;  %v11619_v39 = vadd.f32 %v11618_v45, %v11617_v33  ;;  %v11503_v37 = vadd.f32 %v21304_v2, %v21303_v35 }
 0x7b1   :  { %12616 = vtanh.f32 %v10345_v57  ;;  %v10251_v22 = vadd.f32 %v11555_v50, %v10154_v29  ;;  %v11620_v63 = vpop.f32.mrf.mxu0 }
 0x7b2   :  { %v12611_v38 = vpop.eup %12610  ;;  %v11557_v46 = vpop.f32.mrf.mxu1  ;;  %v10170_v56 = vadd.f32 %v11503_v37, %v10073_v14 }
 0x7b3   :  { %10535 = vst.msk [vmem:[%s19942_s6 + $0x1b8] sm:$0xff] %vm10485_vm1, %v12611_v38  ;;  %v10348_v16 = vadd.f32 %v11619_v39, %v10251_v22  ;;  %v11558_v34 = vadd.f32 %v11557_v46, %v11556_v26  ;;  %v11621_v49 = vpop.f32.mrf.mxu0 }
 0x7b4   :  { %v11559_v6 = vpop.f32.mrf.mxu1  ;;  %v11622_v5 = vadd.f32 %v11621_v49, %v11620_v63 }
 0x7b5   :  { %12618 = vtanh.f32 %v10348_v16  ;;  %v10256_v53 = vadd.f32 %v11558_v34, %v10159_v11  ;;  %v11623_v58 = vpop.f32.mrf.mxu0 }
 0x7b6   :  { %v12613_v10 = vpop.eup %12612  ;;  %v11560_v23 = vpop.f32.mrf.mxu1 }
 0x7b7   :  { %10542 = vst.msk [vmem:[%s19942_s6 + $0x1f0] sm:$0xff] %vm10485_vm1, %v12613_v10  ;;  %v10353_v42 = vadd.f32 %v11622_v5, %v10256_v53  ;;  %v11561_v4 = vadd.f32 %v11560_v23, %v11559_v6  ;;  %v11624_v25 = vpop.f32.mrf.mxu0 }
 0x7b8   :  { %v11562_v7 = vpop.f32.mrf.mxu1  ;;  %v11625_v28 = vadd.f32 %v11624_v25, %v11623_v58 }
 0x7b9   :  { %12620 = vtanh.f32 %v10353_v42  ;;  %v10259_v15 = vadd.f32 %v11561_v4, %v10162_v12  ;;  %v11626_v59 = vpop.f32.mrf.mxu0 }
 0x7ba   :  { %v12615_v13 = vpop.eup %12614  ;;  %v11563_v3 = vpop.f32.mrf.mxu1 }
 0x7bb   :  { %10549 = vst.msk [vmem:[%s19942_s6 + $0x228] sm:$0xff] %vm10485_vm1, %v12615_v13  ;;  %v10356_v1 = vadd.f32 %v11625_v28, %v10259_v15  ;;  %v11564_v27 = vadd.f32 %v11563_v3, %v11562_v7  ;;  %v11627_v55 = vpop.f32.mrf.mxu0 }
 0x7bc   :  { %v11565_v40 = vpop.f32.mrf.mxu1  ;;  %v11628_v54 = vadd.f32 %v11627_v55, %v11626_v59 }
 0x7bd   :  { %12622 = vtanh.f32 %v10356_v1  ;;  %v10264_v47 = vadd.f32 %v11564_v27, %v10167_v43  ;;  %v11629_v60 = vpop.f32.mrf.mxu0 }
 0x7be   :  { %v12617_v30 = vpop.eup %12616  ;;  %v11566_v33 = vpop.f32.mrf.mxu1 }
 0x7bf   :  { %10556 = vst.msk [vmem:[%s19942_s6 + $0x260] sm:$0xff] %vm10485_vm1, %v12617_v30  ;;  %v10361_v32 = vadd.f32 %v11628_v54, %v10264_v47  ;;  %v11567_v29 = vadd.f32 %v11566_v33, %v11565_v40  ;;  %v11630_v17 = vpop.f32.mrf.mxu0 }
 0x7c0   :  { %v11631_v50 = vadd.f32 %v11630_v17, %v11629_v60 }
 0x7c1   :  { %12624 = vtanh.f32 %v10361_v32  ;;  %v10267_v57 = vadd.f32 %v11567_v29, %v10170_v56 }
 0x7c2   :  { %v12619_v45 = vpop.eup %12618 }
 0x7c3   :  { %10563 = vst.msk [vmem:[%s19942_s6 + $0x298] sm:$0xff] %vm10485_vm1, %v12619_v45  ;;  %v10364_v26 = vadd.f32 %v11631_v50, %v10267_v57 }
 0x7c5   :  { %12626 = vtanh.f32 %v10364_v26 }
 0x7c6   :  { %v12621_v61 = vpop.eup %12620 }
 0x7c7   :  { %10570 = vst.msk [vmem:[%s19942_s6 + $0x2d0] sm:$0xff] %vm10485_vm1, %v12621_v61 }
 0x7ca   :  { %v12623_v41 = vpop.eup %12622 }
 0x7cb   :  { %10577 = vst.msk [vmem:[%s19942_s6 + $0x308] sm:$0xff] %vm10485_vm1, %v12623_v41 }
 0x7ce   :  { %v12625_v36 = vpop.eup %12624 }
 0x7cf   :  { %10584 = vst.msk [vmem:[%s19942_s6 + $0x340] sm:$0xff] %vm10485_vm1, %v12625_v36 }
 0x7d2   :  { %v12627_v22 = vpop.eup %12626 }
 0x7d3   :  { %10591 = vst.msk [vmem:[%s19942_s6 + $0x378] sm:$0xff] %vm10485_vm1, %v12627_v22 }

</bundles_post_ra>
